<compile_context>
chip_gen: v5e
topology: v5e:2x2
jax: 0.10.0
libtpu: 0.0.40
codegen_flags: <defaults>
</compile_context>

<pallas_src>
import functools

import jax
import jax.numpy as jnp
from jax.experimental import pallas as pl
from jax.experimental.pallas import tpu as pltpu

# ----------------------------- synthetic config (scaled-down swiftformer-xs) -----------------------------
IMAGE_SIZE = 32            # real: 224
EMBED_DIMS = (16, 32)      # real: (48, 56, 112, 220)
MLP_RATIO = 4
NUM_CLASSES = 182
HEAD_PAD = 256             # lane-dense padded head width (sliced back to NUM_CLASSES outside the kernel)
LAYER_SCALE_INIT = 1e-5
BN_EPS = 1e-5
LN_EPS = 1e-5
GEM_P = 3.0
GEM_EPS = 1e-6


# ----------------------------------------- pallas_call helpers -----------------------------------------
def _batched_pallas_call(kernel, out_shape, batch, inputs, batched_mask):
    """One grid axis over the batch (parallel -> both v7x TensorCores); weights broadcast per step."""
    def make_spec(shape, is_batched):
        nd = len(shape)
        if is_batched:
            blk = (1,) + tuple(shape[1:])
            idx = lambda b, _n=nd: (b,) + (0,) * (_n - 1)
        else:
            blk = tuple(shape)
            idx = lambda b, _n=nd: (0,) * _n
        return pl.BlockSpec(blk, idx)

    in_specs = [make_spec(a.shape, m) for a, m in zip(inputs, batched_mask)]
    out_spec = make_spec(out_shape.shape, True)
    return pl.pallas_call(
        kernel,
        out_shape=out_shape,
        grid=(batch,),
        in_specs=in_specs,
        out_specs=out_spec,
        compiler_params=pltpu.CompilerParams(dimension_semantics=("parallel",)),
    )(*inputs)


def _pcall(kernel, out_shape, *args):
    """Grid-less whole-array pallas_call (everything resident in VMEM — shapes here are tiny)."""
    return pl.pallas_call(
        kernel,
        out_shape=out_shape,
        in_specs=[pl.BlockSpec(memory_space=pltpu.MemorySpace.VMEM) for _ in args],
        out_specs=pl.BlockSpec(memory_space=pltpu.MemorySpace.VMEM),
    )(*args)


# ----------------------------------------------- kernels -----------------------------------------------
def _resize_kernel(x_ref, lh_ref, lwt_ref, o_ref):
    """Fused separable bilinear resize of one plane: o = Lh @ x @ LwT.  x:(1,H,W) -> o:(1,S,S)."""
    t = jnp.dot(lh_ref[...], x_ref[0], preferred_element_type=jnp.float32)        # (S, W)
    o_ref[0] = jnp.dot(t, lwt_ref[...], preferred_element_type=jnp.float32)       # (S, S)


def _conv3x3_s2_kernel(p00_ref, p01_ref, p10_ref, p11_ref, w_ref, b_ref, o_ref, *, act):
    """3x3 conv, stride 2, pad 1 (BN folded), one batch element.

    pXY: parity phases of the padded NHWC input, each (1, Ho+1, Wo+1, Cin).
    w: (9, Cin, Cout) bf16; b: (1, Cout) f32.  Accumulates 9 matmuls in an f32 register accumulator.
    """
    _, Ho, Wo, Cout = o_ref.shape
    Cin = p00_ref.shape[-1]
    phases = ((p00_ref, p01_ref), (p10_ref, p11_ref))
    acc = jnp.zeros((Ho * Wo, Cout), jnp.float32)
    for di in range(3):
        for dj in range(3):
            ph = phases[di % 2][dj % 2]
            oi, oj = di // 2, dj // 2
            patch = ph[:, oi:oi + Ho, oj:oj + Wo, :].reshape(Ho * Wo, Cin)
            acc = acc + jnp.dot(patch.astype(jnp.bfloat16), w_ref[di * 3 + dj],
                                preferred_element_type=jnp.float32)
    y = acc + b_ref[...]
    if act == "relu":
        y = jnp.maximum(y, 0.0)
    o_ref[...] = y.reshape(1, Ho, Wo, Cout)


def _local_representation(xp_ref, wdw_ref, bdw_ref, w1_ref, b1_ref, w2_ref, b2_ref):
    """dwconv3x3(+BN folded) -> pw1 -> GELU -> pw2(+layer_scale folded), residual. Returns (H*W, C)."""
    _, Hp, Wp, C = xp_ref.shape
    H, W = Hp - 2, Wp - 2
    wdw = wdw_ref[...]                                                  # (9, C) f32
    acc = jnp.zeros((1, H, W, C), jnp.float32)
    for idx in range(9):
        di, dj = idx // 3, idx % 3
        acc = acc + xp_ref[:, di:di + H, dj:dj + W, :] * wdw[idx].reshape(1, 1, 1, C)
    h = (acc + bdw_ref[...].reshape(1, 1, 1, C)).reshape(H * W, C)
    h = jax.nn.gelu(jnp.dot(h.astype(jnp.bfloat16), w1_ref[...],
                            preferred_element_type=jnp.float32) + b1_ref[...],
                    approximate=True)  # TODO(synk): exact erf-GELU replaced with tanh approximation
    y = jnp.dot(h.astype(jnp.bfloat16), w2_ref[...],
                preferred_element_type=jnp.float32) + b2_ref[...]
    resid = xp_ref[:, 1:1 + H, 1:1 + W, :].reshape(H * W, C)
    return resid + y


def _conv_mixer_kernel(xp_ref, wdw_ref, bdw_ref, w1_ref, b1_ref, w2_ref, b2_ref, o_ref):
    """SwiftFormerConvEncoder, fully fused, one batch element.  xp:(1,H+2,W+2,C) -> o:(1,H,W,C)."""
    _, Hp, Wp, C = xp_ref.shape
    H, W = Hp - 2, Wp - 2
    x = _local_representation(xp_ref, wdw_ref, bdw_ref, w1_ref, b1_ref, w2_ref, b2_ref)
    o_ref[...] = x.reshape(1, H, W, C)


def _encoder_block_kernel(xp_ref,
                          wdw_ref, bdw_ref, w1_ref, b1_ref, w2_ref, b2_ref,
                          wq_ref, bq_ref, wk_ref, bk_ref, wp_ref, bp_ref, wf_ref, bf_ref,
                          wm1_ref, bm1_ref, wm2_ref, bm2_ref,
                          o_ref):
    """SwiftFormerEncoderBlock fully fused (local rep + additive attention + MLP), one batch element."""
    _, Hp, Wp, C = xp_ref.shape
    H, W = Hp - 2, Wp - 2

    # --- local representation ---
    x = _local_representation(xp_ref, wdw_ref, bdw_ref, w1_ref, b1_ref, w2_ref, b2_ref)   # (N, C)

    # --- EfficientAdditiveAttention (layer_scale_1 folded into the final projection), residual ---
    xb = x.astype(jnp.bfloat16)
    q = jnp.dot(xb, wq_ref[...], preferred_element_type=jnp.float32) + bq_ref[...]
    k = jnp.dot(xb, wk_ref[...], preferred_element_type=jnp.float32) + bk_ref[...]
    # torch.nn.functional.normalize(..., dim=-1, eps=1e-12)
    q = q / jnp.maximum(jnp.sqrt(jnp.sum(q * q, axis=-1, keepdims=True)), 1e-12)
    k = k / jnp.maximum(jnp.sqrt(jnp.sum(k * k, axis=-1, keepdims=True)), 1e-12)
    # softmax over a size-1 axis is exactly 1.0 (HF SwiftFormer), so the attention weights are all ones:
    # the global query is a plain token sum and w_g / the D**-0.5 scale have no effect on the output.
    g = jnp.sum(q, axis=0, keepdims=True)                                          # (1, C)
    out = jnp.dot((g * k).astype(jnp.bfloat16), wp_ref[...],
                  preferred_element_type=jnp.float32) + bp_ref[...] + q
    out = jnp.dot(out.astype(jnp.bfloat16), wf_ref[...],
                  preferred_element_type=jnp.float32) + bf_ref[...]
    x = x + out

    # --- MLP: BatchNorm (folded into fc1) -> fc1 -> GELU -> fc2 (layer_scale_2 folded), residual ---
    hm = jax.nn.gelu(jnp.dot(x.astype(jnp.bfloat16), wm1_ref[...],
                             preferred_element_type=jnp.float32) + bm1_ref[...],
                     approximate=True)
    ym = jnp.dot(hm.astype(jnp.bfloat16), wm2_ref[...],
                 preferred_element_type=jnp.float32) + bm2_ref[...]
    o_ref[...] = (x + ym).reshape(1, H, W, C)


def _gem_ln_head_kernel(x_ref, g_ref, beta_ref, wh_ref, bh_ref, o_ref, *, p, eps, ln_eps):
    """Fused GeM pool + LayerNorm + Linear head.  x:(B, H*W, C) -> logits (B, HEAD_PAD)."""
    x = jnp.maximum(x_ref[...], eps)                       # (B, N, C)
    if p == 3.0:
        xp_ = x * x * x                                    # pure VPU cubes; no EUP on the big tensor
    else:
        xp_ = jnp.exp(p * jnp.log(x))
    m = jnp.mean(xp_, axis=1)                              # (B, C)
    feat = jnp.exp(jnp.log(m) / p)                         # m**(1/p) — only B*C transcendentals
    mu = jnp.mean(feat, axis=-1, keepdims=True)
    var = jnp.mean(jnp.square(feat - mu), axis=-1, keepdims=True)
    xn = (feat - mu) * jax.lax.rsqrt(var + ln_eps)
    y = xn * g_ref[...] + beta_ref[...]
    o_ref[...] = jnp.dot(y, wh_ref[...], preferred_element_type=jnp.float32) + bh_ref[...]


# ----------------------------------------------- wrappers -----------------------------------------------
def _bilinear_matrix(in_size, out_size):
    """Row-interpolation matrix matching F.interpolate(mode='bilinear', align_corners=False)."""
    i = jnp.arange(out_size, dtype=jnp.float32)
    src = (i + 0.5) * (in_size / out_size) - 0.5
    src = jnp.maximum(src, 0.0)
    i0 = jnp.minimum(jnp.floor(src).astype(jnp.int32), in_size - 1)
    i1 = jnp.minimum(i0 + 1, in_size - 1)
    w = src - i0.astype(jnp.float32)
    return (1.0 - w)[:, None] * jax.nn.one_hot(i0, in_size) + w[:, None] * jax.nn.one_hot(i1, in_size)


def bilinear_resize_to(x_nchw, size):
    """(B, C, H, W) -> (B, C, size, size), one fused kernel, grid over B*C planes."""
    B, C, H, W = x_nchw.shape
    lh = _bilinear_matrix(H, size)                  # (S, H)
    lwt = _bilinear_matrix(W, size).T               # (W, S)
    planes = x_nchw.reshape(B * C, H, W)
    out = _batched_pallas_call(
        _resize_kernel,
        jax.ShapeDtypeStruct((B * C, size, size), jnp.float32),
        B * C, [planes, lh, lwt], [True, False, False])
    return out.reshape(B, C, size, size)


def conv3x3_s2(x, w, b, act):
    """3x3 conv, stride 2, pad 1, BN folded, NHWC.  w:(9,Cin,Cout) bf16, b:(Cout,) f32."""
    B, H, W, C = x.shape
    Ho, Wo = H // 2, W // 2
    Cout = w.shape[-1]
    xp = jnp.pad(x, ((0, 0), (1, 1), (1, 1), (0, 0)))
    # parity phases: same total bytes as the input (no im2col 9x blowup), unit-stride slicing in-kernel
    phases = [xp[:, r::2, c::2, :] for r in range(2) for c in range(2)]
    inputs = phases + [w, b.reshape(1, Cout)]
    return _batched_pallas_call(
        functools.partial(_conv3x3_s2_kernel, act=act),
        jax.ShapeDtypeStruct((B, Ho, Wo, Cout), jnp.float32),
        B, inputs, [True, True, True, True, False, False])


def conv_mixer_block(x, p):
    B, H, W, C = x.shape
    hidden = p["w1"].shape[1]
    xp = jnp.pad(x, ((0, 0), (1, 1), (1, 1), (0, 0)))
    inputs = [xp, p["wdw"], p["bdw"].reshape(1, C),
              p["w1"], p["b1"].reshape(1, hidden),
              p["w2"], p["b2"].reshape(1, C)]
    return _batched_pallas_call(
        _conv_mixer_kernel,
        jax.ShapeDtypeStruct((B, H, W, C), jnp.float32),
        B, inputs, [True] + [False] * 6)


def encoder_block(x, p):
    B, H, W, C = x.shape
    lp = p["local"]
    hidden = lp["w1"].shape[1]
    mh = p["wm1"].shape[1]
    xp = jnp.pad(x, ((0, 0), (1, 1), (1, 1), (0, 0)))
    inputs = [xp,
              lp["wdw"], lp["bdw"].reshape(1, C),
              lp["w1"], lp["b1"].reshape(1, hidden),
              lp["w2"], lp["b2"].reshape(1, C),
              p["wq"], p["bq"].reshape(1, C),
              p["wk"], p["bk"].reshape(1, C),
              p["wp"], p["bp"].reshape(1, C),
              p["wf"], p["bf"].reshape(1, C),
              p["wm1"], p["bm1"].reshape(1, mh),
              p["wm2"], p["bm2"].reshape(1, C)]
    return _batched_pallas_call(
        _encoder_block_kernel,
        jax.ShapeDtypeStruct((B, H, W, C), jnp.float32),
        B, inputs, [True] + [False] * (len(inputs) - 1))


# ------------------------------------------------ forward -----------------------------------------------
def swiftformer_classifier_forward(params, x):
    """x: (B, 3, H, W) float32 NCHW image (from_audio=False path). Returns (B, NUM_CLASSES) logits."""
    # TODO(synk): MelSpectrogram + ImageNet Normalize audio frontend (from_audio=True) not implemented.
    x = bilinear_resize_to(x, IMAGE_SIZE)                    # (B, 3, S, S)
    x = x.transpose(0, 2, 3, 1)                              # NHWC: channels on the lane axis

    # --- patch embedding: (conv3x3 s2 p1 + BN + ReLU) x 2 ---
    x = conv3x3_s2(x, params["patch1"]["w"], params["patch1"]["b"], "relu")
    x = conv3x3_s2(x, params["patch2"]["w"], params["patch2"]["b"], "relu")

    # --- stages: [ConvEncoder, SwiftFormerEncoderBlock], downsample embeddings between stages ---
    for i, stage in enumerate(params["stages"]):
        x = conv_mixer_block(x, stage["conv"])
        x = encoder_block(x, stage["block"])
        if i < len(params["downsamples"]):
            d = params["downsamples"][i]
            x = conv3x3_s2(x, d["w"], d["b"], "none")

    # --- fused GeM pool + LayerNorm + (Dropout==identity in eval) + Linear head (padded to 256) ---
    B2, H2, W2, C2 = x.shape
    logits = _pcall(
        functools.partial(_gem_ln_head_kernel, p=GEM_P, eps=GEM_EPS, ln_eps=LN_EPS),
        jax.ShapeDtypeStruct((B2, HEAD_PAD), jnp.float32),
        x.reshape(B2, H2 * W2, C2),
        params["norm"]["gamma"].reshape(1, C2), params["norm"]["beta"].reshape(1, C2),
        params["head"]["w"], params["head"]["b"].reshape(1, HEAD_PAD))
    return logits[:, :NUM_CLASSES]


# ------------------------------------------- parameter init ---------------------------------------------
def init_params(key):
    ks = iter(jax.random.split(key, 256))

    def nrm(shape, scale=0.05):
        return scale * jax.random.normal(next(ks), shape, jnp.float32)

    def dense(cin, cout):
        return dict(w=nrm((cin, cout)), b=nrm((cout,), 0.01))

    def bn(c):  # fresh nn.BatchNorm2d (eval): identity affine + zero mean / unit var
        return dict(gamma=jnp.ones((c,), jnp.float32), beta=jnp.zeros((c,), jnp.float32),
                    mean=jnp.zeros((c,), jnp.float32), var=jnp.ones((c,), jnp.float32))

    def conv3x3(cin, cout):
        return dict(w=nrm((9, cin, cout)), b=nrm((cout,), 0.01), bn=bn(cout))

    def conv_enc(dim, hidden):
        return dict(dw=dict(w=nrm((9, dim)), b=nrm((dim,), 0.01), bn=bn(dim)),
                    pw1=dense(dim, hidden), pw2=dense(hidden, dim),
                    layer_scale=jnp.ones((dim,), jnp.float32))

    def attn(dim):
        return dict(q=dense(dim, dim), k=dense(dim, dim),
                    w_g=jax.random.normal(next(ks), (dim,), jnp.float32),  # inert (size-1 softmax)
                    proj=dense(dim, dim), final=dense(dim, dim))

    def enc_block(dim):
        return dict(local=conv_enc(dim, dim),
                    attn=attn(dim),
                    mlp=dict(bn=bn(dim), fc1=dense(dim, MLP_RATIO * dim),
                             fc2=dense(MLP_RATIO * dim, dim)),
                    ls1=LAYER_SCALE_INIT * jnp.ones((dim,), jnp.float32),
                    ls2=LAYER_SCALE_INIT * jnp.ones((dim,), jnp.float32))

    return dict(
        patch1=conv3x3(3, EMBED_DIMS[0] // 2),
        patch2=conv3x3(EMBED_DIMS[0] // 2, EMBED_DIMS[0]),
        stages=[dict(conv=conv_enc(d, MLP_RATIO * d), block=enc_block(d)) for d in EMBED_DIMS],
        downsamples=[conv3x3(EMBED_DIMS[i], EMBED_DIMS[i + 1]) for i in range(len(EMBED_DIMS) - 1)],
        norm=dict(gamma=jnp.ones((EMBED_DIMS[-1],), jnp.float32),
                  beta=jnp.zeros((EMBED_DIMS[-1],), jnp.float32)),
        head=dense(EMBED_DIMS[-1], NUM_CLASSES),
    )


# ------------------------ one-time (offline) BN / layer_scale folding + bf16 cast ------------------------
def _bn_scale_shift(bn):
    s = bn["gamma"] / jnp.sqrt(bn["var"] + BN_EPS)
    return s, bn["beta"] - bn["mean"] * s


def prepare_inference_params(p):
    """Fold BatchNorm (eval) and layer scales into weights, pad the head, cast matmul weights to bf16."""
    def fold_conv3x3(c):
        s, sh = _bn_scale_shift(c["bn"])
        return dict(w=(c["w"] * s[None, None, :]).astype(jnp.bfloat16),
                    b=c["b"] * s + sh)

    def fold_conv_enc(c):
        s, sh = _bn_scale_shift(c["dw"]["bn"])
        return dict(wdw=c["dw"]["w"] * s[None, :], bdw=c["dw"]["b"] * s + sh,
                    w1=c["pw1"]["w"].astype(jnp.bfloat16), b1=c["pw1"]["b"],
                    w2=(c["pw2"]["w"] * c["layer_scale"][None, :]).astype(jnp.bfloat16),
                    b2=c["pw2"]["b"] * c["layer_scale"])

    def fold_block(bp):
        a = bp["attn"]
        s, sh = _bn_scale_shift(bp["mlp"]["bn"])
        return dict(
            local=fold_conv_enc(bp["local"]),
            wq=a["q"]["w"].astype(jnp.bfloat16), bq=a["q"]["b"],
            wk=a["k"]["w"].astype(jnp.bfloat16), bk=a["k"]["b"],
            wp=a["proj"]["w"].astype(jnp.bfloat16), bp=a["proj"]["b"],
            wf=(a["final"]["w"] * bp["ls1"][None, :]).astype(jnp.bfloat16),
            bf=a["final"]["b"] * bp["ls1"],
            wm1=(bp["mlp"]["fc1"]["w"] * s[:, None]).astype(jnp.bfloat16),
            bm1=bp["mlp"]["fc1"]["b"] + sh @ bp["mlp"]["fc1"]["w"],
            wm2=(bp["mlp"]["fc2"]["w"] * bp["ls2"][None, :]).astype(jnp.bfloat16),
            bm2=bp["mlp"]["fc2"]["b"] * bp["ls2"])

    c_last = EMBED_DIMS[-1]
    wh = jnp.zeros((c_last, HEAD_PAD), jnp.float32).at[:, :NUM_CLASSES].set(p["head"]["w"])
    bh = jnp.zeros((HEAD_PAD,), jnp.float32).at[:NUM_CLASSES].set(p["head"]["b"])

    return dict(
        patch1=fold_conv3x3(p["patch1"]),
        patch2=fold_conv3x3(p["patch2"]),
        stages=[dict(conv=fold_conv_enc(st["conv"]), block=fold_block(st["block"]))
                for st in p["stages"]],
        downsamples=[fold_conv3x3(d) for d in p["downsamples"]],
        norm=dict(gamma=p["norm"]["gamma"], beta=p["norm"]["beta"]),
        head=dict(w=wh, b=bh),
    )


# --------------------------------------------------- main -----------------------------------------------
if __name__ == "__main__":
    root = jax.random.PRNGKey(0)
    pkey, xkey = jax.random.split(root)
    params = prepare_inference_params(init_params(pkey))   # BN / layer_scale folding done once, offline

    # small NCHW image batch (from_audio=False path), non-square to exercise bilinear resize
    x = jax.random.normal(xkey, (2, 3, 24, 40), jnp.float32)

    fwd = jax.jit(swiftformer_classifier_forward)
    logits = fwd(params, x)
    jax.block_until_ready(logits)

    assert logits.shape == (2, NUM_CLASSES), logits.shape
    assert bool(jnp.all(jnp.isfinite(logits)))
    print("KERNEL_OK")
</pallas_src>

<mosaic_0001>
module attributes {stable_mosaic.version = 11 : i64} {
  func.func @_resize_kernel(%arg0: i32, %arg1: memref<1x24x40xf32, #tpu.memory_space<vmem>>, %arg2: memref<32x24xf32, #tpu.memory_space<vmem>>, %arg3: memref<40x32xf32, #tpu.memory_space<vmem>>, %arg4: memref<1x32x32xf32, #tpu.memory_space<vmem>>) attributes {dimension_semantics = [#tpu.dimension_semantics<parallel>], iteration_bounds = array<i64: 6>, scalar_prefetch = 0 : i64, scratch_operands = 0 : i64, tpu.core_type = #tpu.core_type<tc>, window_params = [{transform_indices = @transform_0, window_bounds = array<i64: 1, 24, 40>}, {pipeline_mode = #tpu.pipeline_mode<synchronous>, transform_indices = @transform_1, window_bounds = array<i64: 32, 24>}, {pipeline_mode = #tpu.pipeline_mode<synchronous>, transform_indices = @transform_2, window_bounds = array<i64: 40, 32>}, {transform_indices = @transform_3, window_bounds = array<i64: 1, 32, 32>}]} {
    %c0 = arith.constant 0 : index
    %c0_0 = arith.constant 0 : index
    %0 = vector.load %arg2[%c0, %c0_0] : memref<32x24xf32, #tpu.memory_space<vmem>>, vector<32x24xf32>
    %c0_1 = arith.constant 0 : index
    %c0_2 = arith.constant 0 : index
    %c0_3 = arith.constant 0 : index
    %1 = vector.load %arg1[%c0_1, %c0_2, %c0_3] : memref<1x24x40xf32, #tpu.memory_space<vmem>>, vector<1x24x40xf32>
    %2 = vector.shape_cast %1 : vector<1x24x40xf32> to vector<24x40xf32>
    %cst = arith.constant dense<0.000000e+00> : vector<32x40xf32>
    %3 = tpu.matmul %0, %2, %cst {dimension_numbers = #tpu.dot_dimension_numbers<[1], [0], [0], [1], [0, 0, 1, 1], [], []>} : vector<32x24xf32>, vector<24x40xf32>, vector<32x40xf32> -> vector<32x40xf32>
    %c0_4 = arith.constant 0 : index
    %c0_5 = arith.constant 0 : index
    %4 = vector.load %arg3[%c0_4, %c0_5] : memref<40x32xf32, #tpu.memory_space<vmem>>, vector<40x32xf32>
    %cst_6 = arith.constant dense<0.000000e+00> : vector<32x32xf32>
    %5 = tpu.matmul %3, %4, %cst_6 {dimension_numbers = #tpu.dot_dimension_numbers<[1], [0], [0], [1], [0, 0, 1, 1], [], []>} : vector<32x40xf32>, vector<40x32xf32>, vector<32x32xf32> -> vector<32x32xf32>
    %c0_7 = arith.constant 0 : index
    %c0_8 = arith.constant 0 : index
    %c0_9 = arith.constant 0 : index
    %6 = vector.load %arg4[%c0_7, %c0_8, %c0_9] : memref<1x32x32xf32, #tpu.memory_space<vmem>>, vector<1x32x32xf32>
    %7 = vector.shape_cast %6 : vector<1x32x32xf32> to vector<32x32xf32>
    %8 = vector.shape_cast %5 : vector<32x32xf32> to vector<1x32x32xf32>
    tpu.vector_store %arg4[%c0_7, %c0_8, %c0_9], %8 {strides = array<i32>} : memref<1x32x32xf32, #tpu.memory_space<vmem>>, vector<1x32x32xf32>,
    return
  }
  func.func @transform_0(%arg0: i32) -> (i32, i32, i32) {
    %c0_i32 = arith.constant 0 : i32
    %c0_i32_0 = arith.constant 0 : i32
    %c0_i32_1 = arith.constant 0 : i32
    return %arg0, %c0_i32, %c0_i32_0 : i32, i32, i32
  }
  func.func @transform_1(%arg0: i32) -> (i32, i32) {
    %c0_i32 = arith.constant 0 : i32
    %c0_i32_0 = arith.constant 0 : i32
    %c0_i32_1 = arith.constant 0 : i32
    return %c0_i32, %c0_i32_0 : i32, i32
  }
  func.func @transform_2(%arg0: i32) -> (i32, i32) {
    %c0_i32 = arith.constant 0 : i32
    %c0_i32_0 = arith.constant 0 : i32
    %c0_i32_1 = arith.constant 0 : i32
    return %c0_i32, %c0_i32_0 : i32, i32
  }
  func.func @transform_3(%arg0: i32) -> (i32, i32, i32) {
    %c0_i32 = arith.constant 0 : i32
    %c0_i32_0 = arith.constant 0 : i32
    %c0_i32_1 = arith.constant 0 : i32
    return %arg0, %c0_i32, %c0_i32_0 : i32, i32, i32
  }
}

module attributes {stable_mosaic.version = 11 : i64} {
  func.func @_conv3x3_s2_kernel(%arg0: i32, %arg1: memref<1x17x17x3xf32, #tpu.memory_space<vmem>>, %arg2: memref<1x17x17x3xf32, #tpu.memory_space<vmem>>, %arg3: memref<1x17x17x3xf32, #tpu.memory_space<vmem>>, %arg4: memref<1x17x17x3xf32, #tpu.memory_space<vmem>>, %arg5: memref<9x3x8xbf16, #tpu.memory_space<vmem>>, %arg6: memref<1x8xf32, #tpu.memory_space<vmem>>, %arg7: memref<1x16x16x8xf32, #tpu.memory_space<vmem>>) attributes {dimension_semantics = [#tpu.dimension_semantics<parallel>], iteration_bounds = array<i64: 2>, scalar_prefetch = 0 : i64, scratch_operands = 0 : i64, tpu.core_type = #tpu.core_type<tc>, window_params = [{transform_indices = @transform_0, window_bounds = array<i64: 1, 17, 17, 3>}, {transform_indices = @transform_1, window_bounds = array<i64: 1, 17, 17, 3>}, {transform_indices = @transform_2, window_bounds = array<i64: 1, 17, 17, 3>}, {transform_indices = @transform_3, window_bounds = array<i64: 1, 17, 17, 3>}, {pipeline_mode = #tpu.pipeline_mode<synchronous>, transform_indices = @transform_4, window_bounds = array<i64: 9, 3, 8>}, {pipeline_mode = #tpu.pipeline_mode<synchronous>, transform_indices = @transform_5, window_bounds = array<i64: 1, 8>}, {transform_indices = @transform_6, window_bounds = array<i64: 1, 16, 16, 8>}]} {
    %cst = arith.constant 0.000000e+00 : f32
    %0 = vector.broadcast %cst : f32 to vector<256x8xf32>
    %c0 = arith.constant 0 : index
    %c0_0 = arith.constant 0 : index
    %c0_1 = arith.constant 0 : index
    %c0_2 = arith.constant 0 : index
    %1 = vector.load %arg1[%c0, %c0_0, %c0_1, %c0_2] : memref<1x17x17x3xf32, #tpu.memory_space<vmem>>, vector<1x16x16x3xf32>
    %2 = vector.shape_cast %1 : vector<1x16x16x3xf32> to vector<256x3xf32>
    %3 = arith.truncf %2 : vector<256x3xf32> to vector<256x3xbf16>
    %c0_3 = arith.constant 0 : index
    %c0_4 = arith.constant 0 : index
    %c0_5 = arith.constant 0 : index
    %4 = vector.load %arg5[%c0_3, %c0_4, %c0_5] : memref<9x3x8xbf16, #tpu.memory_space<vmem>>, vector<1x3x8xbf16>
    %5 = vector.shape_cast %4 : vector<1x3x8xbf16> to vector<3x8xbf16>
    %cst_6 = arith.constant dense<0.000000e+00> : vector<256x8xf32>
    %6 = tpu.matmul %3, %5, %cst_6 {dimension_numbers = #tpu.dot_dimension_numbers<[1], [0], [0], [1], [0, 0, 1, 1], [], []>} : vector<256x3xbf16>, vector<3x8xbf16>, vector<256x8xf32> -> vector<256x8xf32>
    %7 = arith.addf %0, %6 : vector<256x8xf32>
    %c0_7 = arith.constant 0 : index
    %c0_8 = arith.constant 0 : index
    %c0_9 = arith.constant 0 : index
    %c0_10 = arith.constant 0 : index
    %8 = vector.load %arg2[%c0_7, %c0_8, %c0_9, %c0_10] : memref<1x17x17x3xf32, #tpu.memory_space<vmem>>, vector<1x16x16x3xf32>
    %9 = vector.shape_cast %8 : vector<1x16x16x3xf32> to vector<256x3xf32>
    %10 = arith.truncf %9 : vector<256x3xf32> to vector<256x3xbf16>
    %c1 = arith.constant 1 : index
    %c0_11 = arith.constant 0 : index
    %c0_12 = arith.constant 0 : index
    %11 = vector.load %arg5[%c1, %c0_11, %c0_12] : memref<9x3x8xbf16, #tpu.memory_space<vmem>>, vector<1x3x8xbf16>
    %12 = vector.shape_cast %11 : vector<1x3x8xbf16> to vector<3x8xbf16>
    %cst_13 = arith.constant dense<0.000000e+00> : vector<256x8xf32>
    %13 = tpu.matmul %10, %12, %cst_13 {dimension_numbers = #tpu.dot_dimension_numbers<[1], [0], [0], [1], [0, 0, 1, 1], [], []>} : vector<256x3xbf16>, vector<3x8xbf16>, vector<256x8xf32> -> vector<256x8xf32>
    %14 = arith.addf %7, %13 : vector<256x8xf32>
    %c0_14 = arith.constant 0 : index
    %c0_15 = arith.constant 0 : index
    %c1_16 = arith.constant 1 : index
    %c0_17 = arith.constant 0 : index
    %15 = vector.load %arg1[%c0_14, %c0_15, %c1_16, %c0_17] : memref<1x17x17x3xf32, #tpu.memory_space<vmem>>, vector<1x16x16x3xf32>
    %16 = vector.shape_cast %15 : vector<1x16x16x3xf32> to vector<256x3xf32>
    %17 = arith.truncf %16 : vector<256x3xf32> to vector<256x3xbf16>
    %c2 = arith.constant 2 : index
    %c0_18 = arith.constant 0 : index
    %c0_19 = arith.constant 0 : index
    %18 = vector.load %arg5[%c2, %c0_18, %c0_19] : memref<9x3x8xbf16, #tpu.memory_space<vmem>>, vector<1x3x8xbf16>
    %19 = vector.shape_cast %18 : vector<1x3x8xbf16> to vector<3x8xbf16>
    %cst_20 = arith.constant dense<0.000000e+00> : vector<256x8xf32>
    %20 = tpu.matmul %17, %19, %cst_20 {dimension_numbers = #tpu.dot_dimension_numbers<[1], [0], [0], [1], [0, 0, 1, 1], [], []>} : vector<256x3xbf16>, vector<3x8xbf16>, vector<256x8xf32> -> vector<256x8xf32>
    %21 = arith.addf %14, %20 : vector<256x8xf32>
    %c0_21 = arith.constant 0 : index
    %c0_22 = arith.constant 0 : index
    %c0_23 = arith.constant 0 : index
    %c0_24 = arith.constant 0 : index
    %22 = vector.load %arg3[%c0_21, %c0_22, %c0_23, %c0_24] : memref<1x17x17x3xf32, #tpu.memory_space<vmem>>, vector<1x16x16x3xf32>
    %23 = vector.shape_cast %22 : vector<1x16x16x3xf32> to vector<256x3xf32>
    %24 = arith.truncf %23 : vector<256x3xf32> to vector<256x3xbf16>
    %c3 = arith.constant 3 : index
    %c0_25 = arith.constant 0 : index
    %c0_26 = arith.constant 0 : index
    %25 = vector.load %arg5[%c3, %c0_25, %c0_26] : memref<9x3x8xbf16, #tpu.memory_space<vmem>>, vector<1x3x8xbf16>
    %26 = vector.shape_cast %25 : vector<1x3x8xbf16> to vector<3x8xbf16>
    %cst_27 = arith.constant dense<0.000000e+00> : vector<256x8xf32>
    %27 = tpu.matmul %24, %26, %cst_27 {dimension_numbers = #tpu.dot_dimension_numbers<[1], [0], [0], [1], [0, 0, 1, 1], [], []>} : vector<256x3xbf16>, vector<3x8xbf16>, vector<256x8xf32> -> vector<256x8xf32>
    %28 = arith.addf %21, %27 : vector<256x8xf32>
    %c0_28 = arith.constant 0 : index
    %c0_29 = arith.constant 0 : index
    %c0_30 = arith.constant 0 : index
    %c0_31 = arith.constant 0 : index
    %29 = vector.load %arg4[%c0_28, %c0_29, %c0_30, %c0_31] : memref<1x17x17x3xf32, #tpu.memory_space<vmem>>, vector<1x16x16x3xf32>
    %30 = vector.shape_cast %29 : vector<1x16x16x3xf32> to vector<256x3xf32>
    %31 = arith.truncf %30 : vector<256x3xf32> to vector<256x3xbf16>
    %c4 = arith.constant 4 : index
    %c0_32 = arith.constant 0 : index
    %c0_33 = arith.constant 0 : index
    %32 = vector.load %arg5[%c4, %c0_32, %c0_33] : memref<9x3x8xbf16, #tpu.memory_space<vmem>>, vector<1x3x8xbf16>
    %33 = vector.shape_cast %32 : vector<1x3x8xbf16> to vector<3x8xbf16>
    %cst_34 = arith.constant dense<0.000000e+00> : vector<256x8xf32>
    %34 = tpu.matmul %31, %33, %cst_34 {dimension_numbers = #tpu.dot_dimension_numbers<[1], [0], [0], [1], [0, 0, 1, 1], [], []>} : vector<256x3xbf16>, vector<3x8xbf16>, vector<256x8xf32> -> vector<256x8xf32>
    %35 = arith.addf %28, %34 : vector<256x8xf32>
    %c0_35 = arith.constant 0 : index
    %c0_36 = arith.constant 0 : index
    %c1_37 = arith.constant 1 : index
    %c0_38 = arith.constant 0 : index
    %36 = vector.load %arg3[%c0_35, %c0_36, %c1_37, %c0_38] : memref<1x17x17x3xf32, #tpu.memory_space<vmem>>, vector<1x16x16x3xf32>
    %37 = vector.shape_cast %36 : vector<1x16x16x3xf32> to vector<256x3xf32>
    %38 = arith.truncf %37 : vector<256x3xf32> to vector<256x3xbf16>
    %c5 = arith.constant 5 : index
    %c0_39 = arith.constant 0 : index
    %c0_40 = arith.constant 0 : index
    %39 = vector.load %arg5[%c5, %c0_39, %c0_40] : memref<9x3x8xbf16, #tpu.memory_space<vmem>>, vector<1x3x8xbf16>
    %40 = vector.shape_cast %39 : vector<1x3x8xbf16> to vector<3x8xbf16>
    %cst_41 = arith.constant dense<0.000000e+00> : vector<256x8xf32>
    %41 = tpu.matmul %38, %40, %cst_41 {dimension_numbers = #tpu.dot_dimension_numbers<[1], [0], [0], [1], [0, 0, 1, 1], [], []>} : vector<256x3xbf16>, vector<3x8xbf16>, vector<256x8xf32> -> vector<256x8xf32>
    %42 = arith.addf %35, %41 : vector<256x8xf32>
    %c0_42 = arith.constant 0 : index
    %c1_43 = arith.constant 1 : index
    %c0_44 = arith.constant 0 : index
    %c0_45 = arith.constant 0 : index
    %43 = vector.load %arg1[%c0_42, %c1_43, %c0_44, %c0_45] : memref<1x17x17x3xf32, #tpu.memory_space<vmem>>, vector<1x16x16x3xf32>
    %44 = vector.shape_cast %43 : vector<1x16x16x3xf32> to vector<256x3xf32>
    %45 = arith.truncf %44 : vector<256x3xf32> to vector<256x3xbf16>
    %c6 = arith.constant 6 : index
    %c0_46 = arith.constant 0 : index
    %c0_47 = arith.constant 0 : index
    %46 = vector.load %arg5[%c6, %c0_46, %c0_47] : memref<9x3x8xbf16, #tpu.memory_space<vmem>>, vector<1x3x8xbf16>
    %47 = vector.shape_cast %46 : vector<1x3x8xbf16> to vector<3x8xbf16>
    %cst_48 = arith.constant dense<0.000000e+00> : vector<256x8xf32>
    %48 = tpu.matmul %45, %47, %cst_48 {dimension_numbers = #tpu.dot_dimension_numbers<[1], [0], [0], [1], [0, 0, 1, 1], [], []>} : vector<256x3xbf16>, vector<3x8xbf16>, vector<256x8xf32> -> vector<256x8xf32>
    %49 = arith.addf %42, %48 : vector<256x8xf32>
    %c0_49 = arith.constant 0 : index
    %c1_50 = arith.constant 1 : index
    %c0_51 = arith.constant 0 : index
    %c0_52 = arith.constant 0 : index
    %50 = vector.load %arg2[%c0_49, %c1_50, %c0_51, %c0_52] : memref<1x17x17x3xf32, #tpu.memory_space<vmem>>, vector<1x16x16x3xf32>
    %51 = vector.shape_cast %50 : vector<1x16x16x3xf32> to vector<256x3xf32>
    %52 = arith.truncf %51 : vector<256x3xf32> to vector<256x3xbf16>
    %c7 = arith.constant 7 : index
    %c0_53 = arith.constant 0 : index
    %c0_54 = arith.constant 0 : index
    %53 = vector.load %arg5[%c7, %c0_53, %c0_54] : memref<9x3x8xbf16, #tpu.memory_space<vmem>>, vector<1x3x8xbf16>
    %54 = vector.shape_cast %53 : vector<1x3x8xbf16> to vector<3x8xbf16>
    %cst_55 = arith.constant dense<0.000000e+00> : vector<256x8xf32>
    %55 = tpu.matmul %52, %54, %cst_55 {dimension_numbers = #tpu.dot_dimension_numbers<[1], [0], [0], [1], [0, 0, 1, 1], [], []>} : vector<256x3xbf16>, vector<3x8xbf16>, vector<256x8xf32> -> vector<256x8xf32>
    %56 = arith.addf %49, %55 : vector<256x8xf32>
    %c0_56 = arith.constant 0 : index
    %c1_57 = arith.constant 1 : index
    %c1_58 = arith.constant 1 : index
    %c0_59 = arith.constant 0 : index
    %57 = vector.load %arg1[%c0_56, %c1_57, %c1_58, %c0_59] : memref<1x17x17x3xf32, #tpu.memory_space<vmem>>, vector<1x16x16x3xf32>
    %58 = vector.shape_cast %57 : vector<1x16x16x3xf32> to vector<256x3xf32>
    %59 = arith.truncf %58 : vector<256x3xf32> to vector<256x3xbf16>
    %c8 = arith.constant 8 : index
    %c0_60 = arith.constant 0 : index
    %c0_61 = arith.constant 0 : index
    %60 = vector.load %arg5[%c8, %c0_60, %c0_61] : memref<9x3x8xbf16, #tpu.memory_space<vmem>>, vector<1x3x8xbf16>
    %61 = vector.shape_cast %60 : vector<1x3x8xbf16> to vector<3x8xbf16>
    %cst_62 = arith.constant dense<0.000000e+00> : vector<256x8xf32>
    %62 = tpu.matmul %59, %61, %cst_62 {dimension_numbers = #tpu.dot_dimension_numbers<[1], [0], [0], [1], [0, 0, 1, 1], [], []>} : vector<256x3xbf16>, vector<3x8xbf16>, vector<256x8xf32> -> vector<256x8xf32>
    %63 = arith.addf %56, %62 : vector<256x8xf32>
    %c0_63 = arith.constant 0 : index
    %c0_64 = arith.constant 0 : index
    %64 = vector.load %arg6[%c0_63, %c0_64] : memref<1x8xf32, #tpu.memory_space<vmem>>, vector<1x8xf32>
    %65 = vector.broadcast %64 : vector<1x8xf32> to vector<256x8xf32>
    %66 = arith.addf %63, %65 : vector<256x8xf32>
    %cst_65 = arith.constant 0.000000e+00 : f32
    %67 = vector.broadcast %cst_65 : f32 to vector<256x8xf32>
    %68 = arith.maximumf %66, %67 : vector<256x8xf32>
    %69 = vector.shape_cast %68 : vector<256x8xf32> to vector<1x16x16x8xf32>
    %c0_66 = arith.constant 0 : index
    %c0_67 = arith.constant 0 : index
    %c0_68 = arith.constant 0 : index
    %c0_69 = arith.constant 0 : index
    %70 = vector.load %arg7[%c0_66, %c0_67, %c0_68, %c0_69] : memref<1x16x16x8xf32, #tpu.memory_space<vmem>>, vector<1x16x16x8xf32>
    tpu.vector_store %arg7[%c0_66, %c0_67, %c0_68, %c0_69], %69 {strides = array<i32>} : memref<1x16x16x8xf32, #tpu.memory_space<vmem>>, vector<1x16x16x8xf32>,
    return
  }
  func.func @transform_0(%arg0: i32) -> (i32, i32, i32, i32) {
    %c0_i32 = arith.constant 0 : i32
    %c0_i32_0 = arith.constant 0 : i32
    %c0_i32_1 = arith.constant 0 : i32
    %c0_i32_2 = arith.constant 0 : i32
    return %arg0, %c0_i32, %c0_i32_0, %c0_i32_1 : i32, i32, i32, i32
  }
  func.func @transform_1(%arg0: i32) -> (i32, i32, i32, i32) {
    %c0_i32 = arith.constant 0 : i32
    %c0_i32_0 = arith.constant 0 : i32
    %c0_i32_1 = arith.constant 0 : i32
    %c0_i32_2 = arith.constant 0 : i32
    return %arg0, %c0_i32, %c0_i32_0, %c0_i32_1 : i32, i32, i32, i32
  }
  func.func @transform_2(%arg0: i32) -> (i32, i32, i32, i32) {
    %c0_i32 = arith.constant 0 : i32
    %c0_i32_0 = arith.constant 0 : i32
    %c0_i32_1 = arith.constant 0 : i32
    %c0_i32_2 = arith.constant 0 : i32
    return %arg0, %c0_i32, %c0_i32_0, %c0_i32_1 : i32, i32, i32, i32
  }
  func.func @transform_3(%arg0: i32) -> (i32, i32, i32, i32) {
    %c0_i32 = arith.constant 0 : i32
    %c0_i32_0 = arith.constant 0 : i32
    %c0_i32_1 = arith.constant 0 : i32
    %c0_i32_2 = arith.constant 0 : i32
    return %arg0, %c0_i32, %c0_i32_0, %c0_i32_1 : i32, i32, i32, i32
  }
  func.func @transform_4(%arg0: i32) -> (i32, i32, i32) {
    %c0_i32 = arith.constant 0 : i32
    %c0_i32_0 = arith.constant 0 : i32
    %c0_i32_1 = arith.constant 0 : i32
    %c0_i32_2 = arith.constant 0 : i32
    return %c0_i32, %c0_i32_0, %c0_i32_1 : i32, i32, i32
  }
  func.func @transform_5(%arg0: i32) -> (i32, i32) {
    %c0_i32 = arith.constant 0 : i32
    %c0_i32_0 = arith.constant 0 : i32
    %c0_i32_1 = arith.constant 0 : i32
    return %c0_i32, %c0_i32_0 : i32, i32
  }
  func.func @transform_6(%arg0: i32) -> (i32, i32, i32, i32) {
    %c0_i32 = arith.constant 0 : i32
    %c0_i32_0 = arith.constant 0 : i32
    %c0_i32_1 = arith.constant 0 : i32
    %c0_i32_2 = arith.constant 0 : i32
    return %arg0, %c0_i32, %c0_i32_0, %c0_i32_1 : i32, i32, i32, i32
  }
}

module attributes {stable_mosaic.version = 11 : i64} {
  func.func @_conv3x3_s2_kernel(%arg0: i32, %arg1: memref<1x9x9x8xf32, #tpu.memory_space<vmem>>, %arg2: memref<1x9x9x8xf32, #tpu.memory_space<vmem>>, %arg3: memref<1x9x9x8xf32, #tpu.memory_space<vmem>>, %arg4: memref<1x9x9x8xf32, #tpu.memory_space<vmem>>, %arg5: memref<9x8x16xbf16, #tpu.memory_space<vmem>>, %arg6: memref<1x16xf32, #tpu.memory_space<vmem>>, %arg7: memref<1x8x8x16xf32, #tpu.memory_space<vmem>>) attributes {dimension_semantics = [#tpu.dimension_semantics<parallel>], iteration_bounds = array<i64: 2>, scalar_prefetch = 0 : i64, scratch_operands = 0 : i64, tpu.core_type = #tpu.core_type<tc>, window_params = [{transform_indices = @transform_0, window_bounds = array<i64: 1, 9, 9, 8>}, {transform_indices = @transform_1, window_bounds = array<i64: 1, 9, 9, 8>}, {transform_indices = @transform_2, window_bounds = array<i64: 1, 9, 9, 8>}, {transform_indices = @transform_3, window_bounds = array<i64: 1, 9, 9, 8>}, {pipeline_mode = #tpu.pipeline_mode<synchronous>, transform_indices = @transform_4, window_bounds = array<i64: 9, 8, 16>}, {pipeline_mode = #tpu.pipeline_mode<synchronous>, transform_indices = @transform_5, window_bounds = array<i64: 1, 16>}, {transform_indices = @transform_6, window_bounds = array<i64: 1, 8, 8, 16>}]} {
    %cst = arith.constant 0.000000e+00 : f32
    %0 = vector.broadcast %cst : f32 to vector<64x16xf32>
    %c0 = arith.constant 0 : index
    %c0_0 = arith.constant 0 : index
    %c0_1 = arith.constant 0 : index
    %c0_2 = arith.constant 0 : index
    %1 = vector.load %arg1[%c0, %c0_0, %c0_1, %c0_2] : memref<1x9x9x8xf32, #tpu.memory_space<vmem>>, vector<1x8x8x8xf32>
    %2 = vector.shape_cast %1 : vector<1x8x8x8xf32> to vector<64x8xf32>
    %3 = arith.truncf %2 : vector<64x8xf32> to vector<64x8xbf16>
    %c0_3 = arith.constant 0 : index
    %c0_4 = arith.constant 0 : index
    %c0_5 = arith.constant 0 : index
    %4 = vector.load %arg5[%c0_3, %c0_4, %c0_5] : memref<9x8x16xbf16, #tpu.memory_space<vmem>>, vector<1x8x16xbf16>
    %5 = vector.shape_cast %4 : vector<1x8x16xbf16> to vector<8x16xbf16>
    %cst_6 = arith.constant dense<0.000000e+00> : vector<64x16xf32>
    %6 = tpu.matmul %3, %5, %cst_6 {dimension_numbers = #tpu.dot_dimension_numbers<[1], [0], [0], [1], [0, 0, 1, 1], [], []>} : vector<64x8xbf16>, vector<8x16xbf16>, vector<64x16xf32> -> vector<64x16xf32>
    %7 = arith.addf %0, %6 : vector<64x16xf32>
    %c0_7 = arith.constant 0 : index
    %c0_8 = arith.constant 0 : index
    %c0_9 = arith.constant 0 : index
    %c0_10 = arith.constant 0 : index
    %8 = vector.load %arg2[%c0_7, %c0_8, %c0_9, %c0_10] : memref<1x9x9x8xf32, #tpu.memory_space<vmem>>, vector<1x8x8x8xf32>
    %9 = vector.shape_cast %8 : vector<1x8x8x8xf32> to vector<64x8xf32>
    %10 = arith.truncf %9 : vector<64x8xf32> to vector<64x8xbf16>
    %c1 = arith.constant 1 : index
    %c0_11 = arith.constant 0 : index
    %c0_12 = arith.constant 0 : index
    %11 = vector.load %arg5[%c1, %c0_11, %c0_12] : memref<9x8x16xbf16, #tpu.memory_space<vmem>>, vector<1x8x16xbf16>
    %12 = vector.shape_cast %11 : vector<1x8x16xbf16> to vector<8x16xbf16>
    %cst_13 = arith.constant dense<0.000000e+00> : vector<64x16xf32>
    %13 = tpu.matmul %10, %12, %cst_13 {dimension_numbers = #tpu.dot_dimension_numbers<[1], [0], [0], [1], [0, 0, 1, 1], [], []>} : vector<64x8xbf16>, vector<8x16xbf16>, vector<64x16xf32> -> vector<64x16xf32>
    %14 = arith.addf %7, %13 : vector<64x16xf32>
    %c0_14 = arith.constant 0 : index
    %c0_15 = arith.constant 0 : index
    %c1_16 = arith.constant 1 : index
    %c0_17 = arith.constant 0 : index
    %15 = vector.load %arg1[%c0_14, %c0_15, %c1_16, %c0_17] : memref<1x9x9x8xf32, #tpu.memory_space<vmem>>, vector<1x8x8x8xf32>
    %16 = vector.shape_cast %15 : vector<1x8x8x8xf32> to vector<64x8xf32>
    %17 = arith.truncf %16 : vector<64x8xf32> to vector<64x8xbf16>
    %c2 = arith.constant 2 : index
    %c0_18 = arith.constant 0 : index
    %c0_19 = arith.constant 0 : index
    %18 = vector.load %arg5[%c2, %c0_18, %c0_19] : memref<9x8x16xbf16, #tpu.memory_space<vmem>>, vector<1x8x16xbf16>
    %19 = vector.shape_cast %18 : vector<1x8x16xbf16> to vector<8x16xbf16>
    %cst_20 = arith.constant dense<0.000000e+00> : vector<64x16xf32>
    %20 = tpu.matmul %17, %19, %cst_20 {dimension_numbers = #tpu.dot_dimension_numbers<[1], [0], [0], [1], [0, 0, 1, 1], [], []>} : vector<64x8xbf16>, vector<8x16xbf16>, vector<64x16xf32> -> vector<64x16xf32>
    %21 = arith.addf %14, %20 : vector<64x16xf32>
    %c0_21 = arith.constant 0 : index
    %c0_22 = arith.constant 0 : index
    %c0_23 = arith.constant 0 : index
    %c0_24 = arith.constant 0 : index
    %22 = vector.load %arg3[%c0_21, %c0_22, %c0_23, %c0_24] : memref<1x9x9x8xf32, #tpu.memory_space<vmem>>, vector<1x8x8x8xf32>
    %23 = vector.shape_cast %22 : vector<1x8x8x8xf32> to vector<64x8xf32>
    %24 = arith.truncf %23 : vector<64x8xf32> to vector<64x8xbf16>
    %c3 = arith.constant 3 : index
    %c0_25 = arith.constant 0 : index
    %c0_26 = arith.constant 0 : index
    %25 = vector.load %arg5[%c3, %c0_25, %c0_26] : memref<9x8x16xbf16, #tpu.memory_space<vmem>>, vector<1x8x16xbf16>
    %26 = vector.shape_cast %25 : vector<1x8x16xbf16> to vector<8x16xbf16>
    %cst_27 = arith.constant dense<0.000000e+00> : vector<64x16xf32>
    %27 = tpu.matmul %24, %26, %cst_27 {dimension_numbers = #tpu.dot_dimension_numbers<[1], [0], [0], [1], [0, 0, 1, 1], [], []>} : vector<64x8xbf16>, vector<8x16xbf16>, vector<64x16xf32> -> vector<64x16xf32>
    %28 = arith.addf %21, %27 : vector<64x16xf32>
    %c0_28 = arith.constant 0 : index
    %c0_29 = arith.constant 0 : index
    %c0_30 = arith.constant 0 : index
    %c0_31 = arith.constant 0 : index
    %29 = vector.load %arg4[%c0_28, %c0_29, %c0_30, %c0_31] : memref<1x9x9x8xf32, #tpu.memory_space<vmem>>, vector<1x8x8x8xf32>
    %30 = vector.shape_cast %29 : vector<1x8x8x8xf32> to vector<64x8xf32>
    %31 = arith.truncf %30 : vector<64x8xf32> to vector<64x8xbf16>
    %c4 = arith.constant 4 : index
    %c0_32 = arith.constant 0 : index
    %c0_33 = arith.constant 0 : index
    %32 = vector.load %arg5[%c4, %c0_32, %c0_33] : memref<9x8x16xbf16, #tpu.memory_space<vmem>>, vector<1x8x16xbf16>
    %33 = vector.shape_cast %32 : vector<1x8x16xbf16> to vector<8x16xbf16>
    %cst_34 = arith.constant dense<0.000000e+00> : vector<64x16xf32>
    %34 = tpu.matmul %31, %33, %cst_34 {dimension_numbers = #tpu.dot_dimension_numbers<[1], [0], [0], [1], [0, 0, 1, 1], [], []>} : vector<64x8xbf16>, vector<8x16xbf16>, vector<64x16xf32> -> vector<64x16xf32>
    %35 = arith.addf %28, %34 : vector<64x16xf32>
    %c0_35 = arith.constant 0 : index
    %c0_36 = arith.constant 0 : index
    %c1_37 = arith.constant 1 : index
    %c0_38 = arith.constant 0 : index
    %36 = vector.load %arg3[%c0_35, %c0_36, %c1_37, %c0_38] : memref<1x9x9x8xf32, #tpu.memory_space<vmem>>, vector<1x8x8x8xf32>
    %37 = vector.shape_cast %36 : vector<1x8x8x8xf32> to vector<64x8xf32>
    %38 = arith.truncf %37 : vector<64x8xf32> to vector<64x8xbf16>
    %c5 = arith.constant 5 : index
    %c0_39 = arith.constant 0 : index
    %c0_40 = arith.constant 0 : index
    %39 = vector.load %arg5[%c5, %c0_39, %c0_40] : memref<9x8x16xbf16, #tpu.memory_space<vmem>>, vector<1x8x16xbf16>
    %40 = vector.shape_cast %39 : vector<1x8x16xbf16> to vector<8x16xbf16>
    %cst_41 = arith.constant dense<0.000000e+00> : vector<64x16xf32>
    %41 = tpu.matmul %38, %40, %cst_41 {dimension_numbers = #tpu.dot_dimension_numbers<[1], [0], [0], [1], [0, 0, 1, 1], [], []>} : vector<64x8xbf16>, vector<8x16xbf16>, vector<64x16xf32> -> vector<64x16xf32>
    %42 = arith.addf %35, %41 : vector<64x16xf32>
    %c0_42 = arith.constant 0 : index
    %c1_43 = arith.constant 1 : index
    %c0_44 = arith.constant 0 : index
    %c0_45 = arith.constant 0 : index
    %43 = vector.load %arg1[%c0_42, %c1_43, %c0_44, %c0_45] : memref<1x9x9x8xf32, #tpu.memory_space<vmem>>, vector<1x8x8x8xf32>
    %44 = vector.shape_cast %43 : vector<1x8x8x8xf32> to vector<64x8xf32>
    %45 = arith.truncf %44 : vector<64x8xf32> to vector<64x8xbf16>
    %c6 = arith.constant 6 : index
    %c0_46 = arith.constant 0 : index
    %c0_47 = arith.constant 0 : index
    %46 = vector.load %arg5[%c6, %c0_46, %c0_47] : memref<9x8x16xbf16, #tpu.memory_space<vmem>>, vector<1x8x16xbf16>
    %47 = vector.shape_cast %46 : vector<1x8x16xbf16> to vector<8x16xbf16>
    %cst_48 = arith.constant dense<0.000000e+00> : vector<64x16xf32>
    %48 = tpu.matmul %45, %47, %cst_48 {dimension_numbers = #tpu.dot_dimension_numbers<[1], [0], [0], [1], [0, 0, 1, 1], [], []>} : vector<64x8xbf16>, vector<8x16xbf16>, vector<64x16xf32> -> vector<64x16xf32>
    %49 = arith.addf %42, %48 : vector<64x16xf32>
    %c0_49 = arith.constant 0 : index
    %c1_50 = arith.constant 1 : index
    %c0_51 = arith.constant 0 : index
    %c0_52 = arith.constant 0 : index
    %50 = vector.load %arg2[%c0_49, %c1_50, %c0_51, %c0_52] : memref<1x9x9x8xf32, #tpu.memory_space<vmem>>, vector<1x8x8x8xf32>
    %51 = vector.shape_cast %50 : vector<1x8x8x8xf32> to vector<64x8xf32>
    %52 = arith.truncf %51 : vector<64x8xf32> to vector<64x8xbf16>
    %c7 = arith.constant 7 : index
    %c0_53 = arith.constant 0 : index
    %c0_54 = arith.constant 0 : index
    %53 = vector.load %arg5[%c7, %c0_53, %c0_54] : memref<9x8x16xbf16, #tpu.memory_space<vmem>>, vector<1x8x16xbf16>
    %54 = vector.shape_cast %53 : vector<1x8x16xbf16> to vector<8x16xbf16>
    %cst_55 = arith.constant dense<0.000000e+00> : vector<64x16xf32>
    %55 = tpu.matmul %52, %54, %cst_55 {dimension_numbers = #tpu.dot_dimension_numbers<[1], [0], [0], [1], [0, 0, 1, 1], [], []>} : vector<64x8xbf16>, vector<8x16xbf16>, vector<64x16xf32> -> vector<64x16xf32>
    %56 = arith.addf %49, %55 : vector<64x16xf32>
    %c0_56 = arith.constant 0 : index
    %c1_57 = arith.constant 1 : index
    %c1_58 = arith.constant 1 : index
    %c0_59 = arith.constant 0 : index
    %57 = vector.load %arg1[%c0_56, %c1_57, %c1_58, %c0_59] : memref<1x9x9x8xf32, #tpu.memory_space<vmem>>, vector<1x8x8x8xf32>
    %58 = vector.shape_cast %57 : vector<1x8x8x8xf32> to vector<64x8xf32>
    %59 = arith.truncf %58 : vector<64x8xf32> to vector<64x8xbf16>
    %c8 = arith.constant 8 : index
    %c0_60 = arith.constant 0 : index
    %c0_61 = arith.constant 0 : index
    %60 = vector.load %arg5[%c8, %c0_60, %c0_61] : memref<9x8x16xbf16, #tpu.memory_space<vmem>>, vector<1x8x16xbf16>
    %61 = vector.shape_cast %60 : vector<1x8x16xbf16> to vector<8x16xbf16>
    %cst_62 = arith.constant dense<0.000000e+00> : vector<64x16xf32>
    %62 = tpu.matmul %59, %61, %cst_62 {dimension_numbers = #tpu.dot_dimension_numbers<[1], [0], [0], [1], [0, 0, 1, 1], [], []>} : vector<64x8xbf16>, vector<8x16xbf16>, vector<64x16xf32> -> vector<64x16xf32>
    %63 = arith.addf %56, %62 : vector<64x16xf32>
    %c0_63 = arith.constant 0 : index
    %c0_64 = arith.constant 0 : index
    %64 = vector.load %arg6[%c0_63, %c0_64] : memref<1x16xf32, #tpu.memory_space<vmem>>, vector<1x16xf32>
    %65 = vector.broadcast %64 : vector<1x16xf32> to vector<64x16xf32>
    %66 = arith.addf %63, %65 : vector<64x16xf32>
    %cst_65 = arith.constant 0.000000e+00 : f32
    %67 = vector.broadcast %cst_65 : f32 to vector<64x16xf32>
    %68 = arith.maximumf %66, %67 : vector<64x16xf32>
    %69 = vector.shape_cast %68 : vector<64x16xf32> to vector<1x8x8x16xf32>
    %c0_66 = arith.constant 0 : index
    %c0_67 = arith.constant 0 : index
    %c0_68 = arith.constant 0 : index
    %c0_69 = arith.constant 0 : index
    %70 = vector.load %arg7[%c0_66, %c0_67, %c0_68, %c0_69] : memref<1x8x8x16xf32, #tpu.memory_space<vmem>>, vector<1x8x8x16xf32>
    tpu.vector_store %arg7[%c0_66, %c0_67, %c0_68, %c0_69], %69 {strides = array<i32>} : memref<1x8x8x16xf32, #tpu.memory_space<vmem>>, vector<1x8x8x16xf32>,
    return
  }
  func.func @transform_0(%arg0: i32) -> (i32, i32, i32, i32) {
    %c0_i32 = arith.constant 0 : i32
    %c0_i32_0 = arith.constant 0 : i32
    %c0_i32_1 = arith.constant 0 : i32
    %c0_i32_2 = arith.constant 0 : i32
    return %arg0, %c0_i32, %c0_i32_0, %c0_i32_1 : i32, i32, i32, i32
  }
  func.func @transform_1(%arg0: i32) -> (i32, i32, i32, i32) {
    %c0_i32 = arith.constant 0 : i32
    %c0_i32_0 = arith.constant 0 : i32
    %c0_i32_1 = arith.constant 0 : i32
    %c0_i32_2 = arith.constant 0 : i32
    return %arg0, %c0_i32, %c0_i32_0, %c0_i32_1 : i32, i32, i32, i32
  }
  func.func @transform_2(%arg0: i32) -> (i32, i32, i32, i32) {
    %c0_i32 = arith.constant 0 : i32
    %c0_i32_0 = arith.constant 0 : i32
    %c0_i32_1 = arith.constant 0 : i32
    %c0_i32_2 = arith.constant 0 : i32
    return %arg0, %c0_i32, %c0_i32_0, %c0_i32_1 : i32, i32, i32, i32
  }
  func.func @transform_3(%arg0: i32) -> (i32, i32, i32, i32) {
    %c0_i32 = arith.constant 0 : i32
    %c0_i32_0 = arith.constant 0 : i32
    %c0_i32_1 = arith.constant 0 : i32
    %c0_i32_2 = arith.constant 0 : i32
    return %arg0, %c0_i32, %c0_i32_0, %c0_i32_1 : i32, i32, i32, i32
  }
  func.func @transform_4(%arg0: i32) -> (i32, i32, i32) {
    %c0_i32 = arith.constant 0 : i32
    %c0_i32_0 = arith.constant 0 : i32
    %c0_i32_1 = arith.constant 0 : i32
    %c0_i32_2 = arith.constant 0 : i32
    return %c0_i32, %c0_i32_0, %c0_i32_1 : i32, i32, i32
  }
  func.func @transform_5(%arg0: i32) -> (i32, i32) {
    %c0_i32 = arith.constant 0 : i32
    %c0_i32_0 = arith.constant 0 : i32
    %c0_i32_1 = arith.constant 0 : i32
    return %c0_i32, %c0_i32_0 : i32, i32
  }
  func.func @transform_6(%arg0: i32) -> (i32, i32, i32, i32) {
    %c0_i32 = arith.constant 0 : i32
    %c0_i32_0 = arith.constant 0 : i32
    %c0_i32_1 = arith.constant 0 : i32
    %c0_i32_2 = arith.constant 0 : i32
    return %arg0, %c0_i32, %c0_i32_0, %c0_i32_1 : i32, i32, i32, i32
  }
}

module attributes {stable_mosaic.version = 11 : i64} {
  func.func @_conv_mixer_kernel(%arg0: i32, %arg1: memref<1x10x10x16xf32, #tpu.memory_space<vmem>>, %arg2: memref<9x16xf32, #tpu.memory_space<vmem>>, %arg3: memref<1x16xf32, #tpu.memory_space<vmem>>, %arg4: memref<16x64xbf16, #tpu.memory_space<vmem>>, %arg5: memref<1x64xf32, #tpu.memory_space<vmem>>, %arg6: memref<64x16xbf16, #tpu.memory_space<vmem>>, %arg7: memref<1x16xf32, #tpu.memory_space<vmem>>, %arg8: memref<1x8x8x16xf32, #tpu.memory_space<vmem>>) attributes {dimension_semantics = [#tpu.dimension_semantics<parallel>], iteration_bounds = array<i64: 2>, scalar_prefetch = 0 : i64, scratch_operands = 0 : i64, tpu.core_type = #tpu.core_type<tc>, window_params = [{transform_indices = @transform_0, window_bounds = array<i64: 1, 10, 10, 16>}, {pipeline_mode = #tpu.pipeline_mode<synchronous>, transform_indices = @transform_1, window_bounds = array<i64: 9, 16>}, {pipeline_mode = #tpu.pipeline_mode<synchronous>, transform_indices = @transform_2, window_bounds = array<i64: 1, 16>}, {pipeline_mode = #tpu.pipeline_mode<synchronous>, transform_indices = @transform_3, window_bounds = array<i64: 16, 64>}, {pipeline_mode = #tpu.pipeline_mode<synchronous>, transform_indices = @transform_4, window_bounds = array<i64: 1, 64>}, {pipeline_mode = #tpu.pipeline_mode<synchronous>, transform_indices = @transform_5, window_bounds = array<i64: 64, 16>}, {pipeline_mode = #tpu.pipeline_mode<synchronous>, transform_indices = @transform_6, window_bounds = array<i64: 1, 16>}, {transform_indices = @transform_7, window_bounds = array<i64: 1, 8, 8, 16>}]} {
    %c0 = arith.constant 0 : index
    %c0_0 = arith.constant 0 : index
    %0 = vector.load %arg2[%c0, %c0_0] : memref<9x16xf32, #tpu.memory_space<vmem>>, vector<9x16xf32>
    %cst = arith.constant 0.000000e+00 : f32
    %1 = vector.broadcast %cst : f32 to vector<1x8x8x16xf32>
    %c0_1 = arith.constant 0 : index
    %c0_2 = arith.constant 0 : index
    %c0_3 = arith.constant 0 : index
    %c0_4 = arith.constant 0 : index
    %2 = vector.load %arg1[%c0_1, %c0_2, %c0_3, %c0_4] : memref<1x10x10x16xf32, #tpu.memory_space<vmem>>, vector<1x8x8x16xf32>
    %3 = vector.extract_strided_slice %0 {offsets = [0, 0], sizes = [1, 16], strides = [1, 1]} : vector<9x16xf32> to vector<1x16xf32>
    %4 = vector.shape_cast %3 : vector<1x16xf32> to vector<16xf32>
    %5 = vector.shape_cast %4 : vector<16xf32> to vector<1x1x1x16xf32>
    %6 = vector.broadcast %5 : vector<1x1x1x16xf32> to vector<1x8x8x16xf32>
    %7 = arith.mulf %2, %6 : vector<1x8x8x16xf32>
    %8 = arith.addf %1, %7 : vector<1x8x8x16xf32>
    %c0_5 = arith.constant 0 : index
    %c0_6 = arith.constant 0 : index
    %c1 = arith.constant 1 : index
    %c0_7 = arith.constant 0 : index
    %9 = vector.load %arg1[%c0_5, %c0_6, %c1, %c0_7] : memref<1x10x10x16xf32, #tpu.memory_space<vmem>>, vector<1x8x8x16xf32>
    %10 = vector.extract_strided_slice %0 {offsets = [1, 0], sizes = [1, 16], strides = [1, 1]} : vector<9x16xf32> to vector<1x16xf32>
    %11 = vector.shape_cast %10 : vector<1x16xf32> to vector<16xf32>
    %12 = vector.shape_cast %11 : vector<16xf32> to vector<1x1x1x16xf32>
    %13 = vector.broadcast %12 : vector<1x1x1x16xf32> to vector<1x8x8x16xf32>
    %14 = arith.mulf %9, %13 : vector<1x8x8x16xf32>
    %15 = arith.addf %8, %14 : vector<1x8x8x16xf32>
    %c0_8 = arith.constant 0 : index
    %c0_9 = arith.constant 0 : index
    %c2 = arith.constant 2 : index
    %c0_10 = arith.constant 0 : index
    %16 = vector.load %arg1[%c0_8, %c0_9, %c2, %c0_10] : memref<1x10x10x16xf32, #tpu.memory_space<vmem>>, vector<1x8x8x16xf32>
    %17 = vector.extract_strided_slice %0 {offsets = [2, 0], sizes = [1, 16], strides = [1, 1]} : vector<9x16xf32> to vector<1x16xf32>
    %18 = vector.shape_cast %17 : vector<1x16xf32> to vector<16xf32>
    %19 = vector.shape_cast %18 : vector<16xf32> to vector<1x1x1x16xf32>
    %20 = vector.broadcast %19 : vector<1x1x1x16xf32> to vector<1x8x8x16xf32>
    %21 = arith.mulf %16, %20 : vector<1x8x8x16xf32>
    %22 = arith.addf %15, %21 : vector<1x8x8x16xf32>
    %c0_11 = arith.constant 0 : index
    %c1_12 = arith.constant 1 : index
    %c0_13 = arith.constant 0 : index
    %c0_14 = arith.constant 0 : index
    %23 = vector.load %arg1[%c0_11, %c1_12, %c0_13, %c0_14] : memref<1x10x10x16xf32, #tpu.memory_space<vmem>>, vector<1x8x8x16xf32>
    %24 = vector.extract_strided_slice %0 {offsets = [3, 0], sizes = [1, 16], strides = [1, 1]} : vector<9x16xf32> to vector<1x16xf32>
    %25 = vector.shape_cast %24 : vector<1x16xf32> to vector<16xf32>
    %26 = vector.shape_cast %25 : vector<16xf32> to vector<1x1x1x16xf32>
    %27 = vector.broadcast %26 : vector<1x1x1x16xf32> to vector<1x8x8x16xf32>
    %28 = arith.mulf %23, %27 : vector<1x8x8x16xf32>
    %29 = arith.addf %22, %28 : vector<1x8x8x16xf32>
    %c0_15 = arith.constant 0 : index
    %c1_16 = arith.constant 1 : index
    %c1_17 = arith.constant 1 : index
    %c0_18 = arith.constant 0 : index
    %30 = vector.load %arg1[%c0_15, %c1_16, %c1_17, %c0_18] : memref<1x10x10x16xf32, #tpu.memory_space<vmem>>, vector<1x8x8x16xf32>
    %31 = vector.extract_strided_slice %0 {offsets = [4, 0], sizes = [1, 16], strides = [1, 1]} : vector<9x16xf32> to vector<1x16xf32>
    %32 = vector.shape_cast %31 : vector<1x16xf32> to vector<16xf32>
    %33 = vector.shape_cast %32 : vector<16xf32> to vector<1x1x1x16xf32>
    %34 = vector.broadcast %33 : vector<1x1x1x16xf32> to vector<1x8x8x16xf32>
    %35 = arith.mulf %30, %34 : vector<1x8x8x16xf32>
    %36 = arith.addf %29, %35 : vector<1x8x8x16xf32>
    %c0_19 = arith.constant 0 : index
    %c1_20 = arith.constant 1 : index
    %c2_21 = arith.constant 2 : index
    %c0_22 = arith.constant 0 : index
    %37 = vector.load %arg1[%c0_19, %c1_20, %c2_21, %c0_22] : memref<1x10x10x16xf32, #tpu.memory_space<vmem>>, vector<1x8x8x16xf32>
    %38 = vector.extract_strided_slice %0 {offsets = [5, 0], sizes = [1, 16], strides = [1, 1]} : vector<9x16xf32> to vector<1x16xf32>
    %39 = vector.shape_cast %38 : vector<1x16xf32> to vector<16xf32>
    %40 = vector.shape_cast %39 : vector<16xf32> to vector<1x1x1x16xf32>
    %41 = vector.broadcast %40 : vector<1x1x1x16xf32> to vector<1x8x8x16xf32>
    %42 = arith.mulf %37, %41 : vector<1x8x8x16xf32>
    %43 = arith.addf %36, %42 : vector<1x8x8x16xf32>
    %c0_23 = arith.constant 0 : index
    %c2_24 = arith.constant 2 : index
    %c0_25 = arith.constant 0 : index
    %c0_26 = arith.constant 0 : index
    %44 = vector.load %arg1[%c0_23, %c2_24, %c0_25, %c0_26] : memref<1x10x10x16xf32, #tpu.memory_space<vmem>>, vector<1x8x8x16xf32>
    %45 = vector.extract_strided_slice %0 {offsets = [6, 0], sizes = [1, 16], strides = [1, 1]} : vector<9x16xf32> to vector<1x16xf32>
    %46 = vector.shape_cast %45 : vector<1x16xf32> to vector<16xf32>
    %47 = vector.shape_cast %46 : vector<16xf32> to vector<1x1x1x16xf32>
    %48 = vector.broadcast %47 : vector<1x1x1x16xf32> to vector<1x8x8x16xf32>
    %49 = arith.mulf %44, %48 : vector<1x8x8x16xf32>
    %50 = arith.addf %43, %49 : vector<1x8x8x16xf32>
    %c0_27 = arith.constant 0 : index
    %c2_28 = arith.constant 2 : index
    %c1_29 = arith.constant 1 : index
    %c0_30 = arith.constant 0 : index
    %51 = vector.load %arg1[%c0_27, %c2_28, %c1_29, %c0_30] : memref<1x10x10x16xf32, #tpu.memory_space<vmem>>, vector<1x8x8x16xf32>
    %52 = vector.extract_strided_slice %0 {offsets = [7, 0], sizes = [1, 16], strides = [1, 1]} : vector<9x16xf32> to vector<1x16xf32>
    %53 = vector.shape_cast %52 : vector<1x16xf32> to vector<16xf32>
    %54 = vector.shape_cast %53 : vector<16xf32> to vector<1x1x1x16xf32>
    %55 = vector.broadcast %54 : vector<1x1x1x16xf32> to vector<1x8x8x16xf32>
    %56 = arith.mulf %51, %55 : vector<1x8x8x16xf32>
    %57 = arith.addf %50, %56 : vector<1x8x8x16xf32>
    %c0_31 = arith.constant 0 : index
    %c2_32 = arith.constant 2 : index
    %c2_33 = arith.constant 2 : index
    %c0_34 = arith.constant 0 : index
    %58 = vector.load %arg1[%c0_31, %c2_32, %c2_33, %c0_34] : memref<1x10x10x16xf32, #tpu.memory_space<vmem>>, vector<1x8x8x16xf32>
    %59 = vector.extract_strided_slice %0 {offsets = [8, 0], sizes = [1, 16], strides = [1, 1]} : vector<9x16xf32> to vector<1x16xf32>
    %60 = vector.shape_cast %59 : vector<1x16xf32> to vector<16xf32>
    %61 = vector.shape_cast %60 : vector<16xf32> to vector<1x1x1x16xf32>
    %62 = vector.broadcast %61 : vector<1x1x1x16xf32> to vector<1x8x8x16xf32>
    %63 = arith.mulf %58, %62 : vector<1x8x8x16xf32>
    %64 = arith.addf %57, %63 : vector<1x8x8x16xf32>
    %c0_35 = arith.constant 0 : index
    %c0_36 = arith.constant 0 : index
    %65 = vector.load %arg3[%c0_35, %c0_36] : memref<1x16xf32, #tpu.memory_space<vmem>>, vector<1x16xf32>
    %66 = vector.shape_cast %65 : vector<1x16xf32> to vector<1x1x1x16xf32>
    %67 = vector.broadcast %66 : vector<1x1x1x16xf32> to vector<1x8x8x16xf32>
    %68 = arith.addf %64, %67 : vector<1x8x8x16xf32>
    %69 = vector.shape_cast %68 : vector<1x8x8x16xf32> to vector<64x16xf32>
    %70 = arith.truncf %69 : vector<64x16xf32> to vector<64x16xbf16>
    %c0_37 = arith.constant 0 : index
    %c0_38 = arith.constant 0 : index
    %71 = vector.load %arg4[%c0_37, %c0_38] : memref<16x64xbf16, #tpu.memory_space<vmem>>, vector<16x64xbf16>
    %cst_39 = arith.constant dense<0.000000e+00> : vector<64x64xf32>
    %72 = tpu.matmul %70, %71, %cst_39 {dimension_numbers = #tpu.dot_dimension_numbers<[1], [0], [0], [1], [0, 0, 1, 1], [], []>} : vector<64x16xbf16>, vector<16x64xbf16>, vector<64x64xf32> -> vector<64x64xf32>
    %c0_40 = arith.constant 0 : index
    %c0_41 = arith.constant 0 : index
    %73 = vector.load %arg5[%c0_40, %c0_41] : memref<1x64xf32, #tpu.memory_space<vmem>>, vector<1x64xf32>
    %74 = vector.broadcast %73 : vector<1x64xf32> to vector<64x64xf32>
    %75 = arith.addf %72, %74 : vector<64x64xf32>
    %76 = arith.mulf %75, %75 : vector<64x64xf32>
    %77 = arith.mulf %75, %76 : vector<64x64xf32>
    %cst_42 = arith.constant 4.471500e-02 : f32
    %78 = vector.broadcast %cst_42 : f32 to vector<64x64xf32>
    %79 = arith.mulf %78, %77 : vector<64x64xf32>
    %80 = arith.addf %75, %79 : vector<64x64xf32>
    %cst_43 = arith.constant 0.797884583 : f32
    %81 = vector.broadcast %cst_43 : f32 to vector<64x64xf32>
    %82 = arith.mulf %81, %80 : vector<64x64xf32>
    %83 = math.tanh %82 : vector<64x64xf32>
    %cst_44 = arith.constant 1.000000e+00 : f32
    %84 = vector.broadcast %cst_44 : f32 to vector<64x64xf32>
    %85 = arith.addf %84, %83 : vector<64x64xf32>
    %cst_45 = arith.constant 5.000000e-01 : f32
    %86 = vector.broadcast %cst_45 : f32 to vector<64x64xf32>
    %87 = arith.mulf %86, %85 : vector<64x64xf32>
    %88 = arith.mulf %75, %87 : vector<64x64xf32>
    %89 = arith.truncf %88 : vector<64x64xf32> to vector<64x64xbf16>
    %c0_46 = arith.constant 0 : index
    %c0_47 = arith.constant 0 : index
    %90 = vector.load %arg6[%c0_46, %c0_47] : memref<64x16xbf16, #tpu.memory_space<vmem>>, vector<64x16xbf16>
    %cst_48 = arith.constant dense<0.000000e+00> : vector<64x16xf32>
    %91 = tpu.matmul %89, %90, %cst_48 {dimension_numbers = #tpu.dot_dimension_numbers<[1], [0], [0], [1], [0, 0, 1, 1], [], []>} : vector<64x64xbf16>, vector<64x16xbf16>, vector<64x16xf32> -> vector<64x16xf32>
    %c0_49 = arith.constant 0 : index
    %c0_50 = arith.constant 0 : index
    %92 = vector.load %arg7[%c0_49, %c0_50] : memref<1x16xf32, #tpu.memory_space<vmem>>, vector<1x16xf32>
    %93 = vector.broadcast %92 : vector<1x16xf32> to vector<64x16xf32>
    %94 = arith.addf %91, %93 : vector<64x16xf32>
    %c0_51 = arith.constant 0 : index
    %c1_52 = arith.constant 1 : index
    %c1_53 = arith.constant 1 : index
    %c0_54 = arith.constant 0 : index
    %95 = vector.load %arg1[%c0_51, %c1_52, %c1_53, %c0_54] : memref<1x10x10x16xf32, #tpu.memory_space<vmem>>, vector<1x8x8x16xf32>
    %96 = vector.shape_cast %95 : vector<1x8x8x16xf32> to vector<64x16xf32>
    %97 = arith.addf %96, %94 : vector<64x16xf32>
    %98 = vector.shape_cast %97 : vector<64x16xf32> to vector<1x8x8x16xf32>
    %c0_55 = arith.constant 0 : index
    %c0_56 = arith.constant 0 : index
    %c0_57 = arith.constant 0 : index
    %c0_58 = arith.constant 0 : index
    %99 = vector.load %arg8[%c0_55, %c0_56, %c0_57, %c0_58] : memref<1x8x8x16xf32, #tpu.memory_space<vmem>>, vector<1x8x8x16xf32>
    tpu.vector_store %arg8[%c0_55, %c0_56, %c0_57, %c0_58], %98 {strides = array<i32>} : memref<1x8x8x16xf32, #tpu.memory_space<vmem>>, vector<1x8x8x16xf32>,
    return
  }
  func.func @transform_0(%arg0: i32) -> (i32, i32, i32, i32) {
    %c0_i32 = arith.constant 0 : i32
    %c0_i32_0 = arith.constant 0 : i32
    %c0_i32_1 = arith.constant 0 : i32
    %c0_i32_2 = arith.constant 0 : i32
    return %arg0, %c0_i32, %c0_i32_0, %c0_i32_1 : i32, i32, i32, i32
  }
  func.func @transform_1(%arg0: i32) -> (i32, i32) {
    %c0_i32 = arith.constant 0 : i32
    %c0_i32_0 = arith.constant 0 : i32
    %c0_i32_1 = arith.constant 0 : i32
    return %c0_i32, %c0_i32_0 : i32, i32
  }
  func.func @transform_2(%arg0: i32) -> (i32, i32) {
    %c0_i32 = arith.constant 0 : i32
    %c0_i32_0 = arith.constant 0 : i32
    %c0_i32_1 = arith.constant 0 : i32
    return %c0_i32, %c0_i32_0 : i32, i32
  }
  func.func @transform_3(%arg0: i32) -> (i32, i32) {
    %c0_i32 = arith.constant 0 : i32
    %c0_i32_0 = arith.constant 0 : i32
    %c0_i32_1 = arith.constant 0 : i32
    return %c0_i32, %c0_i32_0 : i32, i32
  }
  func.func @transform_4(%arg0: i32) -> (i32, i32) {
    %c0_i32 = arith.constant 0 : i32
    %c0_i32_0 = arith.constant 0 : i32
    %c0_i32_1 = arith.constant 0 : i32
    return %c0_i32, %c0_i32_0 : i32, i32
  }
  func.func @transform_5(%arg0: i32) -> (i32, i32) {
    %c0_i32 = arith.constant 0 : i32
    %c0_i32_0 = arith.constant 0 : i32
    %c0_i32_1 = arith.constant 0 : i32
    return %c0_i32, %c0_i32_0 : i32, i32
  }
  func.func @transform_6(%arg0: i32) -> (i32, i32) {
    %c0_i32 = arith.constant 0 : i32
    %c0_i32_0 = arith.constant 0 : i32
    %c0_i32_1 = arith.constant 0 : i32
    return %c0_i32, %c0_i32_0 : i32, i32
  }
  func.func @transform_7(%arg0: i32) -> (i32, i32, i32, i32) {
    %c0_i32 = arith.constant 0 : i32
    %c0_i32_0 = arith.constant 0 : i32
    %c0_i32_1 = arith.constant 0 : i32
    %c0_i32_2 = arith.constant 0 : i32
    return %arg0, %c0_i32, %c0_i32_0, %c0_i32_1 : i32, i32, i32, i32
  }
}

module attributes {stable_mosaic.version = 11 : i64} {
  func.func @_encoder_block_kernel(%arg0: i32, %arg1: memref<1x10x10x16xf32, #tpu.memory_space<vmem>>, %arg2: memref<9x16xf32, #tpu.memory_space<vmem>>, %arg3: memref<1x16xf32, #tpu.memory_space<vmem>>, %arg4: memref<16x16xbf16, #tpu.memory_space<vmem>>, %arg5: memref<1x16xf32, #tpu.memory_space<vmem>>, %arg6: memref<16x16xbf16, #tpu.memory_space<vmem>>, %arg7: memref<1x16xf32, #tpu.memory_space<vmem>>, %arg8: memref<16x16xbf16, #tpu.memory_space<vmem>>, %arg9: memref<1x16xf32, #tpu.memory_space<vmem>>, %arg10: memref<16x16xbf16, #tpu.memory_space<vmem>>, %arg11: memref<1x16xf32, #tpu.memory_space<vmem>>, %arg12: memref<16x16xbf16, #tpu.memory_space<vmem>>, %arg13: memref<1x16xf32, #tpu.memory_space<vmem>>, %arg14: memref<16x16xbf16, #tpu.memory_space<vmem>>, %arg15: memref<1x16xf32, #tpu.memory_space<vmem>>, %arg16: memref<16x64xbf16, #tpu.memory_space<vmem>>, %arg17: memref<1x64xf32, #tpu.memory_space<vmem>>, %arg18: memref<64x16xbf16, #tpu.memory_space<vmem>>, %arg19: memref<1x16xf32, #tpu.memory_space<vmem>>, %arg20: memref<1x8x8x16xf32, #tpu.memory_space<vmem>>) attributes {dimension_semantics = [#tpu.dimension_semantics<parallel>], iteration_bounds = array<i64: 2>, scalar_prefetch = 0 : i64, scratch_operands = 0 : i64, tpu.core_type = #tpu.core_type<tc>, window_params = [{transform_indices = @transform_0, window_bounds = array<i64: 1, 10, 10, 16>}, {pipeline_mode = #tpu.pipeline_mode<synchronous>, transform_indices = @transform_1, window_bounds = array<i64: 9, 16>}, {pipeline_mode = #tpu.pipeline_mode<synchronous>, transform_indices = @transform_2, window_bounds = array<i64: 1, 16>}, {pipeline_mode = #tpu.pipeline_mode<synchronous>, transform_indices = @transform_3, window_bounds = array<i64: 16, 16>}, {pipeline_mode = #tpu.pipeline_mode<synchronous>, transform_indices = @transform_4, window_bounds = array<i64: 1, 16>}, {pipeline_mode = #tpu.pipeline_mode<synchronous>, transform_indices = @transform_5, window_bounds = array<i64: 16, 16>}, {pipeline_mode = #tpu.pipeline_mode<synchronous>, transform_indices = @transform_6, window_bounds = array<i64: 1, 16>}, {pipeline_mode = #tpu.pipeline_mode<synchronous>, transform_indices = @transform_7, window_bounds = array<i64: 16, 16>}, {pipeline_mode = #tpu.pipeline_mode<synchronous>, transform_indices = @transform_8, window_bounds = array<i64: 1, 16>}, {pipeline_mode = #tpu.pipeline_mode<synchronous>, transform_indices = @transform_9, window_bounds = array<i64: 16, 16>}, {pipeline_mode = #tpu.pipeline_mode<synchronous>, transform_indices = @transform_10, window_bounds = array<i64: 1, 16>}, {pipeline_mode = #tpu.pipeline_mode<synchronous>, transform_indices = @transform_11, window_bounds = array<i64: 16, 16>}, {pipeline_mode = #tpu.pipeline_mode<synchronous>, transform_indices = @transform_12, window_bounds = array<i64: 1, 16>}, {pipeline_mode = #tpu.pipeline_mode<synchronous>, transform_indices = @transform_13, window_bounds = array<i64: 16, 16>}, {pipeline_mode = #tpu.pipeline_mode<synchronous>, transform_indices = @transform_14, window_bounds = array<i64: 1, 16>}, {pipeline_mode = #tpu.pipeline_mode<synchronous>, transform_indices = @transform_15, window_bounds = array<i64: 16, 64>}, {pipeline_mode = #tpu.pipeline_mode<synchronous>, transform_indices = @transform_16, window_bounds = array<i64: 1, 64>}, {pipeline_mode = #tpu.pipeline_mode<synchronous>, transform_indices = @transform_17, window_bounds = array<i64: 64, 16>}, {pipeline_mode = #tpu.pipeline_mode<synchronous>, transform_indices = @transform_18, window_bounds = array<i64: 1, 16>}, {transform_indices = @transform_19, window_bounds = array<i64: 1, 8, 8, 16>}]} {
    %c0 = arith.constant 0 : index
    %c0_0 = arith.constant 0 : index
    %0 = vector.load %arg2[%c0, %c0_0] : memref<9x16xf32, #tpu.memory_space<vmem>>, vector<9x16xf32>
    %cst = arith.constant 0.000000e+00 : f32
    %1 = vector.broadcast %cst : f32 to vector<1x8x8x16xf32>
    %c0_1 = arith.constant 0 : index
    %c0_2 = arith.constant 0 : index
    %c0_3 = arith.constant 0 : index
    %c0_4 = arith.constant 0 : index
    %2 = vector.load %arg1[%c0_1, %c0_2, %c0_3, %c0_4] : memref<1x10x10x16xf32, #tpu.memory_space<vmem>>, vector<1x8x8x16xf32>
    %3 = vector.extract_strided_slice %0 {offsets = [0, 0], sizes = [1, 16], strides = [1, 1]} : vector<9x16xf32> to vector<1x16xf32>
    %4 = vector.shape_cast %3 : vector<1x16xf32> to vector<16xf32>
    %5 = vector.shape_cast %4 : vector<16xf32> to vector<1x1x1x16xf32>
    %6 = vector.broadcast %5 : vector<1x1x1x16xf32> to vector<1x8x8x16xf32>
    %7 = arith.mulf %2, %6 : vector<1x8x8x16xf32>
    %8 = arith.addf %1, %7 : vector<1x8x8x16xf32>
    %c0_5 = arith.constant 0 : index
    %c0_6 = arith.constant 0 : index
    %c1 = arith.constant 1 : index
    %c0_7 = arith.constant 0 : index
    %9 = vector.load %arg1[%c0_5, %c0_6, %c1, %c0_7] : memref<1x10x10x16xf32, #tpu.memory_space<vmem>>, vector<1x8x8x16xf32>
    %10 = vector.extract_strided_slice %0 {offsets = [1, 0], sizes = [1, 16], strides = [1, 1]} : vector<9x16xf32> to vector<1x16xf32>
    %11 = vector.shape_cast %10 : vector<1x16xf32> to vector<16xf32>
    %12 = vector.shape_cast %11 : vector<16xf32> to vector<1x1x1x16xf32>
    %13 = vector.broadcast %12 : vector<1x1x1x16xf32> to vector<1x8x8x16xf32>
    %14 = arith.mulf %9, %13 : vector<1x8x8x16xf32>
    %15 = arith.addf %8, %14 : vector<1x8x8x16xf32>
    %c0_8 = arith.constant 0 : index
    %c0_9 = arith.constant 0 : index
    %c2 = arith.constant 2 : index
    %c0_10 = arith.constant 0 : index
    %16 = vector.load %arg1[%c0_8, %c0_9, %c2, %c0_10] : memref<1x10x10x16xf32, #tpu.memory_space<vmem>>, vector<1x8x8x16xf32>
    %17 = vector.extract_strided_slice %0 {offsets = [2, 0], sizes = [1, 16], strides = [1, 1]} : vector<9x16xf32> to vector<1x16xf32>
    %18 = vector.shape_cast %17 : vector<1x16xf32> to vector<16xf32>
    %19 = vector.shape_cast %18 : vector<16xf32> to vector<1x1x1x16xf32>
    %20 = vector.broadcast %19 : vector<1x1x1x16xf32> to vector<1x8x8x16xf32>
    %21 = arith.mulf %16, %20 : vector<1x8x8x16xf32>
    %22 = arith.addf %15, %21 : vector<1x8x8x16xf32>
    %c0_11 = arith.constant 0 : index
    %c1_12 = arith.constant 1 : index
    %c0_13 = arith.constant 0 : index
    %c0_14 = arith.constant 0 : index
    %23 = vector.load %arg1[%c0_11, %c1_12, %c0_13, %c0_14] : memref<1x10x10x16xf32, #tpu.memory_space<vmem>>, vector<1x8x8x16xf32>
    %24 = vector.extract_strided_slice %0 {offsets = [3, 0], sizes = [1, 16], strides = [1, 1]} : vector<9x16xf32> to vector<1x16xf32>
    %25 = vector.shape_cast %24 : vector<1x16xf32> to vector<16xf32>
    %26 = vector.shape_cast %25 : vector<16xf32> to vector<1x1x1x16xf32>
    %27 = vector.broadcast %26 : vector<1x1x1x16xf32> to vector<1x8x8x16xf32>
    %28 = arith.mulf %23, %27 : vector<1x8x8x16xf32>
    %29 = arith.addf %22, %28 : vector<1x8x8x16xf32>
    %c0_15 = arith.constant 0 : index
    %c1_16 = arith.constant 1 : index
    %c1_17 = arith.constant 1 : index
    %c0_18 = arith.constant 0 : index
    %30 = vector.load %arg1[%c0_15, %c1_16, %c1_17, %c0_18] : memref<1x10x10x16xf32, #tpu.memory_space<vmem>>, vector<1x8x8x16xf32>
    %31 = vector.extract_strided_slice %0 {offsets = [4, 0], sizes = [1, 16], strides = [1, 1]} : vector<9x16xf32> to vector<1x16xf32>
    %32 = vector.shape_cast %31 : vector<1x16xf32> to vector<16xf32>
    %33 = vector.shape_cast %32 : vector<16xf32> to vector<1x1x1x16xf32>
    %34 = vector.broadcast %33 : vector<1x1x1x16xf32> to vector<1x8x8x16xf32>
    %35 = arith.mulf %30, %34 : vector<1x8x8x16xf32>
    %36 = arith.addf %29, %35 : vector<1x8x8x16xf32>
    %c0_19 = arith.constant 0 : index
    %c1_20 = arith.constant 1 : index
    %c2_21 = arith.constant 2 : index
    %c0_22 = arith.constant 0 : index
    %37 = vector.load %arg1[%c0_19, %c1_20, %c2_21, %c0_22] : memref<1x10x10x16xf32, #tpu.memory_space<vmem>>, vector<1x8x8x16xf32>
    %38 = vector.extract_strided_slice %0 {offsets = [5, 0], sizes = [1, 16], strides = [1, 1]} : vector<9x16xf32> to vector<1x16xf32>
    %39 = vector.shape_cast %38 : vector<1x16xf32> to vector<16xf32>
    %40 = vector.shape_cast %39 : vector<16xf32> to vector<1x1x1x16xf32>
    %41 = vector.broadcast %40 : vector<1x1x1x16xf32> to vector<1x8x8x16xf32>
    %42 = arith.mulf %37, %41 : vector<1x8x8x16xf32>
    %43 = arith.addf %36, %42 : vector<1x8x8x16xf32>
    %c0_23 = arith.constant 0 : index
    %c2_24 = arith.constant 2 : index
    %c0_25 = arith.constant 0 : index
    %c0_26 = arith.constant 0 : index
    %44 = vector.load %arg1[%c0_23, %c2_24, %c0_25, %c0_26] : memref<1x10x10x16xf32, #tpu.memory_space<vmem>>, vector<1x8x8x16xf32>
    %45 = vector.extract_strided_slice %0 {offsets = [6, 0], sizes = [1, 16], strides = [1, 1]} : vector<9x16xf32> to vector<1x16xf32>
    %46 = vector.shape_cast %45 : vector<1x16xf32> to vector<16xf32>
    %47 = vector.shape_cast %46 : vector<16xf32> to vector<1x1x1x16xf32>
    %48 = vector.broadcast %47 : vector<1x1x1x16xf32> to vector<1x8x8x16xf32>
    %49 = arith.mulf %44, %48 : vector<1x8x8x16xf32>
    %50 = arith.addf %43, %49 : vector<1x8x8x16xf32>
    %c0_27 = arith.constant 0 : index
    %c2_28 = arith.constant 2 : index
    %c1_29 = arith.constant 1 : index
    %c0_30 = arith.constant 0 : index
    %51 = vector.load %arg1[%c0_27, %c2_28, %c1_29, %c0_30] : memref<1x10x10x16xf32, #tpu.memory_space<vmem>>, vector<1x8x8x16xf32>
    %52 = vector.extract_strided_slice %0 {offsets = [7, 0], sizes = [1, 16], strides = [1, 1]} : vector<9x16xf32> to vector<1x16xf32>
    %53 = vector.shape_cast %52 : vector<1x16xf32> to vector<16xf32>
    %54 = vector.shape_cast %53 : vector<16xf32> to vector<1x1x1x16xf32>
    %55 = vector.broadcast %54 : vector<1x1x1x16xf32> to vector<1x8x8x16xf32>
    %56 = arith.mulf %51, %55 : vector<1x8x8x16xf32>
    %57 = arith.addf %50, %56 : vector<1x8x8x16xf32>
    %c0_31 = arith.constant 0 : index
    %c2_32 = arith.constant 2 : index
    %c2_33 = arith.constant 2 : index
    %c0_34 = arith.constant 0 : index
    %58 = vector.load %arg1[%c0_31, %c2_32, %c2_33, %c0_34] : memref<1x10x10x16xf32, #tpu.memory_space<vmem>>, vector<1x8x8x16xf32>
    %59 = vector.extract_strided_slice %0 {offsets = [8, 0], sizes = [1, 16], strides = [1, 1]} : vector<9x16xf32> to vector<1x16xf32>
    %60 = vector.shape_cast %59 : vector<1x16xf32> to vector<16xf32>
    %61 = vector.shape_cast %60 : vector<16xf32> to vector<1x1x1x16xf32>
    %62 = vector.broadcast %61 : vector<1x1x1x16xf32> to vector<1x8x8x16xf32>
    %63 = arith.mulf %58, %62 : vector<1x8x8x16xf32>
    %64 = arith.addf %57, %63 : vector<1x8x8x16xf32>
    %c0_35 = arith.constant 0 : index
    %c0_36 = arith.constant 0 : index
    %65 = vector.load %arg3[%c0_35, %c0_36] : memref<1x16xf32, #tpu.memory_space<vmem>>, vector<1x16xf32>
    %66 = vector.shape_cast %65 : vector<1x16xf32> to vector<1x1x1x16xf32>
    %67 = vector.broadcast %66 : vector<1x1x1x16xf32> to vector<1x8x8x16xf32>
    %68 = arith.addf %64, %67 : vector<1x8x8x16xf32>
    %69 = vector.shape_cast %68 : vector<1x8x8x16xf32> to vector<64x16xf32>
    %70 = arith.truncf %69 : vector<64x16xf32> to vector<64x16xbf16>
    %c0_37 = arith.constant 0 : index
    %c0_38 = arith.constant 0 : index
    %71 = vector.load %arg4[%c0_37, %c0_38] : memref<16x16xbf16, #tpu.memory_space<vmem>>, vector<16x16xbf16>
    %cst_39 = arith.constant dense<0.000000e+00> : vector<64x16xf32>
    %72 = tpu.matmul %70, %71, %cst_39 {dimension_numbers = #tpu.dot_dimension_numbers<[1], [0], [0], [1], [0, 0, 1, 1], [], []>} : vector<64x16xbf16>, vector<16x16xbf16>, vector<64x16xf32> -> vector<64x16xf32>
    %c0_40 = arith.constant 0 : index
    %c0_41 = arith.constant 0 : index
    %73 = vector.load %arg5[%c0_40, %c0_41] : memref<1x16xf32, #tpu.memory_space<vmem>>, vector<1x16xf32>
    %74 = vector.broadcast %73 : vector<1x16xf32> to vector<64x16xf32>
    %75 = arith.addf %72, %74 : vector<64x16xf32>
    %76 = arith.mulf %75, %75 : vector<64x16xf32>
    %77 = arith.mulf %75, %76 : vector<64x16xf32>
    %cst_42 = arith.constant 4.471500e-02 : f32
    %78 = vector.broadcast %cst_42 : f32 to vector<64x16xf32>
    %79 = arith.mulf %78, %77 : vector<64x16xf32>
    %80 = arith.addf %75, %79 : vector<64x16xf32>
    %cst_43 = arith.constant 0.797884583 : f32
    %81 = vector.broadcast %cst_43 : f32 to vector<64x16xf32>
    %82 = arith.mulf %81, %80 : vector<64x16xf32>
    %83 = math.tanh %82 : vector<64x16xf32>
    %cst_44 = arith.constant 1.000000e+00 : f32
    %84 = vector.broadcast %cst_44 : f32 to vector<64x16xf32>
    %85 = arith.addf %84, %83 : vector<64x16xf32>
    %cst_45 = arith.constant 5.000000e-01 : f32
    %86 = vector.broadcast %cst_45 : f32 to vector<64x16xf32>
    %87 = arith.mulf %86, %85 : vector<64x16xf32>
    %88 = arith.mulf %75, %87 : vector<64x16xf32>
    %89 = arith.truncf %88 : vector<64x16xf32> to vector<64x16xbf16>
    %c0_46 = arith.constant 0 : index
    %c0_47 = arith.constant 0 : index
    %90 = vector.load %arg6[%c0_46, %c0_47] : memref<16x16xbf16, #tpu.memory_space<vmem>>, vector<16x16xbf16>
    %cst_48 = arith.constant dense<0.000000e+00> : vector<64x16xf32>
    %91 = tpu.matmul %89, %90, %cst_48 {dimension_numbers = #tpu.dot_dimension_numbers<[1], [0], [0], [1], [0, 0, 1, 1], [], []>} : vector<64x16xbf16>, vector<16x16xbf16>, vector<64x16xf32> -> vector<64x16xf32>
    %c0_49 = arith.constant 0 : index
    %c0_50 = arith.constant 0 : index
    %92 = vector.load %arg7[%c0_49, %c0_50] : memref<1x16xf32, #tpu.memory_space<vmem>>, vector<1x16xf32>
    %93 = vector.broadcast %92 : vector<1x16xf32> to vector<64x16xf32>
    %94 = arith.addf %91, %93 : vector<64x16xf32>
    %c0_51 = arith.constant 0 : index
    %c1_52 = arith.constant 1 : index
    %c1_53 = arith.constant 1 : index
    %c0_54 = arith.constant 0 : index
    %95 = vector.load %arg1[%c0_51, %c1_52, %c1_53, %c0_54] : memref<1x10x10x16xf32, #tpu.memory_space<vmem>>, vector<1x8x8x16xf32>
    %96 = vector.shape_cast %95 : vector<1x8x8x16xf32> to vector<64x16xf32>
    %97 = arith.addf %96, %94 : vector<64x16xf32>
    %98 = arith.truncf %97 : vector<64x16xf32> to vector<64x16xbf16>
    %c0_55 = arith.constant 0 : index
    %c0_56 = arith.constant 0 : index
    %99 = vector.load %arg8[%c0_55, %c0_56] : memref<16x16xbf16, #tpu.memory_space<vmem>>, vector<16x16xbf16>
    %cst_57 = arith.constant dense<0.000000e+00> : vector<64x16xf32>
    %100 = tpu.matmul %98, %99, %cst_57 {dimension_numbers = #tpu.dot_dimension_numbers<[1], [0], [0], [1], [0, 0, 1, 1], [], []>} : vector<64x16xbf16>, vector<16x16xbf16>, vector<64x16xf32> -> vector<64x16xf32>
    %c0_58 = arith.constant 0 : index
    %c0_59 = arith.constant 0 : index
    %101 = vector.load %arg9[%c0_58, %c0_59] : memref<1x16xf32, #tpu.memory_space<vmem>>, vector<1x16xf32>
    %102 = vector.broadcast %101 : vector<1x16xf32> to vector<64x16xf32>
    %103 = arith.addf %100, %102 : vector<64x16xf32>
    %c0_60 = arith.constant 0 : index
    %c0_61 = arith.constant 0 : index
    %104 = vector.load %arg10[%c0_60, %c0_61] : memref<16x16xbf16, #tpu.memory_space<vmem>>, vector<16x16xbf16>
    %cst_62 = arith.constant dense<0.000000e+00> : vector<64x16xf32>
    %105 = tpu.matmul %98, %104, %cst_62 {dimension_numbers = #tpu.dot_dimension_numbers<[1], [0], [0], [1], [0, 0, 1, 1], [], []>} : vector<64x16xbf16>, vector<16x16xbf16>, vector<64x16xf32> -> vector<64x16xf32>
    %c0_63 = arith.constant 0 : index
    %c0_64 = arith.constant 0 : index
    %106 = vector.load %arg11[%c0_63, %c0_64] : memref<1x16xf32, #tpu.memory_space<vmem>>, vector<1x16xf32>
    %107 = vector.broadcast %106 : vector<1x16xf32> to vector<64x16xf32>
    %108 = arith.addf %105, %107 : vector<64x16xf32>
    %109 = arith.mulf %103, %103 : vector<64x16xf32>
    %cst_65 = arith.constant dense<0.000000e+00> : vector<64xf32>
    %110 = vector.multi_reduction <add>, %109, %cst_65 [1] : vector<64x16xf32> to vector<64xf32>
    %111 = vector.shape_cast %110 : vector<64xf32> to vector<64x1xf32>
    %112 = math.sqrt %111 : vector<64x1xf32>
    %cst_66 = arith.constant 9.99999996E-13 : f32
    %113 = vector.broadcast %cst_66 : f32 to vector<64x1xf32>
    %114 = arith.maximumf %112, %113 : vector<64x1xf32>
    %115 = vector.broadcast %114 : vector<64x1xf32> to vector<64x16xf32>
    %116 = arith.divf %103, %115 : vector<64x16xf32>
    %117 = arith.mulf %108, %108 : vector<64x16xf32>
    %cst_67 = arith.constant dense<0.000000e+00> : vector<64xf32>
    %118 = vector.multi_reduction <add>, %117, %cst_67 [1] : vector<64x16xf32> to vector<64xf32>
    %119 = vector.shape_cast %118 : vector<64xf32> to vector<64x1xf32>
    %120 = math.sqrt %119 : vector<64x1xf32>
    %cst_68 = arith.constant 9.99999996E-13 : f32
    %121 = vector.broadcast %cst_68 : f32 to vector<64x1xf32>
    %122 = arith.maximumf %120, %121 : vector<64x1xf32>
    %123 = vector.broadcast %122 : vector<64x1xf32> to vector<64x16xf32>
    %124 = arith.divf %108, %123 : vector<64x16xf32>
    %cst_69 = arith.constant dense<0.000000e+00> : vector<16xf32>
    %125 = vector.multi_reduction <add>, %116, %cst_69 [0] : vector<64x16xf32> to vector<16xf32>
    %126 = vector.shape_cast %125 : vector<16xf32> to vector<1x16xf32>
    %127 = vector.broadcast %126 : vector<1x16xf32> to vector<64x16xf32>
    %128 = arith.mulf %127, %124 : vector<64x16xf32>
    %129 = arith.truncf %128 : vector<64x16xf32> to vector<64x16xbf16>
    %c0_70 = arith.constant 0 : index
    %c0_71 = arith.constant 0 : index
    %130 = vector.load %arg12[%c0_70, %c0_71] : memref<16x16xbf16, #tpu.memory_space<vmem>>, vector<16x16xbf16>
    %cst_72 = arith.constant dense<0.000000e+00> : vector<64x16xf32>
    %131 = tpu.matmul %129, %130, %cst_72 {dimension_numbers = #tpu.dot_dimension_numbers<[1], [0], [0], [1], [0, 0, 1, 1], [], []>} : vector<64x16xbf16>, vector<16x16xbf16>, vector<64x16xf32> -> vector<64x16xf32>
    %c0_73 = arith.constant 0 : index
    %c0_74 = arith.constant 0 : index
    %132 = vector.load %arg13[%c0_73, %c0_74] : memref<1x16xf32, #tpu.memory_space<vmem>>, vector<1x16xf32>
    %133 = vector.broadcast %132 : vector<1x16xf32> to vector<64x16xf32>
    %134 = arith.addf %131, %133 : vector<64x16xf32>
    %135 = arith.addf %134, %116 : vector<64x16xf32>
    %136 = arith.truncf %135 : vector<64x16xf32> to vector<64x16xbf16>
    %c0_75 = arith.constant 0 : index
    %c0_76 = arith.constant 0 : index
    %137 = vector.load %arg14[%c0_75, %c0_76] : memref<16x16xbf16, #tpu.memory_space<vmem>>, vector<16x16xbf16>
    %cst_77 = arith.constant dense<0.000000e+00> : vector<64x16xf32>
    %138 = tpu.matmul %136, %137, %cst_77 {dimension_numbers = #tpu.dot_dimension_numbers<[1], [0], [0], [1], [0, 0, 1, 1], [], []>} : vector<64x16xbf16>, vector<16x16xbf16>, vector<64x16xf32> -> vector<64x16xf32>
    %c0_78 = arith.constant 0 : index
    %c0_79 = arith.constant 0 : index
    %139 = vector.load %arg15[%c0_78, %c0_79] : memref<1x16xf32, #tpu.memory_space<vmem>>, vector<1x16xf32>
    %140 = vector.broadcast %139 : vector<1x16xf32> to vector<64x16xf32>
    %141 = arith.addf %138, %140 : vector<64x16xf32>
    %142 = arith.addf %97, %141 : vector<64x16xf32>
    %143 = arith.truncf %142 : vector<64x16xf32> to vector<64x16xbf16>
    %c0_80 = arith.constant 0 : index
    %c0_81 = arith.constant 0 : index
    %144 = vector.load %arg16[%c0_80, %c0_81] : memref<16x64xbf16, #tpu.memory_space<vmem>>, vector<16x64xbf16>
    %cst_82 = arith.constant dense<0.000000e+00> : vector<64x64xf32>
    %145 = tpu.matmul %143, %144, %cst_82 {dimension_numbers = #tpu.dot_dimension_numbers<[1], [0], [0], [1], [0, 0, 1, 1], [], []>} : vector<64x16xbf16>, vector<16x64xbf16>, vector<64x64xf32> -> vector<64x64xf32>
    %c0_83 = arith.constant 0 : index
    %c0_84 = arith.constant 0 : index
    %146 = vector.load %arg17[%c0_83, %c0_84] : memref<1x64xf32, #tpu.memory_space<vmem>>, vector<1x64xf32>
    %147 = vector.broadcast %146 : vector<1x64xf32> to vector<64x64xf32>
    %148 = arith.addf %145, %147 : vector<64x64xf32>
    %149 = arith.mulf %148, %148 : vector<64x64xf32>
    %150 = arith.mulf %148, %149 : vector<64x64xf32>
    %cst_85 = arith.constant 4.471500e-02 : f32
    %151 = vector.broadcast %cst_85 : f32 to vector<64x64xf32>
    %152 = arith.mulf %151, %150 : vector<64x64xf32>
    %153 = arith.addf %148, %152 : vector<64x64xf32>
    %cst_86 = arith.constant 0.797884583 : f32
    %154 = vector.broadcast %cst_86 : f32 to vector<64x64xf32>
    %155 = arith.mulf %154, %153 : vector<64x64xf32>
    %156 = math.tanh %155 : vector<64x64xf32>
    %cst_87 = arith.constant 1.000000e+00 : f32
    %157 = vector.broadcast %cst_87 : f32 to vector<64x64xf32>
    %158 = arith.addf %157, %156 : vector<64x64xf32>
    %cst_88 = arith.constant 5.000000e-01 : f32
    %159 = vector.broadcast %cst_88 : f32 to vector<64x64xf32>
    %160 = arith.mulf %159, %158 : vector<64x64xf32>
    %161 = arith.mulf %148, %160 : vector<64x64xf32>
    %162 = arith.truncf %161 : vector<64x64xf32> to vector<64x64xbf16>
    %c0_89 = arith.constant 0 : index
    %c0_90 = arith.constant 0 : index
    %163 = vector.load %arg18[%c0_89, %c0_90] : memref<64x16xbf16, #tpu.memory_space<vmem>>, vector<64x16xbf16>
    %cst_91 = arith.constant dense<0.000000e+00> : vector<64x16xf32>
    %164 = tpu.matmul %162, %163, %cst_91 {dimension_numbers = #tpu.dot_dimension_numbers<[1], [0], [0], [1], [0, 0, 1, 1], [], []>} : vector<64x64xbf16>, vector<64x16xbf16>, vector<64x16xf32> -> vector<64x16xf32>
    %c0_92 = arith.constant 0 : index
    %c0_93 = arith.constant 0 : index
    %165 = vector.load %arg19[%c0_92, %c0_93] : memref<1x16xf32, #tpu.memory_space<vmem>>, vector<1x16xf32>
    %166 = vector.broadcast %165 : vector<1x16xf32> to vector<64x16xf32>
    %167 = arith.addf %164, %166 : vector<64x16xf32>
    %168 = arith.addf %142, %167 : vector<64x16xf32>
    %169 = vector.shape_cast %168 : vector<64x16xf32> to vector<1x8x8x16xf32>
    %c0_94 = arith.constant 0 : index
    %c0_95 = arith.constant 0 : index
    %c0_96 = arith.constant 0 : index
    %c0_97 = arith.constant 0 : index
    %170 = vector.load %arg20[%c0_94, %c0_95, %c0_96, %c0_97] : memref<1x8x8x16xf32, #tpu.memory_space<vmem>>, vector<1x8x8x16xf32>
    tpu.vector_store %arg20[%c0_94, %c0_95, %c0_96, %c0_97], %169 {strides = array<i32>} : memref<1x8x8x16xf32, #tpu.memory_space<vmem>>, vector<1x8x8x16xf32>,
    return
  }
  func.func @transform_0(%arg0: i32) -> (i32, i32, i32, i32) {
    %c0_i32 = arith.constant 0 : i32
    %c0_i32_0 = arith.constant 0 : i32
    %c0_i32_1 = arith.constant 0 : i32
    %c0_i32_2 = arith.constant 0 : i32
    return %arg0, %c0_i32, %c0_i32_0, %c0_i32_1 : i32, i32, i32, i32
  }
  func.func @transform_1(%arg0: i32) -> (i32, i32) {
    %c0_i32 = arith.constant 0 : i32
    %c0_i32_0 = arith.constant 0 : i32
    %c0_i32_1 = arith.constant 0 : i32
    return %c0_i32, %c0_i32_0 : i32, i32
  }
  func.func @transform_2(%arg0: i32) -> (i32, i32) {
    %c0_i32 = arith.constant 0 : i32
    %c0_i32_0 = arith.constant 0 : i32
    %c0_i32_1 = arith.constant 0 : i32
    return %c0_i32, %c0_i32_0 : i32, i32
  }
  func.func @transform_3(%arg0: i32) -> (i32, i32) {
    %c0_i32 = arith.constant 0 : i32
    %c0_i32_0 = arith.constant 0 : i32
    %c0_i32_1 = arith.constant 0 : i32
    return %c0_i32, %c0_i32_0 : i32, i32
  }
  func.func @transform_4(%arg0: i32) -> (i32, i32) {
    %c0_i32 = arith.constant 0 : i32
    %c0_i32_0 = arith.constant 0 : i32
    %c0_i32_1 = arith.constant 0 : i32
    return %c0_i32, %c0_i32_0 : i32, i32
  }
  func.func @transform_5(%arg0: i32) -> (i32, i32) {
    %c0_i32 = arith.constant 0 : i32
    %c0_i32_0 = arith.constant 0 : i32
    %c0_i32_1 = arith.constant 0 : i32
    return %c0_i32, %c0_i32_0 : i32, i32
  }
  func.func @transform_6(%arg0: i32) -> (i32, i32) {
    %c0_i32 = arith.constant 0 : i32
    %c0_i32_0 = arith.constant 0 : i32
    %c0_i32_1 = arith.constant 0 : i32
    return %c0_i32, %c0_i32_0 : i32, i32
  }
  func.func @transform_7(%arg0: i32) -> (i32, i32) {
    %c0_i32 = arith.constant 0 : i32
    %c0_i32_0 = arith.constant 0 : i32
    %c0_i32_1 = arith.constant 0 : i32
    return %c0_i32, %c0_i32_0 : i32, i32
  }
  func.func @transform_8(%arg0: i32) -> (i32, i32) {
    %c0_i32 = arith.constant 0 : i32
    %c0_i32_0 = arith.constant 0 : i32
    %c0_i32_1 = arith.constant 0 : i32
    return %c0_i32, %c0_i32_0 : i32, i32
  }
  func.func @transform_9(%arg0: i32) -> (i32, i32) {
    %c0_i32 = arith.constant 0 : i32
    %c0_i32_0 = arith.constant 0 : i32
    %c0_i32_1 = arith.constant 0 : i32
    return %c0_i32, %c0_i32_0 : i32, i32
  }
  func.func @transform_10(%arg0: i32) -> (i32, i32) {
    %c0_i32 = arith.constant 0 : i32
    %c0_i32_0 = arith.constant 0 : i32
    %c0_i32_1 = arith.constant 0 : i32
    return %c0_i32, %c0_i32_0 : i32, i32
  }
  func.func @transform_11(%arg0: i32) -> (i32, i32) {
    %c0_i32 = arith.constant 0 : i32
    %c0_i32_0 = arith.constant 0 : i32
    %c0_i32_1 = arith.constant 0 : i32
    return %c0_i32, %c0_i32_0 : i32, i32
  }
  func.func @transform_12(%arg0: i32) -> (i32, i32) {
    %c0_i32 = arith.constant 0 : i32
    %c0_i32_0 = arith.constant 0 : i32
    %c0_i32_1 = arith.constant 0 : i32
    return %c0_i32, %c0_i32_0 : i32, i32
  }
  func.func @transform_13(%arg0: i32) -> (i32, i32) {
    %c0_i32 = arith.constant 0 : i32
    %c0_i32_0 = arith.constant 0 : i32
    %c0_i32_1 = arith.constant 0 : i32
    return %c0_i32, %c0_i32_0 : i32, i32
  }
  func.func @transform_14(%arg0: i32) -> (i32, i32) {
    %c0_i32 = arith.constant 0 : i32
    %c0_i32_0 = arith.constant 0 : i32
    %c0_i32_1 = arith.constant 0 : i32
    return %c0_i32, %c0_i32_0 : i32, i32
  }
  func.func @transform_15(%arg0: i32) -> (i32, i32) {
    %c0_i32 = arith.constant 0 : i32
    %c0_i32_0 = arith.constant 0 : i32
    %c0_i32_1 = arith.constant 0 : i32
    return %c0_i32, %c0_i32_0 : i32, i32
  }
  func.func @transform_16(%arg0: i32) -> (i32, i32) {
    %c0_i32 = arith.constant 0 : i32
    %c0_i32_0 = arith.constant 0 : i32
    %c0_i32_1 = arith.constant 0 : i32
    return %c0_i32, %c0_i32_0 : i32, i32
  }
  func.func @transform_17(%arg0: i32) -> (i32, i32) {
    %c0_i32 = arith.constant 0 : i32
    %c0_i32_0 = arith.constant 0 : i32
    %c0_i32_1 = arith.constant 0 : i32
    return %c0_i32, %c0_i32_0 : i32, i32
  }
  func.func @transform_18(%arg0: i32) -> (i32, i32) {
    %c0_i32 = arith.constant 0 : i32
    %c0_i32_0 = arith.constant 0 : i32
    %c0_i32_1 = arith.constant 0 : i32
    return %c0_i32, %c0_i32_0 : i32, i32
  }
  func.func @transform_19(%arg0: i32) -> (i32, i32, i32, i32) {
    %c0_i32 = arith.constant 0 : i32
    %c0_i32_0 = arith.constant 0 : i32
    %c0_i32_1 = arith.constant 0 : i32
    %c0_i32_2 = arith.constant 0 : i32
    return %arg0, %c0_i32, %c0_i32_0, %c0_i32_1 : i32, i32, i32, i32
  }
}

module attributes {stable_mosaic.version = 11 : i64} {
  func.func @_conv3x3_s2_kernel(%arg0: i32, %arg1: memref<1x5x5x16xf32, #tpu.memory_space<vmem>>, %arg2: memref<1x5x5x16xf32, #tpu.memory_space<vmem>>, %arg3: memref<1x5x5x16xf32, #tpu.memory_space<vmem>>, %arg4: memref<1x5x5x16xf32, #tpu.memory_space<vmem>>, %arg5: memref<9x16x32xbf16, #tpu.memory_space<vmem>>, %arg6: memref<1x32xf32, #tpu.memory_space<vmem>>, %arg7: memref<1x4x4x32xf32, #tpu.memory_space<vmem>>) attributes {dimension_semantics = [#tpu.dimension_semantics<parallel>], iteration_bounds = array<i64: 2>, scalar_prefetch = 0 : i64, scratch_operands = 0 : i64, tpu.core_type = #tpu.core_type<tc>, window_params = [{transform_indices = @transform_0, window_bounds = array<i64: 1, 5, 5, 16>}, {transform_indices = @transform_1, window_bounds = array<i64: 1, 5, 5, 16>}, {transform_indices = @transform_2, window_bounds = array<i64: 1, 5, 5, 16>}, {transform_indices = @transform_3, window_bounds = array<i64: 1, 5, 5, 16>}, {pipeline_mode = #tpu.pipeline_mode<synchronous>, transform_indices = @transform_4, window_bounds = array<i64: 9, 16, 32>}, {pipeline_mode = #tpu.pipeline_mode<synchronous>, transform_indices = @transform_5, window_bounds = array<i64: 1, 32>}, {transform_indices = @transform_6, window_bounds = array<i64: 1, 4, 4, 32>}]} {
    %cst = arith.constant 0.000000e+00 : f32
    %0 = vector.broadcast %cst : f32 to vector<16x32xf32>
    %c0 = arith.constant 0 : index
    %c0_0 = arith.constant 0 : index
    %c0_1 = arith.constant 0 : index
    %c0_2 = arith.constant 0 : index
    %1 = vector.load %arg1[%c0, %c0_0, %c0_1, %c0_2] : memref<1x5x5x16xf32, #tpu.memory_space<vmem>>, vector<1x4x4x16xf32>
    %2 = vector.shape_cast %1 : vector<1x4x4x16xf32> to vector<16x16xf32>
    %3 = arith.truncf %2 : vector<16x16xf32> to vector<16x16xbf16>
    %c0_3 = arith.constant 0 : index
    %c0_4 = arith.constant 0 : index
    %c0_5 = arith.constant 0 : index
    %4 = vector.load %arg5[%c0_3, %c0_4, %c0_5] : memref<9x16x32xbf16, #tpu.memory_space<vmem>>, vector<1x16x32xbf16>
    %5 = vector.shape_cast %4 : vector<1x16x32xbf16> to vector<16x32xbf16>
    %cst_6 = arith.constant dense<0.000000e+00> : vector<16x32xf32>
    %6 = tpu.matmul %3, %5, %cst_6 {dimension_numbers = #tpu.dot_dimension_numbers<[1], [0], [0], [1], [0, 0, 1, 1], [], []>} : vector<16x16xbf16>, vector<16x32xbf16>, vector<16x32xf32> -> vector<16x32xf32>
    %7 = arith.addf %0, %6 : vector<16x32xf32>
    %c0_7 = arith.constant 0 : index
    %c0_8 = arith.constant 0 : index
    %c0_9 = arith.constant 0 : index
    %c0_10 = arith.constant 0 : index
    %8 = vector.load %arg2[%c0_7, %c0_8, %c0_9, %c0_10] : memref<1x5x5x16xf32, #tpu.memory_space<vmem>>, vector<1x4x4x16xf32>
    %9 = vector.shape_cast %8 : vector<1x4x4x16xf32> to vector<16x16xf32>
    %10 = arith.truncf %9 : vector<16x16xf32> to vector<16x16xbf16>
    %c1 = arith.constant 1 : index
    %c0_11 = arith.constant 0 : index
    %c0_12 = arith.constant 0 : index
    %11 = vector.load %arg5[%c1, %c0_11, %c0_12] : memref<9x16x32xbf16, #tpu.memory_space<vmem>>, vector<1x16x32xbf16>
    %12 = vector.shape_cast %11 : vector<1x16x32xbf16> to vector<16x32xbf16>
    %cst_13 = arith.constant dense<0.000000e+00> : vector<16x32xf32>
    %13 = tpu.matmul %10, %12, %cst_13 {dimension_numbers = #tpu.dot_dimension_numbers<[1], [0], [0], [1], [0, 0, 1, 1], [], []>} : vector<16x16xbf16>, vector<16x32xbf16>, vector<16x32xf32> -> vector<16x32xf32>
    %14 = arith.addf %7, %13 : vector<16x32xf32>
    %c0_14 = arith.constant 0 : index
    %c0_15 = arith.constant 0 : index
    %c1_16 = arith.constant 1 : index
    %c0_17 = arith.constant 0 : index
    %15 = vector.load %arg1[%c0_14, %c0_15, %c1_16, %c0_17] : memref<1x5x5x16xf32, #tpu.memory_space<vmem>>, vector<1x4x4x16xf32>
    %16 = vector.shape_cast %15 : vector<1x4x4x16xf32> to vector<16x16xf32>
    %17 = arith.truncf %16 : vector<16x16xf32> to vector<16x16xbf16>
    %c2 = arith.constant 2 : index
    %c0_18 = arith.constant 0 : index
    %c0_19 = arith.constant 0 : index
    %18 = vector.load %arg5[%c2, %c0_18, %c0_19] : memref<9x16x32xbf16, #tpu.memory_space<vmem>>, vector<1x16x32xbf16>
    %19 = vector.shape_cast %18 : vector<1x16x32xbf16> to vector<16x32xbf16>
    %cst_20 = arith.constant dense<0.000000e+00> : vector<16x32xf32>
    %20 = tpu.matmul %17, %19, %cst_20 {dimension_numbers = #tpu.dot_dimension_numbers<[1], [0], [0], [1], [0, 0, 1, 1], [], []>} : vector<16x16xbf16>, vector<16x32xbf16>, vector<16x32xf32> -> vector<16x32xf32>
    %21 = arith.addf %14, %20 : vector<16x32xf32>
    %c0_21 = arith.constant 0 : index
    %c0_22 = arith.constant 0 : index
    %c0_23 = arith.constant 0 : index
    %c0_24 = arith.constant 0 : index
    %22 = vector.load %arg3[%c0_21, %c0_22, %c0_23, %c0_24] : memref<1x5x5x16xf32, #tpu.memory_space<vmem>>, vector<1x4x4x16xf32>
    %23 = vector.shape_cast %22 : vector<1x4x4x16xf32> to vector<16x16xf32>
    %24 = arith.truncf %23 : vector<16x16xf32> to vector<16x16xbf16>
    %c3 = arith.constant 3 : index
    %c0_25 = arith.constant 0 : index
    %c0_26 = arith.constant 0 : index
    %25 = vector.load %arg5[%c3, %c0_25, %c0_26] : memref<9x16x32xbf16, #tpu.memory_space<vmem>>, vector<1x16x32xbf16>
    %26 = vector.shape_cast %25 : vector<1x16x32xbf16> to vector<16x32xbf16>
    %cst_27 = arith.constant dense<0.000000e+00> : vector<16x32xf32>
    %27 = tpu.matmul %24, %26, %cst_27 {dimension_numbers = #tpu.dot_dimension_numbers<[1], [0], [0], [1], [0, 0, 1, 1], [], []>} : vector<16x16xbf16>, vector<16x32xbf16>, vector<16x32xf32> -> vector<16x32xf32>
    %28 = arith.addf %21, %27 : vector<16x32xf32>
    %c0_28 = arith.constant 0 : index
    %c0_29 = arith.constant 0 : index
    %c0_30 = arith.constant 0 : index
    %c0_31 = arith.constant 0 : index
    %29 = vector.load %arg4[%c0_28, %c0_29, %c0_30, %c0_31] : memref<1x5x5x16xf32, #tpu.memory_space<vmem>>, vector<1x4x4x16xf32>
    %30 = vector.shape_cast %29 : vector<1x4x4x16xf32> to vector<16x16xf32>
    %31 = arith.truncf %30 : vector<16x16xf32> to vector<16x16xbf16>
    %c4 = arith.constant 4 : index
    %c0_32 = arith.constant 0 : index
    %c0_33 = arith.constant 0 : index
    %32 = vector.load %arg5[%c4, %c0_32, %c0_33] : memref<9x16x32xbf16, #tpu.memory_space<vmem>>, vector<1x16x32xbf16>
    %33 = vector.shape_cast %32 : vector<1x16x32xbf16> to vector<16x32xbf16>
    %cst_34 = arith.constant dense<0.000000e+00> : vector<16x32xf32>
    %34 = tpu.matmul %31, %33, %cst_34 {dimension_numbers = #tpu.dot_dimension_numbers<[1], [0], [0], [1], [0, 0, 1, 1], [], []>} : vector<16x16xbf16>, vector<16x32xbf16>, vector<16x32xf32> -> vector<16x32xf32>
    %35 = arith.addf %28, %34 : vector<16x32xf32>
    %c0_35 = arith.constant 0 : index
    %c0_36 = arith.constant 0 : index
    %c1_37 = arith.constant 1 : index
    %c0_38 = arith.constant 0 : index
    %36 = vector.load %arg3[%c0_35, %c0_36, %c1_37, %c0_38] : memref<1x5x5x16xf32, #tpu.memory_space<vmem>>, vector<1x4x4x16xf32>
    %37 = vector.shape_cast %36 : vector<1x4x4x16xf32> to vector<16x16xf32>
    %38 = arith.truncf %37 : vector<16x16xf32> to vector<16x16xbf16>
    %c5 = arith.constant 5 : index
    %c0_39 = arith.constant 0 : index
    %c0_40 = arith.constant 0 : index
    %39 = vector.load %arg5[%c5, %c0_39, %c0_40] : memref<9x16x32xbf16, #tpu.memory_space<vmem>>, vector<1x16x32xbf16>
    %40 = vector.shape_cast %39 : vector<1x16x32xbf16> to vector<16x32xbf16>
    %cst_41 = arith.constant dense<0.000000e+00> : vector<16x32xf32>
    %41 = tpu.matmul %38, %40, %cst_41 {dimension_numbers = #tpu.dot_dimension_numbers<[1], [0], [0], [1], [0, 0, 1, 1], [], []>} : vector<16x16xbf16>, vector<16x32xbf16>, vector<16x32xf32> -> vector<16x32xf32>
    %42 = arith.addf %35, %41 : vector<16x32xf32>
    %c0_42 = arith.constant 0 : index
    %c1_43 = arith.constant 1 : index
    %c0_44 = arith.constant 0 : index
    %c0_45 = arith.constant 0 : index
    %43 = vector.load %arg1[%c0_42, %c1_43, %c0_44, %c0_45] : memref<1x5x5x16xf32, #tpu.memory_space<vmem>>, vector<1x4x4x16xf32>
    %44 = vector.shape_cast %43 : vector<1x4x4x16xf32> to vector<16x16xf32>
    %45 = arith.truncf %44 : vector<16x16xf32> to vector<16x16xbf16>
    %c6 = arith.constant 6 : index
    %c0_46 = arith.constant 0 : index
    %c0_47 = arith.constant 0 : index
    %46 = vector.load %arg5[%c6, %c0_46, %c0_47] : memref<9x16x32xbf16, #tpu.memory_space<vmem>>, vector<1x16x32xbf16>
    %47 = vector.shape_cast %46 : vector<1x16x32xbf16> to vector<16x32xbf16>
    %cst_48 = arith.constant dense<0.000000e+00> : vector<16x32xf32>
    %48 = tpu.matmul %45, %47, %cst_48 {dimension_numbers = #tpu.dot_dimension_numbers<[1], [0], [0], [1], [0, 0, 1, 1], [], []>} : vector<16x16xbf16>, vector<16x32xbf16>, vector<16x32xf32> -> vector<16x32xf32>
    %49 = arith.addf %42, %48 : vector<16x32xf32>
    %c0_49 = arith.constant 0 : index
    %c1_50 = arith.constant 1 : index
    %c0_51 = arith.constant 0 : index
    %c0_52 = arith.constant 0 : index
    %50 = vector.load %arg2[%c0_49, %c1_50, %c0_51, %c0_52] : memref<1x5x5x16xf32, #tpu.memory_space<vmem>>, vector<1x4x4x16xf32>
    %51 = vector.shape_cast %50 : vector<1x4x4x16xf32> to vector<16x16xf32>
    %52 = arith.truncf %51 : vector<16x16xf32> to vector<16x16xbf16>
    %c7 = arith.constant 7 : index
    %c0_53 = arith.constant 0 : index
    %c0_54 = arith.constant 0 : index
    %53 = vector.load %arg5[%c7, %c0_53, %c0_54] : memref<9x16x32xbf16, #tpu.memory_space<vmem>>, vector<1x16x32xbf16>
    %54 = vector.shape_cast %53 : vector<1x16x32xbf16> to vector<16x32xbf16>
    %cst_55 = arith.constant dense<0.000000e+00> : vector<16x32xf32>
    %55 = tpu.matmul %52, %54, %cst_55 {dimension_numbers = #tpu.dot_dimension_numbers<[1], [0], [0], [1], [0, 0, 1, 1], [], []>} : vector<16x16xbf16>, vector<16x32xbf16>, vector<16x32xf32> -> vector<16x32xf32>
    %56 = arith.addf %49, %55 : vector<16x32xf32>
    %c0_56 = arith.constant 0 : index
    %c1_57 = arith.constant 1 : index
    %c1_58 = arith.constant 1 : index
    %c0_59 = arith.constant 0 : index
    %57 = vector.load %arg1[%c0_56, %c1_57, %c1_58, %c0_59] : memref<1x5x5x16xf32, #tpu.memory_space<vmem>>, vector<1x4x4x16xf32>
    %58 = vector.shape_cast %57 : vector<1x4x4x16xf32> to vector<16x16xf32>
    %59 = arith.truncf %58 : vector<16x16xf32> to vector<16x16xbf16>
    %c8 = arith.constant 8 : index
    %c0_60 = arith.constant 0 : index
    %c0_61 = arith.constant 0 : index
    %60 = vector.load %arg5[%c8, %c0_60, %c0_61] : memref<9x16x32xbf16, #tpu.memory_space<vmem>>, vector<1x16x32xbf16>
    %61 = vector.shape_cast %60 : vector<1x16x32xbf16> to vector<16x32xbf16>
    %cst_62 = arith.constant dense<0.000000e+00> : vector<16x32xf32>
    %62 = tpu.matmul %59, %61, %cst_62 {dimension_numbers = #tpu.dot_dimension_numbers<[1], [0], [0], [1], [0, 0, 1, 1], [], []>} : vector<16x16xbf16>, vector<16x32xbf16>, vector<16x32xf32> -> vector<16x32xf32>
    %63 = arith.addf %56, %62 : vector<16x32xf32>
    %c0_63 = arith.constant 0 : index
    %c0_64 = arith.constant 0 : index
    %64 = vector.load %arg6[%c0_63, %c0_64] : memref<1x32xf32, #tpu.memory_space<vmem>>, vector<1x32xf32>
    %65 = vector.broadcast %64 : vector<1x32xf32> to vector<16x32xf32>
    %66 = arith.addf %63, %65 : vector<16x32xf32>
    %67 = vector.shape_cast %66 : vector<16x32xf32> to vector<1x4x4x32xf32>
    %c0_65 = arith.constant 0 : index
    %c0_66 = arith.constant 0 : index
    %c0_67 = arith.constant 0 : index
    %c0_68 = arith.constant 0 : index
    %68 = vector.load %arg7[%c0_65, %c0_66, %c0_67, %c0_68] : memref<1x4x4x32xf32, #tpu.memory_space<vmem>>, vector<1x4x4x32xf32>
    tpu.vector_store %arg7[%c0_65, %c0_66, %c0_67, %c0_68], %67 {strides = array<i32>} : memref<1x4x4x32xf32, #tpu.memory_space<vmem>>, vector<1x4x4x32xf32>,
    return
  }
  func.func @transform_0(%arg0: i32) -> (i32, i32, i32, i32) {
    %c0_i32 = arith.constant 0 : i32
    %c0_i32_0 = arith.constant 0 : i32
    %c0_i32_1 = arith.constant 0 : i32
    %c0_i32_2 = arith.constant 0 : i32
    return %arg0, %c0_i32, %c0_i32_0, %c0_i32_1 : i32, i32, i32, i32
  }
  func.func @transform_1(%arg0: i32) -> (i32, i32, i32, i32) {
    %c0_i32 = arith.constant 0 : i32
    %c0_i32_0 = arith.constant 0 : i32
    %c0_i32_1 = arith.constant 0 : i32
    %c0_i32_2 = arith.constant 0 : i32
    return %arg0, %c0_i32, %c0_i32_0, %c0_i32_1 : i32, i32, i32, i32
  }
  func.func @transform_2(%arg0: i32) -> (i32, i32, i32, i32) {
    %c0_i32 = arith.constant 0 : i32
    %c0_i32_0 = arith.constant 0 : i32
    %c0_i32_1 = arith.constant 0 : i32
    %c0_i32_2 = arith.constant 0 : i32
    return %arg0, %c0_i32, %c0_i32_0, %c0_i32_1 : i32, i32, i32, i32
  }
  func.func @transform_3(%arg0: i32) -> (i32, i32, i32, i32) {
    %c0_i32 = arith.constant 0 : i32
    %c0_i32_0 = arith.constant 0 : i32
    %c0_i32_1 = arith.constant 0 : i32
    %c0_i32_2 = arith.constant 0 : i32
    return %arg0, %c0_i32, %c0_i32_0, %c0_i32_1 : i32, i32, i32, i32
  }
  func.func @transform_4(%arg0: i32) -> (i32, i32, i32) {
    %c0_i32 = arith.constant 0 : i32
    %c0_i32_0 = arith.constant 0 : i32
    %c0_i32_1 = arith.constant 0 : i32
    %c0_i32_2 = arith.constant 0 : i32
    return %c0_i32, %c0_i32_0, %c0_i32_1 : i32, i32, i32
  }
  func.func @transform_5(%arg0: i32) -> (i32, i32) {
    %c0_i32 = arith.constant 0 : i32
    %c0_i32_0 = arith.constant 0 : i32
    %c0_i32_1 = arith.constant 0 : i32
    return %c0_i32, %c0_i32_0 : i32, i32
  }
  func.func @transform_6(%arg0: i32) -> (i32, i32, i32, i32) {
    %c0_i32 = arith.constant 0 : i32
    %c0_i32_0 = arith.constant 0 : i32
    %c0_i32_1 = arith.constant 0 : i32
    %c0_i32_2 = arith.constant 0 : i32
    return %arg0, %c0_i32, %c0_i32_0, %c0_i32_1 : i32, i32, i32, i32
  }
}

module attributes {stable_mosaic.version = 11 : i64} {
  func.func @_encoder_block_kernel(%arg0: i32, %arg1: memref<1x6x6x32xf32, #tpu.memory_space<vmem>>, %arg2: memref<9x32xf32, #tpu.memory_space<vmem>>, %arg3: memref<1x32xf32, #tpu.memory_space<vmem>>, %arg4: memref<32x32xbf16, #tpu.memory_space<vmem>>, %arg5: memref<1x32xf32, #tpu.memory_space<vmem>>, %arg6: memref<32x32xbf16, #tpu.memory_space<vmem>>, %arg7: memref<1x32xf32, #tpu.memory_space<vmem>>, %arg8: memref<32x32xbf16, #tpu.memory_space<vmem>>, %arg9: memref<1x32xf32, #tpu.memory_space<vmem>>, %arg10: memref<32x32xbf16, #tpu.memory_space<vmem>>, %arg11: memref<1x32xf32, #tpu.memory_space<vmem>>, %arg12: memref<32x32xbf16, #tpu.memory_space<vmem>>, %arg13: memref<1x32xf32, #tpu.memory_space<vmem>>, %arg14: memref<32x32xbf16, #tpu.memory_space<vmem>>, %arg15: memref<1x32xf32, #tpu.memory_space<vmem>>, %arg16: memref<32x128xbf16, #tpu.memory_space<vmem>>, %arg17: memref<1x128xf32, #tpu.memory_space<vmem>>, %arg18: memref<128x32xbf16, #tpu.memory_space<vmem>>, %arg19: memref<1x32xf32, #tpu.memory_space<vmem>>, %arg20: memref<1x4x4x32xf32, #tpu.memory_space<vmem>>) attributes {dimension_semantics = [#tpu.dimension_semantics<parallel>], iteration_bounds = array<i64: 2>, scalar_prefetch = 0 : i64, scratch_operands = 0 : i64, tpu.core_type = #tpu.core_type<tc>, window_params = [{transform_indices = @transform_0, window_bounds = array<i64: 1, 6, 6, 32>}, {pipeline_mode = #tpu.pipeline_mode<synchronous>, transform_indices = @transform_1, window_bounds = array<i64: 9, 32>}, {pipeline_mode = #tpu.pipeline_mode<synchronous>, transform_indices = @transform_2, window_bounds = array<i64: 1, 32>}, {pipeline_mode = #tpu.pipeline_mode<synchronous>, transform_indices = @transform_3, window_bounds = array<i64: 32, 32>}, {pipeline_mode = #tpu.pipeline_mode<synchronous>, transform_indices = @transform_4, window_bounds = array<i64: 1, 32>}, {pipeline_mode = #tpu.pipeline_mode<synchronous>, transform_indices = @transform_5, window_bounds = array<i64: 32, 32>}, {pipeline_mode = #tpu.pipeline_mode<synchronous>, transform_indices = @transform_6, window_bounds = array<i64: 1, 32>}, {pipeline_mode = #tpu.pipeline_mode<synchronous>, transform_indices = @transform_7, window_bounds = array<i64: 32, 32>}, {pipeline_mode = #tpu.pipeline_mode<synchronous>, transform_indices = @transform_8, window_bounds = array<i64: 1, 32>}, {pipeline_mode = #tpu.pipeline_mode<synchronous>, transform_indices = @transform_9, window_bounds = array<i64: 32, 32>}, {pipeline_mode = #tpu.pipeline_mode<synchronous>, transform_indices = @transform_10, window_bounds = array<i64: 1, 32>}, {pipeline_mode = #tpu.pipeline_mode<synchronous>, transform_indices = @transform_11, window_bounds = array<i64: 32, 32>}, {pipeline_mode = #tpu.pipeline_mode<synchronous>, transform_indices = @transform_12, window_bounds = array<i64: 1, 32>}, {pipeline_mode = #tpu.pipeline_mode<synchronous>, transform_indices = @transform_13, window_bounds = array<i64: 32, 32>}, {pipeline_mode = #tpu.pipeline_mode<synchronous>, transform_indices = @transform_14, window_bounds = array<i64: 1, 32>}, {pipeline_mode = #tpu.pipeline_mode<synchronous>, transform_indices = @transform_15, window_bounds = array<i64: 32, 128>}, {pipeline_mode = #tpu.pipeline_mode<synchronous>, transform_indices = @transform_16, window_bounds = array<i64: 1, 128>}, {pipeline_mode = #tpu.pipeline_mode<synchronous>, transform_indices = @transform_17, window_bounds = array<i64: 128, 32>}, {pipeline_mode = #tpu.pipeline_mode<synchronous>, transform_indices = @transform_18, window_bounds = array<i64: 1, 32>}, {transform_indices = @transform_19, window_bounds = array<i64: 1, 4, 4, 32>}]} {
    %c0 = arith.constant 0 : index
    %c0_0 = arith.constant 0 : index
    %0 = vector.load %arg2[%c0, %c0_0] : memref<9x32xf32, #tpu.memory_space<vmem>>, vector<9x32xf32>
    %cst = arith.constant 0.000000e+00 : f32
    %1 = vector.broadcast %cst : f32 to vector<1x4x4x32xf32>
    %c0_1 = arith.constant 0 : index
    %c0_2 = arith.constant 0 : index
    %c0_3 = arith.constant 0 : index
    %c0_4 = arith.constant 0 : index
    %2 = vector.load %arg1[%c0_1, %c0_2, %c0_3, %c0_4] : memref<1x6x6x32xf32, #tpu.memory_space<vmem>>, vector<1x4x4x32xf32>
    %3 = vector.extract_strided_slice %0 {offsets = [0, 0], sizes = [1, 32], strides = [1, 1]} : vector<9x32xf32> to vector<1x32xf32>
    %4 = vector.shape_cast %3 : vector<1x32xf32> to vector<32xf32>
    %5 = vector.shape_cast %4 : vector<32xf32> to vector<1x1x1x32xf32>
    %6 = vector.broadcast %5 : vector<1x1x1x32xf32> to vector<1x4x4x32xf32>
    %7 = arith.mulf %2, %6 : vector<1x4x4x32xf32>
    %8 = arith.addf %1, %7 : vector<1x4x4x32xf32>
    %c0_5 = arith.constant 0 : index
    %c0_6 = arith.constant 0 : index
    %c1 = arith.constant 1 : index
    %c0_7 = arith.constant 0 : index
    %9 = vector.load %arg1[%c0_5, %c0_6, %c1, %c0_7] : memref<1x6x6x32xf32, #tpu.memory_space<vmem>>, vector<1x4x4x32xf32>
    %10 = vector.extract_strided_slice %0 {offsets = [1, 0], sizes = [1, 32], strides = [1, 1]} : vector<9x32xf32> to vector<1x32xf32>
    %11 = vector.shape_cast %10 : vector<1x32xf32> to vector<32xf32>
    %12 = vector.shape_cast %11 : vector<32xf32> to vector<1x1x1x32xf32>
    %13 = vector.broadcast %12 : vector<1x1x1x32xf32> to vector<1x4x4x32xf32>
    %14 = arith.mulf %9, %13 : vector<1x4x4x32xf32>
    %15 = arith.addf %8, %14 : vector<1x4x4x32xf32>
    %c0_8 = arith.constant 0 : index
    %c0_9 = arith.constant 0 : index
    %c2 = arith.constant 2 : index
    %c0_10 = arith.constant 0 : index
    %16 = vector.load %arg1[%c0_8, %c0_9, %c2, %c0_10] : memref<1x6x6x32xf32, #tpu.memory_space<vmem>>, vector<1x4x4x32xf32>
    %17 = vector.extract_strided_slice %0 {offsets = [2, 0], sizes = [1, 32], strides = [1, 1]} : vector<9x32xf32> to vector<1x32xf32>
    %18 = vector.shape_cast %17 : vector<1x32xf32> to vector<32xf32>
    %19 = vector.shape_cast %18 : vector<32xf32> to vector<1x1x1x32xf32>
    %20 = vector.broadcast %19 : vector<1x1x1x32xf32> to vector<1x4x4x32xf32>
    %21 = arith.mulf %16, %20 : vector<1x4x4x32xf32>
    %22 = arith.addf %15, %21 : vector<1x4x4x32xf32>
    %c0_11 = arith.constant 0 : index
    %c1_12 = arith.constant 1 : index
    %c0_13 = arith.constant 0 : index
    %c0_14 = arith.constant 0 : index
    %23 = vector.load %arg1[%c0_11, %c1_12, %c0_13, %c0_14] : memref<1x6x6x32xf32, #tpu.memory_space<vmem>>, vector<1x4x4x32xf32>
    %24 = vector.extract_strided_slice %0 {offsets = [3, 0], sizes = [1, 32], strides = [1, 1]} : vector<9x32xf32> to vector<1x32xf32>
    %25 = vector.shape_cast %24 : vector<1x32xf32> to vector<32xf32>
    %26 = vector.shape_cast %25 : vector<32xf32> to vector<1x1x1x32xf32>
    %27 = vector.broadcast %26 : vector<1x1x1x32xf32> to vector<1x4x4x32xf32>
    %28 = arith.mulf %23, %27 : vector<1x4x4x32xf32>
    %29 = arith.addf %22, %28 : vector<1x4x4x32xf32>
    %c0_15 = arith.constant 0 : index
    %c1_16 = arith.constant 1 : index
    %c1_17 = arith.constant 1 : index
    %c0_18 = arith.constant 0 : index
    %30 = vector.load %arg1[%c0_15, %c1_16, %c1_17, %c0_18] : memref<1x6x6x32xf32, #tpu.memory_space<vmem>>, vector<1x4x4x32xf32>
    %31 = vector.extract_strided_slice %0 {offsets = [4, 0], sizes = [1, 32], strides = [1, 1]} : vector<9x32xf32> to vector<1x32xf32>
    %32 = vector.shape_cast %31 : vector<1x32xf32> to vector<32xf32>
    %33 = vector.shape_cast %32 : vector<32xf32> to vector<1x1x1x32xf32>
    %34 = vector.broadcast %33 : vector<1x1x1x32xf32> to vector<1x4x4x32xf32>
    %35 = arith.mulf %30, %34 : vector<1x4x4x32xf32>
    %36 = arith.addf %29, %35 : vector<1x4x4x32xf32>
    %c0_19 = arith.constant 0 : index
    %c1_20 = arith.constant 1 : index
    %c2_21 = arith.constant 2 : index
    %c0_22 = arith.constant 0 : index
    %37 = vector.load %arg1[%c0_19, %c1_20, %c2_21, %c0_22] : memref<1x6x6x32xf32, #tpu.memory_space<vmem>>, vector<1x4x4x32xf32>
    %38 = vector.extract_strided_slice %0 {offsets = [5, 0], sizes = [1, 32], strides = [1, 1]} : vector<9x32xf32> to vector<1x32xf32>
    %39 = vector.shape_cast %38 : vector<1x32xf32> to vector<32xf32>
    %40 = vector.shape_cast %39 : vector<32xf32> to vector<1x1x1x32xf32>
    %41 = vector.broadcast %40 : vector<1x1x1x32xf32> to vector<1x4x4x32xf32>
    %42 = arith.mulf %37, %41 : vector<1x4x4x32xf32>
    %43 = arith.addf %36, %42 : vector<1x4x4x32xf32>
    %c0_23 = arith.constant 0 : index
    %c2_24 = arith.constant 2 : index
    %c0_25 = arith.constant 0 : index
    %c0_26 = arith.constant 0 : index
    %44 = vector.load %arg1[%c0_23, %c2_24, %c0_25, %c0_26] : memref<1x6x6x32xf32, #tpu.memory_space<vmem>>, vector<1x4x4x32xf32>
    %45 = vector.extract_strided_slice %0 {offsets = [6, 0], sizes = [1, 32], strides = [1, 1]} : vector<9x32xf32> to vector<1x32xf32>
    %46 = vector.shape_cast %45 : vector<1x32xf32> to vector<32xf32>
    %47 = vector.shape_cast %46 : vector<32xf32> to vector<1x1x1x32xf32>
    %48 = vector.broadcast %47 : vector<1x1x1x32xf32> to vector<1x4x4x32xf32>
    %49 = arith.mulf %44, %48 : vector<1x4x4x32xf32>
    %50 = arith.addf %43, %49 : vector<1x4x4x32xf32>
    %c0_27 = arith.constant 0 : index
    %c2_28 = arith.constant 2 : index
    %c1_29 = arith.constant 1 : index
    %c0_30 = arith.constant 0 : index
    %51 = vector.load %arg1[%c0_27, %c2_28, %c1_29, %c0_30] : memref<1x6x6x32xf32, #tpu.memory_space<vmem>>, vector<1x4x4x32xf32>
    %52 = vector.extract_strided_slice %0 {offsets = [7, 0], sizes = [1, 32], strides = [1, 1]} : vector<9x32xf32> to vector<1x32xf32>
    %53 = vector.shape_cast %52 : vector<1x32xf32> to vector<32xf32>
    %54 = vector.shape_cast %53 : vector<32xf32> to vector<1x1x1x32xf32>
    %55 = vector.broadcast %54 : vector<1x1x1x32xf32> to vector<1x4x4x32xf32>
    %56 = arith.mulf %51, %55 : vector<1x4x4x32xf32>
    %57 = arith.addf %50, %56 : vector<1x4x4x32xf32>
    %c0_31 = arith.constant 0 : index
    %c2_32 = arith.constant 2 : index
    %c2_33 = arith.constant 2 : index
    %c0_34 = arith.constant 0 : index
    %58 = vector.load %arg1[%c0_31, %c2_32, %c2_33, %c0_34] : memref<1x6x6x32xf32, #tpu.memory_space<vmem>>, vector<1x4x4x32xf32>
    %59 = vector.extract_strided_slice %0 {offsets = [8, 0], sizes = [1, 32], strides = [1, 1]} : vector<9x32xf32> to vector<1x32xf32>
    %60 = vector.shape_cast %59 : vector<1x32xf32> to vector<32xf32>
    %61 = vector.shape_cast %60 : vector<32xf32> to vector<1x1x1x32xf32>
    %62 = vector.broadcast %61 : vector<1x1x1x32xf32> to vector<1x4x4x32xf32>
    %63 = arith.mulf %58, %62 : vector<1x4x4x32xf32>
    %64 = arith.addf %57, %63 : vector<1x4x4x32xf32>
    %c0_35 = arith.constant 0 : index
    %c0_36 = arith.constant 0 : index
    %65 = vector.load %arg3[%c0_35, %c0_36] : memref<1x32xf32, #tpu.memory_space<vmem>>, vector<1x32xf32>
    %66 = vector.shape_cast %65 : vector<1x32xf32> to vector<1x1x1x32xf32>
    %67 = vector.broadcast %66 : vector<1x1x1x32xf32> to vector<1x4x4x32xf32>
    %68 = arith.addf %64, %67 : vector<1x4x4x32xf32>
    %69 = vector.shape_cast %68 : vector<1x4x4x32xf32> to vector<16x32xf32>
    %70 = arith.truncf %69 : vector<16x32xf32> to vector<16x32xbf16>
    %c0_37 = arith.constant 0 : index
    %c0_38 = arith.constant 0 : index
    %71 = vector.load %arg4[%c0_37, %c0_38] : memref<32x32xbf16, #tpu.memory_space<vmem>>, vector<32x32xbf16>
    %cst_39 = arith.constant dense<0.000000e+00> : vector<16x32xf32>
    %72 = tpu.matmul %70, %71, %cst_39 {dimension_numbers = #tpu.dot_dimension_numbers<[1], [0], [0], [1], [0, 0, 1, 1], [], []>} : vector<16x32xbf16>, vector<32x32xbf16>, vector<16x32xf32> -> vector<16x32xf32>
    %c0_40 = arith.constant 0 : index
    %c0_41 = arith.constant 0 : index
    %73 = vector.load %arg5[%c0_40, %c0_41] : memref<1x32xf32, #tpu.memory_space<vmem>>, vector<1x32xf32>
    %74 = vector.broadcast %73 : vector<1x32xf32> to vector<16x32xf32>
    %75 = arith.addf %72, %74 : vector<16x32xf32>
    %76 = arith.mulf %75, %75 : vector<16x32xf32>
    %77 = arith.mulf %75, %76 : vector<16x32xf32>
    %cst_42 = arith.constant 4.471500e-02 : f32
    %78 = vector.broadcast %cst_42 : f32 to vector<16x32xf32>
    %79 = arith.mulf %78, %77 : vector<16x32xf32>
    %80 = arith.addf %75, %79 : vector<16x32xf32>
    %cst_43 = arith.constant 0.797884583 : f32
    %81 = vector.broadcast %cst_43 : f32 to vector<16x32xf32>
    %82 = arith.mulf %81, %80 : vector<16x32xf32>
    %83 = math.tanh %82 : vector<16x32xf32>
    %cst_44 = arith.constant 1.000000e+00 : f32
    %84 = vector.broadcast %cst_44 : f32 to vector<16x32xf32>
    %85 = arith.addf %84, %83 : vector<16x32xf32>
    %cst_45 = arith.constant 5.000000e-01 : f32
    %86 = vector.broadcast %cst_45 : f32 to vector<16x32xf32>
    %87 = arith.mulf %86, %85 : vector<16x32xf32>
    %88 = arith.mulf %75, %87 : vector<16x32xf32>
    %89 = arith.truncf %88 : vector<16x32xf32> to vector<16x32xbf16>
    %c0_46 = arith.constant 0 : index
    %c0_47 = arith.constant 0 : index
    %90 = vector.load %arg6[%c0_46, %c0_47] : memref<32x32xbf16, #tpu.memory_space<vmem>>, vector<32x32xbf16>
    %cst_48 = arith.constant dense<0.000000e+00> : vector<16x32xf32>
    %91 = tpu.matmul %89, %90, %cst_48 {dimension_numbers = #tpu.dot_dimension_numbers<[1], [0], [0], [1], [0, 0, 1, 1], [], []>} : vector<16x32xbf16>, vector<32x32xbf16>, vector<16x32xf32> -> vector<16x32xf32>
    %c0_49 = arith.constant 0 : index
    %c0_50 = arith.constant 0 : index
    %92 = vector.load %arg7[%c0_49, %c0_50] : memref<1x32xf32, #tpu.memory_space<vmem>>, vector<1x32xf32>
    %93 = vector.broadcast %92 : vector<1x32xf32> to vector<16x32xf32>
    %94 = arith.addf %91, %93 : vector<16x32xf32>
    %c0_51 = arith.constant 0 : index
    %c1_52 = arith.constant 1 : index
    %c1_53 = arith.constant 1 : index
    %c0_54 = arith.constant 0 : index
    %95 = vector.load %arg1[%c0_51, %c1_52, %c1_53, %c0_54] : memref<1x6x6x32xf32, #tpu.memory_space<vmem>>, vector<1x4x4x32xf32>
    %96 = vector.shape_cast %95 : vector<1x4x4x32xf32> to vector<16x32xf32>
    %97 = arith.addf %96, %94 : vector<16x32xf32>
    %98 = arith.truncf %97 : vector<16x32xf32> to vector<16x32xbf16>
    %c0_55 = arith.constant 0 : index
    %c0_56 = arith.constant 0 : index
    %99 = vector.load %arg8[%c0_55, %c0_56] : memref<32x32xbf16, #tpu.memory_space<vmem>>, vector<32x32xbf16>
    %cst_57 = arith.constant dense<0.000000e+00> : vector<16x32xf32>
    %100 = tpu.matmul %98, %99, %cst_57 {dimension_numbers = #tpu.dot_dimension_numbers<[1], [0], [0], [1], [0, 0, 1, 1], [], []>} : vector<16x32xbf16>, vector<32x32xbf16>, vector<16x32xf32> -> vector<16x32xf32>
    %c0_58 = arith.constant 0 : index
    %c0_59 = arith.constant 0 : index
    %101 = vector.load %arg9[%c0_58, %c0_59] : memref<1x32xf32, #tpu.memory_space<vmem>>, vector<1x32xf32>
    %102 = vector.broadcast %101 : vector<1x32xf32> to vector<16x32xf32>
    %103 = arith.addf %100, %102 : vector<16x32xf32>
    %c0_60 = arith.constant 0 : index
    %c0_61 = arith.constant 0 : index
    %104 = vector.load %arg10[%c0_60, %c0_61] : memref<32x32xbf16, #tpu.memory_space<vmem>>, vector<32x32xbf16>
    %cst_62 = arith.constant dense<0.000000e+00> : vector<16x32xf32>
    %105 = tpu.matmul %98, %104, %cst_62 {dimension_numbers = #tpu.dot_dimension_numbers<[1], [0], [0], [1], [0, 0, 1, 1], [], []>} : vector<16x32xbf16>, vector<32x32xbf16>, vector<16x32xf32> -> vector<16x32xf32>
    %c0_63 = arith.constant 0 : index
    %c0_64 = arith.constant 0 : index
    %106 = vector.load %arg11[%c0_63, %c0_64] : memref<1x32xf32, #tpu.memory_space<vmem>>, vector<1x32xf32>
    %107 = vector.broadcast %106 : vector<1x32xf32> to vector<16x32xf32>
    %108 = arith.addf %105, %107 : vector<16x32xf32>
    %109 = arith.mulf %103, %103 : vector<16x32xf32>
    %cst_65 = arith.constant dense<0.000000e+00> : vector<16xf32>
    %110 = vector.multi_reduction <add>, %109, %cst_65 [1] : vector<16x32xf32> to vector<16xf32>
    %111 = vector.shape_cast %110 : vector<16xf32> to vector<16x1xf32>
    %112 = math.sqrt %111 : vector<16x1xf32>
    %cst_66 = arith.constant 9.99999996E-13 : f32
    %113 = vector.broadcast %cst_66 : f32 to vector<16x1xf32>
    %114 = arith.maximumf %112, %113 : vector<16x1xf32>
    %115 = vector.broadcast %114 : vector<16x1xf32> to vector<16x32xf32>
    %116 = arith.divf %103, %115 : vector<16x32xf32>
    %117 = arith.mulf %108, %108 : vector<16x32xf32>
    %cst_67 = arith.constant dense<0.000000e+00> : vector<16xf32>
    %118 = vector.multi_reduction <add>, %117, %cst_67 [1] : vector<16x32xf32> to vector<16xf32>
    %119 = vector.shape_cast %118 : vector<16xf32> to vector<16x1xf32>
    %120 = math.sqrt %119 : vector<16x1xf32>
    %cst_68 = arith.constant 9.99999996E-13 : f32
    %121 = vector.broadcast %cst_68 : f32 to vector<16x1xf32>
    %122 = arith.maximumf %120, %121 : vector<16x1xf32>
    %123 = vector.broadcast %122 : vector<16x1xf32> to vector<16x32xf32>
    %124 = arith.divf %108, %123 : vector<16x32xf32>
    %cst_69 = arith.constant dense<0.000000e+00> : vector<32xf32>
    %125 = vector.multi_reduction <add>, %116, %cst_69 [0] : vector<16x32xf32> to vector<32xf32>
    %126 = vector.shape_cast %125 : vector<32xf32> to vector<1x32xf32>
    %127 = vector.broadcast %126 : vector<1x32xf32> to vector<16x32xf32>
    %128 = arith.mulf %127, %124 : vector<16x32xf32>
    %129 = arith.truncf %128 : vector<16x32xf32> to vector<16x32xbf16>
    %c0_70 = arith.constant 0 : index
    %c0_71 = arith.constant 0 : index
    %130 = vector.load %arg12[%c0_70, %c0_71] : memref<32x32xbf16, #tpu.memory_space<vmem>>, vector<32x32xbf16>
    %cst_72 = arith.constant dense<0.000000e+00> : vector<16x32xf32>
    %131 = tpu.matmul %129, %130, %cst_72 {dimension_numbers = #tpu.dot_dimension_numbers<[1], [0], [0], [1], [0, 0, 1, 1], [], []>} : vector<16x32xbf16>, vector<32x32xbf16>, vector<16x32xf32> -> vector<16x32xf32>
    %c0_73 = arith.constant 0 : index
    %c0_74 = arith.constant 0 : index
    %132 = vector.load %arg13[%c0_73, %c0_74] : memref<1x32xf32, #tpu.memory_space<vmem>>, vector<1x32xf32>
    %133 = vector.broadcast %132 : vector<1x32xf32> to vector<16x32xf32>
    %134 = arith.addf %131, %133 : vector<16x32xf32>
    %135 = arith.addf %134, %116 : vector<16x32xf32>
    %136 = arith.truncf %135 : vector<16x32xf32> to vector<16x32xbf16>
    %c0_75 = arith.constant 0 : index
    %c0_76 = arith.constant 0 : index
    %137 = vector.load %arg14[%c0_75, %c0_76] : memref<32x32xbf16, #tpu.memory_space<vmem>>, vector<32x32xbf16>
    %cst_77 = arith.constant dense<0.000000e+00> : vector<16x32xf32>
    %138 = tpu.matmul %136, %137, %cst_77 {dimension_numbers = #tpu.dot_dimension_numbers<[1], [0], [0], [1], [0, 0, 1, 1], [], []>} : vector<16x32xbf16>, vector<32x32xbf16>, vector<16x32xf32> -> vector<16x32xf32>
    %c0_78 = arith.constant 0 : index
    %c0_79 = arith.constant 0 : index
    %139 = vector.load %arg15[%c0_78, %c0_79] : memref<1x32xf32, #tpu.memory_space<vmem>>, vector<1x32xf32>
    %140 = vector.broadcast %139 : vector<1x32xf32> to vector<16x32xf32>
    %141 = arith.addf %138, %140 : vector<16x32xf32>
    %142 = arith.addf %97, %141 : vector<16x32xf32>
    %143 = arith.truncf %142 : vector<16x32xf32> to vector<16x32xbf16>
    %c0_80 = arith.constant 0 : index
    %c0_81 = arith.constant 0 : index
    %144 = vector.load %arg16[%c0_80, %c0_81] : memref<32x128xbf16, #tpu.memory_space<vmem>>, vector<32x128xbf16>
    %cst_82 = arith.constant dense<0.000000e+00> : vector<16x128xf32>
    %145 = tpu.matmul %143, %144, %cst_82 {dimension_numbers = #tpu.dot_dimension_numbers<[1], [0], [0], [1], [0, 0, 1, 1], [], []>} : vector<16x32xbf16>, vector<32x128xbf16>, vector<16x128xf32> -> vector<16x128xf32>
    %c0_83 = arith.constant 0 : index
    %c0_84 = arith.constant 0 : index
    %146 = vector.load %arg17[%c0_83, %c0_84] : memref<1x128xf32, #tpu.memory_space<vmem>>, vector<1x128xf32>
    %147 = vector.broadcast %146 : vector<1x128xf32> to vector<16x128xf32>
    %148 = arith.addf %145, %147 : vector<16x128xf32>
    %149 = arith.mulf %148, %148 : vector<16x128xf32>
    %150 = arith.mulf %148, %149 : vector<16x128xf32>
    %cst_85 = arith.constant 4.471500e-02 : f32
    %151 = vector.broadcast %cst_85 : f32 to vector<16x128xf32>
    %152 = arith.mulf %151, %150 : vector<16x128xf32>
    %153 = arith.addf %148, %152 : vector<16x128xf32>
    %cst_86 = arith.constant 0.797884583 : f32
    %154 = vector.broadcast %cst_86 : f32 to vector<16x128xf32>
    %155 = arith.mulf %154, %153 : vector<16x128xf32>
    %156 = math.tanh %155 : vector<16x128xf32>
    %cst_87 = arith.constant 1.000000e+00 : f32
    %157 = vector.broadcast %cst_87 : f32 to vector<16x128xf32>
    %158 = arith.addf %157, %156 : vector<16x128xf32>
    %cst_88 = arith.constant 5.000000e-01 : f32
    %159 = vector.broadcast %cst_88 : f32 to vector<16x128xf32>
    %160 = arith.mulf %159, %158 : vector<16x128xf32>
    %161 = arith.mulf %148, %160 : vector<16x128xf32>
    %162 = arith.truncf %161 : vector<16x128xf32> to vector<16x128xbf16>
    %c0_89 = arith.constant 0 : index
    %c0_90 = arith.constant 0 : index
    %163 = vector.load %arg18[%c0_89, %c0_90] : memref<128x32xbf16, #tpu.memory_space<vmem>>, vector<128x32xbf16>
    %cst_91 = arith.constant dense<0.000000e+00> : vector<16x32xf32>
    %164 = tpu.matmul %162, %163, %cst_91 {dimension_numbers = #tpu.dot_dimension_numbers<[1], [0], [0], [1], [0, 0, 1, 1], [], []>} : vector<16x128xbf16>, vector<128x32xbf16>, vector<16x32xf32> -> vector<16x32xf32>
    %c0_92 = arith.constant 0 : index
    %c0_93 = arith.constant 0 : index
    %165 = vector.load %arg19[%c0_92, %c0_93] : memref<1x32xf32, #tpu.memory_space<vmem>>, vector<1x32xf32>
    %166 = vector.broadcast %165 : vector<1x32xf32> to vector<16x32xf32>
    %167 = arith.addf %164, %166 : vector<16x32xf32>
    %168 = arith.addf %142, %167 : vector<16x32xf32>
    %169 = vector.shape_cast %168 : vector<16x32xf32> to vector<1x4x4x32xf32>
    %c0_94 = arith.constant 0 : index
    %c0_95 = arith.constant 0 : index
    %c0_96 = arith.constant 0 : index
    %c0_97 = arith.constant 0 : index
    %170 = vector.load %arg20[%c0_94, %c0_95, %c0_96, %c0_97] : memref<1x4x4x32xf32, #tpu.memory_space<vmem>>, vector<1x4x4x32xf32>
    tpu.vector_store %arg20[%c0_94, %c0_95, %c0_96, %c0_97], %169 {strides = array<i32>} : memref<1x4x4x32xf32, #tpu.memory_space<vmem>>, vector<1x4x4x32xf32>,
    return
  }
  func.func @transform_0(%arg0: i32) -> (i32, i32, i32, i32) {
    %c0_i32 = arith.constant 0 : i32
    %c0_i32_0 = arith.constant 0 : i32
    %c0_i32_1 = arith.constant 0 : i32
    %c0_i32_2 = arith.constant 0 : i32
    return %arg0, %c0_i32, %c0_i32_0, %c0_i32_1 : i32, i32, i32, i32
  }
  func.func @transform_1(%arg0: i32) -> (i32, i32) {
    %c0_i32 = arith.constant 0 : i32
    %c0_i32_0 = arith.constant 0 : i32
    %c0_i32_1 = arith.constant 0 : i32
    return %c0_i32, %c0_i32_0 : i32, i32
  }
  func.func @transform_2(%arg0: i32) -> (i32, i32) {
    %c0_i32 = arith.constant 0 : i32
    %c0_i32_0 = arith.constant 0 : i32
    %c0_i32_1 = arith.constant 0 : i32
    return %c0_i32, %c0_i32_0 : i32, i32
  }
  func.func @transform_3(%arg0: i32) -> (i32, i32) {
    %c0_i32 = arith.constant 0 : i32
    %c0_i32_0 = arith.constant 0 : i32
    %c0_i32_1 = arith.constant 0 : i32
    return %c0_i32, %c0_i32_0 : i32, i32
  }
  func.func @transform_4(%arg0: i32) -> (i32, i32) {
    %c0_i32 = arith.constant 0 : i32
    %c0_i32_0 = arith.constant 0 : i32
    %c0_i32_1 = arith.constant 0 : i32
    return %c0_i32, %c0_i32_0 : i32, i32
  }
  func.func @transform_5(%arg0: i32) -> (i32, i32) {
    %c0_i32 = arith.constant 0 : i32
    %c0_i32_0 = arith.constant 0 : i32
    %c0_i32_1 = arith.constant 0 : i32
    return %c0_i32, %c0_i32_0 : i32, i32
  }
  func.func @transform_6(%arg0: i32) -> (i32, i32) {
    %c0_i32 = arith.constant 0 : i32
    %c0_i32_0 = arith.constant 0 : i32
    %c0_i32_1 = arith.constant 0 : i32
    return %c0_i32, %c0_i32_0 : i32, i32
  }
  func.func @transform_7(%arg0: i32) -> (i32, i32) {
    %c0_i32 = arith.constant 0 : i32
    %c0_i32_0 = arith.constant 0 : i32
    %c0_i32_1 = arith.constant 0 : i32
    return %c0_i32, %c0_i32_0 : i32, i32
  }
  func.func @transform_8(%arg0: i32) -> (i32, i32) {
    %c0_i32 = arith.constant 0 : i32
    %c0_i32_0 = arith.constant 0 : i32
    %c0_i32_1 = arith.constant 0 : i32
    return %c0_i32, %c0_i32_0 : i32, i32
  }
  func.func @transform_9(%arg0: i32) -> (i32, i32) {
    %c0_i32 = arith.constant 0 : i32
    %c0_i32_0 = arith.constant 0 : i32
    %c0_i32_1 = arith.constant 0 : i32
    return %c0_i32, %c0_i32_0 : i32, i32
  }
  func.func @transform_10(%arg0: i32) -> (i32, i32) {
    %c0_i32 = arith.constant 0 : i32
    %c0_i32_0 = arith.constant 0 : i32
    %c0_i32_1 = arith.constant 0 : i32
    return %c0_i32, %c0_i32_0 : i32, i32
  }
  func.func @transform_11(%arg0: i32) -> (i32, i32) {
    %c0_i32 = arith.constant 0 : i32
    %c0_i32_0 = arith.constant 0 : i32
    %c0_i32_1 = arith.constant 0 : i32
    return %c0_i32, %c0_i32_0 : i32, i32
  }
  func.func @transform_12(%arg0: i32) -> (i32, i32) {
    %c0_i32 = arith.constant 0 : i32
    %c0_i32_0 = arith.constant 0 : i32
    %c0_i32_1 = arith.constant 0 : i32
    return %c0_i32, %c0_i32_0 : i32, i32
  }
  func.func @transform_13(%arg0: i32) -> (i32, i32) {
    %c0_i32 = arith.constant 0 : i32
    %c0_i32_0 = arith.constant 0 : i32
    %c0_i32_1 = arith.constant 0 : i32
    return %c0_i32, %c0_i32_0 : i32, i32
  }
  func.func @transform_14(%arg0: i32) -> (i32, i32) {
    %c0_i32 = arith.constant 0 : i32
    %c0_i32_0 = arith.constant 0 : i32
    %c0_i32_1 = arith.constant 0 : i32
    return %c0_i32, %c0_i32_0 : i32, i32
  }
  func.func @transform_15(%arg0: i32) -> (i32, i32) {
    %c0_i32 = arith.constant 0 : i32
    %c0_i32_0 = arith.constant 0 : i32
    %c0_i32_1 = arith.constant 0 : i32
    return %c0_i32, %c0_i32_0 : i32, i32
  }
  func.func @transform_16(%arg0: i32) -> (i32, i32) {
    %c0_i32 = arith.constant 0 : i32
    %c0_i32_0 = arith.constant 0 : i32
    %c0_i32_1 = arith.constant 0 : i32
    return %c0_i32, %c0_i32_0 : i32, i32
  }
  func.func @transform_17(%arg0: i32) -> (i32, i32) {
    %c0_i32 = arith.constant 0 : i32
    %c0_i32_0 = arith.constant 0 : i32
    %c0_i32_1 = arith.constant 0 : i32
    return %c0_i32, %c0_i32_0 : i32, i32
  }
  func.func @transform_18(%arg0: i32) -> (i32, i32) {
    %c0_i32 = arith.constant 0 : i32
    %c0_i32_0 = arith.constant 0 : i32
    %c0_i32_1 = arith.constant 0 : i32
    return %c0_i32, %c0_i32_0 : i32, i32
  }
  func.func @transform_19(%arg0: i32) -> (i32, i32, i32, i32) {
    %c0_i32 = arith.constant 0 : i32
    %c0_i32_0 = arith.constant 0 : i32
    %c0_i32_1 = arith.constant 0 : i32
    %c0_i32_2 = arith.constant 0 : i32
    return %arg0, %c0_i32, %c0_i32_0, %c0_i32_1 : i32, i32, i32, i32
  }
}

module attributes {stable_mosaic.version = 11 : i64} {
  func.func @_conv_mixer_kernel(%arg0: i32, %arg1: memref<1x6x6x32xf32, #tpu.memory_space<vmem>>, %arg2: memref<9x32xf32, #tpu.memory_space<vmem>>, %arg3: memref<1x32xf32, #tpu.memory_space<vmem>>, %arg4: memref<32x128xbf16, #tpu.memory_space<vmem>>, %arg5: memref<1x128xf32, #tpu.memory_space<vmem>>, %arg6: memref<128x32xbf16, #tpu.memory_space<vmem>>, %arg7: memref<1x32xf32, #tpu.memory_space<vmem>>, %arg8: memref<1x4x4x32xf32, #tpu.memory_space<vmem>>) attributes {dimension_semantics = [#tpu.dimension_semantics<parallel>], iteration_bounds = array<i64: 2>, scalar_prefetch = 0 : i64, scratch_operands = 0 : i64, tpu.core_type = #tpu.core_type<tc>, window_params = [{transform_indices = @transform_0, window_bounds = array<i64: 1, 6, 6, 32>}, {pipeline_mode = #tpu.pipeline_mode<synchronous>, transform_indices = @transform_1, window_bounds = array<i64: 9, 32>}, {pipeline_mode = #tpu.pipeline_mode<synchronous>, transform_indices = @transform_2, window_bounds = array<i64: 1, 32>}, {pipeline_mode = #tpu.pipeline_mode<synchronous>, transform_indices = @transform_3, window_bounds = array<i64: 32, 128>}, {pipeline_mode = #tpu.pipeline_mode<synchronous>, transform_indices = @transform_4, window_bounds = array<i64: 1, 128>}, {pipeline_mode = #tpu.pipeline_mode<synchronous>, transform_indices = @transform_5, window_bounds = array<i64: 128, 32>}, {pipeline_mode = #tpu.pipeline_mode<synchronous>, transform_indices = @transform_6, window_bounds = array<i64: 1, 32>}, {transform_indices = @transform_7, window_bounds = array<i64: 1, 4, 4, 32>}]} {
    %c0 = arith.constant 0 : index
    %c0_0 = arith.constant 0 : index
    %0 = vector.load %arg2[%c0, %c0_0] : memref<9x32xf32, #tpu.memory_space<vmem>>, vector<9x32xf32>
    %cst = arith.constant 0.000000e+00 : f32
    %1 = vector.broadcast %cst : f32 to vector<1x4x4x32xf32>
    %c0_1 = arith.constant 0 : index
    %c0_2 = arith.constant 0 : index
    %c0_3 = arith.constant 0 : index
    %c0_4 = arith.constant 0 : index
    %2 = vector.load %arg1[%c0_1, %c0_2, %c0_3, %c0_4] : memref<1x6x6x32xf32, #tpu.memory_space<vmem>>, vector<1x4x4x32xf32>
    %3 = vector.extract_strided_slice %0 {offsets = [0, 0], sizes = [1, 32], strides = [1, 1]} : vector<9x32xf32> to vector<1x32xf32>
    %4 = vector.shape_cast %3 : vector<1x32xf32> to vector<32xf32>
    %5 = vector.shape_cast %4 : vector<32xf32> to vector<1x1x1x32xf32>
    %6 = vector.broadcast %5 : vector<1x1x1x32xf32> to vector<1x4x4x32xf32>
    %7 = arith.mulf %2, %6 : vector<1x4x4x32xf32>
    %8 = arith.addf %1, %7 : vector<1x4x4x32xf32>
    %c0_5 = arith.constant 0 : index
    %c0_6 = arith.constant 0 : index
    %c1 = arith.constant 1 : index
    %c0_7 = arith.constant 0 : index
    %9 = vector.load %arg1[%c0_5, %c0_6, %c1, %c0_7] : memref<1x6x6x32xf32, #tpu.memory_space<vmem>>, vector<1x4x4x32xf32>
    %10 = vector.extract_strided_slice %0 {offsets = [1, 0], sizes = [1, 32], strides = [1, 1]} : vector<9x32xf32> to vector<1x32xf32>
    %11 = vector.shape_cast %10 : vector<1x32xf32> to vector<32xf32>
    %12 = vector.shape_cast %11 : vector<32xf32> to vector<1x1x1x32xf32>
    %13 = vector.broadcast %12 : vector<1x1x1x32xf32> to vector<1x4x4x32xf32>
    %14 = arith.mulf %9, %13 : vector<1x4x4x32xf32>
    %15 = arith.addf %8, %14 : vector<1x4x4x32xf32>
    %c0_8 = arith.constant 0 : index
    %c0_9 = arith.constant 0 : index
    %c2 = arith.constant 2 : index
    %c0_10 = arith.constant 0 : index
    %16 = vector.load %arg1[%c0_8, %c0_9, %c2, %c0_10] : memref<1x6x6x32xf32, #tpu.memory_space<vmem>>, vector<1x4x4x32xf32>
    %17 = vector.extract_strided_slice %0 {offsets = [2, 0], sizes = [1, 32], strides = [1, 1]} : vector<9x32xf32> to vector<1x32xf32>
    %18 = vector.shape_cast %17 : vector<1x32xf32> to vector<32xf32>
    %19 = vector.shape_cast %18 : vector<32xf32> to vector<1x1x1x32xf32>
    %20 = vector.broadcast %19 : vector<1x1x1x32xf32> to vector<1x4x4x32xf32>
    %21 = arith.mulf %16, %20 : vector<1x4x4x32xf32>
    %22 = arith.addf %15, %21 : vector<1x4x4x32xf32>
    %c0_11 = arith.constant 0 : index
    %c1_12 = arith.constant 1 : index
    %c0_13 = arith.constant 0 : index
    %c0_14 = arith.constant 0 : index
    %23 = vector.load %arg1[%c0_11, %c1_12, %c0_13, %c0_14] : memref<1x6x6x32xf32, #tpu.memory_space<vmem>>, vector<1x4x4x32xf32>
    %24 = vector.extract_strided_slice %0 {offsets = [3, 0], sizes = [1, 32], strides = [1, 1]} : vector<9x32xf32> to vector<1x32xf32>
    %25 = vector.shape_cast %24 : vector<1x32xf32> to vector<32xf32>
    %26 = vector.shape_cast %25 : vector<32xf32> to vector<1x1x1x32xf32>
    %27 = vector.broadcast %26 : vector<1x1x1x32xf32> to vector<1x4x4x32xf32>
    %28 = arith.mulf %23, %27 : vector<1x4x4x32xf32>
    %29 = arith.addf %22, %28 : vector<1x4x4x32xf32>
    %c0_15 = arith.constant 0 : index
    %c1_16 = arith.constant 1 : index
    %c1_17 = arith.constant 1 : index
    %c0_18 = arith.constant 0 : index
    %30 = vector.load %arg1[%c0_15, %c1_16, %c1_17, %c0_18] : memref<1x6x6x32xf32, #tpu.memory_space<vmem>>, vector<1x4x4x32xf32>
    %31 = vector.extract_strided_slice %0 {offsets = [4, 0], sizes = [1, 32], strides = [1, 1]} : vector<9x32xf32> to vector<1x32xf32>
    %32 = vector.shape_cast %31 : vector<1x32xf32> to vector<32xf32>
    %33 = vector.shape_cast %32 : vector<32xf32> to vector<1x1x1x32xf32>
    %34 = vector.broadcast %33 : vector<1x1x1x32xf32> to vector<1x4x4x32xf32>
    %35 = arith.mulf %30, %34 : vector<1x4x4x32xf32>
    %36 = arith.addf %29, %35 : vector<1x4x4x32xf32>
    %c0_19 = arith.constant 0 : index
    %c1_20 = arith.constant 1 : index
    %c2_21 = arith.constant 2 : index
    %c0_22 = arith.constant 0 : index
    %37 = vector.load %arg1[%c0_19, %c1_20, %c2_21, %c0_22] : memref<1x6x6x32xf32, #tpu.memory_space<vmem>>, vector<1x4x4x32xf32>
    %38 = vector.extract_strided_slice %0 {offsets = [5, 0], sizes = [1, 32], strides = [1, 1]} : vector<9x32xf32> to vector<1x32xf32>
    %39 = vector.shape_cast %38 : vector<1x32xf32> to vector<32xf32>
    %40 = vector.shape_cast %39 : vector<32xf32> to vector<1x1x1x32xf32>
    %41 = vector.broadcast %40 : vector<1x1x1x32xf32> to vector<1x4x4x32xf32>
    %42 = arith.mulf %37, %41 : vector<1x4x4x32xf32>
    %43 = arith.addf %36, %42 : vector<1x4x4x32xf32>
    %c0_23 = arith.constant 0 : index
    %c2_24 = arith.constant 2 : index
    %c0_25 = arith.constant 0 : index
    %c0_26 = arith.constant 0 : index
    %44 = vector.load %arg1[%c0_23, %c2_24, %c0_25, %c0_26] : memref<1x6x6x32xf32, #tpu.memory_space<vmem>>, vector<1x4x4x32xf32>
    %45 = vector.extract_strided_slice %0 {offsets = [6, 0], sizes = [1, 32], strides = [1, 1]} : vector<9x32xf32> to vector<1x32xf32>
    %46 = vector.shape_cast %45 : vector<1x32xf32> to vector<32xf32>
    %47 = vector.shape_cast %46 : vector<32xf32> to vector<1x1x1x32xf32>
    %48 = vector.broadcast %47 : vector<1x1x1x32xf32> to vector<1x4x4x32xf32>
    %49 = arith.mulf %44, %48 : vector<1x4x4x32xf32>
    %50 = arith.addf %43, %49 : vector<1x4x4x32xf32>
    %c0_27 = arith.constant 0 : index
    %c2_28 = arith.constant 2 : index
    %c1_29 = arith.constant 1 : index
    %c0_30 = arith.constant 0 : index
    %51 = vector.load %arg1[%c0_27, %c2_28, %c1_29, %c0_30] : memref<1x6x6x32xf32, #tpu.memory_space<vmem>>, vector<1x4x4x32xf32>
    %52 = vector.extract_strided_slice %0 {offsets = [7, 0], sizes = [1, 32], strides = [1, 1]} : vector<9x32xf32> to vector<1x32xf32>
    %53 = vector.shape_cast %52 : vector<1x32xf32> to vector<32xf32>
    %54 = vector.shape_cast %53 : vector<32xf32> to vector<1x1x1x32xf32>
    %55 = vector.broadcast %54 : vector<1x1x1x32xf32> to vector<1x4x4x32xf32>
    %56 = arith.mulf %51, %55 : vector<1x4x4x32xf32>
    %57 = arith.addf %50, %56 : vector<1x4x4x32xf32>
    %c0_31 = arith.constant 0 : index
    %c2_32 = arith.constant 2 : index
    %c2_33 = arith.constant 2 : index
    %c0_34 = arith.constant 0 : index
    %58 = vector.load %arg1[%c0_31, %c2_32, %c2_33, %c0_34] : memref<1x6x6x32xf32, #tpu.memory_space<vmem>>, vector<1x4x4x32xf32>
    %59 = vector.extract_strided_slice %0 {offsets = [8, 0], sizes = [1, 32], strides = [1, 1]} : vector<9x32xf32> to vector<1x32xf32>
    %60 = vector.shape_cast %59 : vector<1x32xf32> to vector<32xf32>
    %61 = vector.shape_cast %60 : vector<32xf32> to vector<1x1x1x32xf32>
    %62 = vector.broadcast %61 : vector<1x1x1x32xf32> to vector<1x4x4x32xf32>
    %63 = arith.mulf %58, %62 : vector<1x4x4x32xf32>
    %64 = arith.addf %57, %63 : vector<1x4x4x32xf32>
    %c0_35 = arith.constant 0 : index
    %c0_36 = arith.constant 0 : index
    %65 = vector.load %arg3[%c0_35, %c0_36] : memref<1x32xf32, #tpu.memory_space<vmem>>, vector<1x32xf32>
    %66 = vector.shape_cast %65 : vector<1x32xf32> to vector<1x1x1x32xf32>
    %67 = vector.broadcast %66 : vector<1x1x1x32xf32> to vector<1x4x4x32xf32>
    %68 = arith.addf %64, %67 : vector<1x4x4x32xf32>
    %69 = vector.shape_cast %68 : vector<1x4x4x32xf32> to vector<16x32xf32>
    %70 = arith.truncf %69 : vector<16x32xf32> to vector<16x32xbf16>
    %c0_37 = arith.constant 0 : index
    %c0_38 = arith.constant 0 : index
    %71 = vector.load %arg4[%c0_37, %c0_38] : memref<32x128xbf16, #tpu.memory_space<vmem>>, vector<32x128xbf16>
    %cst_39 = arith.constant dense<0.000000e+00> : vector<16x128xf32>
    %72 = tpu.matmul %70, %71, %cst_39 {dimension_numbers = #tpu.dot_dimension_numbers<[1], [0], [0], [1], [0, 0, 1, 1], [], []>} : vector<16x32xbf16>, vector<32x128xbf16>, vector<16x128xf32> -> vector<16x128xf32>
    %c0_40 = arith.constant 0 : index
    %c0_41 = arith.constant 0 : index
    %73 = vector.load %arg5[%c0_40, %c0_41] : memref<1x128xf32, #tpu.memory_space<vmem>>, vector<1x128xf32>
    %74 = vector.broadcast %73 : vector<1x128xf32> to vector<16x128xf32>
    %75 = arith.addf %72, %74 : vector<16x128xf32>
    %76 = arith.mulf %75, %75 : vector<16x128xf32>
    %77 = arith.mulf %75, %76 : vector<16x128xf32>
    %cst_42 = arith.constant 4.471500e-02 : f32
    %78 = vector.broadcast %cst_42 : f32 to vector<16x128xf32>
    %79 = arith.mulf %78, %77 : vector<16x128xf32>
    %80 = arith.addf %75, %79 : vector<16x128xf32>
    %cst_43 = arith.constant 0.797884583 : f32
    %81 = vector.broadcast %cst_43 : f32 to vector<16x128xf32>
    %82 = arith.mulf %81, %80 : vector<16x128xf32>
    %83 = math.tanh %82 : vector<16x128xf32>
    %cst_44 = arith.constant 1.000000e+00 : f32
    %84 = vector.broadcast %cst_44 : f32 to vector<16x128xf32>
    %85 = arith.addf %84, %83 : vector<16x128xf32>
    %cst_45 = arith.constant 5.000000e-01 : f32
    %86 = vector.broadcast %cst_45 : f32 to vector<16x128xf32>
    %87 = arith.mulf %86, %85 : vector<16x128xf32>
    %88 = arith.mulf %75, %87 : vector<16x128xf32>
    %89 = arith.truncf %88 : vector<16x128xf32> to vector<16x128xbf16>
    %c0_46 = arith.constant 0 : index
    %c0_47 = arith.constant 0 : index
    %90 = vector.load %arg6[%c0_46, %c0_47] : memref<128x32xbf16, #tpu.memory_space<vmem>>, vector<128x32xbf16>
    %cst_48 = arith.constant dense<0.000000e+00> : vector<16x32xf32>
    %91 = tpu.matmul %89, %90, %cst_48 {dimension_numbers = #tpu.dot_dimension_numbers<[1], [0], [0], [1], [0, 0, 1, 1], [], []>} : vector<16x128xbf16>, vector<128x32xbf16>, vector<16x32xf32> -> vector<16x32xf32>
    %c0_49 = arith.constant 0 : index
    %c0_50 = arith.constant 0 : index
    %92 = vector.load %arg7[%c0_49, %c0_50] : memref<1x32xf32, #tpu.memory_space<vmem>>, vector<1x32xf32>
    %93 = vector.broadcast %92 : vector<1x32xf32> to vector<16x32xf32>
    %94 = arith.addf %91, %93 : vector<16x32xf32>
    %c0_51 = arith.constant 0 : index
    %c1_52 = arith.constant 1 : index
    %c1_53 = arith.constant 1 : index
    %c0_54 = arith.constant 0 : index
    %95 = vector.load %arg1[%c0_51, %c1_52, %c1_53, %c0_54] : memref<1x6x6x32xf32, #tpu.memory_space<vmem>>, vector<1x4x4x32xf32>
    %96 = vector.shape_cast %95 : vector<1x4x4x32xf32> to vector<16x32xf32>
    %97 = arith.addf %96, %94 : vector<16x32xf32>
    %98 = vector.shape_cast %97 : vector<16x32xf32> to vector<1x4x4x32xf32>
    %c0_55 = arith.constant 0 : index
    %c0_56 = arith.constant 0 : index
    %c0_57 = arith.constant 0 : index
    %c0_58 = arith.constant 0 : index
    %99 = vector.load %arg8[%c0_55, %c0_56, %c0_57, %c0_58] : memref<1x4x4x32xf32, #tpu.memory_space<vmem>>, vector<1x4x4x32xf32>
    tpu.vector_store %arg8[%c0_55, %c0_56, %c0_57, %c0_58], %98 {strides = array<i32>} : memref<1x4x4x32xf32, #tpu.memory_space<vmem>>, vector<1x4x4x32xf32>,
    return
  }
  func.func @transform_0(%arg0: i32) -> (i32, i32, i32, i32) {
    %c0_i32 = arith.constant 0 : i32
    %c0_i32_0 = arith.constant 0 : i32
    %c0_i32_1 = arith.constant 0 : i32
    %c0_i32_2 = arith.constant 0 : i32
    return %arg0, %c0_i32, %c0_i32_0, %c0_i32_1 : i32, i32, i32, i32
  }
  func.func @transform_1(%arg0: i32) -> (i32, i32) {
    %c0_i32 = arith.constant 0 : i32
    %c0_i32_0 = arith.constant 0 : i32
    %c0_i32_1 = arith.constant 0 : i32
    return %c0_i32, %c0_i32_0 : i32, i32
  }
  func.func @transform_2(%arg0: i32) -> (i32, i32) {
    %c0_i32 = arith.constant 0 : i32
    %c0_i32_0 = arith.constant 0 : i32
    %c0_i32_1 = arith.constant 0 : i32
    return %c0_i32, %c0_i32_0 : i32, i32
  }
  func.func @transform_3(%arg0: i32) -> (i32, i32) {
    %c0_i32 = arith.constant 0 : i32
    %c0_i32_0 = arith.constant 0 : i32
    %c0_i32_1 = arith.constant 0 : i32
    return %c0_i32, %c0_i32_0 : i32, i32
  }
  func.func @transform_4(%arg0: i32) -> (i32, i32) {
    %c0_i32 = arith.constant 0 : i32
    %c0_i32_0 = arith.constant 0 : i32
    %c0_i32_1 = arith.constant 0 : i32
    return %c0_i32, %c0_i32_0 : i32, i32
  }
  func.func @transform_5(%arg0: i32) -> (i32, i32) {
    %c0_i32 = arith.constant 0 : i32
    %c0_i32_0 = arith.constant 0 : i32
    %c0_i32_1 = arith.constant 0 : i32
    return %c0_i32, %c0_i32_0 : i32, i32
  }
  func.func @transform_6(%arg0: i32) -> (i32, i32) {
    %c0_i32 = arith.constant 0 : i32
    %c0_i32_0 = arith.constant 0 : i32
    %c0_i32_1 = arith.constant 0 : i32
    return %c0_i32, %c0_i32_0 : i32, i32
  }
  func.func @transform_7(%arg0: i32) -> (i32, i32, i32, i32) {
    %c0_i32 = arith.constant 0 : i32
    %c0_i32_0 = arith.constant 0 : i32
    %c0_i32_1 = arith.constant 0 : i32
    %c0_i32_2 = arith.constant 0 : i32
    return %arg0, %c0_i32, %c0_i32_0, %c0_i32_1 : i32, i32, i32, i32
  }
}

module attributes {stable_mosaic.version = 11 : i64} {
  func.func @_gem_ln_head_kernel(%arg0: memref<2x16x32xf32, #tpu.memory_space<vmem>>, %arg1: memref<1x32xf32, #tpu.memory_space<vmem>>, %arg2: memref<1x32xf32, #tpu.memory_space<vmem>>, %arg3: memref<32x256xf32, #tpu.memory_space<vmem>>, %arg4: memref<1x256xf32, #tpu.memory_space<vmem>>, %arg5: memref<2x256xf32, #tpu.memory_space<vmem>>) attributes {dimension_semantics = [], scalar_prefetch = 0 : i64, scratch_operands = 0 : i64, tpu.core_type = #tpu.core_type<tc>} {
    %c0 = arith.constant 0 : index
    %c0_0 = arith.constant 0 : index
    %c0_1 = arith.constant 0 : index
    %0 = vector.load %arg0[%c0, %c0_0, %c0_1] : memref<2x16x32xf32, #tpu.memory_space<vmem>>, vector<2x16x32xf32>
    %cst = arith.constant 9.99999997E-7 : f32
    %1 = vector.broadcast %cst : f32 to vector<2x16x32xf32>
    %2 = arith.maximumf %0, %1 : vector<2x16x32xf32>
    %3 = arith.mulf %2, %2 : vector<2x16x32xf32>
    %4 = arith.mulf %3, %2 : vector<2x16x32xf32>
    %cst_2 = arith.constant dense<0.000000e+00> : vector<2x32xf32>
    %5 = vector.multi_reduction <add>, %4, %cst_2 [1] : vector<2x16x32xf32> to vector<2x32xf32>
    %cst_3 = arith.constant 1.600000e+01 : f32
    %6 = vector.broadcast %cst_3 : f32 to vector<2x32xf32>
    %7 = arith.divf %5, %6 : vector<2x32xf32>
    %8 = math.log %7 : vector<2x32xf32>
    %cst_4 = arith.constant 3.000000e+00 : f32
    %9 = vector.broadcast %cst_4 : f32 to vector<2x32xf32>
    %10 = arith.divf %8, %9 : vector<2x32xf32>
    %11 = math.exp %10 : vector<2x32xf32>
    %cst_5 = arith.constant dense<0.000000e+00> : vector<2xf32>
    %12 = vector.multi_reduction <add>, %11, %cst_5 [1] : vector<2x32xf32> to vector<2xf32>
    %13 = vector.shape_cast %12 : vector<2xf32> to vector<2x1xf32>
    %cst_6 = arith.constant 3.200000e+01 : f32
    %14 = vector.broadcast %cst_6 : f32 to vector<2x1xf32>
    %15 = arith.divf %13, %14 : vector<2x1xf32>
    %16 = vector.broadcast %15 : vector<2x1xf32> to vector<2x32xf32>
    %17 = arith.subf %11, %16 : vector<2x32xf32>
    %18 = arith.mulf %17, %17 : vector<2x32xf32>
    %cst_7 = arith.constant dense<0.000000e+00> : vector<2xf32>
    %19 = vector.multi_reduction <add>, %18, %cst_7 [1] : vector<2x32xf32> to vector<2xf32>
    %20 = vector.shape_cast %19 : vector<2xf32> to vector<2x1xf32>
    %cst_8 = arith.constant 3.200000e+01 : f32
    %21 = vector.broadcast %cst_8 : f32 to vector<2x1xf32>
    %22 = arith.divf %20, %21 : vector<2x1xf32>
    %23 = vector.broadcast %15 : vector<2x1xf32> to vector<2x32xf32>
    %24 = arith.subf %11, %23 : vector<2x32xf32>
    %cst_9 = arith.constant 9.99999974E-6 : f32
    %25 = vector.broadcast %cst_9 : f32 to vector<2x1xf32>
    %26 = arith.addf %22, %25 : vector<2x1xf32>
    %27 = math.rsqrt %26 : vector<2x1xf32>
    %28 = vector.broadcast %27 : vector<2x1xf32> to vector<2x32xf32>
    %29 = arith.mulf %24, %28 : vector<2x32xf32>
    %c0_10 = arith.constant 0 : index
    %c0_11 = arith.constant 0 : index
    %30 = vector.load %arg1[%c0_10, %c0_11] : memref<1x32xf32, #tpu.memory_space<vmem>>, vector<1x32xf32>
    %31 = vector.broadcast %30 : vector<1x32xf32> to vector<2x32xf32>
    %32 = arith.mulf %29, %31 : vector<2x32xf32>
    %c0_12 = arith.constant 0 : index
    %c0_13 = arith.constant 0 : index
    %33 = vector.load %arg2[%c0_12, %c0_13] : memref<1x32xf32, #tpu.memory_space<vmem>>, vector<1x32xf32>
    %34 = vector.broadcast %33 : vector<1x32xf32> to vector<2x32xf32>
    %35 = arith.addf %32, %34 : vector<2x32xf32>
    %c0_14 = arith.constant 0 : index
    %c0_15 = arith.constant 0 : index
    %36 = vector.load %arg3[%c0_14, %c0_15] : memref<32x256xf32, #tpu.memory_space<vmem>>, vector<32x256xf32>
    %cst_16 = arith.constant dense<0.000000e+00> : vector<2x256xf32>
    %37 = tpu.matmul %35, %36, %cst_16 {dimension_numbers = #tpu.dot_dimension_numbers<[1], [0], [0], [1], [0, 0, 1, 1], [], []>} : vector<2x32xf32>, vector<32x256xf32>, vector<2x256xf32> -> vector<2x256xf32>
    %c0_17 = arith.constant 0 : index
    %c0_18 = arith.constant 0 : index
    %38 = vector.load %arg4[%c0_17, %c0_18] : memref<1x256xf32, #tpu.memory_space<vmem>>, vector<1x256xf32>
    %39 = vector.broadcast %38 : vector<1x256xf32> to vector<2x256xf32>
    %40 = arith.addf %37, %39 : vector<2x256xf32>
    %c0_19 = arith.constant 0 : index
    %c0_20 = arith.constant 0 : index
    %41 = vector.load %arg5[%c0_19, %c0_20] : memref<2x256xf32, #tpu.memory_space<vmem>>, vector<2x256xf32>
    tpu.vector_store %arg5[%c0_19, %c0_20], %40 {strides = array<i32>} : memref<2x256xf32, #tpu.memory_space<vmem>>, vector<2x256xf32>,
    return
  }
}

</mosaic_0001>

<bundles_post_ra>
// kernel: swiftformer_classifier_forward.9
= control target key start
LH: loop header
LB: loop body
LE: loop exit
PB: predicated region body
PF: predicated region fallthrough
CT: control target
= control target key end

     0   :  { %8 = vsyncpa [#allocation3], 0  ;;  %s636_s0 = inlined_call_operand.hbm [shape: f32[6,24,40], index: 0, kind: input, shape index: {}]   ;;  %s637_s1 = inlined_call_operand.vmem [shape: f32[32,24], index: 1, kind: input, shape index: {}]   ;;  %s638_s2 = inlined_call_operand.vmem [shape: f32[40,32], index: 2, kind: input, shape index: {}]   ;;  %s639_s3 = inlined_call_operand.vmem [shape: f32[6,32,32], index: 3, kind: output, shape index: {}]  }
   0x1   :  { %10 = vsyncpa [#allocation3 + $0x1], 0  ;;  %s519_s12 = smov 0   ;;  %s521_s13 = smov 0  }
   0x2   :  { %s523_s14 = smov 0   ;;  %s525_s15 = smov 0  }
   0x3 LB: > { %s538_s16 = sadd.s32 4294967295, %s495_s15   ;;  %s541_s17 = sadd.s32 1, %s495_s15   ;;  %s495_s15 = sphi %s525_s15, %s645_s15   ;;  %s491_s14 = sphi %s523_s14, %s644_s14   ;;  %s487_s13 = sphi %s521_s13, %s643_s13   ;;  %s483_s12 = sphi %s519_s12, %s642_s12  }
   0x4   : > { %s20_s18 = ssub.s32 %s495_s15, %s541_s17  ;;  %s23_s19 = sadd.s32 1, %s491_s14 }
   0x5   : > { %p21_p0 = scmp.eq.s32.totalorder %s20_s18, 0  ;;  %p30_p1 = scmp.ne.s32.totalorder %s491_s14, %s487_s13 }
   0x6   : > { %p31_p2 = scmp.eq.s32.totalorder %s495_s15, 0  ;;  %p36_p3 = scmp.ne.s32.totalorder %s487_s13, %s483_s12 }
   0x7   : > { %s551_s20 = scalar_select %p21_p0, %s491_s14, %s23_s19  }
   0x8   : > { %p32_p4 = por %p31_p2, %p30_p1  ;;  %p37_p5 = scmp.eq.s32.totalorder %s538_s16, 0 }
   0x9   : > { %p396_p6 = scmp.lt.s32.totalorder %s495_s15, 6  ;;  %s134_s22 = sand.u32 1, %s491_s14  }
   0xa   : > { %p555_p7 = por %p37_p5, %p36_p3  ;;  %s387_s23 = smul.u32 24, %s134_s22 }
   0xb   : > { %s388_s24 = smul.u32 24, %s495_s15  ;;  %p561_p8 = pnand %p396_p6, %p32_p4 }
   0xc   : > { %s138_s29 = scalar_lea.vmem [#allocation2], %s387_s23  ;;  %p365_p9 = scmp.ge.s32.totalorder %s495_s15, 1 }
   0xd   : > { %s143_s28 = scalar_lea.hbm %s636_s0, %s388_s24  ;;  %s146_s30 = sshll.u32 %s138_s29, 4  ;;  %s147_s30 = int_to_ptr.vmem [resolvable:$true] %s146_s30 }
   0xe   : > { %s144_s4 = sshll.u32 %s143_s28, 4  ;;  %s135_s5 = scalar_lea.sflag [#allocation3], %s134_s22  ;;  %s145_s4 = int_to_ptr.hbm [resolvable:$true] %s144_s4 }
   0xf   : > { %s431_s6 = sshra.s32 %s145_s4, 4  ;;  %p435_p11 = pneg %p561_p8  ;;  %s432_s6 = int_to_ptr.hbm [resolvable:$true] %s431_s6 }
  0x10   : > { %s433_s7 = scalar_lea.hbm %s432_s6, 24  ;;  %s438_s10 = scalar_lea.hbm %s636_s0, 144 }
  0x11   : > { %p434_p10 = scmp.ne.s32.totalorder %s432_s6, %s433_s7  ;;  %p439_p0 = scmp.lt.s32.totalorder %s432_s6, %s636_s0 }
  0x12   : > { %p440_p1 = scmp.lt.s32.totalorder %s438_s10, %s433_s7 }
  0x13   : > { %p436_p12 = pnand %p435_p11, %p434_p10 }
  0x14   : > { %p441_p2 = por %p440_p1, %p439_p0 }
  0x15   : > { %p437_p13 = pneg %p436_p12 }
  0x17   : > { %p442_p3 = pnand %p441_p2, %p437_p13 }
  0x19   : > { %445 = shalt.err (!%p442_p3)
}
  0x1a   : > { %s497_s18 = smov 128   ;;  %s498_s19 = smov 8  }
  0x1b   : > { %395 = dma.hbm_to_vmem [thread:$0]  (!%p561_p8), %s145_s4, 384, %s147_s30, %s135_s5, %s497_s18, %s497_s18, %s498_s19  }
  0x1c   : > { %p154_p4 = scmp.lt.s32.totalorder %s495_s15, 7 }
  0x1e   : > { %p155_p5 = pnand %p365_p9, %p154_p4 }
  0x1f   : > { %s160_s22 = sand.u32 (!%p155_p5), 1, %s487_s13  }
  0x20   : > { %158 = sbr.rel (%p155_p5) target bundleno = 325 (0x145), region = 32  ;;  %s161_s24 = scalar_lea.sflag (!%p155_p5), [#allocation3], %s160_s22 }
  0x21   : > { %s389_s23 = smul.u32 (!%p155_p5), 24, %s160_s22 }
  0x23   : > { %s164_s26 = scalar_lea.vmem (!%p155_p5), [#allocation2], %s389_s23 }
  0x25   : > { %478 = dma.done.wait (%p555_p7), %s161_s24, 384  }
  0x26   : > { %480 = vsyncadd (%p555_p7), %s161_s24, 4294966912  ;;  %v199_v0 = vld [vmem:[%s164_s26 + $0x10] sm:$0xff]  ;;  %v198_v1 = vld [vmem:[%s164_s26 + $0x8] sm:$0xff]  ;;  %vm200_vm0 = vcmask 195584   ;;  %vm247_vm1 = vcmask 326656   ;;  %p188_p6 = scmp.lt.s32.totalorder %s538_s16, 5 }
  0x27   : > { %226 = vmatpush.msra.mxu0 %v199_v0  ;;  %379 = vmatpush.msra.mxu3 %v199_v0  ;;  %v197_v2 = vld [vmem:[%s164_s26] sm:$0xff]  ;;  %v194_v5 = vld [vmem:[%s637_s1 + $0x8] sm:$0xff]  ;;  %v244_v7 = vld [vmem:[%s638_s2 + $0x10] sm:$0xff]  ;;  %vm289_vm2 = vcmask 261120  }
  0x28   : > { %v246_v3 = vld [vmem:[%s638_s2 + $0x20] sm:$0xff]  ;;  %v245_v6 = vld [vmem:[%s638_s2 + $0x18] sm:$0xff]  ;;  %v243_v8 = vld [vmem:[%s638_s2 + $0x8] sm:$0xff]  ;;  %s647_s16 = smov (!%p188_p6, %s538_s16), 5 }
  0x29   : > { %227 = vmatpush.msra.mxu0 %v198_v1  ;;  %380 = vmatpush.msra.mxu3 %v198_v1  ;;  %v193_v4 = vld [vmem:[%s637_s1] sm:$0xff]  ;;  %v195_v9 = vld [vmem:[%s637_s1 + $0x10] sm:$0xff]  ;;  %v196_v10 = vld [vmem:[%s637_s1 + $0x18] sm:$0xff]  ;;  %s378_s22 = sshll.u32 %s647_s16, 5 }
  0x2a   : > { %271 = vmatpush.msra.mxu1 %v246_v3  ;;  %382 = vmatpush.msra.mxu2 %v246_v3  ;;  %v242_v11 = vld [vmem:[%s638_s2] sm:$0xff]  ;;  %s192_s26 = scalar_lea.vmem %s639_s3, %s378_s22 }
  0x2b   : > { %228 = vmatpush.msra.mxu0 %v197_v2  ;;  %381 = vmatpush.msra.mxu3 %v197_v2 }
  0x2c   : > { %368 = vmatmul.msk.f32.vlgmr.msra.gmra.mxu0 %vm200_vm0, %v193_v4  ;;  %369 = vmatmul.msk.f32.vlgmr.msra.gmra.mxu3 %vm200_vm0, %v194_v5 }
  0x2d   : > { %272 = vmatpush.msra.mxu1 %v245_v6  ;;  %383 = vmatpush.msra.mxu2 %v245_v6 }
  0x2f   : > { %273 = vmatpush.msra.mxu1 %v244_v7  ;;  %384 = vmatpush.msra.mxu2 %v244_v7 }
  0x31   : > { %274 = vmatpush.msra.mxu1 %v243_v8  ;;  %385 = vmatpush.msra.mxu2 %v243_v8 }
  0x33   : > { %275 = vmatpush.msra.mxu1 %v242_v11  ;;  %386 = vmatpush.msra.mxu2 %v242_v11 }
  0x34   : > { %370 = vmatmul.msk.f32.gmra.mxu3 %vm200_vm0, %v195_v9 }
  0x3c   : > { %371 = vmatmul.msk.f32.gmra.mxu3 %vm200_vm0, %v196_v10 }
  0xa9   : > { %v230_v12 = vpop.f32.mrf.mxu0 }
  0xaa   : > { %372 = vmatmul.msk.f32.vlgmr.msra.gmra.mxu1 %vm247_vm1, %v230_v12 }
  0xaf   : > { %v233_v13 = vpop.f32.mrf.mxu3 }
  0xb2   : > { %373 = vmatmul.msk.f32.gmra.mxu1 %vm247_vm1, %v233_v13 }
  0xb7   : > { %v236_v14 = vpop.f32.mrf.mxu3 }
  0xb8   : > { %374 = vmatmul.msk.f32.vlgmr.msra.gmra.mxu2 %vm247_vm1, %v236_v14 }
  0xbf   : > { %v239_v15 = vpop.f32.mrf.mxu3 }
  0xc0   : > { %375 = vmatmul.msk.f32.gmra.mxu2 %vm247_vm1, %v239_v15 }
 0x127   : > { %v277_v16 = vpop.f32.mrf.mxu1 }
 0x128   : > { %290 = vst.msk [vmem:[%s192_s26] sm:$0xff] %vm289_vm2, %v277_v16 }
 0x12f   : > { %v280_v17 = vpop.f32.mrf.mxu1 }
 0x130   : > { %291 = vst.msk [vmem:[%s192_s26 + $0x8] sm:$0xff] %vm289_vm2, %v280_v17 }
 0x13b   : > { %v283_v18 = vpop.f32.mrf.mxu2 }
 0x13c   : > { %292 = vst.msk [vmem:[%s192_s26 + $0x10] sm:$0xff] %vm289_vm2, %v283_v18 }
 0x143   : > { %v286_v19 = vpop.f32.mrf.mxu2 }
 0x144   : > { %293 = vst.msk [vmem:[%s192_s26 + $0x18] sm:$0xff] %vm289_vm2, %v286_v19 }
 0x145 PF: > { %p13_p7 = scmp.ge.s32.totalorder %s541_s17, 8   ;;  %s642_s12 = smov %s487_s13 }
 0x146   : > { %s643_s13 = smov %s491_s14  ;;  %s644_s14 = smov %s551_s20 }
 0x147   : > { %s645_s15 = smov %s541_s17  ;;  %15 = sbr.rel (!%p13_p7) target bundleno = 3 (0x3), region = 72 }
 0x14c   :  { %315 = vsyncpa [#allocation3], 1 }
 0x14d   :  { %317 = vsyncpa [#allocation3 + $0x1], 1 }

// kernel: swiftformer_classifier_forward.10
= control target key start
LH: loop header
LB: loop body
LE: loop exit
PB: predicated region body
PF: predicated region fallthrough
CT: control target
= control target key end

     0   :  { %s2765_s21 = smov 0   ;;  %s3634_s0 = inlined_call_operand.vmem [shape: f32[2,17,17,3], index: 0, kind: input, shape index: {}]   ;;  %s3635_s1 = inlined_call_operand.vmem [shape: f32[2,17,17,3], index: 1, kind: input, shape index: {}]   ;;  %s3636_s2 = inlined_call_operand.vmem [shape: f32[2,17,17,3], index: 2, kind: input, shape index: {}]   ;;  %s3637_s3 = inlined_call_operand.vmem [shape: f32[2,17,17,3], index: 3, kind: input, shape index: {}]   ;;  %s3638_s4 = inlined_call_operand.vmem [shape: bf16[9,3,8], index: 4, kind: input, shape index: {}]   ;;  %s3639_s5 = inlined_call_operand.vmem [shape: f32[1,8], index: 5, kind: input, shape index: {}]   ;;  %s3640_s6 = inlined_call_operand.vmem [shape: f32[2,16,16,8], index: 6, kind: output, shape index: {}]  }
   0x1 LB: > { %s2445_s22 = sadd.s32 4294967295, %s2727_s21   ;;  %p2449_p0 = scmp.ge.s32.totalorder %s2727_s21, 1  ;;  %s2727_s21 = sphi %s2765_s21, %s16_s21  }
   0x2   : > { %p242_p1 = scmp.lt.s32.totalorder %s2727_s21, 3 }
   0x4   : > { %p243_p2 = pnand %p2449_p0, %p242_p1 }
   0x6   : > { %246 = sbr.rel (%p243_p2) target bundleno = 733 (0x2dd), region = 44 }
   0xb   : > { %v2456_v0 = vld [vmem:[%s3638_s4 + $0x2] sm:$0x3]  ;;  %vm461_vm0 = vcmask 1040384   ;;  %vm462_vm1 = vcmask 1041408   ;;  %p287_p3 = scmp.lt.s32.totalorder %s2445_s22, 1  ;;  %v2729_v1 = vmov 65535  }
   0xc   : > { %v463_v2 = vsel %vm461_vm0, 4294967295, %v2729_v1  ;;  %v2489_v3 = vld [vmem:[%s3638_s4 + $0x4] sm:$0x3]  ;;  %v2506_v4 = vld [vmem:[%s3638_s4 + $0x6] sm:$0x3]  ;;  %vm412_vm2 = vcmask 23552  }
   0xd   : > { %v2782_v5 = vsel %vm462_vm1, %v463_v2, 0  ;;  %s3686_s22 = smov (!%p287_p3, %s2445_s22), 1  ;;  %v361_v6 = vld [vmem:[%s3638_s4] sm:$0x3]  ;;  %v2523_v7 = vld [vmem:[%s3638_s4 + $0x8] sm:$0x3] }
   0xe   : > { %v466_v8 = vand.u32 %v2456_v0, %v2782_v5  ;;  %v796_v9 = vand.u32 %v2489_v3, %v2782_v5  ;;  %v1018_v10 = vand.u32 %v2506_v4, %v2782_v5  ;;  %s2796_s9 = smul.u32 408, %s3686_s22  ;;  %v606_v11 = vand.u32 %v2782_v5, %v361_v6  ;;  %v2589_v49 = vld [vmem:[%s3638_s4 + $0xc] sm:$0x3]  ;;  %v2638_v51 = vld [vmem:[%s3638_s4 + $0xe] sm:$0x3]  ;;  %s2706_s10 = sshll.u32 %s3686_s22, 8 }
   0xf   : > { %v1240_v12 = vand.u32 %v2523_v7, %v2782_v5  ;;  %v1685_v50 = vand.u32 %v2589_v49, %v2782_v5  ;;  %v2540_v52 = vld [vmem:[%s3638_s4 + $0xa] sm:$0x3]  ;;  %v2687_v53 = vld [vmem:[%s3638_s4 + $0x10] sm:$0x3]  ;;  %v1908_v54 = vand.u32 %v2638_v51, %v2782_v5  ;;  %s3433_s14 = scalar_lea.vmem %s3640_s6, %s2706_s10  ;;  %vm2321_vm3 = vcmask 64512  }
  0x10   : > { %2707 = vmatpush.bf16.msra.mxu1 %v466_v8  ;;  %2708 = vmatpush.bf16.msra.mxu2 %v466_v8  ;;  %s2804_s12 = scalar_lea.vmem %s3635_s1, %s2796_s9  ;;  %v1462_v55 = vand.u32 %v2540_v52, %v2782_v5  ;;  %v2130_v56 = vand.u32 %v2687_v53, %v2782_v5  ;;  %s2883_s25 = scalar_lea.vmem %s3634_s0, %s2796_s9 }
  0x11   : > { %2709 = vmatpush.bf16.msra.mxu3 %v466_v8  ;;  %475 = vmatpush.bf16.msra.mxu0 %v466_v8  ;;  %v370_v13 = vld [vmem:[%s2804_s12 + $0x60] sm:$0xff]  ;;  %v371_v14 = vld [vmem:[%s2804_s12 + $0x68] sm:$0xff]  ;;  %v372_v25 = vld [vmem:[%s2804_s12 + $0x78] sm:$0xff]  ;;  %s2889_s28 = scalar_lea.vmem %s3636_s2, %s2796_s9  ;;  %s2895_s7 = scalar_lea.vmem %s3637_s3, %s2796_s9 }
  0x12   : > { %v378_v15 = vld [vmem:[%s2804_s12 + $0xc0] sm:$0xff]  ;;  %v398_v16 = vpack.c.bf16 %v371_v14, %v370_v13  ;;  %v379_v17 = vld [vmem:[%s2804_s12 + $0xc8] sm:$0xff]  ;;  %v380_v27 = vld [vmem:[%s2804_s12 + $0xd8] sm:$0xff] }
  0x13   : > { %v386_v18 = vld [vmem:[%s2804_s12 + $0x120] sm:$0xff]  ;;  %v387_v19 = vld [vmem:[%s2804_s12 + $0x128] sm:$0xff]  ;;  %v402_v20 = vpack.c.bf16 %v379_v17, %v378_v15  ;;  %v388_v29 = vld [vmem:[%s2804_s12 + $0x138] sm:$0xff] }
  0x14   : > { %805 = vmatpush.bf16.msrb.mxu2 %v796_v9  ;;  %615 = vmatpush.bf16.msrb.mxu1 %v606_v11  ;;  %v406_v21 = vpack.c.bf16 %v387_v19, %v386_v18  ;;  %v362_v22 = vld [vmem:[%s2804_s12] sm:$0xff]  ;;  %v363_v23 = vld [vmem:[%s2804_s12 + $0x8] sm:$0xff]  ;;  %v364_v31 = vld [vmem:[%s2804_s12 + $0x18] sm:$0xff] }
  0x15   : > { %1027 = vmatpush.bf16.msrb.mxu3 %v1018_v10  ;;  %1249 = vmatpush.bf16.msrb.mxu0 %v1240_v12  ;;  %v394_v24 = vpack.c.bf16 %v363_v23, %v362_v22  ;;  %v373_v26 = vld [vmem:[%s2804_s12 + $0x80] sm:$0xff]  ;;  %v374_v37 = vld [vmem:[%s2804_s12 + $0x90] sm:$0xff]  ;;  %v375_v38 = vld [vmem:[%s2804_s12 + $0x98] sm:$0xff] }
  0x16   : > { %2461 = vmatmul.msk.bf16.vlgmr.msra.gmra.mxu1 %vm412_vm2, %v398_v16  ;;  %2465 = vmatmul.msk.bf16.vlgmr.msra.gmra.mxu2 %vm412_vm2, %v402_v20  ;;  %v381_v28 = vld [vmem:[%s2804_s12 + $0xe0] sm:$0xff]  ;;  %v399_v33 = vpack.c.bf16 %v373_v26, %v372_v25  ;;  %v382_v39 = vld [vmem:[%s2804_s12 + $0xf0] sm:$0xff]  ;;  %v383_v40 = vld [vmem:[%s2804_s12 + $0xf8] sm:$0xff]  ;;  %v400_v45 = vpack.c.bf16 %v375_v38, %v374_v37 }
  0x17   : > { %2469 = vmatmul.msk.bf16.vlgmr.msra.gmra.mxu3 %vm412_vm2, %v406_v21  ;;  %2457 = vmatmul.msk.bf16.vlgmr.msra.gmra.mxu0 %vm412_vm2, %v394_v24  ;;  %v389_v30 = vld [vmem:[%s2804_s12 + $0x140] sm:$0xff]  ;;  %v403_v34 = vpack.c.bf16 %v381_v28, %v380_v27  ;;  %v390_v41 = vld [vmem:[%s2804_s12 + $0x150] sm:$0xff]  ;;  %v391_v42 = vld [vmem:[%s2804_s12 + $0x158] sm:$0xff]  ;;  %v404_v46 = vpack.c.bf16 %v383_v40, %v382_v39 }
  0x18   : > { %v365_v32 = vld [vmem:[%s2804_s12 + $0x20] sm:$0xff]  ;;  %v407_v35 = vpack.c.bf16 %v389_v30, %v388_v29  ;;  %v366_v43 = vld [vmem:[%s2804_s12 + $0x30] sm:$0xff]  ;;  %v367_v44 = vld [vmem:[%s2804_s12 + $0x38] sm:$0xff]  ;;  %v408_v47 = vpack.c.bf16 %v391_v42, %v390_v41  ;;  %1694 = vmatpush.bf16.msra.mxu2 %v1685_v50  ;;  %1471 = vmatpush.bf16.msra.mxu1 %v1462_v55 }
  0x19   : > { %v2826_v36 = vpack.c.bf16 %v365_v32, %v364_v31  ;;  %v2841_v48 = vpack.c.bf16 %v367_v44, %v366_v43  ;;  %1917 = vmatpush.bf16.msra.mxu3 %v1908_v54  ;;  %2139 = vmatpush.bf16.msra.mxu0 %v2130_v56  ;;  %v376_v57 = vld [vmem:[%s2804_s12 + $0xa8] sm:$0xff]  ;;  %v377_v58 = vld [vmem:[%s2804_s12 + $0xb0] sm:$0xff]  ;;  %v313_v5 = vld [vmem:[%s2883_s25] sm:$0xff] }
  0x1a   : > { %v384_v59 = vld [vmem:[%s2804_s12 + $0x108] sm:$0xff]  ;;  %v385_v60 = vld [vmem:[%s2804_s12 + $0x110] sm:$0xff]  ;;  %v401_v1 = vpack.c.bf16 %v377_v58, %v376_v57  ;;  %v919_v9 = vld [vmem:[%s2889_s28] sm:$0xff] }
  0x1b   : > { %v392_v61 = vld [vmem:[%s2804_s12 + $0x168] sm:$0xff]  ;;  %v393_v62 = vld [vmem:[%s2804_s12 + $0x170] sm:$0xff]  ;;  %v405_v2 = vpack.c.bf16 %v385_v60, %v384_v59  ;;  %v1141_v11 = vld [vmem:[%s2895_s7] sm:$0xff] }
  0x1c   : > { %v368_v63 = vld [vmem:[%s2804_s12 + $0x48] sm:$0xff]  ;;  %v369_v0 = vld [vmem:[%s2804_s12 + $0x50] sm:$0xff]  ;;  %v409_v3 = vpack.c.bf16 %v393_v62, %v392_v61  ;;  %v315_v17 = vld [vmem:[%s2883_s25 + $0x18] sm:$0xff] }
  0x1d   : > { %v2872_v4 = vpack.c.bf16 %v369_v0, %v368_v63  ;;  %v314_v6 = vld [vmem:[%s2883_s25 + $0x8] sm:$0xff]  ;;  %v316_v18 = vld [vmem:[%s2883_s25 + $0x20] sm:$0xff]  ;;  %v921_v21 = vld [vmem:[%s2889_s28 + $0x18] sm:$0xff] }
  0x1e   : > { %v697_v7 = vld [vmem:[%s2883_s25 + $0x1] sm:$0xff]  ;;  %v698_v8 = vld [vmem:[%s2883_s25 + $0x9] sm:$0xff]  ;;  %v345_v13 = vpack.c.bf16 %v314_v6, %v313_v5  ;;  %v699_v19 = vld [vmem:[%s2883_s25 + $0x19] sm:$0xff]  ;;  %v2917_v25 = vpack.c.bf16 %v316_v18, %v315_v17 }
  0x1f   : > { %v920_v10 = vld [vmem:[%s2889_s28 + $0x8] sm:$0xff]  ;;  %v729_v14 = vpack.c.bf16 %v698_v8, %v697_v7  ;;  %v922_v22 = vld [vmem:[%s2889_s28 + $0x20] sm:$0xff]  ;;  %v1143_v23 = vld [vmem:[%s2895_s7 + $0x18] sm:$0xff] }
  0x20   : > { %v1142_v12 = vld [vmem:[%s2895_s7 + $0x8] sm:$0xff]  ;;  %v951_v15 = vpack.c.bf16 %v920_v10, %v919_v9  ;;  %v1144_v24 = vld [vmem:[%s2895_s7 + $0x20] sm:$0xff]  ;;  %v952_v27 = vpack.c.bf16 %v922_v22, %v921_v21  ;;  %v317_v29 = vld [vmem:[%s2883_s25 + $0x30] sm:$0xff] }
  0x21   : > { %v1173_v16 = vpack.c.bf16 %v1142_v12, %v1141_v11  ;;  %v700_v20 = vld [vmem:[%s2883_s25 + $0x21] sm:$0xff]  ;;  %v1174_v28 = vpack.c.bf16 %v1144_v24, %v1143_v23  ;;  %v318_v30 = vld [vmem:[%s2883_s25 + $0x38] sm:$0xff]  ;;  %v320_v43 = vld [vmem:[%s2883_s25 + $0x50] sm:$0xff] }
  0x22   : > { %v2919_v26 = vpack.c.bf16 %v700_v20, %v699_v19  ;;  %v701_v31 = vld [vmem:[%s2883_s25 + $0x31] sm:$0xff]  ;;  %v702_v32 = vld [vmem:[%s2883_s25 + $0x39] sm:$0xff]  ;;  %v2935_v38 = vpack.c.bf16 %v318_v30, %v317_v29  ;;  %v319_v42 = vld [vmem:[%s2883_s25 + $0x48] sm:$0xff] }
  0x23   : > { %v1146_v37 = vld [vmem:[%s2895_s7 + $0x38] sm:$0xff]  ;;  %v2937_v39 = vpack.c.bf16 %v702_v32, %v701_v31  ;;  %v703_v44 = vld [vmem:[%s2883_s25 + $0x49] sm:$0xff]  ;;  %v2953_v51 = vpack.c.bf16 %v320_v43, %v319_v42  ;;  %v321_v55 = vld [vmem:[%s2883_s25 + $0x60] sm:$0xff] }
  0x24   : > { %v1147_v49 = vld [vmem:[%s2895_s7 + $0x48] sm:$0xff]  ;;  %v1148_v50 = vld [vmem:[%s2895_s7 + $0x50] sm:$0xff]  ;;  %v927_v59 = vld [vmem:[%s2889_s28 + $0x60] sm:$0xff] }
  0x25   : > { %v1176_v54 = vpack.c.bf16 %v1148_v50, %v1147_v49  ;;  %v322_v56 = vld [vmem:[%s2883_s25 + $0x68] sm:$0xff]  ;;  %v1149_v61 = vld [vmem:[%s2895_s7 + $0x60] sm:$0xff]  ;;  %v323_v10 = vld [vmem:[%s2883_s25 + $0x78] sm:$0xff] }
  0x26   : > { %2462 = vmatmul.msk.bf16.gmra.mxu1 %vm412_vm2, %v399_v33  ;;  %2466 = vmatmul.msk.bf16.gmra.mxu2 %vm412_vm2, %v403_v34  ;;  %v923_v33 = vld [vmem:[%s2889_s28 + $0x30] sm:$0xff]  ;;  %v924_v34 = vld [vmem:[%s2889_s28 + $0x38] sm:$0xff]  ;;  %v705_v57 = vld [vmem:[%s2883_s25 + $0x61] sm:$0xff]  ;;  %v2971_v63 = vpack.c.bf16 %v322_v56, %v321_v55 }
  0x27   : > { %2470 = vmatmul.msk.bf16.gmra.mxu3 %vm412_vm2, %v407_v35  ;;  %2458 = vmatmul.msk.bf16.gmra.mxu0 %vm412_vm2, %v2826_v36  ;;  %v1145_v35 = vld [vmem:[%s2895_s7 + $0x30] sm:$0xff]  ;;  %v953_v40 = vpack.c.bf16 %v924_v34, %v923_v33  ;;  %v928_v60 = vld [vmem:[%s2889_s28 + $0x68] sm:$0xff]  ;;  %v324_v11 = vld [vmem:[%s2883_s25 + $0x80] sm:$0xff] }
  0x28   : > { %v1175_v41 = vpack.c.bf16 %v1146_v37, %v1145_v35  ;;  %v706_v58 = vld [vmem:[%s2883_s25 + $0x69] sm:$0xff]  ;;  %v707_v12 = vld [vmem:[%s2883_s25 + $0x79] sm:$0xff]  ;;  %v3005_v20 = vpack.c.bf16 %v324_v11, %v323_v10  ;;  %v709_v34 = vld [vmem:[%s2883_s25 + $0x91] sm:$0xff] }
  0x29   : > { %v1150_v62 = vld [vmem:[%s2895_s7 + $0x68] sm:$0xff]  ;;  %v1152_v17 = vld [vmem:[%s2895_s7 + $0x80] sm:$0xff]  ;;  %v325_v32 = vld [vmem:[%s2883_s25 + $0x90] sm:$0xff] }
  0x2a   : > { %v326_v33 = vld [vmem:[%s2883_s25 + $0x98] sm:$0xff]  ;;  %v931_v37 = vld [vmem:[%s2889_s28 + $0x90] sm:$0xff] }
  0x2b   : > { %v710_v35 = vld [vmem:[%s2883_s25 + $0x99] sm:$0xff]  ;;  %v1156_v10 = vld [vmem:[%s2895_s7 + $0xb0] sm:$0xff] }
  0x2c   : > { %v1154_v42 = vld [vmem:[%s2895_s7 + $0x98] sm:$0xff] }
  0x36   : > { %2463 = vmatmul.msk.bf16.gmra.mxu1 %vm412_vm2, %v400_v45  ;;  %2467 = vmatmul.msk.bf16.gmra.mxu2 %vm412_vm2, %v404_v46  ;;  %v704_v45 = vld [vmem:[%s2883_s25 + $0x51] sm:$0xff]  ;;  %v925_v46 = vld [vmem:[%s2889_s28 + $0x48] sm:$0xff] }
  0x37   : > { %2471 = vmatmul.msk.bf16.gmra.mxu3 %vm412_vm2, %v408_v47  ;;  %2459 = vmatmul.msk.bf16.gmra.mxu0 %vm412_vm2, %v2841_v48  ;;  %v926_v47 = vld [vmem:[%s2889_s28 + $0x50] sm:$0xff]  ;;  %v2955_v52 = vpack.c.bf16 %v704_v45, %v703_v44  ;;  %v3039_v45 = vpack.c.bf16 %v326_v33, %v325_v32 }
  0x38   : > { %v954_v53 = vpack.c.bf16 %v926_v47, %v925_v46  ;;  %v3043_v47 = vpack.c.bf16 %v710_v35, %v709_v34  ;;  %v329_v35 = vld [vmem:[%s2883_s25 + $0xc0] sm:$0xff] }
  0x46   : > { %2464 = vmatmul.msk.bf16.gmra.mxu1 %vm412_vm2, %v401_v1  ;;  %2468 = vmatmul.msk.bf16.gmra.mxu2 %vm412_vm2, %v405_v2  ;;  %v2975_v1 = vpack.c.bf16 %v706_v58, %v705_v57  ;;  %v955_v2 = vpack.c.bf16 %v928_v60, %v927_v59  ;;  %v327_v58 = vld [vmem:[%s2883_s25 + $0xa8] sm:$0xff]  ;;  %v328_v59 = vld [vmem:[%s2883_s25 + $0xb0] sm:$0xff] }
  0x47   : > { %2472 = vmatmul.msk.bf16.gmra.mxu3 %vm412_vm2, %v409_v3  ;;  %2460 = vmatmul.msk.bf16.gmra.mxu0 %vm412_vm2, %v2872_v4  ;;  %v1177_v3 = vpack.c.bf16 %v1150_v62, %v1149_v61  ;;  %v711_v60 = vld [vmem:[%s2883_s25 + $0xa9] sm:$0xff]  ;;  %v712_v61 = vld [vmem:[%s2883_s25 + $0xb1] sm:$0xff] }
  0x48   : > { %v933_v62 = vld [vmem:[%s2889_s28 + $0xa8] sm:$0xff] }
  0x56   : > { %2473 = vmatmul.msk.bf16.vlgmr.msrb.gmra.mxu1 %vm412_vm2, %v345_v13  ;;  %2490 = vmatmul.msk.bf16.vlgmr.msrb.gmra.mxu2 %vm412_vm2, %v729_v14  ;;  %v708_v13 = vld [vmem:[%s2883_s25 + $0x81] sm:$0xff]  ;;  %v929_v14 = vld [vmem:[%s2889_s28 + $0x78] sm:$0xff] }
  0x57   : > { %2507 = vmatmul.msk.bf16.vlgmr.msrb.gmra.mxu3 %vm412_vm2, %v951_v15  ;;  %2524 = vmatmul.msk.bf16.vlgmr.msrb.gmra.mxu0 %vm412_vm2, %v1173_v16  ;;  %v930_v15 = vld [vmem:[%s2889_s28 + $0x80] sm:$0xff]  ;;  %v1151_v16 = vld [vmem:[%s2895_s7 + $0x78] sm:$0xff]  ;;  %v3009_v22 = vpack.c.bf16 %v708_v13, %v707_v12  ;;  %v3073_v13 = vpack.c.bf16 %v328_v59, %v327_v58  ;;  %v1158_v58 = vld [vmem:[%s2895_s7 + $0xc8] sm:$0xff] }
  0x58   : > { %v956_v23 = vpack.c.bf16 %v930_v15, %v929_v14  ;;  %v1178_v24 = vpack.c.bf16 %v1152_v17, %v1151_v16  ;;  %v3077_v15 = vpack.c.bf16 %v712_v61, %v711_v60 }
  0x59   : > { %3647 = vst [vmem:[#allocation4_spill] sm:$0xff] %v3073_v13 }
  0x5a   : > { %3648 = vst [vmem:[#allocation5_spill] sm:$0xff] %v3077_v15 }
  0x66   : > { %2474 = vmatmul.msk.bf16.gmra.mxu1 %vm412_vm2, %v2917_v25  ;;  %2491 = vmatmul.msk.bf16.gmra.mxu2 %vm412_vm2, %v2919_v26 }
  0x67   : > { %2508 = vmatmul.msk.bf16.gmra.mxu3 %vm412_vm2, %v952_v27  ;;  %2525 = vmatmul.msk.bf16.gmra.mxu0 %vm412_vm2, %v1174_v28 }
  0x76   : > { %2475 = vmatmul.msk.bf16.gmra.mxu1 %vm412_vm2, %v2935_v38  ;;  %2492 = vmatmul.msk.bf16.gmra.mxu2 %vm412_vm2, %v2937_v39 }
  0x77   : > { %2509 = vmatmul.msk.bf16.gmra.mxu3 %vm412_vm2, %v953_v40  ;;  %2526 = vmatmul.msk.bf16.gmra.mxu0 %vm412_vm2, %v1175_v41  ;;  %v932_v40 = vld [vmem:[%s2889_s28 + $0x98] sm:$0xff]  ;;  %v1153_v41 = vld [vmem:[%s2895_s7 + $0x90] sm:$0xff] }
  0x78   : > { %v957_v49 = vpack.c.bf16 %v932_v40, %v931_v37  ;;  %v1179_v50 = vpack.c.bf16 %v1154_v42, %v1153_v41  ;;  %v330_v37 = vld [vmem:[%s2883_s25 + $0xc8] sm:$0xff]  ;;  %v935_v42 = vld [vmem:[%s2889_s28 + $0xc0] sm:$0xff] }
  0x79   : > { %v713_v40 = vld [vmem:[%s2883_s25 + $0xc1] sm:$0xff]  ;;  %v714_v41 = vld [vmem:[%s2883_s25 + $0xc9] sm:$0xff]  ;;  %v3107_v61 = vpack.c.bf16 %v330_v37, %v329_v35 }
  0x7b   : > { %3651 = vst [vmem:[#allocation8_spill] sm:$0xff] %v3107_v61 }
  0x86   : > { %2476 = vmatmul.msk.bf16.gmra.mxu1 %vm412_vm2, %v2953_v51  ;;  %2493 = vmatmul.msk.bf16.gmra.mxu2 %vm412_vm2, %v2955_v52 }
  0x87   : > { %2510 = vmatmul.msk.bf16.gmra.mxu3 %vm412_vm2, %v954_v53  ;;  %2527 = vmatmul.msk.bf16.gmra.mxu0 %vm412_vm2, %v1176_v54 }
  0x93   : > { %v2973_v0 = vpop.f32.mrf.mxu1 }
  0x94   : > { %v2977_v5 = vpop.f32.mrf.mxu0 }
  0x96   : > { %2477 = vmatmul.msk.bf16.gmra.mxu1 %vm412_vm2, %v2971_v63  ;;  %2494 = vmatmul.msk.bf16.gmra.mxu2 %vm412_vm2, %v2975_v1 }
  0x97   : > { %2511 = vmatmul.msk.bf16.gmra.mxu3 %vm412_vm2, %v955_v2  ;;  %2528 = vmatmul.msk.bf16.gmra.mxu0 %vm412_vm2, %v1177_v3  ;;  %v934_v2 = vld [vmem:[%s2889_s28 + $0xb0] sm:$0xff]  ;;  %v1155_v3 = vld [vmem:[%s2895_s7 + $0xa8] sm:$0xff] }
  0x98   : > { %v958_v16 = vpack.c.bf16 %v934_v2, %v933_v62  ;;  %v1180_v17 = vpack.c.bf16 %v1156_v10, %v1155_v3  ;;  %v3109_v2 = vpack.c.bf16 %v714_v41, %v713_v40 }
  0x99   : > { %v2985_v6 = vpop.f32.mrf.mxu2 }
  0x9a   : > { %v2987_v7 = vpop.f32.mrf.mxu3  ;;  %3652 = vst [vmem:[#allocation9_spill] sm:$0xff] %v3109_v2 }
  0x9b   : > { %v2989_v8 = vpop.f32.mrf.mxu1 }
  0x9c   : > { %v2991_v9 = vpop.f32.mrf.mxu0 }
  0xa1   : > { %v3001_v18 = vpop.f32.mrf.mxu2 }
  0xa2   : > { %v3003_v19 = vpop.f32.mrf.mxu3 }
  0xa3   : > { %v3007_v21 = vpop.f32.mrf.mxu1 }
  0xa4   : > { %v3011_v27 = vpop.f32.mrf.mxu0 }
  0xa6   : > { %2478 = vmatmul.msk.bf16.gmra.mxu1 %vm412_vm2, %v3005_v20  ;;  %2495 = vmatmul.msk.bf16.gmra.mxu2 %vm412_vm2, %v3009_v22 }
  0xa7   : > { %2512 = vmatmul.msk.bf16.gmra.mxu3 %vm412_vm2, %v956_v23  ;;  %2529 = vmatmul.msk.bf16.gmra.mxu0 %vm412_vm2, %v1178_v24 }
  0xa9   : > { %v3019_v28 = vpop.f32.mrf.mxu2 }
  0xaa   : > { %v3021_v29 = vpop.f32.mrf.mxu3 }
  0xab   : > { %v3023_v30 = vpop.f32.mrf.mxu1 }
  0xac   : > { %v3025_v31 = vpop.f32.mrf.mxu0 }
  0xb1   : > { %v3035_v43 = vpop.f32.mrf.mxu2 }
  0xb2   : > { %v3037_v44 = vpop.f32.mrf.mxu3 }
  0xb3   : > { %v3041_v46 = vpop.f32.mrf.mxu1 }
  0xb4   : > { %v3045_v53 = vpop.f32.mrf.mxu0 }
  0xb6   : > { %2479 = vmatmul.msk.bf16.gmra.mxu1 %vm412_vm2, %v3039_v45  ;;  %2496 = vmatmul.msk.bf16.gmra.mxu2 %vm412_vm2, %v3043_v47 }
  0xb7   : > { %2513 = vmatmul.msk.bf16.gmra.mxu3 %vm412_vm2, %v957_v49  ;;  %2530 = vmatmul.msk.bf16.gmra.mxu0 %vm412_vm2, %v1179_v50  ;;  %v936_v49 = vld [vmem:[%s2889_s28 + $0xc8] sm:$0xff]  ;;  %v1157_v50 = vld [vmem:[%s2895_s7 + $0xc0] sm:$0xff] }
  0xb8   : > { %v959_v3 = vpack.c.bf16 %v936_v49, %v935_v42 }
  0xb9   : > { %v3053_v54 = vpop.f32.mrf.mxu2 }
  0xba   : > { %v3055_v55 = vpop.f32.mrf.mxu3 }
  0xbb   : > { %3645 = vst [vmem:[#allocation2_spill] sm:$0xff] %v3055_v55  ;;  %v3057_v56 = vpop.f32.mrf.mxu1 }
  0xbc   : > { %v3059_v57 = vpop.f32.mrf.mxu0 }
  0xc1   : > { %v3069_v11 = vpop.f32.mrf.mxu2 }
  0xc2   : > { %v3071_v12 = vpop.f32.mrf.mxu3 }
  0xc3   : > { %3646 = vst [vmem:[#allocation3_spill] sm:$0xff] %v3071_v12  ;;  %v3075_v14 = vpop.f32.mrf.mxu1  ;;  %v1160_v12 = vld [vmem:[%s2895_s7 + $0xe0] sm:$0xff] }
  0xc4   : > { %v3079_v23 = vpop.f32.mrf.mxu0 }
  0xc6   : > { %2480 = vmatmul.msk.bf16.gmra.mxu1 %vm412_vm2, %v3073_v13  ;;  %2497 = vmatmul.msk.bf16.gmra.mxu2 %vm412_vm2, %v3077_v15 }
  0xc7   : > { %2514 = vmatmul.msk.bf16.gmra.mxu3 %vm412_vm2, %v958_v16  ;;  %2531 = vmatmul.msk.bf16.gmra.mxu0 %vm412_vm2, %v1180_v17  ;;  %v1181_v16 = vpack.c.bf16 %v1158_v58, %v1157_v50  ;;  %v331_v50 = vld [vmem:[%s2883_s25 + $0xd8] sm:$0xff]  ;;  %v332_v58 = vld [vmem:[%s2883_s25 + $0xe0] sm:$0xff] }
  0xc8   : > { %v3129_v15 = vpack.c.bf16 %v332_v58, %v331_v50  ;;  %v333_v50 = vld [vmem:[%s2883_s25 + $0xf0] sm:$0xff]  ;;  %v334_v58 = vld [vmem:[%s2883_s25 + $0xf8] sm:$0xff] }
  0xc9   : > { %v3087_v24 = vpop.f32.mrf.mxu2 }
  0xca   : > { %v3089_v32 = vpop.f32.mrf.mxu3 }
  0xcb   : > { %3649 = vst [vmem:[#allocation6_spill] sm:$0xff] %v3089_v32  ;;  %v3091_v33 = vpop.f32.mrf.mxu1  ;;  %v716_v32 = vld [vmem:[%s2883_s25 + $0xe1] sm:$0xff] }
  0xcc   : > { %v3093_v34 = vpop.f32.mrf.mxu0 }
  0xd1   : > { %v3103_v59 = vpop.f32.mrf.mxu2 }
  0xd2   : > { %v3105_v60 = vpop.f32.mrf.mxu3 }
  0xd3   : > { %3650 = vst [vmem:[#allocation7_spill] sm:$0xff] %v3105_v60  ;;  %v617_v62 = vpop.f32.mrf.mxu1 }
  0xd4   : > { %v618_v10 = vadd.f32 %v617_v62, %v2977_v5  ;;  %v1251_v17 = vpop.f32.mrf.mxu0  ;;  %v715_v62 = vld [vmem:[%s2883_s25 + $0xd9] sm:$0xff] }
  0xd5   : > { %v3131_v13 = vpack.c.bf16 %v716_v32, %v715_v62  ;;  %v717_v62 = vld [vmem:[%s2883_s25 + $0xf1] sm:$0xff] }
  0xd6   : > { %2481 = vmatmul.msk.bf16.gmra.mxu1 %vm412_vm2, %v3107_v61  ;;  %2498 = vmatmul.msk.bf16.gmra.mxu2 %vm412_vm2, %v3109_v2  ;;  %v937_v2 = vld [vmem:[%s2889_s28 + $0xd8] sm:$0xff] }
  0xd7   : > { %2515 = vmatmul.msk.bf16.gmra.mxu3 %vm412_vm2, %v959_v3  ;;  %2532 = vmatmul.msk.bf16.gmra.mxu0 %vm412_vm2, %v1181_v16  ;;  %v938_v3 = vld [vmem:[%s2889_s28 + $0xe0] sm:$0xff]  ;;  %v1159_v61 = vld [vmem:[%s2895_s7 + $0xd8] sm:$0xff] }
  0xd9   : > { %v807_v35 = vpop.f32.mrf.mxu2 }
  0xda   : > { %v1029_v5 = vpop.f32.mrf.mxu3  ;;  %v887_v37 = vadd.f32 %v807_v35, %v618_v10 }
  0xdb   : > { %v619_v40 = vpop.f32.mrf.mxu1 }
  0xdc   : > { %v620_v41 = vadd.f32 %v619_v40, %v2991_v9  ;;  %v1109_v42 = vadd.f32 %v1029_v5, %v887_v37  ;;  %v1253_v49 = vpop.f32.mrf.mxu0  ;;  %v960_v9 = vpack.c.bf16 %v938_v3, %v937_v2  ;;  %v1182_v37 = vpack.c.bf16 %v1160_v12, %v1159_v61 }
  0xde   : > { %v3122_v60 = vadd.f32 %v1251_v17, %v1109_v42 }
  0xe0   : > { %3653 = vst [vmem:[#allocation10_spill] sm:$0xff] %v3122_v60 }
  0xe1   : > { %v809_v16 = vpop.f32.mrf.mxu2 }
  0xe2   : > { %v1031_v55 = vpop.f32.mrf.mxu3  ;;  %v888_v10 = vadd.f32 %v809_v16, %v620_v41  ;;  %v718_v16 = vld [vmem:[%s2883_s25 + $0xf9] sm:$0xff] }
  0xe3   : > { %v622_v35 = vpop.f32.mrf.mxu1  ;;  %v3155_v60 = vpack.c.bf16 %v718_v16, %v717_v62 }
  0xe4   : > { %v623_v5 = vadd.f32 %v622_v35, %v3011_v27  ;;  %v1110_v17 = vadd.f32 %v1031_v55, %v888_v10  ;;  %v1256_v40 = vpop.f32.mrf.mxu0  ;;  %v940_v10 = vld [vmem:[%s2889_s28 + $0xf8] sm:$0xff]  ;;  %v1161_v35 = vld [vmem:[%s2895_s7 + $0xf0] sm:$0xff] }
  0xe6   : > { %2482 = vmatmul.msk.bf16.gmra.mxu1 %vm412_vm2, %v3129_v15  ;;  %2499 = vmatmul.msk.bf16.gmra.mxu2 %vm412_vm2, %v3131_v13  ;;  %v3139_v32 = vadd.f32 %v1253_v49, %v1110_v17  ;;  %v939_v49 = vld [vmem:[%s2889_s28 + $0xf0] sm:$0xff] }
  0xe7   : > { %2516 = vmatmul.msk.bf16.gmra.mxu3 %vm412_vm2, %v960_v9  ;;  %2533 = vmatmul.msk.bf16.gmra.mxu0 %vm412_vm2, %v1182_v37  ;;  %v1162_v9 = vld [vmem:[%s2895_s7 + $0xf8] sm:$0xff] }
  0xe8   : > { %3654 = vst [vmem:[#allocation11_spill] sm:$0xff] %v3139_v32  ;;  %v3153_v32 = vpack.c.bf16 %v334_v58, %v333_v50 }
  0xe9   : > { %v812_v27 = vpop.f32.mrf.mxu2 }
  0xea   : > { %v1034_v55 = vpop.f32.mrf.mxu3  ;;  %v889_v12 = vadd.f32 %v812_v27, %v623_v5 }
  0xeb   : > { %v624_v61 = vpop.f32.mrf.mxu1 }
  0xec   : > { %v625_v2 = vadd.f32 %v624_v61, %v3025_v31  ;;  %v1111_v41 = vadd.f32 %v1034_v55, %v889_v12  ;;  %v1258_v42 = vpop.f32.mrf.mxu0  ;;  %v961_v31 = vpack.c.bf16 %v940_v10, %v939_v49  ;;  %v1183_v12 = vpack.c.bf16 %v1162_v9, %v1161_v35  ;;  %v335_v10 = vld [vmem:[%s2883_s25 + $0x108] sm:$0xff]  ;;  %v336_v35 = vld [vmem:[%s2883_s25 + $0x110] sm:$0xff] }
  0xed   : > { %v719_v9 = vld [vmem:[%s2883_s25 + $0x109] sm:$0xff] }
  0xee   : > { %v3146_v3 = vadd.f32 %v1256_v40, %v1111_v41 }
  0xf0   : > { %3655 = vst [vmem:[#allocation12_spill] sm:$0xff] %v3146_v3 }
  0xf1   : > { %v814_v37 = vpop.f32.mrf.mxu2 }
  0xf2   : > { %v1036_v17 = vpop.f32.mrf.mxu3  ;;  %v890_v5 = vadd.f32 %v814_v37, %v625_v2 }
  0xf3   : > { %v627_v27 = vpop.f32.mrf.mxu1 }
  0xf4   : > { %v628_v55 = vadd.f32 %v627_v27, %v3045_v53  ;;  %v1112_v40 = vadd.f32 %v1036_v17, %v890_v5  ;;  %v1261_v61 = vpop.f32.mrf.mxu0  ;;  %v720_v17 = vld [vmem:[%s2883_s25 + $0x111] sm:$0xff]  ;;  %v1163_v27 = vld [vmem:[%s2895_s7 + $0x108] sm:$0xff] }
  0xf5   : > { %v942_v5 = vld [vmem:[%s2889_s28 + $0x110] sm:$0xff]  ;;  %v3179_v3 = vpack.c.bf16 %v720_v17, %v719_v9 }
  0xf6   : > { %2483 = vmatmul.msk.bf16.gmra.mxu1 %vm412_vm2, %v3153_v32  ;;  %2500 = vmatmul.msk.bf16.gmra.mxu2 %vm412_vm2, %v3155_v60  ;;  %v3163_v2 = vadd.f32 %v1258_v42, %v1112_v40  ;;  %v941_v42 = vld [vmem:[%s2889_s28 + $0x108] sm:$0xff] }
  0xf7   : > { %2517 = vmatmul.msk.bf16.gmra.mxu3 %vm412_vm2, %v961_v31  ;;  %2534 = vmatmul.msk.bf16.gmra.mxu0 %vm412_vm2, %v1183_v12  ;;  %v1164_v31 = vld [vmem:[%s2895_s7 + $0x110] sm:$0xff] }
  0xf8   : > { %3656 = vst [vmem:[#allocation13_spill] sm:$0xff] %v3163_v2  ;;  %v3177_v2 = vpack.c.bf16 %v336_v35, %v335_v10 }
  0xf9   : > { %v817_v53 = vpop.f32.mrf.mxu2 }
  0xfa   : > { %v1039_v41 = vpop.f32.mrf.mxu3  ;;  %v891_v50 = vadd.f32 %v817_v53, %v628_v55 }
  0xfb   : > { %v629_v58 = vpop.f32.mrf.mxu1 }
  0xfc   : > { %v630_v62 = vadd.f32 %v629_v58, %v3059_v57  ;;  %v1113_v16 = vadd.f32 %v1039_v41, %v891_v50  ;;  %v1263_v49 = vpop.f32.mrf.mxu0  ;;  %v962_v57 = vpack.c.bf16 %v942_v5, %v941_v42  ;;  %v1184_v50 = vpack.c.bf16 %v1164_v31, %v1163_v27  ;;  %v337_v5 = vld [vmem:[%s2883_s25 + $0x120] sm:$0xff]  ;;  %v338_v27 = vld [vmem:[%s2883_s25 + $0x128] sm:$0xff] }
  0xfd   : > { %v721_v31 = vld [vmem:[%s2883_s25 + $0x121] sm:$0xff] }
  0xfe   : > { %v3170_v37 = vadd.f32 %v1261_v61, %v1113_v16 }
 0x100   : > { %3657 = vst [vmem:[#allocation14_spill] sm:$0xff] %v3170_v37 }
 0x101   : > { %v819_v12 = vpop.f32.mrf.mxu2 }
 0x102   : > { %v1041_v40 = vpop.f32.mrf.mxu3  ;;  %v892_v55 = vadd.f32 %v819_v12, %v630_v62 }
 0x103   : > { %v632_v53 = vpop.f32.mrf.mxu1 }
 0x104   : > { %v633_v41 = vadd.f32 %v632_v53, %v3079_v23  ;;  %v1114_v61 = vadd.f32 %v1041_v40, %v892_v55  ;;  %v1266_v58 = vpop.f32.mrf.mxu0  ;;  %v722_v40 = vld [vmem:[%s2883_s25 + $0x129] sm:$0xff]  ;;  %v1165_v53 = vld [vmem:[%s2895_s7 + $0x120] sm:$0xff] }
 0x105   : > { %v944_v55 = vld [vmem:[%s2889_s28 + $0x128] sm:$0xff]  ;;  %v3203_v37 = vpack.c.bf16 %v722_v40, %v721_v31 }
 0x106   : > { %2484 = vmatmul.msk.bf16.gmra.mxu1 %vm412_vm2, %v3177_v2  ;;  %2501 = vmatmul.msk.bf16.gmra.mxu2 %vm412_vm2, %v3179_v3  ;;  %v3187_v62 = vadd.f32 %v1263_v49, %v1114_v61  ;;  %v943_v49 = vld [vmem:[%s2889_s28 + $0x120] sm:$0xff] }
 0x107   : > { %2518 = vmatmul.msk.bf16.gmra.mxu3 %vm412_vm2, %v962_v57  ;;  %2535 = vmatmul.msk.bf16.gmra.mxu0 %vm412_vm2, %v1184_v50  ;;  %v1166_v57 = vld [vmem:[%s2895_s7 + $0x128] sm:$0xff] }
 0x108   : > { %3658 = vst [vmem:[#allocation15_spill] sm:$0xff] %v3187_v62  ;;  %v3201_v62 = vpack.c.bf16 %v338_v27, %v337_v5 }
 0x109   : > { %v822_v23 = vpop.f32.mrf.mxu2 }
 0x10a   : > { %v1044_v16 = vpop.f32.mrf.mxu3  ;;  %v893_v10 = vadd.f32 %v822_v23, %v633_v41 }
 0x10b   : > { %v634_v35 = vpop.f32.mrf.mxu1 }
 0x10c   : > { %v635_v9 = vadd.f32 %v634_v35, %v3093_v34  ;;  %v1115_v17 = vadd.f32 %v1044_v16, %v893_v10  ;;  %v1268_v42 = vpop.f32.mrf.mxu0  ;;  %v963_v34 = vpack.c.bf16 %v944_v55, %v943_v49  ;;  %v1185_v16 = vpack.c.bf16 %v1166_v57, %v1165_v53  ;;  %v339_v55 = vld [vmem:[%s2883_s25 + $0x138] sm:$0xff]  ;;  %v340_v53 = vld [vmem:[%s2883_s25 + $0x140] sm:$0xff] }
 0x10d   : > { %v723_v57 = vld [vmem:[%s2883_s25 + $0x139] sm:$0xff] }
 0x10e   : > { %v3194_v12 = vadd.f32 %v1266_v58, %v1115_v17 }
 0x110   : > { %3659 = vst [vmem:[#allocation16_spill] sm:$0xff] %v3194_v12 }
 0x111   : > { %v824_v50 = vpop.f32.mrf.mxu2 }
 0x112   : > { %v1046_v61 = vpop.f32.mrf.mxu3  ;;  %v894_v41 = vadd.f32 %v824_v50, %v635_v9 }
 0x113   : > { %v637_v23 = vpop.f32.mrf.mxu1 }
 0x114   : > { %v1116_v10 = vadd.f32 %v1046_v61, %v894_v41  ;;  %v1271_v58 = vpop.f32.mrf.mxu0  ;;  %v638_v9 = vadd.f32 %v637_v23, %v2973_v0  ;;  %v724_v61 = vld [vmem:[%s2883_s25 + $0x141] sm:$0xff] }
 0x115   : > { %v946_v41 = vld [vmem:[%s2889_s28 + $0x140] sm:$0xff] }
 0x116   : > { %2485 = vmatmul.msk.bf16.gmra.mxu1 %vm412_vm2, %v3201_v62  ;;  %2502 = vmatmul.msk.bf16.gmra.mxu2 %vm412_vm2, %v3203_v37  ;;  %v3210_v35 = vadd.f32 %v1268_v42, %v1116_v10  ;;  %v945_v42 = vld [vmem:[%s2889_s28 + $0x138] sm:$0xff]  ;;  %v1168_v10 = vld [vmem:[%s2895_s7 + $0x140] sm:$0xff] }
 0x117   : > { %2519 = vmatmul.msk.bf16.gmra.mxu3 %vm412_vm2, %v963_v34  ;;  %2536 = vmatmul.msk.bf16.gmra.mxu0 %vm412_vm2, %v1185_v16  ;;  %v1167_v16 = vld [vmem:[%s2895_s7 + $0x138] sm:$0xff] }
 0x118   : > { %3660 = vst [vmem:[#allocation17_spill] sm:$0xff] %v3210_v35  ;;  %v3225_v35 = vpack.c.bf16 %v340_v53, %v339_v55  ;;  %v1186_v12 = vpack.c.bf16 %v1168_v10, %v1167_v16  ;;  %v342_v16 = vld [vmem:[%s2883_s25 + $0x158] sm:$0xff] }
 0x119   : > { %v827_v17 = vpop.f32.mrf.mxu2  ;;  %v725_v10 = vld [vmem:[%s2883_s25 + $0x151] sm:$0xff] }
 0x11a   : > { %v1049_v5 = vpop.f32.mrf.mxu3  ;;  %v895_v27 = vadd.f32 %v827_v17, %v638_v9 }
 0x11b   : > { %v639_v31 = vpop.f32.mrf.mxu1 }
 0x11c   : > { %v1117_v40 = vadd.f32 %v1049_v5, %v895_v27  ;;  %v1273_v49 = vpop.f32.mrf.mxu0  ;;  %v640_v34 = vadd.f32 %v639_v31, %v2989_v8  ;;  %v3227_v5 = vpack.c.bf16 %v724_v61, %v723_v57  ;;  %v964_v27 = vpack.c.bf16 %v946_v41, %v945_v42 }
 0x11e   : > { %v3217_v50 = vadd.f32 %v1271_v58, %v1117_v40 }
 0x120   : > { %3661 = vst [vmem:[#allocation18_spill] sm:$0xff] %v3217_v50 }
 0x121   : > { %v829_v0 = vpop.f32.mrf.mxu2 }
 0x122   : > { %v1051_v23 = vpop.f32.mrf.mxu3  ;;  %v896_v9 = vadd.f32 %v829_v0, %v640_v34  ;;  %v341_v34 = vld [vmem:[%s2883_s25 + $0x150] sm:$0xff] }
 0x123   : > { %v642_v17 = vpop.f32.mrf.mxu1 }
 0x124   : > { %v1118_v58 = vadd.f32 %v1051_v23, %v896_v9  ;;  %v1276_v40 = vpop.f32.mrf.mxu0  ;;  %v643_v31 = vadd.f32 %v642_v17, %v3007_v21  ;;  %v726_v23 = vld [vmem:[%s2883_s25 + $0x159] sm:$0xff] }
 0x125   : > { %v948_v9 = vld [vmem:[%s2889_s28 + $0x158] sm:$0xff] }
 0x126   : > { %2486 = vmatmul.msk.bf16.gmra.mxu1 %vm412_vm2, %v3225_v35  ;;  %2503 = vmatmul.msk.bf16.gmra.mxu2 %vm412_vm2, %v3227_v5  ;;  %v3234_v8 = vadd.f32 %v1273_v49, %v1118_v58  ;;  %v947_v49 = vld [vmem:[%s2889_s28 + $0x150] sm:$0xff]  ;;  %v1170_v58 = vld [vmem:[%s2895_s7 + $0x158] sm:$0xff] }
 0x127   : > { %2520 = vmatmul.msk.bf16.gmra.mxu3 %vm412_vm2, %v964_v27  ;;  %2537 = vmatmul.msk.bf16.gmra.mxu0 %vm412_vm2, %v1186_v12  ;;  %v1169_v27 = vld [vmem:[%s2895_s7 + $0x150] sm:$0xff] }
 0x128   : > { %3662 = vst [vmem:[#allocation19_spill] sm:$0xff] %v3234_v8  ;;  %v3249_v8 = vpack.c.bf16 %v342_v16, %v341_v34  ;;  %v1187_v50 = vpack.c.bf16 %v1170_v58, %v1169_v27  ;;  %v344_v27 = vld [vmem:[%s2883_s25 + $0x170] sm:$0xff] }
 0x129   : > { %v832_v55 = vpop.f32.mrf.mxu2  ;;  %v727_v58 = vld [vmem:[%s2883_s25 + $0x169] sm:$0xff] }
 0x12a   : > { %v1054_v53 = vpop.f32.mrf.mxu3  ;;  %v897_v57 = vadd.f32 %v832_v55, %v643_v31 }
 0x12b   : > { %v644_v61 = vpop.f32.mrf.mxu1 }
 0x12c   : > { %v1119_v42 = vadd.f32 %v1054_v53, %v897_v57  ;;  %v1278_v41 = vpop.f32.mrf.mxu0  ;;  %v645_v12 = vadd.f32 %v644_v61, %v3023_v30  ;;  %v743_v53 = vpack.c.bf16 %v726_v23, %v725_v10  ;;  %v965_v57 = vpack.c.bf16 %v948_v9, %v947_v49 }
 0x12e   : > { %v3241_v0 = vadd.f32 %v1276_v40, %v1119_v42 }
 0x130   : > { %3663 = vst [vmem:[#allocation20_spill] sm:$0xff] %v3241_v0 }
 0x131   : > { %v834_v21 = vpop.f32.mrf.mxu2 }
 0x132   : > { %v1056_v17 = vpop.f32.mrf.mxu3  ;;  %v898_v31 = vadd.f32 %v834_v21, %v645_v12  ;;  %v343_v12 = vld [vmem:[%s2883_s25 + $0x168] sm:$0xff] }
 0x133   : > { %v647_v55 = vpop.f32.mrf.mxu1 }
 0x134   : > { %v1120_v40 = vadd.f32 %v1056_v17, %v898_v31  ;;  %v1281_v42 = vpop.f32.mrf.mxu0  ;;  %v648_v61 = vadd.f32 %v647_v55, %v3041_v46  ;;  %v728_v17 = vld [vmem:[%s2883_s25 + $0x171] sm:$0xff] }
 0x135   : > { %v950_v31 = vld [vmem:[%s2889_s28 + $0x170] sm:$0xff] }
 0x136   : > { %2487 = vmatmul.msk.bf16.gmra.mxu1 %vm412_vm2, %v3249_v8  ;;  %2504 = vmatmul.msk.bf16.gmra.mxu2 %vm412_vm2, %v743_v53  ;;  %v3255_v30 = vadd.f32 %v1278_v41, %v1120_v40  ;;  %v949_v41 = vld [vmem:[%s2889_s28 + $0x168] sm:$0xff]  ;;  %v360_v40 = vpack.c.bf16 %v344_v27, %v343_v12 }
 0x137   : > { %2521 = vmatmul.msk.bf16.gmra.mxu3 %vm412_vm2, %v965_v57  ;;  %2538 = vmatmul.msk.bf16.gmra.mxu0 %vm412_vm2, %v1187_v50  ;;  %v1171_v53 = vld [vmem:[%s2895_s7 + $0x168] sm:$0xff]  ;;  %v1172_v57 = vld [vmem:[%s2895_s7 + $0x170] sm:$0xff] }
 0x138   : > { %3664 = vst [vmem:[#allocation21_spill] sm:$0xff] %v3255_v30 }
 0x139   : > { %v837_v34 = vpop.f32.mrf.mxu2 }
 0x13a   : > { %v1059_v16 = vpop.f32.mrf.mxu3  ;;  %v899_v10 = vadd.f32 %v837_v34, %v648_v61  ;;  %v744_v34 = vpack.c.bf16 %v728_v17, %v727_v58 }
 0x13b   : > { %v649_v23 = vpop.f32.mrf.mxu1 }
 0x13c   : > { %v1121_v49 = vadd.f32 %v1059_v16, %v899_v10  ;;  %v1283_v9 = vpop.f32.mrf.mxu0  ;;  %v650_v50 = vadd.f32 %v649_v23, %v3057_v56  ;;  %v966_v16 = vpack.c.bf16 %v950_v31, %v949_v41  ;;  %v1188_v10 = vpack.c.bf16 %v1172_v57, %v1171_v53  ;;  %v1364_v31 = vld [vmem:[%s2889_s28 + $0x9] sm:$0xff] }
 0x13e   : > { %v3262_v21 = vadd.f32 %v1281_v42, %v1121_v49 }
 0x141   : > { %v839_v46 = vpop.f32.mrf.mxu2 }
 0x142   : > { %v1061_v55 = vpop.f32.mrf.mxu3  ;;  %v900_v30 = vadd.f32 %v839_v46, %v650_v50 }
 0x143   : > { %v652_v61 = vpop.f32.mrf.mxu1 }
 0x144   : > { %v1122_v0 = vadd.f32 %v1061_v55, %v900_v30  ;;  %v1286_v42 = vpop.f32.mrf.mxu0  ;;  %v653_v23 = vadd.f32 %v652_v61, %v3075_v14  ;;  %v1363_v30 = vld [vmem:[%s2889_s28 + $0x1] sm:$0xff] }
 0x146   : > { %2488 = vmatmul.msk.bf16.gmra.mxu1 %vm412_vm2, %v360_v40  ;;  %2505 = vmatmul.msk.bf16.gmra.mxu2 %vm412_vm2, %v744_v34  ;;  %v3273_v56 = vadd.f32 %v1283_v9, %v1122_v0  ;;  %v1395_v0 = vpack.c.bf16 %v1364_v31, %v1363_v30 }
 0x147   : > { %2522 = vmatmul.msk.bf16.gmra.mxu3 %vm412_vm2, %v966_v16  ;;  %2539 = vmatmul.msk.bf16.gmra.mxu0 %vm412_vm2, %v1188_v10 }
 0x149   : > { %v842_v49 = vpop.f32.mrf.mxu2 }
 0x14a   : > { %v1064_v12 = vpop.f32.mrf.mxu3  ;;  %v901_v27 = vadd.f32 %v842_v49, %v653_v23 }
 0x14b   : > { %v654_v58 = vpop.f32.mrf.mxu1 }
 0x14c   : > { %v1123_v17 = vadd.f32 %v1064_v12, %v901_v27  ;;  %v1288_v41 = vpop.f32.mrf.mxu0  ;;  %v655_v53 = vadd.f32 %v654_v58, %v3091_v33  ;;  %v1365_v12 = vld [vmem:[%s2889_s28 + $0x19] sm:$0xff]  ;;  %v1366_v27 = vld [vmem:[%s2889_s28 + $0x21] sm:$0xff] }
 0x14e   : > { %v3279_v50 = vadd.f32 %v1286_v42, %v1123_v17 }
 0x151   : > { %v844_v57 = vpop.f32.mrf.mxu2 }
 0x152   : > { %v1066_v46 = vpop.f32.mrf.mxu3  ;;  %v902_v9 = vadd.f32 %v844_v57, %v655_v53 }
 0x153   : > { %v657_v55 = vpop.f32.mrf.mxu1 }
 0x154   : > { %v1124_v14 = vadd.f32 %v1066_v46, %v902_v9  ;;  %v1291_v40 = vpop.f32.mrf.mxu0  ;;  %v658_v33 = vadd.f32 %v657_v55, %v2985_v6 }
 0x156   : > { %2541 = vmatmul.msk.bf16.vlgmr.msra.gmra.mxu1 %vm412_vm2, %v1395_v0  ;;  %2590 = vmatmul.msk.bf16.vlgmr.msra.gmra.mxu2 %vm412_vm2, %v2917_v25  ;;  %v3287_v61 = vadd.f32 %v1288_v41, %v1124_v14  ;;  %v1396_v41 = vpack.c.bf16 %v1366_v27, %v1365_v12 }
 0x157   : > { %2639 = vmatmul.msk.bf16.vlgmr.msra.gmra.mxu3 %vm412_vm2, %v2826_v36  ;;  %2688 = vmatmul.msk.bf16.vlgmr.msra.gmra.mxu0 %vm412_vm2, %v2919_v26 }
 0x159   : > { %v847_v34 = vpop.f32.mrf.mxu2 }
 0x15a   : > { %v1069_v16 = vpop.f32.mrf.mxu3  ;;  %v903_v10 = vadd.f32 %v847_v34, %v658_v33  ;;  %v1368_v33 = vld [vmem:[%s2889_s28 + $0x39] sm:$0xff] }
 0x15b   : > { %v659_v42 = vpop.f32.mrf.mxu1 }
 0x15c   : > { %v1125_v23 = vadd.f32 %v1069_v16, %v903_v10  ;;  %v1293_v49 = vpop.f32.mrf.mxu0  ;;  %v660_v25 = vadd.f32 %v659_v42, %v3001_v18 }
 0x15e   : > { %v3294_v58 = vadd.f32 %v1291_v40, %v1125_v23  ;;  %v1367_v40 = vld [vmem:[%s2889_s28 + $0x31] sm:$0xff] }
 0x15f   : > { %v1397_v10 = vpack.c.bf16 %v1368_v33, %v1367_v40 }
 0x161   : > { %v849_v36 = vpop.f32.mrf.mxu2 }
 0x162   : > { %v1071_v17 = vpop.f32.mrf.mxu3  ;;  %v904_v30 = vadd.f32 %v849_v36, %v660_v25 }
 0x163   : > { %v662_v26 = vpop.f32.mrf.mxu1 }
 0x164   : > { %v1126_v6 = vadd.f32 %v1071_v17, %v904_v30  ;;  %v1296_v31 = vpop.f32.mrf.mxu0  ;;  %v663_v18 = vadd.f32 %v662_v26, %v3019_v28  ;;  %v1369_v30 = vld [vmem:[%s2889_s28 + $0x49] sm:$0xff]  ;;  %v1370_v26 = vld [vmem:[%s2889_s28 + $0x51] sm:$0xff] }
 0x166   : > { %2542 = vmatmul.msk.bf16.gmra.mxu1 %vm412_vm2, %v1396_v41  ;;  %2591 = vmatmul.msk.bf16.gmra.mxu2 %vm412_vm2, %v2935_v38  ;;  %v3302_v53 = vadd.f32 %v1293_v49, %v1126_v6 }
 0x167   : > { %2640 = vmatmul.msk.bf16.gmra.mxu3 %vm412_vm2, %v2841_v48  ;;  %2689 = vmatmul.msk.bf16.gmra.mxu0 %vm412_vm2, %v2937_v39 }
 0x169   : > { %v852_v57 = vpop.f32.mrf.mxu2 }
 0x16a   : > { %v1074_v46 = vpop.f32.mrf.mxu3  ;;  %v905_v0 = vadd.f32 %v852_v57, %v663_v18 }
 0x16b   : > { %v664_v9 = vpop.f32.mrf.mxu1 }
 0x16c   : > { %v1127_v55 = vadd.f32 %v1074_v46, %v905_v0  ;;  %v1298_v14 = vpop.f32.mrf.mxu0  ;;  %v665_v38 = vadd.f32 %v664_v9, %v3035_v43  ;;  %v1398_v46 = vpack.c.bf16 %v1370_v26, %v1369_v30 }
 0x16e   : > { %v3309_v34 = vadd.f32 %v1296_v31, %v1127_v55  ;;  %v2613_v31 = vld [vmem:[%s2804_s12 + $0x68] sm:$0xff] }
 0x171   : > { %v854_v48 = vpop.f32.mrf.mxu2 }
 0x172   : > { %v1076_v16 = vpop.f32.mrf.mxu3  ;;  %v906_v42 = vadd.f32 %v854_v48, %v665_v38 }
 0x173   : > { %v667_v39 = vpop.f32.mrf.mxu1 }
 0x174   : > { %v1128_v28 = vadd.f32 %v1076_v16, %v906_v42  ;;  %v1301_v23 = vpop.f32.mrf.mxu0  ;;  %v668_v49 = vadd.f32 %v667_v39, %v3053_v54  ;;  %v1371_v42 = vld [vmem:[%s2889_s28 + $0x61] sm:$0xff]  ;;  %v1372_v39 = vld [vmem:[%s2889_s28 + $0x69] sm:$0xff] }
 0x176   : > { %2543 = vmatmul.msk.bf16.gmra.mxu1 %vm412_vm2, %v1397_v10  ;;  %2592 = vmatmul.msk.bf16.gmra.mxu2 %vm412_vm2, %v2953_v51  ;;  %v3317_v43 = vadd.f32 %v1298_v14, %v1128_v28  ;;  %v2612_v51 = vld [vmem:[%s2804_s12 + $0x60] sm:$0xff] }
 0x177   : > { %2641 = vmatmul.msk.bf16.gmra.mxu3 %vm412_vm2, %v2872_v4  ;;  %2690 = vmatmul.msk.bf16.gmra.mxu0 %vm412_vm2, %v2955_v52  ;;  %v1844_v54 = vpack.c.bf16 %v2613_v31, %v2612_v51 }
 0x179   : > { %v857_v12 = vpop.f32.mrf.mxu2 }
 0x17a   : > { %v1079_v27 = vpop.f32.mrf.mxu3  ;;  %v907_v25 = vadd.f32 %v857_v12, %v668_v49 }
 0x17b   : > { %v669_v36 = vpop.f32.mrf.mxu1 }
 0x17c   : > { %v1129_v17 = vadd.f32 %v1079_v27, %v907_v25  ;;  %v1303_v41 = vpop.f32.mrf.mxu0  ;;  %v670_v4 = vadd.f32 %v669_v36, %v3069_v11  ;;  %v1399_v25 = vpack.c.bf16 %v1372_v39, %v1371_v42 }
 0x17e   : > { %v3324_v6 = vadd.f32 %v1301_v23, %v1129_v17  ;;  %v2615_v23 = vld [vmem:[%s2804_s12 + $0x80] sm:$0xff] }
 0x181   : > { %v859_v18 = vpop.f32.mrf.mxu2 }
 0x182   : > { %v1081_v57 = vpop.f32.mrf.mxu3  ;;  %v908_v52 = vadd.f32 %v859_v18, %v670_v4 }
 0x183   : > { %v672_v0 = vpop.f32.mrf.mxu1 }
 0x184   : > { %v1130_v9 = vadd.f32 %v1081_v57, %v908_v52  ;;  %v1306_v55 = vpop.f32.mrf.mxu0  ;;  %v673_v14 = vadd.f32 %v672_v0, %v3087_v24  ;;  %v1374_v52 = vld [vmem:[%s2889_s28 + $0x81] sm:$0xff] }
 0x186   : > { %2544 = vmatmul.msk.bf16.gmra.mxu1 %vm412_vm2, %v1398_v46  ;;  %2593 = vmatmul.msk.bf16.gmra.mxu2 %vm412_vm2, %v2971_v63  ;;  %v3333_v11 = vadd.f32 %v1303_v41, %v1130_v9  ;;  %v2614_v63 = vld [vmem:[%s2804_s12 + $0x78] sm:$0xff] }
 0x187   : > { %2642 = vmatmul.msk.bf16.gmra.mxu3 %vm412_vm2, %v1844_v54  ;;  %2691 = vmatmul.msk.bf16.gmra.mxu0 %vm412_vm2, %v2975_v1  ;;  %v1845_v24 = vpack.c.bf16 %v2615_v23, %v2614_v63  ;;  %v1373_v46 = vld [vmem:[%s2889_s28 + $0x79] sm:$0xff] }
 0x188   : > { %v2617_v54 = vld [vmem:[%s2804_s12 + $0x98] sm:$0xff] }
 0x189   : > { %v862_v40 = vpop.f32.mrf.mxu2 }
 0x18a   : > { %v1084_v33 = vpop.f32.mrf.mxu3  ;;  %v909_v38 = vadd.f32 %v862_v40, %v673_v14  ;;  %v1400_v40 = vpack.c.bf16 %v1374_v52, %v1373_v46 }
 0x18b   : > { %v674_v48 = vpop.f32.mrf.mxu1 }
 0x18c   : > { %v1131_v16 = vadd.f32 %v1084_v33, %v909_v38  ;;  %v1308_v10 = vpop.f32.mrf.mxu0  ;;  %v675_v49 = vadd.f32 %v674_v48, %v3103_v59 }
 0x18e   : > { %v3340_v28 = vadd.f32 %v1306_v55, %v1131_v16 }
 0x191   : > { %v864_v12 = vpop.f32.mrf.mxu2 }
 0x192   : > { %v1086_v27 = vpop.f32.mrf.mxu3  ;;  %v910_v1 = vadd.f32 %v864_v12, %v675_v49  ;;  %v1375_v12 = vld [vmem:[%s2889_s28 + $0x91] sm:$0xff] }
 0x193   : > { %v677_v36 = vpop.f32.mrf.mxu1 }
 0x194   : > { %v1132_v17 = vadd.f32 %v1086_v27, %v910_v1  ;;  %v1311_v41 = vpop.f32.mrf.mxu0  ;;  %v678_v30 = vadd.f32 %v677_v36, %v2987_v7  ;;  %v1376_v27 = vld [vmem:[%s2889_s28 + $0x99] sm:$0xff]  ;;  %v2619_v1 = vld [vmem:[%s2804_s12 + $0xb0] sm:$0xff] }
 0x196   : > { %2545 = vmatmul.msk.bf16.gmra.mxu1 %vm412_vm2, %v1399_v25  ;;  %2594 = vmatmul.msk.bf16.gmra.mxu2 %vm412_vm2, %v3005_v20  ;;  %v3349_v59 = vadd.f32 %v1308_v10, %v1132_v17  ;;  %v2616_v20 = vld [vmem:[%s2804_s12 + $0x90] sm:$0xff] }
 0x197   : > { %2643 = vmatmul.msk.bf16.gmra.mxu3 %vm412_vm2, %v1845_v24  ;;  %2692 = vmatmul.msk.bf16.gmra.mxu0 %vm412_vm2, %v3009_v22  ;;  %v1846_v7 = vpack.c.bf16 %v2617_v54, %v2616_v20 }
 0x199   : > { %v867_v26 = vpop.f32.mrf.mxu2 }
 0x19a   : > { %v1089_v51 = vpop.f32.mrf.mxu3  ;;  %v911_v31 = vadd.f32 %v867_v26, %v678_v30 }
 0x19b   : > { %v679_v4 = vpop.f32.mrf.mxu1 }
 0x19c   : > { %v1133_v18 = vadd.f32 %v1089_v51, %v911_v31  ;;  %v1313_v57 = vpop.f32.mrf.mxu0  ;;  %v680_v9 = vadd.f32 %v679_v4, %v3003_v19  ;;  %v3665_v31 = vld [vmem:[#allocation4_spill] sm:$0xff]  ;;  %v3666_v4 = vld [vmem:[#allocation5_spill] sm:$0xff] }
 0x19e   : > { %v3356_v0 = vadd.f32 %v1311_v41, %v1133_v18  ;;  %v1401_v41 = vpack.c.bf16 %v1376_v27, %v1375_v12  ;;  %v3667_v18 = vld [vmem:[#allocation2_spill] sm:$0xff]  ;;  %v3669_v27 = vld [vmem:[#allocation8_spill] sm:$0xff] }
 0x1a1   : > { %v869_v55 = vpop.f32.mrf.mxu2 }
 0x1a2   : > { %v1091_v14 = vpop.f32.mrf.mxu3  ;;  %v912_v22 = vadd.f32 %v869_v55, %v680_v9 }
 0x1a3   : > { %v682_v33 = vpop.f32.mrf.mxu1 }
 0x1a4   : > { %v1134_v38 = vadd.f32 %v1091_v14, %v912_v22  ;;  %v1316_v48 = vpop.f32.mrf.mxu0  ;;  %v683_v16 = vadd.f32 %v682_v33, %v3021_v29  ;;  %v1377_v14 = vld [vmem:[%s2889_s28 + $0xa9] sm:$0xff]  ;;  %v2620_v33 = vld [vmem:[%s2804_s12 + $0xc0] sm:$0xff] }
 0x1a6   : > { %2546 = vmatmul.msk.bf16.gmra.mxu1 %vm412_vm2, %v1400_v40  ;;  %2595 = vmatmul.msk.bf16.gmra.mxu2 %vm412_vm2, %v3039_v45  ;;  %v3365_v19 = vadd.f32 %v1313_v57, %v1134_v38  ;;  %v2618_v45 = vld [vmem:[%s2804_s12 + $0xa8] sm:$0xff]  ;;  %v1378_v40 = vld [vmem:[%s2889_s28 + $0xb1] sm:$0xff] }
 0x1a7   : > { %2644 = vmatmul.msk.bf16.gmra.mxu3 %vm412_vm2, %v1846_v7  ;;  %2693 = vmatmul.msk.bf16.gmra.mxu0 %vm412_vm2, %v3043_v47  ;;  %v1847_v29 = vpack.c.bf16 %v2619_v1, %v2618_v45  ;;  %v2621_v7 = vld [vmem:[%s2804_s12 + $0xc8] sm:$0xff]  ;;  %v3670_v1 = vld [vmem:[#allocation9_spill] sm:$0xff] }
 0x1a8   : > { %v3668_v38 = vld [vmem:[#allocation3_spill] sm:$0xff] }
 0x1a9   : > { %v872_v10 = vpop.f32.mrf.mxu2 }
 0x1aa   : > { %v1094_v42 = vpop.f32.mrf.mxu3  ;;  %v913_v39 = vadd.f32 %v872_v10, %v683_v16 }
 0x1ab   : > { %v684_v63 = vpop.f32.mrf.mxu1 }
 0x1ac   : > { %v1135_v23 = vadd.f32 %v1094_v42, %v913_v39  ;;  %v1318_v49 = vpop.f32.mrf.mxu0  ;;  %v685_v36 = vadd.f32 %v684_v63, %v3037_v44  ;;  %v1402_v42 = vpack.c.bf16 %v1378_v40, %v1377_v14 }
 0x1ae   : > { %v3372_v25 = vadd.f32 %v1316_v48, %v1135_v23  ;;  %v1848_v23 = vpack.c.bf16 %v2621_v7, %v2620_v33 }
 0x1b1   : > { %v874_v24 = vpop.f32.mrf.mxu2 }
 0x1b2   : > { %v1096_v17 = vpop.f32.mrf.mxu3  ;;  %v914_v47 = vadd.f32 %v874_v24, %v685_v36  ;;  %v3671_v36 = vld [vmem:[#allocation6_spill] sm:$0xff] }
 0x1b3   : > { %v687_v30 = vpop.f32.mrf.mxu1 }
 0x1b4   : > { %v1136_v26 = vadd.f32 %v1096_v17, %v914_v47  ;;  %v1321_v51 = vpop.f32.mrf.mxu0  ;;  %v688_v57 = vadd.f32 %v687_v30, %v3667_v18  ;;  %v2622_v18 = vld [vmem:[%s2804_s12 + $0xd8] sm:$0xff] }
 0x1b6   : > { %2547 = vmatmul.msk.bf16.gmra.mxu1 %vm412_vm2, %v1401_v41  ;;  %2596 = vmatmul.msk.bf16.gmra.mxu2 %vm412_vm2, %v3665_v31  ;;  %v3381_v44 = vadd.f32 %v1318_v49, %v1136_v26  ;;  %v1380_v31 = vld [vmem:[%s2889_s28 + $0xc9] sm:$0xff] }
 0x1b7   : > { %2645 = vmatmul.msk.bf16.gmra.mxu3 %vm412_vm2, %v1847_v29  ;;  %2694 = vmatmul.msk.bf16.gmra.mxu0 %vm412_vm2, %v3666_v4 }
 0x1b9   : > { %v877_v46 = vpop.f32.mrf.mxu2 }
 0x1ba   : > { %v1099_v52 = vpop.f32.mrf.mxu3  ;;  %v915_v20 = vadd.f32 %v877_v46, %v688_v57  ;;  %v2623_v57 = vld [vmem:[%s2804_s12 + $0xe0] sm:$0xff]  ;;  %v3672_v46 = vld [vmem:[#allocation7_spill] sm:$0xff] }
 0x1bb   : > { %v689_v54 = vpop.f32.mrf.mxu1  ;;  %v1849_v40 = vpack.c.bf16 %v2623_v57, %v2622_v18 }
 0x1bc   : > { %v1137_v9 = vadd.f32 %v1099_v52, %v915_v20  ;;  %v1323_v55 = vpop.f32.mrf.mxu0  ;;  %v690_v48 = vadd.f32 %v689_v54, %v3668_v38 }
 0x1be   : > { %v3388_v22 = vadd.f32 %v1321_v51, %v1137_v9  ;;  %v1379_v51 = vld [vmem:[%s2889_s28 + $0xc1] sm:$0xff] }
 0x1bf   : > { %v1403_v9 = vpack.c.bf16 %v1380_v31, %v1379_v51 }
 0x1c1   : > { %v879_v16 = vpop.f32.mrf.mxu2 }
 0x1c2   : > { %v1101_v10 = vpop.f32.mrf.mxu3  ;;  %v916_v39 = vadd.f32 %v879_v16, %v690_v48  ;;  %v3673_v48 = vld [vmem:[#allocation10_spill] sm:$0xff] }
 0x1c3   : > { %v692_v63 = vpop.f32.mrf.mxu1 }
 0x1c4   : > { %v1138_v49 = vadd.f32 %v1101_v10, %v916_v39  ;;  %v1326_v12 = vpop.f32.mrf.mxu0  ;;  %v693_v24 = vadd.f32 %v692_v63, %v3671_v36  ;;  %v2624_v36 = vld [vmem:[%s2804_s12 + $0xf0] sm:$0xff] }
 0x1c6   : > { %2548 = vmatmul.msk.bf16.gmra.mxu1 %vm412_vm2, %v1402_v42  ;;  %2597 = vmatmul.msk.bf16.gmra.mxu2 %vm412_vm2, %v3669_v27  ;;  %v3397_v45 = vadd.f32 %v1323_v55, %v1138_v49  ;;  %v1381_v27 = vld [vmem:[%s2889_s28 + $0xd9] sm:$0xff] }
 0x1c7   : > { %2646 = vmatmul.msk.bf16.gmra.mxu3 %vm412_vm2, %v1848_v23  ;;  %2695 = vmatmul.msk.bf16.gmra.mxu0 %vm412_vm2, %v3670_v1  ;;  %v1382_v1 = vld [vmem:[%s2889_s28 + $0xe1] sm:$0xff] }
 0x1c9   : > { %v882_v17 = vpop.f32.mrf.mxu2 }
 0x1ca   : > { %v1104_v41 = vpop.f32.mrf.mxu3  ;;  %v917_v47 = vadd.f32 %v882_v17, %v693_v24  ;;  %v2625_v24 = vld [vmem:[%s2804_s12 + $0xf8] sm:$0xff]  ;;  %v3674_v17 = vld [vmem:[#allocation11_spill] sm:$0xff] }
 0x1cb   : > { %v694_v30 = vpop.f32.mrf.mxu1  ;;  %v1850_v18 = vpack.c.bf16 %v2625_v24, %v2624_v36 }
 0x1cc   : > { %v1139_v29 = vadd.f32 %v1104_v41, %v917_v47  ;;  %v1328_v26 = vpop.f32.mrf.mxu0  ;;  %v695_v52 = vadd.f32 %v694_v30, %v3672_v46 }
 0x1ce   : > { %v3404_v4 = vadd.f32 %v1326_v12, %v1139_v29  ;;  %v1404_v29 = vpack.c.bf16 %v1382_v1, %v1381_v27 }
 0x1d1   : > { %v884_v20 = vpop.f32.mrf.mxu2 }
 0x1d2   : > { %v1106_v54 = vpop.f32.mrf.mxu3  ;;  %v918_v55 = vadd.f32 %v884_v20, %v695_v52 }
 0x1d3   : > { %v1473_v14 = vpop.f32.mrf.mxu1 }
 0x1d4   : > { %v1140_v33 = vadd.f32 %v1106_v54, %v918_v55  ;;  %v2141_v7 = vpop.f32.mrf.mxu0  ;;  %v1553_v16 = vadd.f32 %v1473_v14, %v3673_v48  ;;  %v3675_v54 = vld [vmem:[#allocation12_spill] sm:$0xff] }
 0x1d6   : > { %2549 = vmatmul.msk.bf16.gmra.mxu1 %vm412_vm2, %v1403_v9  ;;  %2598 = vmatmul.msk.bf16.gmra.mxu2 %vm412_vm2, %v3129_v15  ;;  %v3413_v38 = vadd.f32 %v1328_v26, %v1140_v33  ;;  %v3421_v15 = vld [vmem:[%s3639_s5] ss:$0 sm:$0xff] }
 0x1d7   : > { %2647 = vmatmul.msk.bf16.gmra.mxu3 %vm412_vm2, %v1849_v40  ;;  %2696 = vmatmul.msk.bf16.gmra.mxu0 %vm412_vm2, %v3131_v13 }
 0x1d9   : > { %v1696_v10 = vpop.f32.mrf.mxu2 }
 0x1da   : > { %v1919_v42 = vpop.f32.mrf.mxu3  ;;  %v1776_v39 = vadd.f32 %v1696_v10, %v1553_v16  ;;  %v1383_v10 = vld [vmem:[%s2889_s28 + $0xf1] sm:$0xff] }
 0x1db   : > { %v1475_v63 = vpop.f32.mrf.mxu1 }
 0x1dc   : > { %v1999_v23 = vadd.f32 %v1919_v42, %v1776_v39  ;;  %v2143_v49 = vpop.f32.mrf.mxu0  ;;  %v1554_v41 = vadd.f32 %v1475_v63, %v3674_v17  ;;  %v1384_v42 = vld [vmem:[%s2889_s28 + $0xf9] sm:$0xff]  ;;  %v2626_v39 = vld [vmem:[%s2804_s12 + $0x108] sm:$0xff]  ;;  %v2627_v63 = vld [vmem:[%s2804_s12 + $0x110] sm:$0xff] }
 0x1dd   : > { %v1405_v1 = vpack.c.bf16 %v1384_v42, %v1383_v10  ;;  %v1851_v17 = vpack.c.bf16 %v2627_v63, %v2626_v39 }
 0x1de   : > { %v2221_v12 = vadd.f32 %v2141_v7, %v1999_v23  ;;  %v3676_v23 = vld [vmem:[#allocation13_spill] sm:$0xff] }
 0x1e0   : > { %v2257_v13 = vadd.f32 %v3421_v15, %v2221_v12 }
 0x1e1   : > { %v1698_v47 = vpop.f32.mrf.mxu2 }
 0x1e2   : > { %v1921_v30 = vpop.f32.mrf.mxu3  ;;  %v2289_v26 = vmax.f32 %v2257_v13, 0.0  ;;  %v1777_v51 = vadd.f32 %v1698_v47, %v1554_v41 }
 0x1e3   : > { %v1478_v31 = vpop.f32.mrf.mxu1 }
 0x1e4   : > { %2322 = vst.msk [vmem:[%s3433_s14] sm:$0xff] %vm2321_vm3, %v2289_v26  ;;  %v2000_v57 = vadd.f32 %v1921_v30, %v1777_v51  ;;  %v2146_v46 = vpop.f32.mrf.mxu0  ;;  %v1555_v9 = vadd.f32 %v1478_v31, %v3675_v54  ;;  %v3677_v26 = vld [vmem:[#allocation14_spill] sm:$0xff] }
 0x1e6   : > { %2550 = vmatmul.msk.bf16.gmra.mxu1 %vm412_vm2, %v1404_v29  ;;  %v2222_v52 = vadd.f32 %v2143_v49, %v2000_v57  ;;  %2599 = vmatmul.msk.bf16.gmra.mxu2 %vm412_vm2, %v3153_v32 }
 0x1e7   : > { %2648 = vmatmul.msk.bf16.gmra.mxu3 %vm412_vm2, %v1850_v18  ;;  %2697 = vmatmul.msk.bf16.gmra.mxu0 %vm412_vm2, %v3155_v60 }
 0x1e8   : > { %v2258_v20 = vadd.f32 %v3421_v15, %v2222_v52 }
 0x1e9   : > { %v1701_v55 = vpop.f32.mrf.mxu2 }
 0x1ea   : > { %v1924_v14 = vpop.f32.mrf.mxu3  ;;  %v2290_v40 = vmax.f32 %v2258_v20, 0.0  ;;  %v1778_v33 = vadd.f32 %v1701_v55, %v1555_v9  ;;  %v1385_v9 = vld [vmem:[%s2889_s28 + $0x109] sm:$0xff]  ;;  %v1386_v55 = vld [vmem:[%s2889_s28 + $0x111] sm:$0xff] }
 0x1eb   : > { %v1480_v7 = vpop.f32.mrf.mxu1 }
 0x1ec   : > { %2323 = vst.msk [vmem:[%s3433_s14 + $0x8] sm:$0xff] %vm2321_vm3, %v2290_v40  ;;  %v2001_v48 = vadd.f32 %v1924_v14, %v1778_v33  ;;  %v2148_v32 = vpop.f32.mrf.mxu0  ;;  %v1556_v49 = vadd.f32 %v1480_v7, %v3676_v23  ;;  %v2628_v14 = vld [vmem:[%s2804_s12 + $0x120] sm:$0xff]  ;;  %v2629_v40 = vld [vmem:[%s2804_s12 + $0x128] sm:$0xff] }
 0x1ed   : > { %v3678_v33 = vld [vmem:[#allocation15_spill] sm:$0xff]  ;;  %v1852_v63 = vpack.c.bf16 %v2629_v40, %v2628_v14 }
 0x1ee   : > { %v2223_v16 = vadd.f32 %v2146_v46, %v2001_v48 }
 0x1f0   : > { %v2259_v60 = vadd.f32 %v3421_v15, %v2223_v16  ;;  %v1406_v16 = vpack.c.bf16 %v1386_v55, %v1385_v9 }
 0x1f1   : > { %v1703_v12 = vpop.f32.mrf.mxu2 }
 0x1f2   : > { %v1926_v27 = vpop.f32.mrf.mxu3  ;;  %v2291_v36 = vmax.f32 %v2259_v60, 0.0  ;;  %v1779_v24 = vadd.f32 %v1703_v12, %v1556_v49 }
 0x1f3   : > { %v1483_v13 = vpop.f32.mrf.mxu1 }
 0x1f4   : > { %2324 = vst.msk [vmem:[%s3433_s14 + $0x10] sm:$0xff] %vm2321_vm3, %v2291_v36  ;;  %v2002_v41 = vadd.f32 %v1926_v27, %v1779_v24  ;;  %v2151_v47 = vpop.f32.mrf.mxu0  ;;  %v1557_v51 = vadd.f32 %v1483_v13, %v3677_v26  ;;  %v3679_v27 = vld [vmem:[#allocation16_spill] sm:$0xff] }
 0x1f5   : > { %v1388_v26 = vld [vmem:[%s2889_s28 + $0x129] sm:$0xff] }
 0x1f6   : > { %2551 = vmatmul.msk.bf16.gmra.mxu1 %vm412_vm2, %v1405_v1  ;;  %v2224_v30 = vadd.f32 %v2148_v32, %v2002_v41  ;;  %2600 = vmatmul.msk.bf16.gmra.mxu2 %vm412_vm2, %v3177_v2 }
 0x1f7   : > { %2649 = vmatmul.msk.bf16.gmra.mxu3 %vm412_vm2, %v1851_v17  ;;  %2698 = vmatmul.msk.bf16.gmra.mxu0 %vm412_vm2, %v3179_v3 }
 0x1f8   : > { %v2260_v29 = vadd.f32 %v3421_v15, %v2224_v30 }
 0x1f9   : > { %v1706_v31 = vpop.f32.mrf.mxu2 }
 0x1fa   : > { %v1929_v18 = vpop.f32.mrf.mxu3  ;;  %v2292_v57 = vmax.f32 %v2260_v29, 0.0  ;;  %v1780_v46 = vadd.f32 %v1706_v31, %v1557_v51  ;;  %v1387_v29 = vld [vmem:[%s2889_s28 + $0x121] sm:$0xff]  ;;  %v2630_v51 = vld [vmem:[%s2804_s12 + $0x138] sm:$0xff] }
 0x1fb   : > { %v1485_v52 = vpop.f32.mrf.mxu1  ;;  %v2631_v31 = vld [vmem:[%s2804_s12 + $0x140] sm:$0xff] }
 0x1fc   : > { %2325 = vst.msk [vmem:[%s3433_s14 + $0x18] sm:$0xff] %vm2321_vm3, %v2292_v57  ;;  %v2003_v20 = vadd.f32 %v1929_v18, %v1780_v46  ;;  %v2153_v2 = vpop.f32.mrf.mxu0  ;;  %v1558_v7 = vadd.f32 %v1485_v52, %v3678_v33  ;;  %v3680_v18 = vld [vmem:[#allocation17_spill] sm:$0xff]  ;;  %v1853_v55 = vpack.c.bf16 %v2631_v31, %v2630_v51 }
 0x1fe   : > { %v2225_v54 = vadd.f32 %v2151_v47, %v2003_v20  ;;  %v1407_v20 = vpack.c.bf16 %v1388_v26, %v1387_v29 }
 0x200   : > { %v2261_v3 = vadd.f32 %v3421_v15, %v2225_v54 }
 0x201   : > { %v1708_v48 = vpop.f32.mrf.mxu2 }
 0x202   : > { %v1931_v32 = vpop.f32.mrf.mxu3  ;;  %v2293_v10 = vmax.f32 %v2261_v3, 0.0  ;;  %v1781_v42 = vadd.f32 %v1708_v48, %v1558_v7  ;;  %v3681_v7 = vld [vmem:[#allocation18_spill] sm:$0xff] }
 0x203   : > { %v1488_v39 = vpop.f32.mrf.mxu1 }
 0x204   : > { %2326 = vst.msk [vmem:[%s3433_s14 + $0x20] sm:$0xff] %vm2321_vm3, %v2293_v10  ;;  %v2004_v60 = vadd.f32 %v1931_v32, %v1781_v42  ;;  %v2156_v23 = vpop.f32.mrf.mxu0  ;;  %v1559_v1 = vadd.f32 %v1488_v39, %v3679_v27 }
 0x206   : > { %2552 = vmatmul.msk.bf16.gmra.mxu1 %vm412_vm2, %v1406_v16  ;;  %v2226_v49 = vadd.f32 %v2153_v2, %v2004_v60  ;;  %2601 = vmatmul.msk.bf16.gmra.mxu2 %vm412_vm2, %v3201_v62 }
 0x207   : > { %2650 = vmatmul.msk.bf16.gmra.mxu3 %vm412_vm2, %v1852_v63  ;;  %2699 = vmatmul.msk.bf16.gmra.mxu0 %vm412_vm2, %v3203_v37 }
 0x208   : > { %v2262_v12 = vadd.f32 %v3421_v15, %v2226_v49  ;;  %v1390_v49 = vld [vmem:[%s2889_s28 + $0x141] sm:$0xff] }
 0x209   : > { %v1711_v36 = vpop.f32.mrf.mxu2 }
 0x20a   : > { %v1934_v24 = vpop.f32.mrf.mxu3  ;;  %v2294_v13 = vmax.f32 %v2262_v12, 0.0  ;;  %v1782_v17 = vadd.f32 %v1711_v36, %v1559_v1  ;;  %v2633_v12 = vld [vmem:[%s2804_s12 + $0x158] sm:$0xff]  ;;  %v3682_v1 = vld [vmem:[#allocation19_spill] sm:$0xff] }
 0x20b   : > { %v1490_v41 = vpop.f32.mrf.mxu1 }
 0x20c   : > { %2327 = vst.msk [vmem:[%s3433_s14 + $0x28] sm:$0xff] %vm2321_vm3, %v2294_v13  ;;  %v2005_v47 = vadd.f32 %v1934_v24, %v1782_v17  ;;  %v2158_v62 = vpop.f32.mrf.mxu0  ;;  %v1560_v57 = vadd.f32 %v1490_v41, %v3680_v18  ;;  %v2681_v24 = vld [vmem:[%s2883_s25 + $0x151] sm:$0xff]  ;;  %v2682_v13 = vld [vmem:[%s2883_s25 + $0x159] sm:$0xff] }
 0x20d   : > { %v2076_v51 = vpack.c.bf16 %v2682_v13, %v2681_v24 }
 0x20e   : > { %v2227_v30 = vadd.f32 %v2156_v23, %v2005_v47  ;;  %v1389_v23 = vld [vmem:[%s2889_s28 + $0x139] sm:$0xff] }
 0x20f   : > { %v1408_v47 = vpack.c.bf16 %v1390_v49, %v1389_v23 }
 0x210   : > { %v2263_v37 = vadd.f32 %v3421_v15, %v2227_v30 }
 0x211   : > { %v1713_v46 = vpop.f32.mrf.mxu2 }
 0x212   : > { %v1936_v52 = vpop.f32.mrf.mxu3  ;;  %v2295_v2 = vmax.f32 %v2263_v37, 0.0  ;;  %v1783_v54 = vadd.f32 %v1713_v46, %v1560_v57  ;;  %v3683_v46 = vld [vmem:[#allocation20_spill] sm:$0xff] }
 0x213   : > { %v1493_v9 = vpop.f32.mrf.mxu1 }
 0x214   : > { %2328 = vst.msk [vmem:[%s3433_s14 + $0x30] sm:$0xff] %vm2321_vm3, %v2295_v2  ;;  %v2006_v14 = vadd.f32 %v1936_v52, %v1783_v54  ;;  %v2161_v40 = vpop.f32.mrf.mxu0  ;;  %v1561_v48 = vadd.f32 %v1493_v9, %v3681_v7  ;;  %v2585_v7 = vld [vmem:[%s2883_s25 + $0x168] sm:$0xff] }
 0x216   : > { %2553 = vmatmul.msk.bf16.gmra.mxu1 %vm412_vm2, %v1407_v20  ;;  %v2228_v3 = vadd.f32 %v2158_v62, %v2006_v14  ;;  %2602 = vmatmul.msk.bf16.gmra.mxu2 %vm412_vm2, %v3225_v35 }
 0x217   : > { %2651 = vmatmul.msk.bf16.gmra.mxu3 %vm412_vm2, %v1853_v55  ;;  %2700 = vmatmul.msk.bf16.gmra.mxu0 %vm412_vm2, %v3227_v5  ;;  %v2632_v5 = vld [vmem:[%s2804_s12 + $0x150] sm:$0xff] }
 0x218   : > { %v2264_v33 = vadd.f32 %v3421_v15, %v2228_v3  ;;  %v1854_v26 = vpack.c.bf16 %v2633_v12, %v2632_v5  ;;  %v1391_v3 = vld [vmem:[%s2889_s28 + $0x151] sm:$0xff] }
 0x219   : > { %v1716_v32 = vpop.f32.mrf.mxu2 }
 0x21a   : > { %v1939_v16 = vpop.f32.mrf.mxu3  ;;  %v2296_v10 = vmax.f32 %v2264_v33, 0.0  ;;  %v1784_v42 = vadd.f32 %v1716_v32, %v1561_v48  ;;  %v1392_v33 = vld [vmem:[%s2889_s28 + $0x159] sm:$0xff]  ;;  %v2586_v48 = vld [vmem:[%s2883_s25 + $0x170] sm:$0xff]  ;;  %v2634_v32 = vld [vmem:[%s2804_s12 + $0x168] sm:$0xff] }
 0x21b   : > { %v1495_v39 = vpop.f32.mrf.mxu1  ;;  %v1409_v49 = vpack.c.bf16 %v1392_v33, %v1391_v3 }
 0x21c   : > { %2329 = vst.msk [vmem:[%s3433_s14 + $0x38] sm:$0xff] %vm2321_vm3, %v2296_v10  ;;  %v2007_v35 = vadd.f32 %v1939_v16, %v1784_v42  ;;  %v2163_v63 = vpop.f32.mrf.mxu0  ;;  %v1562_v36 = vadd.f32 %v1495_v39, %v3682_v1  ;;  %v2635_v16 = vld [vmem:[%s2804_s12 + $0x170] sm:$0xff]  ;;  %v3684_v42 = vld [vmem:[#allocation21_spill] sm:$0xff]  ;;  %v1632_v1 = vpack.c.bf16 %v2586_v48, %v2585_v7 }
 0x21e   : > { %v2229_v60 = vadd.f32 %v2161_v40, %v2007_v35  ;;  %v2683_v35 = vld [vmem:[%s2883_s25 + $0x169] sm:$0xff] }
 0x220   : > { %v2265_v27 = vadd.f32 %v3421_v15, %v2229_v60 }
 0x221   : > { %v1718_v17 = vpop.f32.mrf.mxu2 }
 0x222   : > { %v1941_v41 = vpop.f32.mrf.mxu3  ;;  %v2297_v62 = vmax.f32 %v2265_v27, 0.0  ;;  %v1785_v30 = vadd.f32 %v1718_v17, %v1562_v36  ;;  %v1855_v36 = vpack.c.bf16 %v2635_v16, %v2634_v32 }
 0x223   : > { %v1498_v29 = vpop.f32.mrf.mxu1 }
 0x224   : > { %2330 = vst.msk [vmem:[%s3433_s14 + $0x40] sm:$0xff] %vm2321_vm3, %v2297_v62  ;;  %v2008_v31 = vadd.f32 %v1941_v41, %v1785_v30  ;;  %v2166_v37 = vpop.f32.mrf.mxu0  ;;  %v1563_v52 = vadd.f32 %v1498_v29, %v3683_v46  ;;  %v1393_v46 = vld [vmem:[%s2889_s28 + $0x169] sm:$0xff] }
 0x226   : > { %2554 = vmatmul.msk.bf16.gmra.mxu1 %vm412_vm2, %v1408_v47  ;;  %v2230_v18 = vadd.f32 %v2163_v63, %v2008_v31  ;;  %2603 = vmatmul.msk.bf16.gmra.mxu2 %vm412_vm2, %v3249_v8  ;;  %v2684_v63 = vld [vmem:[%s2883_s25 + $0x171] sm:$0xff] }
 0x227   : > { %2652 = vmatmul.msk.bf16.gmra.mxu3 %vm412_vm2, %v1854_v26  ;;  %2701 = vmatmul.msk.bf16.gmra.mxu0 %vm412_vm2, %v2076_v51  ;;  %v2077_v24 = vpack.c.bf16 %v2684_v63, %v2683_v35 }
 0x228   : > { %v2266_v57 = vadd.f32 %v3421_v15, %v2230_v18 }
 0x229   : > { %v1721_v20 = vpop.f32.mrf.mxu2 }
 0x22a   : > { %v1944_v2 = vpop.f32.mrf.mxu3  ;;  %v2298_v54 = vmax.f32 %v2266_v57, 0.0  ;;  %v1786_v9 = vadd.f32 %v1721_v20, %v1563_v52  ;;  %v1394_v52 = vld [vmem:[%s2889_s28 + $0x171] sm:$0xff]  ;;  %v2587_v20 = vld [vmem:[%s2883_s25 + $0x180] sm:$0xff] }
 0x22b   : > { %v1500_v55 = vpop.f32.mrf.mxu1  ;;  %v1410_v33 = vpack.c.bf16 %v1394_v52, %v1393_v46 }
 0x22c   : > { %2331 = vst.msk [vmem:[%s3433_s14 + $0x48] sm:$0xff] %vm2321_vm3, %v2298_v54  ;;  %v2009_v8 = vadd.f32 %v1944_v2, %v1786_v9  ;;  %v2168_v14 = vpop.f32.mrf.mxu0  ;;  %v1564_v39 = vadd.f32 %v1500_v55, %v3684_v42  ;;  %v2588_v2 = vld [vmem:[%s2883_s25 + $0x188] sm:$0xff]  ;;  %v2636_v54 = vld [vmem:[%s2804_s12 + $0x180] sm:$0xff] }
 0x22d   : > { %v2637_v9 = vld [vmem:[%s2804_s12 + $0x188] sm:$0xff]  ;;  %v1633_v16 = vpack.c.bf16 %v2588_v2, %v2587_v20 }
 0x22e   : > { %v2231_v40 = vadd.f32 %v2166_v37, %v2009_v8  ;;  %v2685_v8 = vld [vmem:[%s2883_s25 + $0x181] sm:$0xff] }
 0x230   : > { %v2267_v10 = vadd.f32 %v3421_v15, %v2231_v40 }
 0x231   : > { %v1723_v60 = vpop.f32.mrf.mxu2 }
 0x232   : > { %v1946_v23 = vpop.f32.mrf.mxu3  ;;  %v2299_v5 = vmax.f32 %v2267_v10, 0.0  ;;  %v1787_v12 = vadd.f32 %v1723_v60, %v1564_v39  ;;  %v1856_v10 = vpack.c.bf16 %v2637_v9, %v2636_v54 }
 0x233   : > { %v1503_v27 = vpop.f32.mrf.mxu1 }
 0x234   : > { %2332 = vst.msk [vmem:[%s3433_s14 + $0x50] sm:$0xff] %vm2321_vm3, %v2299_v5  ;;  %v2010_v13 = vadd.f32 %v1946_v23, %v1787_v12  ;;  %v2171_v17 = vpop.f32.mrf.mxu0  ;;  %v1565_v62 = vadd.f32 %v1503_v27, %v3262_v21 }
 0x236   : > { %2555 = vmatmul.msk.bf16.gmra.mxu1 %vm412_vm2, %v1409_v49  ;;  %v2232_v41 = vadd.f32 %v2168_v14, %v2010_v13  ;;  %2604 = vmatmul.msk.bf16.gmra.mxu2 %vm412_vm2, %v1632_v1  ;;  %v2686_v14 = vld [vmem:[%s2883_s25 + $0x189] sm:$0xff] }
 0x237   : > { %2653 = vmatmul.msk.bf16.gmra.mxu3 %vm412_vm2, %v1855_v36  ;;  %2702 = vmatmul.msk.bf16.gmra.mxu0 %vm412_vm2, %v2077_v24  ;;  %v2078_v42 = vpack.c.bf16 %v2686_v14, %v2685_v8 }
 0x238   : > { %v2268_v47 = vadd.f32 %v3421_v15, %v2232_v41 }
 0x239   : > { %v1726_v30 = vpop.f32.mrf.mxu2 }
 0x23a   : > { %v1949_v29 = vpop.f32.mrf.mxu3  ;;  %v2300_v26 = vmax.f32 %v2268_v47, 0.0  ;;  %v1788_v51 = vadd.f32 %v1726_v30, %v1565_v62 }
 0x23b   : > { %v1505_v31 = vpop.f32.mrf.mxu1 }
 0x23c   : > { %2333 = vst.msk [vmem:[%s3433_s14 + $0x58] sm:$0xff] %vm2321_vm3, %v2300_v26  ;;  %v2011_v37 = vadd.f32 %v1949_v29, %v1788_v51  ;;  %v2173_v18 = vpop.f32.mrf.mxu0  ;;  %v1566_v55 = vadd.f32 %v1505_v31, %v3273_v56 }
 0x23e   : > { %v2233_v57 = vadd.f32 %v2171_v17, %v2011_v37 }
 0x240   : > { %v2269_v21 = vadd.f32 %v3421_v15, %v2233_v57 }
 0x241   : > { %v1728_v40 = vpop.f32.mrf.mxu2 }
 0x242   : > { %v1951_v3 = vpop.f32.mrf.mxu3  ;;  %v2301_v7 = vmax.f32 %v2269_v21, 0.0  ;;  %v1789_v48 = vadd.f32 %v1728_v40, %v1566_v55 }
 0x243   : > { %v1508_v32 = vpop.f32.mrf.mxu1 }
 0x244   : > { %2334 = vst.msk [vmem:[%s3433_s14 + $0x60] sm:$0xff] %vm2321_vm3, %v2301_v7  ;;  %v2012_v39 = vadd.f32 %v1951_v3, %v1789_v48  ;;  %v2176_v35 = vpop.f32.mrf.mxu0  ;;  %v1567_v60 = vadd.f32 %v1508_v32, %v3279_v50 }
 0x246   : > { %2556 = vmatmul.msk.bf16.gmra.mxu1 %vm412_vm2, %v1410_v33  ;;  %v2234_v63 = vadd.f32 %v2173_v18, %v2012_v39  ;;  %2605 = vmatmul.msk.bf16.gmra.mxu2 %vm412_vm2, %v1633_v16 }
 0x247   : > { %2654 = vmatmul.msk.bf16.gmra.mxu3 %vm412_vm2, %v1856_v10  ;;  %2703 = vmatmul.msk.bf16.gmra.mxu0 %vm412_vm2, %v2078_v42 }
 0x248   : > { %v2270_v56 = vadd.f32 %v3421_v15, %v2234_v63 }
 0x249   : > { %v1731_v23 = vpop.f32.mrf.mxu2 }
 0x24a   : > { %v1954_v49 = vpop.f32.mrf.mxu3  ;;  %v2302_v5 = vmax.f32 %v2270_v56, 0.0  ;;  %v1790_v12 = vadd.f32 %v1731_v23, %v1567_v60 }
 0x24b   : > { %v1510_v27 = vpop.f32.mrf.mxu1 }
 0x24c   : > { %2335 = vst.msk [vmem:[%s3433_s14 + $0x68] sm:$0xff] %vm2321_vm3, %v2302_v5  ;;  %v2013_v1 = vadd.f32 %v1954_v49, %v1790_v12  ;;  %v2178_v36 = vpop.f32.mrf.mxu0  ;;  %v1568_v17 = vadd.f32 %v1510_v27, %v3287_v61 }
 0x24e   : > { %v2235_v24 = vadd.f32 %v2176_v35, %v2013_v1 }
 0x250   : > { %v2271_v13 = vadd.f32 %v3421_v15, %v2235_v24 }
 0x251   : > { %v1733_v41 = vpop.f32.mrf.mxu2 }
 0x252   : > { %v1956_v47 = vpop.f32.mrf.mxu3  ;;  %v2303_v62 = vmax.f32 %v2271_v13, 0.0  ;;  %v1791_v50 = vadd.f32 %v1733_v41, %v1568_v17 }
 0x253   : > { %v1513_v30 = vpop.f32.mrf.mxu1 }
 0x254   : > { %2336 = vst.msk [vmem:[%s3433_s14 + $0x70] sm:$0xff] %vm2321_vm3, %v2303_v62  ;;  %v2014_v29 = vadd.f32 %v1956_v47, %v1791_v50  ;;  %v2181_v26 = vpop.f32.mrf.mxu0  ;;  %v1569_v37 = vadd.f32 %v1513_v30, %v3294_v58 }
 0x256   : > { %v2236_v51 = vadd.f32 %v2178_v36, %v2014_v29 }
 0x258   : > { %v2272_v31 = vadd.f32 %v3421_v15, %v2236_v51 }
 0x259   : > { %v1736_v18 = vpop.f32.mrf.mxu2 }
 0x25a   : > { %v1959_v57 = vpop.f32.mrf.mxu3  ;;  %v2304_v46 = vmax.f32 %v2272_v31, 0.0  ;;  %v1792_v61 = vadd.f32 %v1736_v18, %v1569_v37 }
 0x25b   : > { %v1515_v52 = vpop.f32.mrf.mxu1 }
 0x25c   : > { %2337 = vst.msk [vmem:[%s3433_s14 + $0x78] sm:$0xff] %vm2321_vm3, %v2304_v46  ;;  %v2015_v20 = vadd.f32 %v1959_v57, %v1792_v61  ;;  %v2183_v2 = vpop.f32.mrf.mxu0  ;;  %v1570_v21 = vadd.f32 %v1515_v52, %v3302_v53 }
 0x25e   : > { %v2237_v54 = vadd.f32 %v2181_v26, %v2015_v20 }
 0x260   : > { %v2273_v9 = vadd.f32 %v3421_v15, %v2237_v54 }
 0x261   : > { %v1738_v55 = vpop.f32.mrf.mxu2 }
 0x262   : > { %v1961_v8 = vpop.f32.mrf.mxu3  ;;  %v2305_v14 = vmax.f32 %v2273_v9, 0.0  ;;  %v1793_v58 = vadd.f32 %v1738_v55, %v1570_v21 }
 0x263   : > { %v1518_v40 = vpop.f32.mrf.mxu1 }
 0x264   : > { %2338 = vst.msk [vmem:[%s3433_s14 + $0x80] sm:$0xff] %vm2321_vm3, %v2305_v14  ;;  %v2016_v3 = vadd.f32 %v1961_v8, %v1793_v58  ;;  %v2186_v33 = vpop.f32.mrf.mxu0  ;;  %v1571_v32 = vadd.f32 %v1518_v40, %v3309_v34 }
 0x266   : > { %v2238_v7 = vadd.f32 %v2183_v2, %v2016_v3 }
 0x268   : > { %v2274_v48 = vadd.f32 %v3421_v15, %v2238_v7 }
 0x269   : > { %v1741_v16 = vpop.f32.mrf.mxu2 }
 0x26a   : > { %v1964_v10 = vpop.f32.mrf.mxu3  ;;  %v2306_v42 = vmax.f32 %v2274_v48, 0.0  ;;  %v1794_v53 = vadd.f32 %v1741_v16, %v1571_v32 }
 0x26b   : > { %v1520_v39 = vpop.f32.mrf.mxu1 }
 0x26c   : > { %2339 = vst.msk [vmem:[%s3433_s14 + $0x88] sm:$0xff] %vm2321_vm3, %v2306_v42  ;;  %v2017_v35 = vadd.f32 %v1964_v10, %v1794_v53  ;;  %v2188_v63 = vpop.f32.mrf.mxu0  ;;  %v1572_v23 = vadd.f32 %v1520_v39, %v3317_v43 }
 0x26e   : > { %v2239_v56 = vadd.f32 %v2186_v33, %v2017_v35 }
 0x270   : > { %v2275_v60 = vadd.f32 %v3421_v15, %v2239_v56 }
 0x271   : > { %v1743_v49 = vpop.f32.mrf.mxu2 }
 0x272   : > { %v1966_v5 = vpop.f32.mrf.mxu3  ;;  %v2307_v12 = vmax.f32 %v2275_v60, 0.0  ;;  %v1795_v34 = vadd.f32 %v1743_v49, %v1572_v23 }
 0x273   : > { %v1523_v27 = vpop.f32.mrf.mxu1 }
 0x274   : > { %2340 = vst.msk [vmem:[%s3433_s14 + $0x90] sm:$0xff] %vm2321_vm3, %v2307_v12  ;;  %v2018_v1 = vadd.f32 %v1966_v5, %v1795_v34  ;;  %v2191_v36 = vpop.f32.mrf.mxu0  ;;  %v1573_v17 = vadd.f32 %v1523_v27, %v3324_v6 }
 0x276   : > { %v2240_v24 = vadd.f32 %v2188_v63, %v2018_v1 }
 0x278   : > { %v2276_v13 = vadd.f32 %v3421_v15, %v2240_v24 }
 0x279   : > { %v1746_v41 = vpop.f32.mrf.mxu2 }
 0x27a   : > { %v1969_v47 = vpop.f32.mrf.mxu3  ;;  %v2308_v62 = vmax.f32 %v2276_v13, 0.0  ;;  %v1796_v43 = vadd.f32 %v1746_v41, %v1573_v17 }
 0x27b   : > { %v1525_v50 = vpop.f32.mrf.mxu1 }
 0x27c   : > { %2341 = vst.msk [vmem:[%s3433_s14 + $0x98] sm:$0xff] %vm2321_vm3, %v2308_v62  ;;  %v2019_v30 = vadd.f32 %v1969_v47, %v1796_v43  ;;  %v2193_v29 = vpop.f32.mrf.mxu0  ;;  %v1574_v31 = vadd.f32 %v1525_v50, %v3333_v11 }
 0x27e   : > { %v2241_v26 = vadd.f32 %v2191_v36, %v2019_v30 }
 0x280   : > { %v2277_v51 = vadd.f32 %v3421_v15, %v2241_v26 }
 0x281   : > { %v1748_v37 = vpop.f32.mrf.mxu2 }
 0x282   : > { %v1971_v18 = vpop.f32.mrf.mxu3  ;;  %v2309_v57 = vmax.f32 %v2277_v51, 0.0  ;;  %v1797_v6 = vadd.f32 %v1748_v37, %v1574_v31 }
 0x283   : > { %v1528_v46 = vpop.f32.mrf.mxu1 }
 0x284   : > { %2342 = vst.msk [vmem:[%s3433_s14 + $0xa0] sm:$0xff] %vm2321_vm3, %v2309_v57  ;;  %v2020_v61 = vadd.f32 %v1971_v18, %v1797_v6  ;;  %v2196_v52 = vpop.f32.mrf.mxu0  ;;  %v1575_v54 = vadd.f32 %v1528_v46, %v3340_v28 }
 0x286   : > { %v2242_v20 = vadd.f32 %v2193_v29, %v2020_v61 }
 0x288   : > { %v2278_v2 = vadd.f32 %v3421_v15, %v2242_v20 }
 0x289   : > { %v1751_v9 = vpop.f32.mrf.mxu2 }
 0x28a   : > { %v1974_v21 = vpop.f32.mrf.mxu3  ;;  %v2310_v55 = vmax.f32 %v2278_v2, 0.0  ;;  %v1798_v11 = vadd.f32 %v1751_v9, %v1575_v54 }
 0x28b   : > { %v1530_v8 = vpop.f32.mrf.mxu1 }
 0x28c   : > { %2343 = vst.msk [vmem:[%s3433_s14 + $0xa8] sm:$0xff] %vm2321_vm3, %v2310_v55  ;;  %v2021_v14 = vadd.f32 %v1974_v21, %v1798_v11  ;;  %v2198_v58 = vpop.f32.mrf.mxu0  ;;  %v1576_v33 = vadd.f32 %v1530_v8, %v3349_v59 }
 0x28e   : > { %v2243_v40 = vadd.f32 %v2196_v52, %v2021_v14 }
 0x290   : > { %v2279_v3 = vadd.f32 %v3421_v15, %v2243_v40 }
 0x291   : > { %v1753_v7 = vpop.f32.mrf.mxu2 }
 0x292   : > { %v1976_v48 = vpop.f32.mrf.mxu3  ;;  %v2311_v32 = vmax.f32 %v2279_v3, 0.0  ;;  %v1799_v28 = vadd.f32 %v1753_v7, %v1576_v33 }
 0x293   : > { %v1533_v16 = vpop.f32.mrf.mxu1 }
 0x294   : > { %2344 = vst.msk [vmem:[%s3433_s14 + $0xb0] sm:$0xff] %vm2321_vm3, %v2311_v32  ;;  %v2022_v10 = vadd.f32 %v1976_v48, %v1799_v28  ;;  %v2201_v42 = vpop.f32.mrf.mxu0  ;;  %v1577_v35 = vadd.f32 %v1533_v16, %v3356_v0 }
 0x296   : > { %v2244_v53 = vadd.f32 %v2198_v58, %v2022_v10 }
 0x298   : > { %v2280_v39 = vadd.f32 %v3421_v15, %v2244_v53 }
 0x299   : > { %v1756_v63 = vpop.f32.mrf.mxu2 }
 0x29a   : > { %v1979_v56 = vpop.f32.mrf.mxu3  ;;  %v2312_v60 = vmax.f32 %v2280_v39, 0.0  ;;  %v1800_v59 = vadd.f32 %v1756_v63, %v1577_v35 }
 0x29b   : > { %v1535_v23 = vpop.f32.mrf.mxu1 }
 0x29c   : > { %2345 = vst.msk [vmem:[%s3433_s14 + $0xb8] sm:$0xff] %vm2321_vm3, %v2312_v60  ;;  %v2023_v49 = vadd.f32 %v1979_v56, %v1800_v59  ;;  %v2203_v5 = vpop.f32.mrf.mxu0  ;;  %v1578_v27 = vadd.f32 %v1535_v23, %v3365_v19 }
 0x29e   : > { %v2245_v12 = vadd.f32 %v2201_v42, %v2023_v49 }
 0x2a0   : > { %v2281_v34 = vadd.f32 %v3421_v15, %v2245_v12 }
 0x2a1   : > { %v1758_v1 = vpop.f32.mrf.mxu2 }
 0x2a2   : > { %v1981_v36 = vpop.f32.mrf.mxu3  ;;  %v2313_v24 = vmax.f32 %v2281_v34, 0.0  ;;  %v1801_v0 = vadd.f32 %v1758_v1, %v1578_v27 }
 0x2a3   : > { %v1538_v13 = vpop.f32.mrf.mxu1 }
 0x2a4   : > { %2346 = vst.msk [vmem:[%s3433_s14 + $0xc0] sm:$0xff] %vm2321_vm3, %v2313_v24  ;;  %v2024_v17 = vadd.f32 %v1981_v36, %v1801_v0  ;;  %v2206_v41 = vpop.f32.mrf.mxu0  ;;  %v1579_v43 = vadd.f32 %v1538_v13, %v3372_v25 }
 0x2a6   : > { %v2246_v47 = vadd.f32 %v2203_v5, %v2024_v17 }
 0x2a8   : > { %v2282_v62 = vadd.f32 %v3421_v15, %v2246_v47 }
 0x2a9   : > { %v1761_v50 = vpop.f32.mrf.mxu2 }
 0x2aa   : > { %v1984_v30 = vpop.f32.mrf.mxu3  ;;  %v2314_v29 = vmax.f32 %v2282_v62, 0.0  ;;  %v1802_v19 = vadd.f32 %v1761_v50, %v1579_v43 }
 0x2ab   : > { %v1540_v26 = vpop.f32.mrf.mxu1 }
 0x2ac   : > { %2347 = vst.msk [vmem:[%s3433_s14 + $0xc8] sm:$0xff] %vm2321_vm3, %v2314_v29  ;;  %v2025_v51 = vadd.f32 %v1984_v30, %v1802_v19  ;;  %v2208_v31 = vpop.f32.mrf.mxu0  ;;  %v1580_v57 = vadd.f32 %v1540_v26, %v3381_v44 }
 0x2ae   : > { %v2247_v37 = vadd.f32 %v2206_v41, %v2025_v51 }
 0x2b0   : > { %v2283_v18 = vadd.f32 %v3421_v15, %v2247_v37 }
 0x2b1   : > { %v1763_v6 = vpop.f32.mrf.mxu2 }
 0x2b2   : > { %v1986_v46 = vpop.f32.mrf.mxu3  ;;  %v2315_v61 = vmax.f32 %v2283_v18, 0.0  ;;  %v1803_v25 = vadd.f32 %v1763_v6, %v1580_v57 }
 0x2b3   : > { %v1543_v52 = vpop.f32.mrf.mxu1 }
 0x2b4   : > { %2348 = vst.msk [vmem:[%s3433_s14 + $0xd0] sm:$0xff] %vm2321_vm3, %v2315_v61  ;;  %v2026_v20 = vadd.f32 %v1986_v46, %v1803_v25  ;;  %v2211_v54 = vpop.f32.mrf.mxu0  ;;  %v1581_v21 = vadd.f32 %v1543_v52, %v3388_v22 }
 0x2b6   : > { %v2248_v2 = vadd.f32 %v2208_v31, %v2026_v20 }
 0x2b8   : > { %v2284_v9 = vadd.f32 %v3421_v15, %v2248_v2 }
 0x2b9   : > { %v1766_v55 = vpop.f32.mrf.mxu2 }
 0x2ba   : > { %v1989_v11 = vpop.f32.mrf.mxu3  ;;  %v2316_v8 = vmax.f32 %v2284_v9, 0.0  ;;  %v1804_v44 = vadd.f32 %v1766_v55, %v1581_v21 }
 0x2bb   : > { %v1545_v14 = vpop.f32.mrf.mxu1 }
 0x2bc   : > { %2349 = vst.msk [vmem:[%s3433_s14 + $0xd8] sm:$0xff] %vm2321_vm3, %v2316_v8  ;;  %v2027_v58 = vadd.f32 %v1989_v11, %v1804_v44  ;;  %v1582_v33 = vadd.f32 %v1545_v14, %v3397_v45  ;;  %v2213_v7 = vpop.f32.mrf.mxu0 }
 0x2be   : > { %v2249_v40 = vadd.f32 %v2211_v54, %v2027_v58 }
 0x2c0   : > { %v2285_v3 = vadd.f32 %v3421_v15, %v2249_v40 }
 0x2c1   : > { %v1768_v48 = vpop.f32.mrf.mxu2 }
 0x2c2   : > { %v1991_v32 = vpop.f32.mrf.mxu3  ;;  %v2317_v28 = vmax.f32 %v2285_v3, 0.0  ;;  %v1805_v22 = vadd.f32 %v1768_v48, %v1582_v33 }
 0x2c3   : > { %v1548_v16 = vpop.f32.mrf.mxu1 }
 0x2c4   : > { %2350 = vst.msk [vmem:[%s3433_s14 + $0xe0] sm:$0xff] %vm2321_vm3, %v2317_v28  ;;  %v2028_v10 = vadd.f32 %v1991_v32, %v1805_v22  ;;  %v1583_v39 = vadd.f32 %v1548_v16, %v3404_v4  ;;  %v2216_v60 = vpop.f32.mrf.mxu0 }
 0x2c6   : > { %v2250_v42 = vadd.f32 %v2213_v7, %v2028_v10 }
 0x2c8   : > { %v2286_v53 = vadd.f32 %v3421_v15, %v2250_v42 }
 0x2c9   : > { %v1771_v35 = vpop.f32.mrf.mxu2 }
 0x2ca   : > { %v1994_v63 = vpop.f32.mrf.mxu3  ;;  %v2318_v56 = vmax.f32 %v2286_v53, 0.0  ;;  %v1806_v45 = vadd.f32 %v1771_v35, %v1583_v39 }
 0x2cb   : > { %v1550_v23 = vpop.f32.mrf.mxu1 }
 0x2cc   : > { %2351 = vst.msk [vmem:[%s3433_s14 + $0xe8] sm:$0xff] %vm2321_vm3, %v2318_v56  ;;  %v2029_v59 = vadd.f32 %v1994_v63, %v1806_v45  ;;  %v1584_v12 = vadd.f32 %v1550_v23, %v3413_v38  ;;  %v2218_v24 = vpop.f32.mrf.mxu0 }
 0x2ce   : > { %v2251_v49 = vadd.f32 %v2216_v60, %v2029_v59 }
 0x2d0   : > { %v2287_v5 = vadd.f32 %v3421_v15, %v2251_v49 }
 0x2d1   : > { %v1773_v34 = vpop.f32.mrf.mxu2 }
 0x2d2   : > { %v2319_v27 = vmax.f32 %v2287_v5, 0.0  ;;  %v1807_v1 = vadd.f32 %v1773_v34, %v1584_v12  ;;  %v1996_v4 = vpop.f32.mrf.mxu3 }
 0x2d4   : > { %2352 = vst.msk [vmem:[%s3433_s14 + $0xf0] sm:$0xff] %vm2321_vm3, %v2319_v27  ;;  %v2030_v36 = vadd.f32 %v1996_v4, %v1807_v1 }
 0x2d6   : > { %v2252_v0 = vadd.f32 %v2218_v24, %v2030_v36 }
 0x2d8   : > { %v2288_v13 = vadd.f32 %v3421_v15, %v2252_v0 }
 0x2da   : > { %v2320_v17 = vmax.f32 %v2288_v13, 0.0 }
 0x2dc   : > { %2353 = vst.msk [vmem:[%s3433_s14 + $0xf8] sm:$0xff] %vm2321_vm3, %v2320_v17 }
 0x2dd PF: > { %s16_s21 = sadd.s32 1, %s2727_s21  }
 0x2de   : > { %p13_p4 = scmp.ge.s32.totalorder %s16_s21, 4  }
 0x2e0   :  { %15 = sbr.rel (!%p13_p4) target bundleno = 1 (0x1), region = 93 }

// kernel: swiftformer_classifier_forward.11
= control target key start
LH: loop header
LB: loop body
LE: loop exit
PB: predicated region body
PF: predicated region fallthrough
CT: control target
= control target key end

     0   :  { %s1152_s21 = smov 0   ;;  %s1460_s0 = inlined_call_operand.vmem [shape: f32[2,9,9,8], index: 0, kind: input, shape index: {}]   ;;  %s1461_s1 = inlined_call_operand.vmem [shape: f32[2,9,9,8], index: 1, kind: input, shape index: {}]   ;;  %s1462_s2 = inlined_call_operand.vmem [shape: f32[2,9,9,8], index: 2, kind: input, shape index: {}]   ;;  %s1463_s3 = inlined_call_operand.vmem [shape: f32[2,9,9,8], index: 3, kind: input, shape index: {}]   ;;  %s1464_s4 = inlined_call_operand.vmem [shape: bf16[9,8,16], index: 4, kind: input, shape index: {}]   ;;  %s1465_s5 = inlined_call_operand.vmem [shape: f32[1,16], index: 5, kind: input, shape index: {}]   ;;  %s1466_s6 = inlined_call_operand.vmem [shape: f32[2,8,8,16], index: 6, kind: output, shape index: {}]  }
   0x1 LB: > { %s1014_s22 = sadd.s32 4294967295, %s1115_s21   ;;  %p1018_p0 = scmp.ge.s32.totalorder %s1115_s21, 1  ;;  %s1115_s21 = sphi %s1152_s21, %s16_s21  }
   0x2   : > { %p242_p1 = scmp.lt.s32.totalorder %s1115_s21, 3 }
   0x4   : > { %p243_p2 = pnand %p1018_p0, %p242_p1 }
   0x5   : > { %p287_p3 = scmp.lt.s32.totalorder (!%p243_p2), %s1014_s22, 1 }
   0x6   : > { %246 = sbr.rel (%p243_p2) target bundleno = 299 (0x12b), region = 44 }
   0xb   : > { %v1025_v0 = vld [vmem:[%s1464_s4 + $0x4] sm:$0xf]  ;;  %vm353_vm0 = vcmask 1043456   ;;  %v1034_v2 = vld [vmem:[%s1464_s4 + $0x8] sm:$0xf]  ;;  %s1468_s22 = smov (!%p287_p3, %s1014_s22), 1 }
   0xc   : > { %v355_v1 = vsel %vm353_vm0, %v1025_v0, 0  ;;  %v1039_v3 = vld [vmem:[%s1464_s4 + $0xc] sm:$0xf]  ;;  %v457_v4 = vsel %vm353_vm0, %v1034_v2, 0  ;;  %v325_v6 = vld [vmem:[%s1464_s4] sm:$0xf] }
   0xd   : > { %1096 = vmatpush.bf16.msra.mxu1 %v355_v1  ;;  %1097 = vmatpush.bf16.msra.mxu2 %v355_v1  ;;  %v523_v5 = vsel %vm353_vm0, %v1039_v3, 0  ;;  %v399_v7 = vsel %vm353_vm0, %v325_v6, 0  ;;  %v1044_v8 = vld [vmem:[%s1464_s4 + $0x10] sm:$0xf]  ;;  %s1182_s9 = smul.u32 144, %s1468_s22  ;;  %vm340_vm1 = vcmask 64512  }
   0xe   : > { %1098 = vmatpush.bf16.msra.mxu3 %v355_v1  ;;  %364 = vmatpush.bf16.msra.mxu0 %v355_v1  ;;  %v589_v9 = vsel %vm353_vm0, %v1044_v8, 0  ;;  %v1062_v10 = vld [vmem:[%s1464_s4 + $0x18] sm:$0xf]  ;;  %v1075_v11 = vld [vmem:[%s1464_s4 + $0x1c] sm:$0xf]  ;;  %s1095_s10 = sshll.u32 %s1468_s22, 6 }
   0xf   : > { %s1195_s16 = scalar_lea.vmem %s1461_s1, %s1182_s9  ;;  %v1049_v12 = vld [vmem:[%s1464_s4 + $0x14] sm:$0xf]  ;;  %v1088_v13 = vld [vmem:[%s1464_s4 + $0x20] sm:$0xf]  ;;  %v722_v25 = vsel %vm353_vm0, %v1062_v10, 0  ;;  %v789_v27 = vsel %vm353_vm0, %v1075_v11, 0  ;;  %s1244_s25 = scalar_lea.vmem %s1460_s0, %s1182_s9 }
  0x10   : > { %v1204_v14 = vld [vmem:[%s1195_s16 + $0x20] sm:$0xff]  ;;  %v1207_v15 = vld [vmem:[%s1195_s16 + $0x30] sm:$0xff]  ;;  %v655_v28 = vsel %vm353_vm0, %v1049_v12, 0  ;;  %v855_v29 = vsel %vm353_vm0, %v1088_v13, 0  ;;  %s1250_s28 = scalar_lea.vmem %s1462_s2, %s1182_s9  ;;  %s1256_s7 = scalar_lea.vmem %s1463_s3, %s1182_s9  ;;  %vm914_vm2 = vcmask 130048  }
  0x11   : > { %466 = vmatpush.bf16.msrb.mxu2 %v457_v4  ;;  %408 = vmatpush.bf16.msrb.mxu1 %v399_v7  ;;  %v1210_v16 = vld [vmem:[%s1195_s16 + $0x40] sm:$0xff]  ;;  %v335_v17 = vpack.c.bf16 %v1207_v15, %v1204_v14  ;;  %v1215_v18 = vld [vmem:[%s1195_s16 + $0x50] sm:$0xff]  ;;  %s1410_s13 = scalar_lea.vmem %s1466_s6, %s1095_s10 }
  0x12   : > { %532 = vmatpush.bf16.msrb.mxu3 %v523_v5  ;;  %598 = vmatpush.bf16.msrb.mxu0 %v589_v9  ;;  %v1218_v19 = vld [vmem:[%s1195_s16 + $0x60] sm:$0xff]  ;;  %v1221_v20 = vld [vmem:[%s1195_s16 + $0x70] sm:$0xff]  ;;  %v336_v21 = vpack.c.bf16 %v1215_v18, %v1210_v16 }
  0x13   : > { %v337_v22 = vpack.c.bf16 %v1221_v20, %v1218_v19  ;;  %v326_v23 = vld [vmem:[%s1195_s16] sm:$0xff]  ;;  %v1229_v24 = vld [vmem:[%s1195_s16 + $0x10] sm:$0xff]  ;;  %1027 = vmatmul.msk.bf16.vlgmr.msra.gmra.mxu1 %vm340_vm1, %v335_v17 }
  0x14   : > { %v334_v26 = vpack.c.bf16 %v1229_v24, %v326_v23  ;;  %1028 = vmatmul.msk.bf16.vlgmr.msra.gmra.mxu2 %vm340_vm1, %v336_v21  ;;  %v313_v30 = vld [vmem:[%s1244_s25] sm:$0xff]  ;;  %v1260_v31 = vld [vmem:[%s1244_s25 + $0x10] sm:$0xff]  ;;  %v770_v2 = vpack.c.bf16 %v1204_v14, %v1229_v24 }
  0x15   : > { %1029 = vmatmul.msk.bf16.vlgmr.msra.gmra.mxu3 %vm340_vm1, %v337_v22  ;;  %731 = vmatpush.bf16.msra.mxu2 %v722_v25  ;;  %v430_v32 = vld [vmem:[%s1244_s25 + $0x1] sm:$0xff]  ;;  %v1264_v33 = vld [vmem:[%s1244_s25 + $0x11] sm:$0xff]  ;;  %v321_v38 = vpack.c.bf16 %v1260_v31, %v313_v30 }
  0x16   : > { %1026 = vmatmul.msk.bf16.vlgmr.msra.gmra.mxu0 %vm340_vm1, %v334_v26  ;;  %798 = vmatpush.bf16.msra.mxu3 %v789_v27  ;;  %v496_v34 = vld [vmem:[%s1250_s28] sm:$0xff]  ;;  %v497_v35 = vld [vmem:[%s1250_s28 + $0x10] sm:$0xff]  ;;  %v438_v39 = vpack.c.bf16 %v1264_v33, %v430_v32 }
  0x17   : > { %664 = vmatpush.bf16.msra.mxu1 %v655_v28  ;;  %864 = vmatpush.bf16.msra.mxu0 %v855_v29  ;;  %v562_v36 = vld [vmem:[%s1256_s7] sm:$0xff]  ;;  %v563_v37 = vld [vmem:[%s1256_s7 + $0x10] sm:$0xff]  ;;  %v504_v40 = vpack.c.bf16 %v497_v35, %v496_v34  ;;  %v771_v29 = vpack.c.bf16 %v1210_v16, %v1207_v15  ;;  %v772_v15 = vpack.c.bf16 %v1218_v19, %v1215_v18 }
  0x18   : > { %v570_v41 = vpack.c.bf16 %v563_v37, %v562_v36  ;;  %v315_v42 = vld [vmem:[%s1244_s25 + $0x20] sm:$0xff]  ;;  %v1278_v43 = vld [vmem:[%s1244_s25 + $0x30] sm:$0xff] }
  0x19   : > { %v432_v44 = vld [vmem:[%s1244_s25 + $0x21] sm:$0xff]  ;;  %v1282_v45 = vld [vmem:[%s1244_s25 + $0x31] sm:$0xff]  ;;  %v322_v50 = vpack.c.bf16 %v1278_v43, %v315_v42  ;;  %v703_v23 = vpack.c.bf16 %v315_v42, %v1260_v31 }
  0x1a   : > { %v498_v46 = vld [vmem:[%s1250_s28 + $0x20] sm:$0xff]  ;;  %v499_v47 = vld [vmem:[%s1250_s28 + $0x30] sm:$0xff]  ;;  %v439_v51 = vpack.c.bf16 %v1282_v45, %v432_v44  ;;  %v836_v24 = vpack.c.bf16 %v432_v44, %v1264_v33 }
  0x1b   : > { %v564_v48 = vld [vmem:[%s1256_s7 + $0x20] sm:$0xff]  ;;  %v565_v49 = vld [vmem:[%s1256_s7 + $0x30] sm:$0xff]  ;;  %v505_v52 = vpack.c.bf16 %v499_v47, %v498_v46 }
  0x1c   : > { %v571_v53 = vpack.c.bf16 %v565_v49, %v564_v48  ;;  %v317_v54 = vld [vmem:[%s1244_s25 + $0x40] sm:$0xff]  ;;  %v318_v55 = vld [vmem:[%s1244_s25 + $0x50] sm:$0xff] }
  0x1d   : > { %v434_v56 = vld [vmem:[%s1244_s25 + $0x41] sm:$0xff]  ;;  %v435_v57 = vld [vmem:[%s1244_s25 + $0x51] sm:$0xff]  ;;  %v323_v62 = vpack.c.bf16 %v318_v55, %v317_v54  ;;  %v704_v28 = vpack.c.bf16 %v317_v54, %v1278_v43 }
  0x1e   : > { %v500_v58 = vld [vmem:[%s1250_s28 + $0x40] sm:$0xff]  ;;  %v501_v59 = vld [vmem:[%s1250_s28 + $0x50] sm:$0xff]  ;;  %v440_v63 = vpack.c.bf16 %v435_v57, %v434_v56  ;;  %v837_v30 = vpack.c.bf16 %v434_v56, %v1282_v45 }
  0x1f   : > { %v566_v60 = vld [vmem:[%s1256_s7 + $0x40] sm:$0xff]  ;;  %v567_v61 = vld [vmem:[%s1256_s7 + $0x50] sm:$0xff]  ;;  %v506_v0 = vpack.c.bf16 %v501_v59, %v500_v58 }
  0x20   : > { %v572_v1 = vpack.c.bf16 %v567_v61, %v566_v60  ;;  %v319_v3 = vld [vmem:[%s1244_s25 + $0x60] sm:$0xff]  ;;  %v320_v4 = vld [vmem:[%s1244_s25 + $0x70] sm:$0xff] }
  0x21   : > { %v436_v5 = vld [vmem:[%s1244_s25 + $0x61] sm:$0xff]  ;;  %v437_v6 = vld [vmem:[%s1244_s25 + $0x71] sm:$0xff]  ;;  %v324_v11 = vpack.c.bf16 %v320_v4, %v319_v3  ;;  %v705_v34 = vpack.c.bf16 %v319_v3, %v318_v55 }
  0x22   : > { %v502_v7 = vld [vmem:[%s1250_s28 + $0x60] sm:$0xff]  ;;  %v503_v8 = vld [vmem:[%s1250_s28 + $0x70] sm:$0xff]  ;;  %v441_v12 = vpack.c.bf16 %v437_v6, %v436_v5  ;;  %v838_v16 = vpack.c.bf16 %v436_v5, %v435_v57 }
  0x23   : > { %1030 = vmatmul.msk.bf16.vlgmr.msrb.gmra.mxu1 %vm340_vm1, %v321_v38  ;;  %v568_v9 = vld [vmem:[%s1256_s7 + $0x60] sm:$0xff]  ;;  %v569_v10 = vld [vmem:[%s1256_s7 + $0x70] sm:$0xff]  ;;  %v507_v13 = vpack.c.bf16 %v503_v8, %v502_v7 }
  0x24   : > { %1035 = vmatmul.msk.bf16.vlgmr.msrb.gmra.mxu2 %vm340_vm1, %v438_v39  ;;  %v573_v14 = vpack.c.bf16 %v569_v10, %v568_v9  ;;  %v628_v17 = vld [vmem:[%s1250_s28 + $0x1] sm:$0xff]  ;;  %v629_v21 = vld [vmem:[%s1250_s28 + $0x11] sm:$0xff] }
  0x25   : > { %1040 = vmatmul.msk.bf16.vlgmr.msrb.gmra.mxu3 %vm340_vm1, %v504_v40  ;;  %v636_v22 = vpack.c.bf16 %v629_v21, %v628_v17  ;;  %v630_v25 = vld [vmem:[%s1250_s28 + $0x21] sm:$0xff]  ;;  %v631_v26 = vld [vmem:[%s1250_s28 + $0x31] sm:$0xff] }
  0x26   : > { %1045 = vmatmul.msk.bf16.vlgmr.msrb.gmra.mxu0 %vm340_vm1, %v570_v41  ;;  %v637_v27 = vpack.c.bf16 %v631_v26, %v630_v25  ;;  %v632_v31 = vld [vmem:[%s1250_s28 + $0x41] sm:$0xff]  ;;  %v633_v32 = vld [vmem:[%s1250_s28 + $0x51] sm:$0xff] }
  0x27   : > { %v638_v33 = vpack.c.bf16 %v633_v32, %v632_v31  ;;  %v634_v35 = vld [vmem:[%s1250_s28 + $0x61] sm:$0xff]  ;;  %v635_v36 = vld [vmem:[%s1250_s28 + $0x71] sm:$0xff] }
  0x28   : > { %v1061_v37 = vld [vmem:[%s1244_s25 + $0x80] sm:$0xff]  ;;  %v639_v40 = vpack.c.bf16 %v635_v36, %v634_v35 }
  0x29   : > { %v1074_v38 = vld [vmem:[%s1195_s16 + $0x80] sm:$0xff]  ;;  %v706_v42 = vpack.c.bf16 %v1061_v37, %v320_v4 }
  0x2a   : > { %v1087_v39 = vld [vmem:[%s1244_s25 + $0x81] sm:$0xff]  ;;  %v773_v43 = vpack.c.bf16 %v1074_v38, %v1221_v20  ;;  %v1403_v36 = vld [vmem:[%s1465_s5] ss:$0 sm:$0xff] }
  0x2b   : > { %v839_v18 = vpack.c.bf16 %v1087_v39, %v437_v6 }
  0x33   : > { %1031 = vmatmul.msk.bf16.gmra.mxu1 %vm340_vm1, %v322_v50 }
  0x34   : > { %1036 = vmatmul.msk.bf16.gmra.mxu2 %vm340_vm1, %v439_v51 }
  0x35   : > { %1041 = vmatmul.msk.bf16.gmra.mxu3 %vm340_vm1, %v505_v52 }
  0x36   : > { %1046 = vmatmul.msk.bf16.gmra.mxu0 %vm340_vm1, %v571_v53 }
  0x43   : > { %1032 = vmatmul.msk.bf16.gmra.mxu1 %vm340_vm1, %v323_v62 }
  0x44   : > { %1037 = vmatmul.msk.bf16.gmra.mxu2 %vm340_vm1, %v440_v63 }
  0x45   : > { %1042 = vmatmul.msk.bf16.gmra.mxu3 %vm340_vm1, %v506_v0 }
  0x46   : > { %1047 = vmatmul.msk.bf16.gmra.mxu0 %vm340_vm1, %v572_v1 }
  0x53   : > { %1033 = vmatmul.msk.bf16.gmra.mxu1 %vm340_vm1, %v324_v11 }
  0x54   : > { %1038 = vmatmul.msk.bf16.gmra.mxu2 %vm340_vm1, %v441_v12 }
  0x55   : > { %1043 = vmatmul.msk.bf16.gmra.mxu3 %vm340_vm1, %v507_v13 }
  0x56   : > { %1048 = vmatmul.msk.bf16.gmra.mxu0 %vm340_vm1, %v573_v14 }
  0x63   : > { %1050 = vmatmul.msk.bf16.vlgmr.msra.gmra.mxu1 %vm340_vm1, %v636_v22 }
  0x64   : > { %1063 = vmatmul.msk.bf16.vlgmr.msra.gmra.mxu2 %vm340_vm1, %v703_v23 }
  0x65   : > { %1076 = vmatmul.msk.bf16.vlgmr.msra.gmra.mxu3 %vm340_vm1, %v770_v2 }
  0x66   : > { %1089 = vmatmul.msk.bf16.vlgmr.msra.gmra.mxu0 %vm340_vm1, %v836_v24 }
  0x73   : > { %1051 = vmatmul.msk.bf16.gmra.mxu1 %vm340_vm1, %v637_v27 }
  0x74   : > { %1064 = vmatmul.msk.bf16.gmra.mxu2 %vm340_vm1, %v704_v28 }
  0x75   : > { %1077 = vmatmul.msk.bf16.gmra.mxu3 %vm340_vm1, %v771_v29 }
  0x76   : > { %1090 = vmatmul.msk.bf16.gmra.mxu0 %vm340_vm1, %v837_v30 }
  0x83   : > { %1052 = vmatmul.msk.bf16.gmra.mxu1 %vm340_vm1, %v638_v33 }
  0x84   : > { %1065 = vmatmul.msk.bf16.gmra.mxu2 %vm340_vm1, %v705_v34 }
  0x85   : > { %1078 = vmatmul.msk.bf16.gmra.mxu3 %vm340_vm1, %v772_v15 }
  0x86   : > { %1091 = vmatmul.msk.bf16.gmra.mxu0 %vm340_vm1, %v838_v16 }
  0x90   : > { %v371_v41 = vpop.f32.mrf.mxu1 }
  0x93   : > { %v366_v19 = vpop.f32.mrf.mxu0  ;;  %1053 = vmatmul.msk.bf16.gmra.mxu1 %vm340_vm1, %v639_v40 }
  0x94   : > { %1066 = vmatmul.msk.bf16.gmra.mxu2 %vm340_vm1, %v706_v42 }
  0x95   : > { %1079 = vmatmul.msk.bf16.gmra.mxu3 %vm340_vm1, %v773_v43 }
  0x96   : > { %1092 = vmatmul.msk.bf16.gmra.mxu0 %vm340_vm1, %v839_v18 }
  0x97   : > { %v1356_v44 = vpop.f32.mrf.mxu2 }
  0x98   : > { %v1358_v45 = vpop.f32.mrf.mxu3  ;;  %v1360_v46 = vpop.f32.mrf.mxu1 }
  0x9b   : > { %v368_v47 = vpop.f32.mrf.mxu0 }
  0x9f   : > { %v1362_v48 = vpop.f32.mrf.mxu2 }
  0xa0   : > { %v1364_v20 = vpop.f32.mrf.mxu3  ;;  %v410_v49 = vpop.f32.mrf.mxu1 }
  0xa1   : > { %v411_v14 = vadd.f32 %v410_v49, %v366_v19 }
  0xa3   : > { %v600_v50 = vpop.f32.mrf.mxu0 }
  0xa7   : > { %v468_v51 = vpop.f32.mrf.mxu2 }
  0xa8   : > { %v534_v52 = vpop.f32.mrf.mxu3  ;;  %v412_v53 = vpop.f32.mrf.mxu1  ;;  %v488_v21 = vadd.f32 %v468_v51, %v411_v14 }
  0xa9   : > { %v413_v26 = vadd.f32 %v412_v53, %v368_v47 }
  0xaa   : > { %v554_v24 = vadd.f32 %v534_v52, %v488_v21 }
  0xab   : > { %v602_v54 = vpop.f32.mrf.mxu0 }
  0xac   : > { %v620_v29 = vadd.f32 %v600_v50, %v554_v24 }
  0xaf   : > { %v470_v55 = vpop.f32.mrf.mxu2 }
  0xb0   : > { %v536_v56 = vpop.f32.mrf.mxu3  ;;  %v415_v57 = vpop.f32.mrf.mxu1  ;;  %v489_v28 = vadd.f32 %v470_v55, %v413_v26 }
  0xb1   : > { %v416_v16 = vadd.f32 %v415_v57, %v371_v41 }
  0xb2   : > { %v555_v33 = vadd.f32 %v536_v56, %v489_v28 }
  0xb3   : > { %v605_v58 = vpop.f32.mrf.mxu0 }
  0xb4   : > { %v621_v40 = vadd.f32 %v602_v54, %v555_v33 }
  0xb7   : > { %v473_v59 = vpop.f32.mrf.mxu2 }
  0xb8   : > { %v539_v60 = vpop.f32.mrf.mxu3  ;;  %v417_v61 = vpop.f32.mrf.mxu1  ;;  %v490_v38 = vadd.f32 %v473_v59, %v416_v16 }
  0xb9   : > { %v418_v51 = vadd.f32 %v417_v61, %v1360_v46 }
  0xba   : > { %v556_v19 = vadd.f32 %v539_v60, %v490_v38 }
  0xbb   : > { %v1366_v62 = vpop.f32.mrf.mxu0 }
  0xbc   : > { %v622_v56 = vadd.f32 %v605_v58, %v556_v19 }
  0xbf   : > { %v475_v63 = vpop.f32.mrf.mxu2 }
  0xc0   : > { %v541_v0 = vpop.f32.mrf.mxu3  ;;  %v1368_v1 = vpop.f32.mrf.mxu1  ;;  %v491_v54 = vadd.f32 %v475_v63, %v418_v51 }
  0xc1   : > { %v421_v46 = vadd.f32 %v1368_v1, %v1356_v44 }
  0xc2   : > { %v557_v24 = vadd.f32 %v541_v0, %v491_v54 }
  0xc3   : > { %v1370_v2 = vpop.f32.mrf.mxu0 }
  0xc4   : > { %v623_v28 = vadd.f32 %v1366_v62, %v557_v24 }
  0xc7   : > { %v1372_v3 = vpop.f32.mrf.mxu2 }
  0xc8   : > { %v1374_v4 = vpop.f32.mrf.mxu3  ;;  %v1376_v5 = vpop.f32.mrf.mxu1  ;;  %v492_v63 = vadd.f32 %v1372_v3, %v421_v46 }
  0xc9   : > { %v423_v1 = vadd.f32 %v1376_v5, %v1362_v48 }
  0xcb   : > { %v1378_v6 = vpop.f32.mrf.mxu0 }
  0xcf   : > { %v1380_v7 = vpop.f32.mrf.mxu2 }
  0xd0   : > { %v1382_v8 = vpop.f32.mrf.mxu3  ;;  %v1384_v9 = vpop.f32.mrf.mxu1 }
  0xd1   : > { %v426_v5 = vadd.f32 %v1384_v9, %v1358_v45 }
  0xd3   : > { %v1386_v10 = vpop.f32.mrf.mxu0 }
  0xd7   : > { %v1388_v11 = vpop.f32.mrf.mxu2 }
  0xd8   : > { %v1390_v12 = vpop.f32.mrf.mxu3  ;;  %v1392_v13 = vpop.f32.mrf.mxu1 }
  0xd9   : > { %v428_v9 = vadd.f32 %v1392_v13, %v1364_v20 }
  0xdb   : > { %v1394_v17 = vpop.f32.mrf.mxu0 }
  0xdf   : > { %v1396_v22 = vpop.f32.mrf.mxu2 }
  0xe0   : > { %v1398_v23 = vpop.f32.mrf.mxu3  ;;  %v666_v25 = vpop.f32.mrf.mxu1 }
  0xe1   : > { %v686_v30 = vadd.f32 %v666_v25, %v620_v29 }
  0xe3   : > { %v866_v27 = vpop.f32.mrf.mxu0 }
  0xe7   : > { %v733_v31 = vpop.f32.mrf.mxu2 }
  0xe8   : > { %v800_v32 = vpop.f32.mrf.mxu3  ;;  %v753_v34 = vadd.f32 %v733_v31, %v686_v30  ;;  %v668_v15 = vpop.f32.mrf.mxu1 }
  0xe9   : > { %v687_v43 = vadd.f32 %v668_v15, %v621_v40  ;;  %v493_v15 = vadd.f32 %v1380_v7, %v423_v1 }
  0xea   : > { %v820_v35 = vadd.f32 %v800_v32, %v753_v34  ;;  %v558_v32 = vadd.f32 %v1374_v4, %v492_v63 }
  0xeb   : > { %v868_v37 = vpop.f32.mrf.mxu0  ;;  %v559_v40 = vadd.f32 %v1382_v8, %v493_v15 }
  0xec   : > { %v886_v39 = vadd.f32 %v866_v27, %v820_v35  ;;  %v624_v16 = vadd.f32 %v1370_v2, %v558_v32  ;;  %v494_v2 = vadd.f32 %v1388_v11, %v426_v5 }
  0xee   : > { %v898_v42 = vadd.f32 %v1403_v36, %v886_v39  ;;  %v560_v51 = vadd.f32 %v1390_v12, %v494_v2 }
  0xef   : > { %v735_v41 = vpop.f32.mrf.mxu2 }
  0xf0   : > { %v802_v18 = vpop.f32.mrf.mxu3  ;;  %v906_v47 = vmax.f32 %v898_v42, 0.0  ;;  %v754_v49 = vadd.f32 %v735_v41, %v687_v43  ;;  %v671_v50 = vpop.f32.mrf.mxu1 }
  0xf1   : > { %v688_v59 = vadd.f32 %v671_v50, %v622_v56 }
  0xf2   : > { %915 = vst.msk [vmem:[%s1410_s13] sm:$0xff] %vm914_vm2, %v906_v47  ;;  %v821_v52 = vadd.f32 %v802_v18, %v754_v49  ;;  %v625_v18 = vadd.f32 %v1378_v6, %v559_v40  ;;  %v495_v6 = vadd.f32 %v1396_v22, %v428_v9 }
  0xf3   : > { %v871_v53 = vpop.f32.mrf.mxu0 }
  0xf4   : > { %v887_v55 = vadd.f32 %v868_v37, %v821_v52 }
  0xf6   : > { %v899_v57 = vadd.f32 %v1403_v36, %v887_v55  ;;  %v626_v55 = vadd.f32 %v1386_v10, %v560_v51 }
  0xf7   : > { %v738_v14 = vpop.f32.mrf.mxu2 }
  0xf8   : > { %v805_v21 = vpop.f32.mrf.mxu3  ;;  %v907_v60 = vmax.f32 %v899_v57, 0.0  ;;  %v755_v25 = vadd.f32 %v738_v14, %v688_v59  ;;  %v673_v26 = vpop.f32.mrf.mxu1  ;;  %v561_v14 = vadd.f32 %v1398_v23, %v495_v6 }
  0xf9   : > { %v689_v30 = vadd.f32 %v673_v26, %v623_v28 }
  0xfa   : > { %916 = vst.msk [vmem:[%s1410_s13 + $0x8] sm:$0xff] %vm914_vm2, %v907_v60  ;;  %v822_v61 = vadd.f32 %v805_v21, %v755_v25  ;;  %v627_v25 = vadd.f32 %v1394_v17, %v561_v14 }
  0xfb   : > { %v873_v27 = vpop.f32.mrf.mxu0 }
  0xfc   : > { %v888_v58 = vadd.f32 %v871_v53, %v822_v61 }
  0xfe   : > { %v900_v29 = vadd.f32 %v1403_v36, %v888_v58 }
  0xff   : > { %v740_v0 = vpop.f32.mrf.mxu2 }
 0x100   : > { %v807_v31 = vpop.f32.mrf.mxu3  ;;  %v908_v33 = vmax.f32 %v900_v29, 0.0  ;;  %v756_v34 = vadd.f32 %v740_v0, %v689_v30  ;;  %v676_v44 = vpop.f32.mrf.mxu1 }
 0x101   : > { %v690_v38 = vadd.f32 %v676_v44, %v624_v16 }
 0x102   : > { %917 = vst.msk [vmem:[%s1410_s13 + $0x10] sm:$0xff] %vm914_vm2, %v908_v33  ;;  %v823_v3 = vadd.f32 %v807_v31, %v756_v34 }
 0x103   : > { %v876_v35 = vpop.f32.mrf.mxu0 }
 0x104   : > { %v889_v62 = vadd.f32 %v873_v27, %v823_v3 }
 0x106   : > { %v901_v37 = vadd.f32 %v1403_v36, %v889_v62 }
 0x107   : > { %v743_v4 = vpop.f32.mrf.mxu2 }
 0x108   : > { %v810_v39 = vpop.f32.mrf.mxu3  ;;  %v909_v42 = vmax.f32 %v901_v37, 0.0  ;;  %v757_v43 = vadd.f32 %v743_v4, %v690_v38  ;;  %v678_v48 = vpop.f32.mrf.mxu1 }
 0x109   : > { %v691_v47 = vadd.f32 %v678_v48, %v625_v18 }
 0x10a   : > { %918 = vst.msk [vmem:[%s1410_s13 + $0x18] sm:$0xff] %vm914_vm2, %v909_v42  ;;  %v824_v7 = vadd.f32 %v810_v39, %v757_v43 }
 0x10b   : > { %v878_v49 = vpop.f32.mrf.mxu0 }
 0x10c   : > { %v890_v41 = vadd.f32 %v876_v35, %v824_v7 }
 0x10e   : > { %v902_v19 = vadd.f32 %v1403_v36, %v890_v41 }
 0x10f   : > { %v745_v8 = vpop.f32.mrf.mxu2 }
 0x110   : > { %v812_v50 = vpop.f32.mrf.mxu3  ;;  %v910_v52 = vmax.f32 %v902_v19, 0.0  ;;  %v758_v53 = vadd.f32 %v745_v8, %v691_v47  ;;  %v681_v45 = vpop.f32.mrf.mxu1 }
 0x111   : > { %v692_v57 = vadd.f32 %v681_v45, %v626_v55 }
 0x112   : > { %919 = vst.msk [vmem:[%s1410_s13 + $0x20] sm:$0xff] %vm914_vm2, %v910_v52  ;;  %v825_v11 = vadd.f32 %v812_v50, %v758_v53 }
 0x113   : > { %v881_v60 = vpop.f32.mrf.mxu0 }
 0x114   : > { %v891_v54 = vadd.f32 %v878_v49, %v825_v11 }
 0x116   : > { %v903_v56 = vadd.f32 %v1403_v36, %v891_v54 }
 0x117   : > { %v748_v59 = vpop.f32.mrf.mxu2 }
 0x118   : > { %v815_v12 = vpop.f32.mrf.mxu3  ;;  %v911_v21 = vmax.f32 %v903_v56, 0.0  ;;  %v759_v24 = vadd.f32 %v748_v59, %v692_v57  ;;  %v683_v13 = vpop.f32.mrf.mxu1 }
 0x119   : > { %v693_v26 = vadd.f32 %v683_v13, %v627_v25 }
 0x11a   : > { %920 = vst.msk [vmem:[%s1410_s13 + $0x28] sm:$0xff] %vm914_vm2, %v911_v21  ;;  %v826_v20 = vadd.f32 %v815_v12, %v759_v24 }
 0x11b   : > { %v883_v58 = vpop.f32.mrf.mxu0 }
 0x11c   : > { %v892_v22 = vadd.f32 %v881_v60, %v826_v20 }
 0x11e   : > { %v904_v10 = vadd.f32 %v1403_v36, %v892_v22 }
 0x11f   : > { %v750_v46 = vpop.f32.mrf.mxu2 }
 0x120   : > { %v912_v61 = vmax.f32 %v904_v10, 0.0  ;;  %v760_v27 = vadd.f32 %v750_v46, %v693_v26  ;;  %v817_v63 = vpop.f32.mrf.mxu3 }
 0x122   : > { %921 = vst.msk [vmem:[%s1410_s13 + $0x30] sm:$0xff] %vm914_vm2, %v912_v61  ;;  %v827_v23 = vadd.f32 %v817_v63, %v760_v27 }
 0x124   : > { %v893_v28 = vadd.f32 %v883_v58, %v827_v23 }
 0x126   : > { %v905_v29 = vadd.f32 %v1403_v36, %v893_v28 }
 0x128   : > { %v913_v30 = vmax.f32 %v905_v29, 0.0 }
 0x12a   : > { %922 = vst.msk [vmem:[%s1410_s13 + $0x38] sm:$0xff] %vm914_vm2, %v913_v30 }
 0x12b PF: > { %s16_s21 = sadd.s32 1, %s1115_s21  }
 0x12c   : > { %p13_p4 = scmp.ge.s32.totalorder %s16_s21, 4  }
 0x12e   :  { %15 = sbr.rel (!%p13_p4) target bundleno = 1 (0x1), region = 93 }

// kernel: swiftformer_classifier_forward.12
= control target key start
LH: loop header
LB: loop body
LE: loop exit
PB: predicated region body
PF: predicated region fallthrough
CT: control target
= control target key end

     0   :  { %s978_s24 = smov 0   ;;  %s1233_s0 = inlined_call_operand.vmem [shape: f32[2,10,10,16], index: 0, kind: input, shape index: {}]   ;;  %s1234_s1 = inlined_call_operand.vmem [shape: f32[9,16], index: 1, kind: input, shape index: {}]   ;;  %s1235_s2 = inlined_call_operand.vmem [shape: f32[1,16], index: 2, kind: input, shape index: {}]   ;;  %s1236_s3 = inlined_call_operand.vmem [shape: bf16[16,64], index: 3, kind: input, shape index: {}]   ;;  %s1237_s4 = inlined_call_operand.vmem [shape: f32[1,64], index: 4, kind: input, shape index: {}]   ;;  %s1238_s5 = inlined_call_operand.vmem [shape: bf16[64,16], index: 5, kind: input, shape index: {}]   ;;  %s1239_s6 = inlined_call_operand.vmem [shape: f32[1,16], index: 6, kind: input, shape index: {}]   ;;  %s1240_s7 = inlined_call_operand.vmem [shape: f32[2,8,8,16], index: 7, kind: output, shape index: {}]  }
   0x1 LB: > { %s804_s25 = sadd.s32 4294967295, %s936_s24   ;;  %p808_p0 = scmp.ge.s32.totalorder %s936_s24, 1  ;;  %s936_s24 = sphi %s978_s24, %s17_s24  }
   0x2   : > { %p237_p1 = scmp.lt.s32.totalorder %s936_s24, 3 }
   0x4   : > { %p238_p2 = pnand %p808_p0, %p237_p1 }
   0x5   : > { %p269_p3 = scmp.lt.s32.totalorder (!%p238_p2), %s804_s25, 1 }
   0x6   : > { %241 = sbr.rel (%p238_p2) target bundleno = 389 (0x185), region = 48 }
   0xb   : > { %v891_v0 = vld [vmem:[%s1236_s3] sm:$0xff]  ;;  %s1242_s25 = smov (!%p269_p3, %s804_s25), 1  ;;  %v1015_v8 = vld [vmem:[%s1234_s1 + $0x8] ss:$0 sm:$0xff]  ;;  %vm537_vm0 = vcmask 130048   ;;  %vm691_vm1 = vcmask 523264  }
   0xc   : > { %v280_v1 = vld [vmem:[%s1234_s1] sm:$0xff]  ;;  %557 = vmatpush.bf16.msra.mxu0 %v891_v0  ;;  %896 = vmatpush.bf16.msra.mxu3 %v891_v0  ;;  %s901_s30 = smul.u32 160, %s1242_s25  ;;  %s890_s29 = sshll.u32 %s1242_s25, 6 }
   0xd   : > { %v995_v2 = vperm.slane %v280_v1, 0  ;;  %v997_v3 = vperm.slane %v280_v1, 1  ;;  %v999_v4 = vperm.slane %v280_v1, 3  ;;  %v1001_v5 = vperm.slane %v280_v1, 2  ;;  %s278_s9 = scalar_lea.vmem %s1240_s7, %s890_s29 }
   0xe   : > { %v1003_v6 = vperm.slane %v280_v1, 4  ;;  %s1008_s10 = scalar_lea.vmem %s1233_s0, %s901_s30  ;;  %v1010_v7 = vperm.slane %v280_v1, 5  ;;  %v1020_v12 = vperm.slane %v280_v1, 6  ;;  %v1022_v13 = vperm.slane %v280_v1, 7 }
   0xf   : > { %v282_v9 = vld [vmem:[%s1008_s10] sm:$0xff]  ;;  %v283_v10 = vld [vmem:[%s1008_s10 + $0x10] sm:$0xff] }
  0x10   : > { %v307_v11 = vld [vmem:[%s1008_s10 + $0x1] sm:$0xff]  ;;  %v291_v14 = vmul.f32 %v995_v2, %v282_v9  ;;  %v292_v15 = vmul.f32 %v995_v2, %v283_v10  ;;  %v1027_v16 = vld [vmem:[%s1008_s10 + $0x11] sm:$0xff]  ;;  %v367_v20 = vmul.f32 %v999_v4, %v283_v10 }
  0x11   : > { %v316_v17 = vmul.f32 %v997_v3, %v307_v11  ;;  %v332_v18 = vld [vmem:[%s1008_s10 + $0x2] sm:$0xff]  ;;  %v333_v19 = vld [vmem:[%s1008_s10 + $0x12] sm:$0xff]  ;;  %v317_v21 = vmul.f32 %v997_v3, %v1027_v16  ;;  %v392_v26 = vmul.f32 %v1003_v6, %v1027_v16 }
  0x12   : > { %v341_v22 = vmul.f32 %v1001_v5, %v332_v18  ;;  %v342_v23 = vmul.f32 %v1001_v5, %v333_v19  ;;  %v813_v24 = vld [vmem:[%s1008_s10 + $0x20] sm:$0xff]  ;;  %v417_v31 = vmul.f32 %v1010_v7, %v333_v19  ;;  %v837_v32 = vld [vmem:[%s1008_s10 + $0x30] sm:$0xff] }
  0x13   : > { %v1039_v25 = vld [vmem:[%s1008_s10 + $0x21] sm:$0xff]  ;;  %v324_v27 = vadd.f32 %v316_v17, %v291_v14  ;;  %v368_v28 = vmul.f32 %v813_v24, %v999_v4  ;;  %v325_v33 = vadd.f32 %v317_v21, %v292_v15  ;;  %v443_v35 = vmul.f32 %v813_v24, %v1020_v12  ;;  %v1053_v37 = vld [vmem:[%s1008_s10 + $0x31] sm:$0xff] }
  0x14   : > { %v393_v29 = vmul.f32 %v1039_v25, %v1003_v6  ;;  %v829_v30 = vld [vmem:[%s1008_s10 + $0x22] sm:$0xff]  ;;  %v444_v36 = vmul.f32 %v837_v32, %v1020_v12  ;;  %v468_v39 = vmul.f32 %v1039_v25, %v1022_v13  ;;  %v469_v40 = vmul.f32 %v1053_v37, %v1022_v13  ;;  %v853_v41 = vld [vmem:[%s1008_s10 + $0x32] sm:$0xff] }
  0x15   : > { %v418_v34 = vmul.f32 %v829_v30, %v1010_v7  ;;  %v349_v38 = vadd.f32 %v341_v22, %v324_v27  ;;  %v493_v42 = vmul.f32 %v1015_v8, %v829_v30  ;;  %v815_v43 = vld [vmem:[%s1008_s10 + $0x40] sm:$0xff]  ;;  %v350_v44 = vadd.f32 %v342_v23, %v325_v33  ;;  %v839_v62 = vld [vmem:[%s1008_s10 + $0x50] sm:$0xff] }
  0x16   : > { %v494_v45 = vmul.f32 %v1015_v8, %v853_v41  ;;  %v293_v46 = vmul.f32 %v813_v24, %v995_v2  ;;  %v294_v47 = vmul.f32 %v837_v32, %v995_v2  ;;  %v318_v49 = vmul.f32 %v1039_v25, %v997_v3  ;;  %v1071_v52 = vld [vmem:[%s1008_s10 + $0x41] sm:$0xff]  ;;  %v1081_v63 = vld [vmem:[%s1008_s10 + $0x51] sm:$0xff]  ;;  %v1101_v33 = vld [vmem:[%s1235_s2] ss:$0 sm:$0xff] }
  0x17   : > { %v375_v48 = vadd.f32 %v367_v20, %v349_v38  ;;  %v319_v50 = vmul.f32 %v1053_v37, %v997_v3  ;;  %v343_v51 = vmul.f32 %v829_v30, %v1001_v5  ;;  %v831_v53 = vld [vmem:[%s1008_s10 + $0x42] sm:$0xff]  ;;  %v376_v54 = vadd.f32 %v368_v28, %v350_v44  ;;  %v855_v18 = vld [vmem:[%s1008_s10 + $0x52] sm:$0xff] }
  0x18   : > { %v344_v55 = vmul.f32 %v853_v41, %v1001_v5  ;;  %v369_v56 = vmul.f32 %v837_v32, %v999_v4  ;;  %v370_v57 = vmul.f32 %v815_v43, %v999_v4  ;;  %v326_v59 = vadd.f32 %v318_v49, %v293_v46 }
  0x19   : > { %v400_v58 = vadd.f32 %v392_v26, %v375_v48  ;;  %v327_v60 = vadd.f32 %v319_v50, %v294_v47  ;;  %v394_v61 = vmul.f32 %v1053_v37, %v1003_v6  ;;  %v401_v0 = vadd.f32 %v393_v29, %v376_v54  ;;  %v1111_v50 = vld [vmem:[%s1008_s10 + $0x61] sm:$0xff] }
  0x1a   : > { %v395_v1 = vmul.f32 %v1071_v52, %v1003_v6  ;;  %v419_v9 = vmul.f32 %v853_v41, %v1010_v7  ;;  %v420_v10 = vmul.f32 %v831_v53, %v1010_v7  ;;  %v351_v14 = vadd.f32 %v343_v51, %v326_v59  ;;  %v817_v41 = vld [vmem:[%s1008_s10 + $0x60] sm:$0xff] }
  0x1b   : > { %v425_v11 = vadd.f32 %v417_v31, %v400_v58  ;;  %v352_v15 = vadd.f32 %v344_v55, %v327_v60  ;;  %v445_v17 = vmul.f32 %v815_v43, %v1020_v12  ;;  %v426_v19 = vadd.f32 %v418_v34, %v401_v0  ;;  %v833_v59 = vld [vmem:[%s1008_s10 + $0x62] sm:$0xff] }
  0x1c   : > { %v446_v20 = vmul.f32 %v839_v62, %v1020_v12  ;;  %v470_v21 = vmul.f32 %v1071_v52, %v1022_v13  ;;  %v471_v22 = vmul.f32 %v1081_v63, %v1022_v13  ;;  %v377_v24 = vadd.f32 %v369_v56, %v351_v14 }
  0x1d   : > { %v451_v23 = vadd.f32 %v443_v35, %v425_v11  ;;  %v378_v26 = vadd.f32 %v370_v57, %v352_v15  ;;  %v495_v27 = vmul.f32 %v1015_v8, %v831_v53  ;;  %v452_v28 = vadd.f32 %v444_v36, %v426_v19  ;;  %v1125_v11 = vld [vmem:[%s1008_s10 + $0x71] sm:$0xff] }
  0x1e   : > { %v496_v29 = vmul.f32 %v1015_v8, %v855_v18  ;;  %v295_v30 = vmul.f32 %v815_v43, %v995_v2  ;;  %v296_v31 = vmul.f32 %v839_v62, %v995_v2  ;;  %v402_v34 = vadd.f32 %v394_v61, %v377_v24 }
  0x1f   : > { %v476_v32 = vadd.f32 %v468_v39, %v451_v23  ;;  %v403_v35 = vadd.f32 %v395_v1, %v378_v26  ;;  %v320_v38 = vmul.f32 %v1071_v52, %v997_v3  ;;  %v477_v36 = vadd.f32 %v469_v40, %v452_v28 }
  0x20   : > { %v321_v44 = vmul.f32 %v1081_v63, %v997_v3  ;;  %v345_v43 = vmul.f32 %v831_v53, %v1001_v5  ;;  %v346_v39 = vmul.f32 %v855_v18, %v1001_v5  ;;  %v427_v47 = vadd.f32 %v419_v9, %v402_v34 }
  0x21   : > { %v501_v46 = vadd.f32 %v493_v42, %v476_v32  ;;  %v428_v48 = vadd.f32 %v420_v10, %v403_v35  ;;  %v328_v49 = vadd.f32 %v320_v38, %v295_v30  ;;  %v502_v51 = vadd.f32 %v494_v45, %v477_v36  ;;  %v841_v10 = vld [vmem:[%s1008_s10 + $0x70] sm:$0xff]  ;;  %v819_v36 = vld [vmem:[%s1008_s10 + $0x80] sm:$0xff] }
  0x22   : > { %v329_v54 = vadd.f32 %v321_v44, %v296_v31  ;;  %v371_v55 = vmul.f32 %v839_v62, %v999_v4  ;;  %v372_v40 = vmul.f32 %v817_v41, %v999_v4  ;;  %v453_v57 = vadd.f32 %v445_v17, %v427_v47  ;;  %v857_v32 = vld [vmem:[%s1008_s10 + $0x72] sm:$0xff] }
  0x23   : > { %v513_v56 = vadd.f32 %v1101_v33, %v501_v46  ;;  %v454_v53 = vadd.f32 %v446_v20, %v428_v48  ;;  %v353_v58 = vadd.f32 %v345_v43, %v328_v49  ;;  %v514_v42 = vadd.f32 %v1101_v33, %v502_v51  ;;  %v1150_v51 = vld [vmem:[%s1008_s10 + $0x81] sm:$0xff] }
  0x24   : > { %v354_v60 = vadd.f32 %v346_v39, %v329_v54  ;;  %v396_v61 = vmul.f32 %v1081_v63, %v1003_v6  ;;  %v397_v45 = vmul.f32 %v1111_v50, %v1003_v6  ;;  %v478_v0 = vadd.f32 %v470_v21, %v453_v57 }
  0x25   : > { %v479_v62 = vadd.f32 %v471_v22, %v454_v53  ;;  %v379_v1 = vadd.f32 %v371_v55, %v353_v58  ;;  %v421_v9 = vmul.f32 %v855_v18, %v1010_v7  ;;  %v521_v14 = vpack.c.bf16 %v514_v42, %v513_v56  ;;  %v835_v53 = vld [vmem:[%s1008_s10 + $0x82] sm:$0xff] }
  0x26   : > { %v380_v15 = vadd.f32 %v372_v40, %v354_v60  ;;  %v422_v17 = vmul.f32 %v833_v59, %v1010_v7  ;;  %v503_v19 = vadd.f32 %v495_v27, %v478_v0  ;;  %v447_v24 = vmul.f32 %v817_v41, %v1020_v12 }
  0x27   : > { %v504_v20 = vadd.f32 %v496_v29, %v479_v62  ;;  %v404_v23 = vadd.f32 %v396_v61, %v379_v1  ;;  %864 = vmatmul.msk.bf16.vlgmr.msra.gmra.mxu0 %vm537_vm0, %v521_v14  ;;  %v448_v22 = vmul.f32 %v841_v10, %v1020_v12  ;;  %v472_v18 = vmul.f32 %v1111_v50, %v1022_v13 }
  0x28   : > { %v405_v21 = vadd.f32 %v397_v45, %v380_v15  ;;  %v473_v26 = vmul.f32 %v1125_v11, %v1022_v13  ;;  %v515_v28 = vadd.f32 %v1101_v33, %v503_v19  ;;  %v497_v30 = vmul.f32 %v1015_v8, %v833_v59  ;;  %v851_v19 = vld [vmem:[%s1008_s10 + $0x91] sm:$0xff] }
  0x29   : > { %v516_v27 = vadd.f32 %v1101_v33, %v504_v20  ;;  %v429_v29 = vadd.f32 %v421_v9, %v404_v23  ;;  %v297_v34 = vmul.f32 %v817_v41, %v995_v2  ;;  %v298_v35 = vmul.f32 %v841_v10, %v995_v2 }
  0x2a   : > { %v430_v31 = vadd.f32 %v422_v17, %v405_v21  ;;  %v322_v38 = vmul.f32 %v1111_v50, %v997_v3  ;;  %v323_v39 = vmul.f32 %v1125_v11, %v997_v3  ;;  %v347_v46 = vmul.f32 %v833_v59, %v1001_v5 }
  0x2b   : > { %v522_v44 = vpack.c.bf16 %v516_v27, %v515_v28  ;;  %v455_v43 = vadd.f32 %v447_v24, %v429_v29  ;;  %v348_v49 = vmul.f32 %v857_v32, %v1001_v5  ;;  %v373_v41 = vmul.f32 %v841_v10, %v999_v4 }
  0x2c   : > { %v456_v47 = vadd.f32 %v448_v22, %v430_v31  ;;  %v330_v48 = vadd.f32 %v322_v38, %v297_v34  ;;  %v498_v54 = vmul.f32 %v1015_v8, %v857_v32  ;;  %v331_v55 = vadd.f32 %v323_v39, %v298_v35  ;;  %v859_v22 = vld [vmem:[%s1008_s10 + $0x92] sm:$0xff]  ;;  %v893_v35 = vld [vmem:[%s1238_s5 + $0x8] sm:$0xff] }
  0x2d   : > { %865 = vmatmul.msk.bf16.vlgmr.msra.gmra.mxu3 %vm537_vm0, %v522_v44  ;;  %v480_v2 = vadd.f32 %v472_v18, %v455_v43  ;;  %v374_v40 = vmul.f32 %v819_v36, %v999_v4  ;;  %v398_v57 = vmul.f32 %v1125_v11, %v1003_v6  ;;  %v399_v58 = vmul.f32 %v1150_v51, %v1003_v6  ;;  %v843_v4 = vld [vmem:[%s1008_s10 + $0x90] sm:$0xff]  ;;  %v892_v44 = vld [vmem:[%s1238_s5] sm:$0xff] }
  0x2e   : > { %v481_v3 = vadd.f32 %v473_v26, %v456_v47  ;;  %v355_v56 = vadd.f32 %v347_v46, %v330_v48  ;;  %v356_v5 = vadd.f32 %v348_v49, %v331_v55  ;;  %v423_v42 = vmul.f32 %v857_v32, %v1010_v7  ;;  %v894_v34 = vld [vmem:[%s1238_s5 + $0x10] sm:$0xff] }
  0x2f   : > { %v505_v60 = vadd.f32 %v497_v30, %v480_v2  ;;  %v424_v0 = vmul.f32 %v835_v53, %v1010_v7  ;;  %v449_v9 = vmul.f32 %v819_v36, %v1020_v12  ;;  %v450_v10 = vmul.f32 %v843_v4, %v1020_v12 }
  0x30   : > { %v381_v59 = vadd.f32 %v373_v41, %v355_v56  ;;  %v506_v61 = vadd.f32 %v498_v54, %v481_v3  ;;  %v382_v45 = vadd.f32 %v374_v40, %v356_v5  ;;  %v474_v20 = vmul.f32 %v1150_v51, %v1022_v13 }
  0x31   : > { %v517_v14 = vadd.f32 %v1101_v33, %v505_v60  ;;  %v475_v21 = vmul.f32 %v851_v19, %v1022_v13  ;;  %v499_v26 = vmul.f32 %v1015_v8, %v835_v53  ;;  %v500_v28 = vmul.f32 %v1015_v8, %v859_v22  ;;  %v895_v13 = vld [vmem:[%s1238_s5 + $0x18] sm:$0xff]  ;;  %v1187_v8 = vld [vmem:[%s1237_s4] ss:$0 sm:$0xff] }
  0x32   : > { %v406_v62 = vadd.f32 %v398_v57, %v381_v59  ;;  %v407_v1 = vadd.f32 %v399_v58, %v382_v45  ;;  %v518_v6 = vadd.f32 %v1101_v33, %v506_v61  ;;  %708 = vmatpush.bf16.msra.mxu1 %v895_v13  ;;  %897 = vmatpush.bf16.msra.mxu2 %v895_v13 }
  0x34   : > { %v431_v15 = vadd.f32 %v423_v42, %v406_v62  ;;  %v432_v17 = vadd.f32 %v424_v0, %v407_v1  ;;  %v523_v23 = vpack.c.bf16 %v518_v6, %v517_v14 }
  0x36   : > { %v457_v7 = vadd.f32 %v449_v9, %v431_v15  ;;  %v458_v24 = vadd.f32 %v450_v10, %v432_v17  ;;  %709 = vmatpush.bf16.msra.mxu1 %v894_v34  ;;  %898 = vmatpush.bf16.msra.mxu2 %v894_v34 }
  0x38   : > { %v482_v18 = vadd.f32 %v474_v20, %v457_v7  ;;  %v483_v12 = vadd.f32 %v475_v21, %v458_v24 }
  0x3a   : > { %v507_v27 = vadd.f32 %v499_v26, %v482_v18  ;;  %v508_v29 = vadd.f32 %v500_v28, %v483_v12  ;;  %710 = vmatpush.bf16.msra.mxu1 %v893_v35  ;;  %899 = vmatpush.bf16.msra.mxu2 %v893_v35 }
  0x3c   : > { %v519_v30 = vadd.f32 %v1101_v33, %v507_v27  ;;  %v520_v31 = vadd.f32 %v1101_v33, %v508_v29 }
  0x3d   : > { %866 = vmatmul.msk.bf16.gmra.mxu3 %vm537_vm0, %v523_v23 }
  0x3e   : > { %v524_v32 = vpack.c.bf16 %v520_v31, %v519_v30  ;;  %711 = vmatpush.bf16.msra.mxu1 %v892_v44  ;;  %900 = vmatpush.bf16.msra.mxu2 %v892_v44 }
  0x4d   : > { %867 = vmatmul.msk.bf16.gmra.mxu3 %vm537_vm0, %v524_v32 }
  0xa4   : > { %v559_v33 = vpop.f32.mrf.mxu0 }
  0xa5   : > { %v560_v38 = vadd.f32 %v1187_v8, %v559_v33 }
  0xa7   : > { %v579_v36 = vmul.f32 %v560_v38, %v560_v38 }
  0xa9   : > { %v587_v43 = vmul.f32 %v579_v36, %v560_v38 }
  0xab   : > { %v595_v39 = vmul.f32 0.044715, %v587_v43 }
  0xac   : > { %v561_v46 = vpop.f32.mrf.mxu0 }
  0xad   : > { %v603_v47 = vadd.f32 %v595_v39, %v560_v38  ;;  %v562_v48 = vadd.f32 %v1187_v8, %v561_v46 }
  0xaf   : > { %v611_v49 = vmul.f32 0.7978846, %v603_v47  ;;  %v580_v2 = vmul.f32 %v562_v48, %v562_v48 }
  0xb0   : > { %v564_v41 = vpop.f32.mrf.mxu3 }
  0xb1   : > { %v565_v54 = vadd.f32 %v1187_v8, %v564_v41  ;;  %914 = vtanh.f32 %v611_v49  ;;  %v588_v55 = vmul.f32 %v580_v2, %v562_v48 }
  0xb3   : > { %v581_v40 = vmul.f32 %v565_v54, %v565_v54  ;;  %v596_v3 = vmul.f32 0.044715, %v588_v55 }
  0xb5   : > { %v589_v56 = vmul.f32 %v581_v40, %v565_v54  ;;  %v604_v57 = vadd.f32 %v596_v3, %v562_v48 }
  0xb7   : > { %v915_v53 = vpop.eup %914  ;;  %v597_v5 = vmul.f32 0.044715, %v589_v56  ;;  %v612_v58 = vmul.f32 0.7978846, %v604_v57 }
  0xb8   : > { %v566_v59 = vpop.f32.mrf.mxu3  ;;  %v627_v61 = vadd.f32 1.0, %v915_v53 }
  0xb9   : > { %v567_v42 = vadd.f32 %v1187_v8, %v566_v59  ;;  %916 = vtanh.f32 %v612_v58  ;;  %v605_v45 = vadd.f32 %v597_v5, %v565_v54 }
  0xba   : > { %v635_v62 = vmul.f32 0.5, %v627_v61 }
  0xbb   : > { %v582_v60 = vmul.f32 %v567_v42, %v567_v42  ;;  %v613_v9 = vmul.f32 0.7978846, %v605_v45 }
  0xbc   : > { %v643_v23 = vmul.f32 %v635_v62, %v560_v38 }
  0xbd   : > { %v590_v0 = vmul.f32 %v582_v60, %v567_v42  ;;  %918 = vtanh.f32 %v613_v9 }
  0xbf   : > { %v598_v4 = vmul.f32 0.044715, %v590_v0  ;;  %v917_v1 = vpop.eup %916 }
  0xc0   : > { %v569_v10 = vpop.f32.mrf.mxu3  ;;  %v628_v15 = vadd.f32 1.0, %v917_v1 }
  0xc1   : > { %v606_v14 = vadd.f32 %v598_v4, %v567_v42  ;;  %v570_v6 = vadd.f32 %v1187_v8, %v569_v10 }
  0xc2   : > { %v636_v20 = vmul.f32 0.5, %v628_v15 }
  0xc3   : > { %v614_v17 = vmul.f32 0.7978846, %v606_v14  ;;  %v583_v19 = vmul.f32 %v570_v6, %v570_v6  ;;  %v919_v28 = vpop.eup %918 }
  0xc4   : > { %v644_v24 = vmul.f32 %v636_v20, %v562_v48  ;;  %v629_v13 = vadd.f32 1.0, %v919_v28 }
  0xc5   : > { %920 = vtanh.f32 %v614_v17  ;;  %v591_v7 = vmul.f32 %v583_v19, %v570_v6 }
  0xc6   : > { %v651_v22 = vpack.c.bf16 %v644_v24, %v643_v23  ;;  %v637_v44 = vmul.f32 0.5, %v629_v13 }
  0xc7   : > { %v599_v21 = vmul.f32 0.044715, %v591_v7 }
  0xc8   : > { %v571_v18 = vpop.f32.mrf.mxu3  ;;  %884 = vmatmul.msk.bf16.vlgmr.msra.gmra.mxu1 %vm691_vm1, %v651_v22  ;;  %v645_v49 = vmul.f32 %v637_v44, %v565_v54 }
  0xc9   : > { %v607_v12 = vadd.f32 %v599_v21, %v570_v6  ;;  %v572_v26 = vadd.f32 %v1187_v8, %v571_v18 }
  0xcb   : > { %v921_v27 = vpop.eup %920  ;;  %v615_v29 = vmul.f32 0.7978846, %v607_v12  ;;  %v584_v30 = vmul.f32 %v572_v26, %v572_v26 }
  0xcc   : > { %v630_v31 = vadd.f32 1.0, %v921_v27 }
  0xcd   : > { %v592_v32 = vmul.f32 %v584_v30, %v572_v26  ;;  %922 = vtanh.f32 %v615_v29 }
  0xce   : > { %v638_v33 = vmul.f32 0.5, %v630_v31 }
  0xcf   : > { %v600_v34 = vmul.f32 0.044715, %v592_v32 }
  0xd0   : > { %v574_v35 = vpop.f32.mrf.mxu3  ;;  %v646_v46 = vmul.f32 %v638_v33, %v567_v42 }
  0xd1   : > { %v608_v38 = vadd.f32 %v600_v34, %v572_v26  ;;  %v575_v36 = vadd.f32 %v1187_v8, %v574_v35 }
  0xd2   : > { %v652_v2 = vpack.c.bf16 %v646_v46, %v645_v49 }
  0xd3   : > { %v616_v43 = vmul.f32 0.7978846, %v608_v38  ;;  %v585_v39 = vmul.f32 %v575_v36, %v575_v36  ;;  %v923_v47 = vpop.eup %922 }
  0xd4   : > { %v631_v40 = vadd.f32 1.0, %v923_v47 }
  0xd5   : > { %924 = vtanh.f32 %v616_v43  ;;  %v593_v48 = vmul.f32 %v585_v39, %v575_v36 }
  0xd6   : > { %v639_v59 = vmul.f32 0.5, %v631_v40 }
  0xd7   : > { %v601_v41 = vmul.f32 0.044715, %v593_v48 }
  0xd8   : > { %v576_v55 = vpop.f32.mrf.mxu3  ;;  %885 = vmatmul.msk.bf16.gmra.mxu1 %vm691_vm1, %v652_v2  ;;  %v647_v45 = vmul.f32 %v639_v59, %v570_v6  ;;  %v913_v6 = vld [vmem:[%s1239_s6] ss:$0 sm:$0xff] }
  0xd9   : > { %v609_v3 = vadd.f32 %v601_v41, %v575_v36  ;;  %v577_v56 = vadd.f32 %v1187_v8, %v576_v55 }
  0xdb   : > { %v925_v57 = vpop.eup %924  ;;  %v617_v53 = vmul.f32 0.7978846, %v609_v3  ;;  %v586_v5 = vmul.f32 %v577_v56, %v577_v56 }
  0xdc   : > { %v632_v58 = vadd.f32 1.0, %v925_v57 }
  0xdd   : > { %v594_v60 = vmul.f32 %v586_v5, %v577_v56  ;;  %926 = vtanh.f32 %v617_v53 }
  0xde   : > { %v640_v42 = vmul.f32 0.5, %v632_v58 }
  0xdf   : > { %v602_v61 = vmul.f32 0.044715, %v594_v60 }
  0xe0   : > { %v648_v54 = vmul.f32 %v640_v42, %v572_v26 }
  0xe1   : > { %v610_v0 = vadd.f32 %v602_v61, %v577_v56 }
  0xe2   : > { %v653_v4 = vpack.c.bf16 %v648_v54, %v647_v45 }
  0xe3   : > { %v618_v62 = vmul.f32 0.7978846, %v610_v0  ;;  %v927_v8 = vpop.eup %926 }
  0xe4   : > { %886 = vmatmul.msk.bf16.vlgmr.msra.gmra.mxu2 %vm691_vm1, %v653_v4  ;;  %v633_v1 = vadd.f32 1.0, %v927_v8 }
  0xe5   : > { %928 = vtanh.f32 %v618_v62 }
  0xe6   : > { %v641_v14 = vmul.f32 0.5, %v633_v1 }
  0xe8   : > { %v649_v17 = vmul.f32 %v641_v14, %v575_v36 }
  0xeb   : > { %v929_v9 = vpop.eup %928 }
  0xec   : > { %v634_v10 = vadd.f32 1.0, %v929_v9 }
  0xee   : > { %v642_v15 = vmul.f32 0.5, %v634_v10 }
  0xf0   : > { %v650_v19 = vmul.f32 %v642_v15, %v577_v56 }
  0xf2   : > { %v654_v20 = vpack.c.bf16 %v650_v19, %v649_v17 }
  0xf4   : > { %887 = vmatmul.msk.bf16.gmra.mxu2 %vm691_vm1, %v654_v20 }
 0x145   : > { %v713_v23 = vpop.f32.mrf.mxu1 }
 0x146   : > { %v714_v7 = vadd.f32 %v913_v6, %v713_v23 }
 0x148   : > { %v733_v24 = vadd.f32 %v714_v7, %v1027_v16 }
 0x14a   : > { %741 = vst.msk [vmem:[%s278_s9] sm:$0xff] %vm537_vm0, %v733_v24 }
 0x14d   : > { %v715_v21 = vpop.f32.mrf.mxu1 }
 0x14e   : > { %v716_v22 = vadd.f32 %v913_v6, %v715_v21 }
 0x150   : > { %v734_v18 = vadd.f32 %v1039_v25, %v716_v22 }
 0x152   : > { %742 = vst.msk [vmem:[%s278_s9 + $0x8] sm:$0xff] %vm537_vm0, %v734_v18 }
 0x155   : > { %v718_v12 = vpop.f32.mrf.mxu1 }
 0x156   : > { %v719_v26 = vadd.f32 %v913_v6, %v718_v12 }
 0x158   : > { %v735_v28 = vadd.f32 %v1053_v37, %v719_v26 }
 0x15a   : > { %743 = vst.msk [vmem:[%s278_s9 + $0x10] sm:$0xff] %vm537_vm0, %v735_v28 }
 0x15d   : > { %v720_v27 = vpop.f32.mrf.mxu1 }
 0x15e   : > { %v721_v29 = vadd.f32 %v913_v6, %v720_v27 }
 0x160   : > { %v736_v30 = vadd.f32 %v1071_v52, %v721_v29 }
 0x162   : > { %744 = vst.msk [vmem:[%s278_s9 + $0x18] sm:$0xff] %vm537_vm0, %v736_v30 }
 0x167   : > { %v723_v16 = vpop.f32.mrf.mxu2 }
 0x168   : > { %v724_v31 = vadd.f32 %v913_v6, %v723_v16 }
 0x16a   : > { %v737_v32 = vadd.f32 %v1081_v63, %v724_v31 }
 0x16c   : > { %745 = vst.msk [vmem:[%s278_s9 + $0x20] sm:$0xff] %vm537_vm0, %v737_v32 }
 0x16f   : > { %v725_v25 = vpop.f32.mrf.mxu2 }
 0x170   : > { %v726_v13 = vadd.f32 %v913_v6, %v725_v25 }
 0x172   : > { %v738_v34 = vadd.f32 %v1111_v50, %v726_v13 }
 0x174   : > { %746 = vst.msk [vmem:[%s278_s9 + $0x28] sm:$0xff] %vm537_vm0, %v738_v34 }
 0x177   : > { %v728_v37 = vpop.f32.mrf.mxu2 }
 0x178   : > { %v729_v33 = vadd.f32 %v913_v6, %v728_v37 }
 0x17a   : > { %v739_v35 = vadd.f32 %v1125_v11, %v729_v33 }
 0x17c   : > { %747 = vst.msk [vmem:[%s278_s9 + $0x30] sm:$0xff] %vm537_vm0, %v739_v35 }
 0x17f   : > { %v730_v52 = vpop.f32.mrf.mxu2 }
 0x180   : > { %v731_v38 = vadd.f32 %v913_v6, %v730_v52 }
 0x182   : > { %v740_v36 = vadd.f32 %v1150_v51, %v731_v38 }
 0x184   : > { %748 = vst.msk [vmem:[%s278_s9 + $0x38] sm:$0xff] %vm537_vm0, %v740_v36 }
 0x185 PF: > { %s17_s24 = sadd.s32 1, %s936_s24  }
 0x186   : > { %p14_p4 = scmp.ge.s32.totalorder %s17_s24, 4  }
 0x188   :  { %16 = sbr.rel (!%p14_p4) target bundleno = 1 (0x1), region = 80 }

// kernel: swiftformer_classifier_forward.13
= control target key start
LH: loop header
LB: loop body
LE: loop exit
PB: predicated region body
PF: predicated region fallthrough
CT: control target
= control target key end

     0   :  { %s3500_s0 = inlined_call_operand.vmem [shape: f32[2,10,10,16], index: 0, kind: input, shape index: {}]   ;;  %s3501_s1 = inlined_call_operand.vmem [shape: f32[9,16], index: 1, kind: input, shape index: {}]   ;;  %s3502_s2 = inlined_call_operand.vmem [shape: f32[1,16], index: 2, kind: input, shape index: {}]   ;;  %s3503_s3 = inlined_call_operand.vmem [shape: bf16[16,16], index: 3, kind: input, shape index: {}]   ;;  %s3504_s4 = inlined_call_operand.vmem [shape: f32[1,16], index: 4, kind: input, shape index: {}]   ;;  %s3505_s5 = inlined_call_operand.vmem [shape: bf16[16,16], index: 5, kind: input, shape index: {}]   ;;  %s3506_s6 = inlined_call_operand.vmem [shape: f32[1,16], index: 6, kind: input, shape index: {}]   ;;  %s3507_s7 = inlined_call_operand.vmem [shape: bf16[16,16], index: 7, kind: input, shape index: {}]   ;;  %s3508_s8 = inlined_call_operand.vmem [shape: f32[1,16], index: 8, kind: input, shape index: {}]   ;;  %s3509_s9 = inlined_call_operand.vmem [shape: bf16[16,16], index: 9, kind: input, shape index: {}]   ;;  %s3510_s10 = inlined_call_operand.vmem [shape: f32[1,16], index: 10, kind: input, shape index: {}]   ;;  %s3511_s11 = inlined_call_operand.vmem [shape: bf16[16,16], index: 11, kind: input, shape index: {}]   ;;  %s3512_s12 = inlined_call_operand.vmem [shape: f32[1,16], index: 12, kind: input, shape index: {}]   ;;  %s3513_s13 = inlined_call_operand.vmem [shape: bf16[16,16], index: 13, kind: input, shape index: {}]   ;;  %s3514_s14 = inlined_call_operand.vmem [shape: f32[1,16], index: 14, kind: input, shape index: {}]   ;;  %s3515_s15 = inlined_call_operand.vmem [shape: bf16[16,64], index: 15, kind: input, shape index: {}]   ;;  %s3516_s16 = inlined_call_operand.vmem [shape: f32[1,64], index: 16, kind: input, shape index: {}]   ;;  %s3517_s17 = inlined_call_operand.vmem [shape: bf16[64,16], index: 17, kind: input, shape index: {}]   ;;  %s3518_s18 = inlined_call_operand.hbm [shape: f32[1,16], index: 18, kind: input, shape index: {}]   ;;  %s3519_s19 = inlined_call_operand.vmem [shape: f32[2,8,8,16], index: 19, kind: output, shape index: {}]  }
   0x1   :  { %3521 = sst [smem:[#allocation5_spill]] %s3500_s0 }
   0x2   :  { %3522 = sst [smem:[#allocation6_spill]] %s3501_s1 }
   0x3   :  { %3523 = sst [smem:[#allocation7_spill]] %s3502_s2 }
   0x4   :  { %3524 = sst [smem:[#allocation8_spill]] %s3503_s3 }
   0x5   :  { %24 = vsyncpa [#allocation3], 0  ;;  %s2535_s0 = smov 0  }
   0x6 LB: > { %s2118_s30 = sadd.s32 4294967295, %s2432_s0   ;;  %p2120_p0 = scmp.ge.s32.totalorder %s2432_s0, 1  ;;  %s2432_s0 = sphi %s2535_s0, %s30_s0  }
   0x7   : > { %p465_p1 = scmp.lt.s32.totalorder %s2432_s0, 3  ;;  %s528_s1 = sshll.u32 %s3518_s18, 4  ;;  %s529_s1 = int_to_ptr.hbm [resolvable:$true] %s528_s1 }
   0x8   : > { %p2275_p3 = scmp.eq.s32.totalorder %s2118_s30, 0  ;;  %s2434_s22 = smov [#allocation2]  }
   0x9   : > { %p466_p2 = pnand %p2120_p0, %p465_p1  ;;  %s530_s2 = sshll.u32 %s2434_s22, 4  ;;  %s531_s2 = int_to_ptr.vmem [resolvable:$true] %s530_s2 }
   0xb   : > { %p2271_p4 = pneg %p466_p2  ;;  %551 = sbr.rel (%p466_p2) target bundleno = 1365 (0x555), region = 96 }
   0xd   : > { %p2272_p5 = pnand %p2275_p3, %p2271_p4 }
   0xf   : > { %2274 = dma.hbm_to_vmem [thread:$0]  (!%p2272_p5), %s529_s1, 16, %s531_s2, [#allocation3]  }
  0x10   : > { %2427 = dma.done.wait (%p2275_p3), [#allocation3], 16  }
  0x11   : > { %2429 = vsyncadd (%p2275_p3), [#allocation3], 4294967280  ;;  %p608_p6 = scmp.lt.s32.totalorder %s2118_s30, 1  ;;  %s3525_s3 = sld [smem:[#allocation5_spill]]  ;;  %vm876_vm0 = vcmask 130048  }
  0x12   : > { %s3526_s29 = sld [smem:[#allocation8_spill]] }
  0x13   : > { %s3556_s30 = smov (!%p608_p6, %s2118_s30), 1  ;;  %s3527_s1 = sld [smem:[#allocation6_spill]] }
  0x14   : > { %s2266_s23 = smul.u32 160, %s3556_s30  ;;  %s3528_s25 = sld [smem:[#allocation7_spill]] }
  0x15   : > { %s2254_s24 = sshll.u32 %s3556_s30, 6 }
  0x16   : > { %s617_s27 = scalar_lea.vmem %s3519_s19, %s2254_s24 }
  0x17   : > { %s2552_s26 = scalar_lea.vmem %s3525_s3, %s2266_s23 }
  0x18   : > { %v2255_v0 = vld [vmem:[%s3526_s29] sm:$0xff]  ;;  %v622_v3 = vld [vmem:[%s2552_s26 + $0x10] sm:$0xff] }
  0x19   : > { %v619_v1 = vld [vmem:[%s3527_s1] sm:$0xff]  ;;  %896 = vmatpush.bf16.msra.mxu0 %v2255_v0  ;;  %v2570_v8 = vld [vmem:[%s2552_s26 + $0x11] sm:$0xff]  ;;  %v2601_v30 = vld [vmem:[%s3527_s1 + $0x8] ss:$0 sm:$0xff] }
  0x1a   : > { %v621_v2 = vld [vmem:[%s2552_s26] sm:$0xff]  ;;  %v2562_v4 = vperm.slane %v619_v1, 0  ;;  %v2565_v6 = vperm.slane %v619_v1, 1  ;;  %v2567_v7 = vperm.slane %v619_v1, 2  ;;  %v672_v10 = vld [vmem:[%s2552_s26 + $0x12] sm:$0xff]  ;;  %v2574_v11 = vperm.slane %v619_v1, 3 }
  0x1b   : > { %v646_v5 = vld [vmem:[%s2552_s26 + $0x1] sm:$0xff]  ;;  %v2576_v12 = vperm.slane %v619_v1, 4  ;;  %v2578_v13 = vperm.slane %v619_v1, 5  ;;  %v2153_v24 = vld [vmem:[%s2552_s26 + $0x30] sm:$0xff]  ;;  %v2606_v33 = vperm.slane %v619_v1, 6  ;;  %v2608_v34 = vperm.slane %v619_v1, 7 }
  0x1c   : > { %v671_v9 = vld [vmem:[%s2552_s26 + $0x2] sm:$0xff]  ;;  %v630_v14 = vmul.f32 %v2562_v4, %v621_v2  ;;  %v631_v15 = vmul.f32 %v2562_v4, %v622_v3  ;;  %v655_v16 = vmul.f32 %v2565_v6, %v646_v5  ;;  %v656_v17 = vmul.f32 %v2565_v6, %v2570_v8  ;;  %v2169_v29 = vld [vmem:[%s2552_s26 + $0x32] sm:$0xff] }
  0x1d   : > { %v2129_v18 = vld [vmem:[%s2552_s26 + $0x20] sm:$0xff]  ;;  %v680_v20 = vmul.f32 %v2567_v7, %v671_v9  ;;  %v681_v21 = vmul.f32 %v2567_v7, %v672_v10  ;;  %v706_v22 = vmul.f32 %v2574_v11, %v622_v3  ;;  %v731_v28 = vmul.f32 %v2576_v12, %v2570_v8  ;;  %v2615_v41 = vld [vmem:[%s2552_s26 + $0x31] sm:$0xff] }
  0x1e   : > { %v2587_v19 = vld [vmem:[%s2552_s26 + $0x21] sm:$0xff]  ;;  %v663_v25 = vadd.f32 %v655_v16, %v630_v14  ;;  %v664_v26 = vadd.f32 %v656_v17, %v631_v15  ;;  %v707_v27 = vmul.f32 %v2129_v18, %v2574_v11  ;;  %v756_v32 = vmul.f32 %v2578_v13, %v672_v10  ;;  %v2155_v63 = vld [vmem:[%s2552_s26 + $0x50] sm:$0xff] }
  0x1f   : > { %v2145_v23 = vld [vmem:[%s2552_s26 + $0x22] sm:$0xff]  ;;  %v732_v31 = vmul.f32 %v2587_v19, %v2576_v12  ;;  %v782_v39 = vmul.f32 %v2129_v18, %v2606_v33  ;;  %v783_v40 = vmul.f32 %v2153_v24, %v2606_v33  ;;  %v807_v42 = vmul.f32 %v2587_v19, %v2608_v34  ;;  %v2644_v5 = vld [vmem:[%s2552_s26 + $0x51] sm:$0xff] }
  0x20   : > { %v688_v35 = vadd.f32 %v680_v20, %v663_v25  ;;  %v689_v36 = vadd.f32 %v681_v21, %v664_v26  ;;  %v757_v37 = vmul.f32 %v2145_v23, %v2578_v13  ;;  %v832_v38 = vmul.f32 %v2601_v30, %v2145_v23  ;;  %v2131_v48 = vld [vmem:[%s2552_s26 + $0x40] sm:$0xff] }
  0x21   : > { %v833_v43 = vmul.f32 %v2601_v30, %v2169_v29  ;;  %v632_v46 = vmul.f32 %v2129_v18, %v2562_v4  ;;  %v633_v47 = vmul.f32 %v2153_v24, %v2562_v4  ;;  %v2624_v49 = vld [vmem:[%s2552_s26 + $0x41] sm:$0xff]  ;;  %v657_v50 = vmul.f32 %v2587_v19, %v2565_v6 }
  0x22   : > { %v714_v44 = vadd.f32 %v706_v22, %v688_v35  ;;  %v715_v45 = vadd.f32 %v707_v27, %v689_v36  ;;  %v658_v51 = vmul.f32 %v2615_v41, %v2565_v6  ;;  %v682_v52 = vmul.f32 %v2145_v23, %v2567_v7  ;;  %v2147_v54 = vld [vmem:[%s2552_s26 + $0x42] sm:$0xff]  ;;  %v2657_v27 = vld [vmem:[%s3528_s25] ss:$0 sm:$0xff]  ;;  %v2171_v35 = vld [vmem:[%s2552_s26 + $0x52] sm:$0xff] }
  0x23   : > { %v683_v53 = vmul.f32 %v2169_v29, %v2567_v7  ;;  %v808_v57 = vmul.f32 %v2615_v41, %v2608_v34  ;;  %v708_v58 = vmul.f32 %v2153_v24, %v2574_v11  ;;  %v665_v59 = vadd.f32 %v657_v50, %v632_v46 }
  0x24   : > { %v739_v55 = vadd.f32 %v731_v28, %v714_v44  ;;  %v740_v56 = vadd.f32 %v732_v31, %v715_v45  ;;  %v666_v60 = vadd.f32 %v658_v51, %v633_v47  ;;  %v709_v61 = vmul.f32 %v2131_v48, %v2574_v11  ;;  %v2670_v51 = vld [vmem:[%s2552_s26 + $0x61] sm:$0xff] }
  0x25   : > { %v733_v62 = vmul.f32 %v2615_v41, %v2576_v12  ;;  %v734_v2 = vmul.f32 %v2624_v49, %v2576_v12  ;;  %v758_v3 = vmul.f32 %v2169_v29, %v2578_v13  ;;  %v690_v9 = vadd.f32 %v682_v52, %v665_v59 }
  0x26   : > { %v764_v0 = vadd.f32 %v756_v32, %v739_v55  ;;  %v765_v1 = vadd.f32 %v757_v37, %v740_v56  ;;  %v691_v10 = vadd.f32 %v683_v53, %v666_v60  ;;  %v759_v14 = vmul.f32 %v2147_v54, %v2578_v13 }
  0x27   : > { %v784_v15 = vmul.f32 %v2131_v48, %v2606_v33  ;;  %v785_v18 = vmul.f32 %v2155_v63, %v2606_v33  ;;  %v809_v20 = vmul.f32 %v2624_v49, %v2608_v34  ;;  %v716_v21 = vadd.f32 %v708_v58, %v690_v9 }
  0x28   : > { %v790_v16 = vadd.f32 %v782_v39, %v764_v0  ;;  %v791_v17 = vadd.f32 %v783_v40, %v765_v1  ;;  %v717_v22 = vadd.f32 %v709_v61, %v691_v10  ;;  %v810_v23 = vmul.f32 %v2644_v5, %v2608_v34  ;;  %v2133_v39 = vld [vmem:[%s2552_s26 + $0x60] sm:$0xff] }
  0x29   : > { %v834_v24 = vmul.f32 %v2601_v30, %v2147_v54  ;;  %v634_v28 = vmul.f32 %v2131_v48, %v2562_v4  ;;  %v635_v29 = vmul.f32 %v2155_v63, %v2562_v4  ;;  %v741_v31 = vadd.f32 %v733_v62, %v716_v21 }
  0x2a   : > { %v815_v25 = vadd.f32 %v807_v42, %v790_v16  ;;  %v816_v26 = vadd.f32 %v808_v57, %v791_v17  ;;  %v742_v32 = vadd.f32 %v734_v2, %v717_v22  ;;  %v659_v36 = vmul.f32 %v2624_v49, %v2565_v6  ;;  %v2149_v2 = vld [vmem:[%s2552_s26 + $0x62] sm:$0xff]  ;;  %v2157_v17 = vld [vmem:[%s2552_s26 + $0x70] sm:$0xff] }
  0x2b   : > { %v660_v37 = vmul.f32 %v2644_v5, %v2565_v6  ;;  %v684_v44 = vmul.f32 %v2147_v54, %v2567_v7  ;;  %v685_v45 = vmul.f32 %v2171_v35, %v2567_v7  ;;  %v766_v46 = vadd.f32 %v758_v3, %v741_v31 }
  0x2c   : > { %v840_v40 = vadd.f32 %v832_v38, %v815_v25  ;;  %v841_v42 = vadd.f32 %v833_v43, %v816_v26  ;;  %v767_v47 = vadd.f32 %v759_v14, %v742_v32  ;;  %v667_v48 = vadd.f32 %v659_v36, %v634_v28  ;;  %v2173_v32 = vld [vmem:[%s2552_s26 + $0x72] sm:$0xff] }
  0x2d   : > { %v668_v50 = vadd.f32 %v660_v37, %v635_v29  ;;  %v710_v55 = vmul.f32 %v2155_v63, %v2574_v11  ;;  %v711_v38 = vmul.f32 %v2133_v39, %v2574_v11  ;;  %v792_v43 = vadd.f32 %v784_v15, %v766_v46 }
  0x2e   : > { %v852_v52 = vadd.f32 %v2657_v27, %v840_v40  ;;  %v853_v53 = vadd.f32 %v2657_v27, %v841_v42  ;;  %v793_v56 = vadd.f32 %v785_v18, %v767_v47  ;;  %v692_v54 = vadd.f32 %v684_v44, %v667_v48  ;;  %v2687_v18 = vld [vmem:[%s2552_s26 + $0x71] sm:$0xff]  ;;  %v2135_v40 = vld [vmem:[%s2552_s26 + $0x80] sm:$0xff] }
  0x2f   : > { %v693_v57 = vadd.f32 %v685_v45, %v668_v50  ;;  %v835_v59 = vmul.f32 %v2601_v30, %v2171_v35  ;;  %v735_v60 = vmul.f32 %v2644_v5, %v2576_v12  ;;  %v736_v61 = vmul.f32 %v2670_v51, %v2576_v12 }
  0x30   : > { %v860_v58 = vpack.c.bf16 %v853_v53, %v852_v52  ;;  %v817_v62 = vadd.f32 %v809_v20, %v792_v43  ;;  %v818_v0 = vadd.f32 %v810_v23, %v793_v56  ;;  %v718_v63 = vadd.f32 %v710_v55, %v692_v54  ;;  %v2710_v52 = vld [vmem:[%s2552_s26 + $0x81] sm:$0xff] }
  0x31   : > { %v719_v1 = vadd.f32 %v711_v38, %v693_v57  ;;  %v760_v3 = vmul.f32 %v2171_v35, %v2578_v13  ;;  %v761_v9 = vmul.f32 %v2149_v2, %v2578_v13  ;;  %v636_v20 = vmul.f32 %v2133_v39, %v2562_v4  ;;  %v2151_v57 = vld [vmem:[%s2552_s26 + $0x82] sm:$0xff] }
  0x32   : > { %2180 = vmatmul.msk.bf16.vlgmr.msra.gmra.mxu0 %vm876_vm0, %v860_v58  ;;  %v842_v10 = vadd.f32 %v834_v24, %v817_v62  ;;  %v843_v14 = vadd.f32 %v835_v59, %v818_v0  ;;  %v743_v15 = vadd.f32 %v735_v60, %v718_v63  ;;  %v637_v21 = vmul.f32 %v2157_v17, %v2562_v4  ;;  %v2159_v63 = vld [vmem:[%s2552_s26 + $0x90] sm:$0xff] }
  0x33   : > { %v744_v16 = vadd.f32 %v736_v61, %v719_v1  ;;  %v661_v22 = vmul.f32 %v2670_v51, %v2565_v6  ;;  %v662_v23 = vmul.f32 %v2687_v18, %v2565_v6  ;;  %v786_v24 = vmul.f32 %v2133_v39, %v2606_v33 }
  0x34   : > { %v787_v25 = vmul.f32 %v2157_v17, %v2606_v33  ;;  %v854_v26 = vadd.f32 %v2657_v27, %v842_v10  ;;  %v855_v28 = vadd.f32 %v2657_v27, %v843_v14  ;;  %v768_v29 = vadd.f32 %v760_v3, %v743_v15  ;;  %v2167_v14 = vld [vmem:[%s2552_s26 + $0x91] sm:$0xff] }
  0x35   : > { %v769_v31 = vadd.f32 %v761_v9, %v744_v16  ;;  %v669_v35 = vadd.f32 %v661_v22, %v636_v20  ;;  %v670_v4 = vadd.f32 %v662_v23, %v637_v21  ;;  %v686_v36 = vmul.f32 %v2149_v2, %v2567_v7  ;;  %v2175_v21 = vld [vmem:[%s2552_s26 + $0x92] sm:$0xff] }
  0x36   : > { %v687_v37 = vmul.f32 %v2173_v32, %v2567_v7  ;;  %v811_v6 = vmul.f32 %v2670_v51, %v2608_v34  ;;  %v861_v39 = vpack.c.bf16 %v855_v28, %v854_v26  ;;  %v794_v42 = vadd.f32 %v786_v24, %v768_v29 }
  0x37   : > { %v795_v44 = vadd.f32 %v787_v25, %v769_v31  ;;  %v812_v45 = vmul.f32 %v2687_v18, %v2608_v34  ;;  %v694_v46 = vadd.f32 %v686_v36, %v669_v35  ;;  %v712_v48 = vmul.f32 %v2157_v17, %v2574_v11 }
  0x38   : > { %v695_v47 = vadd.f32 %v687_v37, %v670_v4  ;;  %v713_v50 = vmul.f32 %v2135_v40, %v2574_v11  ;;  %v819_v7 = vadd.f32 %v811_v6, %v794_v42  ;;  %v836_v55 = vmul.f32 %v2601_v30, %v2149_v2 }
  0x39   : > { %v820_v53 = vadd.f32 %v812_v45, %v795_v44  ;;  %v837_v38 = vmul.f32 %v2601_v30, %v2173_v32  ;;  %v720_v43 = vadd.f32 %v712_v48, %v694_v46  ;;  %v737_v54 = vmul.f32 %v2687_v18, %v2576_v12 }
  0x3a   : > { %v721_v56 = vadd.f32 %v713_v50, %v695_v47  ;;  %v738_v11 = vmul.f32 %v2710_v52, %v2576_v12  ;;  %v762_v58 = vmul.f32 %v2173_v32, %v2578_v13  ;;  %v763_v59 = vmul.f32 %v2151_v57, %v2578_v13  ;;  %v2256_v32 = vld [vmem:[%s3505_s5] sm:$0xff] }
  0x3b   : > { %v844_v60 = vadd.f32 %v836_v55, %v819_v7  ;;  %v845_v61 = vadd.f32 %v837_v38, %v820_v53  ;;  %v745_v62 = vadd.f32 %v737_v54, %v720_v43  ;;  %v788_v1 = vmul.f32 %v2135_v40, %v2606_v33  ;;  %1025 = vmatpush.bf16.msra.mxu1 %v2256_v32 }
  0x3c   : > { %v746_v0 = vadd.f32 %v738_v11, %v721_v56  ;;  %v789_v2 = vmul.f32 %v2159_v63, %v2606_v33  ;;  %v813_v13 = vmul.f32 %v2710_v52, %v2608_v34  ;;  %v814_v20 = vmul.f32 %v2167_v14, %v2608_v34  ;;  %v2741_v34 = vld [vmem:[%s3504_s4] ss:$0 sm:$0xff] }
  0x3d   : > { %v856_v3 = vadd.f32 %v2657_v27, %v844_v60  ;;  %v857_v9 = vadd.f32 %v2657_v27, %v845_v61  ;;  %v770_v12 = vadd.f32 %v762_v58, %v745_v62  ;;  %v838_v23 = vmul.f32 %v2601_v30, %v2151_v57 }
  0x3e   : > { %v771_v10 = vadd.f32 %v763_v59, %v746_v0  ;;  %v839_v24 = vmul.f32 %v2601_v30, %v2175_v21 }
  0x3f   : > { %v862_v15 = vpack.c.bf16 %v857_v9, %v856_v3  ;;  %v796_v16 = vadd.f32 %v788_v1, %v770_v12 }
  0x40   : > { %v797_v17 = vadd.f32 %v789_v2, %v771_v10 }
  0x41   : > { %v821_v22 = vadd.f32 %v813_v13, %v796_v16 }
  0x42   : > { %2181 = vmatmul.msk.bf16.gmra.mxu0 %vm876_vm0, %v861_v39  ;;  %v822_v33 = vadd.f32 %v814_v20, %v797_v17 }
  0x43   : > { %v846_v25 = vadd.f32 %v838_v23, %v821_v22 }
  0x44   : > { %v847_v26 = vadd.f32 %v839_v24, %v822_v33 }
  0x45   : > { %v858_v28 = vadd.f32 %v2657_v27, %v846_v25 }
  0x46   : > { %v859_v29 = vadd.f32 %v2657_v27, %v847_v26 }
  0x48   : > { %v863_v31 = vpack.c.bf16 %v859_v29, %v858_v28 }
  0x52   : > { %2182 = vmatmul.msk.bf16.gmra.mxu0 %vm876_vm0, %v862_v15 }
  0x62   : > { %2183 = vmatmul.msk.bf16.gmra.mxu0 %vm876_vm0, %v863_v31 }
  0xaf   : > { %v898_v35 = vpop.f32.mrf.mxu0 }
  0xb0   : > { %v899_v30 = vadd.f32 %v2741_v34, %v898_v35 }
  0xb2   : > { %v918_v4 = vmul.f32 %v899_v30, %v899_v30 }
  0xb4   : > { %v926_v36 = vmul.f32 %v918_v4, %v899_v30 }
  0xb6   : > { %v934_v37 = vmul.f32 0.044715, %v926_v36 }
  0xb7   : > { %v900_v27 = vpop.f32.mrf.mxu0 }
  0xb8   : > { %v942_v40 = vadd.f32 %v934_v37, %v899_v30  ;;  %v901_v6 = vadd.f32 %v2741_v34, %v900_v27 }
  0xba   : > { %v950_v39 = vmul.f32 0.7978846, %v942_v40  ;;  %v919_v42 = vmul.f32 %v901_v6, %v901_v6 }
  0xbc   : > { %v927_v44 = vmul.f32 %v919_v42, %v901_v6  ;;  %2296 = vtanh.f32 %v950_v39 }
  0xbe   : > { %v935_v45 = vmul.f32 0.044715, %v927_v44 }
  0xbf   : > { %v903_v46 = vpop.f32.mrf.mxu0 }
  0xc0   : > { %v943_v47 = vadd.f32 %v935_v45, %v901_v6  ;;  %v904_v48 = vadd.f32 %v2741_v34, %v903_v46 }
  0xc2   : > { %v951_v50 = vmul.f32 0.7978846, %v943_v47  ;;  %v920_v7 = vmul.f32 %v904_v48, %v904_v48  ;;  %v2297_v53 = vpop.eup %2296 }
  0xc3   : > { %v966_v56 = vadd.f32 1.0, %v2297_v53 }
  0xc4   : > { %2298 = vtanh.f32 %v951_v50  ;;  %v928_v55 = vmul.f32 %v920_v7, %v904_v48 }
  0xc5   : > { %v974_v61 = vmul.f32 0.5, %v966_v56 }
  0xc6   : > { %v936_v38 = vmul.f32 0.044715, %v928_v55 }
  0xc7   : > { %v905_v43 = vpop.f32.mrf.mxu0  ;;  %v982_v2 = vmul.f32 %v974_v61, %v899_v30 }
  0xc8   : > { %v944_v54 = vadd.f32 %v936_v38, %v904_v48  ;;  %v906_v11 = vadd.f32 %v2741_v34, %v905_v43 }
  0xca   : > { %v2299_v57 = vpop.eup %2298  ;;  %v952_v58 = vmul.f32 0.7978846, %v944_v54  ;;  %v921_v59 = vmul.f32 %v906_v11, %v906_v11 }
  0xcb   : > { %v967_v60 = vadd.f32 1.0, %v2299_v57 }
  0xcc   : > { %v929_v62 = vmul.f32 %v921_v59, %v906_v11  ;;  %2300 = vtanh.f32 %v952_v58 }
  0xcd   : > { %v975_v0 = vmul.f32 0.5, %v967_v60 }
  0xce   : > { %v937_v63 = vmul.f32 0.044715, %v929_v62 }
  0xcf   : > { %v908_v1 = vpop.f32.mrf.mxu0  ;;  %v983_v3 = vmul.f32 %v975_v0, %v901_v6 }
  0xd0   : > { %v945_v9 = vadd.f32 %v937_v63, %v906_v11  ;;  %v909_v12 = vadd.f32 %v2741_v34, %v908_v1 }
  0xd1   : > { %v990_v10 = vpack.c.bf16 %v983_v3, %v982_v2 }
  0xd2   : > { %v953_v14 = vmul.f32 0.7978846, %v945_v9  ;;  %v922_v13 = vmul.f32 %v909_v12, %v909_v12  ;;  %v2301_v15 = vpop.eup %2300 }
  0xd3   : > { %2188 = vmatmul.msk.bf16.vlgmr.msra.gmra.mxu1 %vm876_vm0, %v990_v10  ;;  %v968_v21 = vadd.f32 1.0, %v2301_v15  ;;  %v2258_v10 = vld [vmem:[%s3509_s9] sm:$0xff] }
  0xd4   : > { %2302 = vtanh.f32 %v953_v14  ;;  %v930_v16 = vmul.f32 %v922_v13, %v909_v12  ;;  %1131 = vmatpush.bf16.msra.mxu3 %v2258_v10  ;;  %v2289_v13 = vld [vmem:[%s3506_s6] ss:$0 sm:$0xff] }
  0xd5   : > { %v976_v28 = vmul.f32 0.5, %v968_v21 }
  0xd6   : > { %v938_v17 = vmul.f32 0.044715, %v930_v16 }
  0xd7   : > { %v910_v20 = vpop.f32.mrf.mxu0  ;;  %v984_v30 = vmul.f32 %v976_v28, %v904_v48 }
  0xd8   : > { %v946_v22 = vadd.f32 %v938_v17, %v909_v12  ;;  %v911_v33 = vadd.f32 %v2741_v34, %v910_v20 }
  0xda   : > { %v2303_v23 = vpop.eup %2302  ;;  %v954_v24 = vmul.f32 0.7978846, %v946_v22  ;;  %v923_v25 = vmul.f32 %v911_v33, %v911_v33 }
  0xdb   : > { %v969_v26 = vadd.f32 1.0, %v2303_v23 }
  0xdc   : > { %v931_v29 = vmul.f32 %v923_v25, %v911_v33  ;;  %2304 = vtanh.f32 %v954_v24 }
  0xdd   : > { %v977_v31 = vmul.f32 0.5, %v969_v26 }
  0xde   : > { %v939_v32 = vmul.f32 0.044715, %v931_v29 }
  0xdf   : > { %v913_v35 = vpop.f32.mrf.mxu0  ;;  %v985_v4 = vmul.f32 %v977_v31, %v906_v11 }
  0xe0   : > { %v947_v36 = vadd.f32 %v939_v32, %v911_v33  ;;  %v914_v37 = vadd.f32 %v2741_v34, %v913_v35 }
  0xe1   : > { %v991_v27 = vpack.c.bf16 %v985_v4, %v984_v30 }
  0xe2   : > { %v955_v40 = vmul.f32 0.7978846, %v947_v36  ;;  %v924_v6 = vmul.f32 %v914_v37, %v914_v37  ;;  %v2305_v39 = vpop.eup %2304 }
  0xe3   : > { %2189 = vmatmul.msk.bf16.gmra.mxu1 %vm876_vm0, %v991_v27  ;;  %v970_v46 = vadd.f32 1.0, %v2305_v39 }
  0xe4   : > { %2306 = vtanh.f32 %v955_v40  ;;  %v932_v42 = vmul.f32 %v924_v6, %v914_v37  ;;  %v2290_v40 = vld [vmem:[%s3508_s8] ss:$0 sm:$0xff] }
  0xe5   : > { %v978_v38 = vmul.f32 0.5, %v970_v46 }
  0xe6   : > { %v940_v44 = vmul.f32 0.044715, %v932_v42 }
  0xe7   : > { %v915_v45 = vpop.f32.mrf.mxu0  ;;  %v986_v11 = vmul.f32 %v978_v38, %v909_v12  ;;  %v2257_v12 = vld [vmem:[%s3507_s7] sm:$0xff] }
  0xe8   : > { %v948_v47 = vadd.f32 %v940_v44, %v914_v37  ;;  %v916_v50 = vadd.f32 %v2741_v34, %v915_v45  ;;  %1090 = vmatpush.bf16.msra.mxu2 %v2257_v12 }
  0xea   : > { %v2307_v7 = vpop.eup %2306  ;;  %v956_v48 = vmul.f32 0.7978846, %v948_v47  ;;  %v925_v53 = vmul.f32 %v916_v50, %v916_v50 }
  0xeb   : > { %v971_v55 = vadd.f32 1.0, %v2307_v7 }
  0xec   : > { %v933_v43 = vmul.f32 %v925_v53, %v916_v50  ;;  %2308 = vtanh.f32 %v956_v48 }
  0xed   : > { %v979_v56 = vmul.f32 0.5, %v971_v55 }
  0xee   : > { %v941_v54 = vmul.f32 0.044715, %v933_v43 }
  0xef   : > { %v987_v57 = vmul.f32 %v979_v56, %v911_v33 }
  0xf0   : > { %v949_v58 = vadd.f32 %v941_v54, %v916_v50 }
  0xf1   : > { %v992_v59 = vpack.c.bf16 %v987_v57, %v986_v11 }
  0xf2   : > { %v957_v60 = vmul.f32 0.7978846, %v949_v58  ;;  %v2309_v61 = vpop.eup %2308 }
  0xf3   : > { %2190 = vmatmul.msk.bf16.gmra.mxu1 %vm876_vm0, %v992_v59  ;;  %v972_v62 = vadd.f32 1.0, %v2309_v61 }
  0xf4   : > { %2310 = vtanh.f32 %v957_v60 }
  0xf5   : > { %v980_v63 = vmul.f32 0.5, %v972_v62 }
  0xf7   : > { %v988_v2 = vmul.f32 %v980_v63, %v914_v37 }
  0xfa   : > { %v2311_v34 = vpop.eup %2310 }
  0xfb   : > { %v973_v0 = vadd.f32 1.0, %v2311_v34 }
  0xfd   : > { %v981_v1 = vmul.f32 0.5, %v973_v0  ;;  %v2291_v0 = vld [vmem:[%s3510_s10] ss:$0 sm:$0xff] }
  0xff   : > { %v989_v3 = vmul.f32 %v981_v1, %v916_v50 }
 0x101   : > { %v993_v9 = vpack.c.bf16 %v989_v3, %v988_v2 }
 0x103   : > { %2191 = vmatmul.msk.bf16.gmra.mxu1 %vm876_vm0, %v993_v9 }
 0x150   : > { %v1027_v14 = vpop.f32.mrf.mxu1 }
 0x151   : > { %v1028_v15 = vadd.f32 %v2289_v13, %v1027_v14 }
 0x153   : > { %v2768_v20 = vadd.f32 %v1028_v15, %v2570_v8 }
 0x158   : > { %v1029_v16 = vpop.f32.mrf.mxu1 }
 0x159   : > { %v1030_v17 = vadd.f32 %v2289_v13, %v1029_v16 }
 0x15b   : > { %v2771_v21 = vadd.f32 %v2587_v19, %v1030_v17 }
 0x15d   : > { %v1055_v22 = vpack.c.bf16 %v2771_v21, %v2768_v20 }
 0x15f   : > { %2196 = vmatmul.msk.bf16.vlgmr.msra.gmra.mxu2 %vm876_vm0, %v1055_v22  ;;  %2204 = vmatmul.msk.bf16.vlgmr.msra.gmra.mxu3 %vm876_vm0, %v1055_v22 }
 0x160   : > { %v1032_v33 = vpop.f32.mrf.mxu1 }
 0x161   : > { %v1033_v23 = vadd.f32 %v2289_v13, %v1032_v33 }
 0x163   : > { %v2778_v26 = vadd.f32 %v2615_v41, %v1033_v23 }
 0x168   : > { %v1034_v24 = vpop.f32.mrf.mxu1 }
 0x169   : > { %v1035_v25 = vadd.f32 %v2289_v13, %v1034_v24 }
 0x16b   : > { %v2781_v8 = vadd.f32 %v2624_v49, %v1035_v25 }
 0x16d   : > { %v1056_v19 = vpack.c.bf16 %v2781_v8, %v2778_v26 }
 0x16f   : > { %2197 = vmatmul.msk.bf16.gmra.mxu2 %vm876_vm0, %v1056_v19  ;;  %2205 = vmatmul.msk.bf16.gmra.mxu3 %vm876_vm0, %v1056_v19 }
 0x170   : > { %v1037_v28 = vpop.f32.mrf.mxu1 }
 0x171   : > { %v1038_v29 = vadd.f32 %v2289_v13, %v1037_v28 }
 0x173   : > { %v2788_v35 = vadd.f32 %v2644_v5, %v1038_v29 }
 0x178   : > { %v1039_v31 = vpop.f32.mrf.mxu1 }
 0x179   : > { %v1040_v32 = vadd.f32 %v2289_v13, %v1039_v31 }
 0x17b   : > { %v2791_v41 = vadd.f32 %v2670_v51, %v1040_v32 }
 0x17d   : > { %v1057_v49 = vpack.c.bf16 %v2791_v41, %v2788_v35 }
 0x17f   : > { %2198 = vmatmul.msk.bf16.gmra.mxu2 %vm876_vm0, %v1057_v49  ;;  %2206 = vmatmul.msk.bf16.gmra.mxu3 %vm876_vm0, %v1057_v49 }
 0x180   : > { %v1042_v30 = vpop.f32.mrf.mxu1 }
 0x181   : > { %v1043_v4 = vadd.f32 %v2289_v13, %v1042_v30 }
 0x183   : > { %v2798_v27 = vadd.f32 %v2687_v18, %v1043_v4 }
 0x188   : > { %v1044_v36 = vpop.f32.mrf.mxu1 }
 0x189   : > { %v1045_v37 = vadd.f32 %v2289_v13, %v1044_v36 }
 0x18b   : > { %v2801_v5 = vadd.f32 %v2710_v52, %v1045_v37 }
 0x18d   : > { %v1058_v51 = vpack.c.bf16 %v2801_v5, %v2798_v27 }
 0x18f   : > { %2199 = vmatmul.msk.bf16.gmra.mxu2 %vm876_vm0, %v1058_v51  ;;  %2207 = vmatmul.msk.bf16.gmra.mxu3 %vm876_vm0, %v1058_v51 }
 0x1e2   : > { %v1092_v6 = vpop.f32.mrf.mxu2  ;;  %v1133_v39 = vpop.f32.mrf.mxu3 }
 0x1e3   : > { %v2810_v42 = vadd.f32 %v2290_v40, %v1092_v6  ;;  %v2842_v2 = vadd.f32 %v2291_v0, %v1133_v39 }
 0x1e5   : > { %v1153_v18 = vmul.f32 %v2810_v42, %v2810_v42  ;;  %v1409_v14 = vmul.f32 %v2842_v2, %v2842_v2 }
 0x1e7   : > { %v1161_v52 = vsel %vm876_vm0, %v1153_v18, 0.0  ;;  %v1417_v16 = vsel %vm876_vm0, %v1409_v14, 0.0 }
 0x1e8   : > { %1162 = vadd.xlane.f32.xlu0 %v1161_v52 }
 0x1ea   : > { %v1094_v44 = vpop.f32.mrf.mxu2  ;;  %v1135_v45 = vpop.f32.mrf.mxu3 }
 0x1eb   : > { %v2815_v46 = vadd.f32 %v2290_v40, %v1094_v44  ;;  %v2855_v22 = vadd.f32 %v2291_v0, %v1135_v45 }
 0x1ed   : > { %v1154_v47 = vmul.f32 %v2815_v46, %v2815_v46  ;;  %v1410_v19 = vmul.f32 %v2855_v22, %v2855_v22 }
 0x1ef   : > { %v1164_v50 = vsel %vm876_vm0, %v1154_v47, 0.0  ;;  %v1420_v4 = vsel %vm876_vm0, %v1410_v19, 0.0 }
 0x1f0   : > { %1165 = vadd.xlane.f32.xlu0 %v1164_v50 }
 0x1f2   : > { %v1097_v7 = vpop.f32.mrf.mxu2  ;;  %v1138_v53 = vpop.f32.mrf.mxu3 }
 0x1f3   : > { %v2820_v48 = vadd.f32 %v2290_v40, %v1097_v7  ;;  %v2865_v29 = vadd.f32 %v2291_v0, %v1138_v53 }
 0x1f5   : > { %v1155_v55 = vmul.f32 %v2820_v48, %v2820_v48  ;;  %v1411_v37 = vmul.f32 %v2865_v29, %v2865_v29 }
 0x1f7   : > { %v1167_v38 = vsel %vm876_vm0, %v1155_v55, 0.0  ;;  %v1423_v18 = vsel %vm876_vm0, %v1411_v37, 0.0 }
 0x1f8   : > { %1168 = vadd.xlane.f32.xlu1 %v1167_v38 }
 0x1fa   : > { %v1099_v43 = vpop.f32.mrf.mxu2  ;;  %v1140_v54 = vpop.f32.mrf.mxu3 }
 0x1fb   : > { %v2825_v56 = vadd.f32 %v2290_v40, %v1099_v43  ;;  %v2851_v15 = vadd.f32 %v2291_v0, %v1140_v54 }
 0x1fd   : > { %v1156_v11 = vmul.f32 %v2825_v56, %v2825_v56  ;;  %v1412_v25 = vmul.f32 %v2851_v15, %v2851_v15 }
 0x1ff   : > { %v1170_v57 = vsel %vm876_vm0, %v1156_v11, 0.0  ;;  %v1426_v32 = vsel %vm876_vm0, %v1412_v25, 0.0 }
 0x200   : > { %1171 = vadd.xlane.f32.xlu1 %v1170_v57 }
 0x202   : > { %v1102_v58 = vpop.f32.mrf.mxu2  ;;  %v1143_v61 = vpop.f32.mrf.mxu3 }
 0x203   : > { %v2830_v59 = vadd.f32 %v2290_v40, %v1102_v58  ;;  %v2871_v30 = vadd.f32 %v2291_v0, %v1143_v61 }
 0x205   : > { %v1157_v60 = vmul.f32 %v2830_v59, %v2830_v59  ;;  %v1413_v51 = vmul.f32 %v2871_v30, %v2871_v30 }
 0x207   : > { %v1173_v62 = vsel %vm876_vm0, %v1157_v60, 0.0  ;;  %v1429_v44 = vsel %vm876_vm0, %v1413_v51, 0.0 }
 0x208   : > { %1174 = vadd.xlane.f32.xlu2 %v1173_v62 }
 0x20a   : > { %v1104_v34 = vpop.f32.mrf.mxu2  ;;  %v1145_v9 = vpop.f32.mrf.mxu3 }
 0x20b   : > { %v2838_v63 = vadd.f32 %v2290_v40, %v1104_v34  ;;  %v2880_v6 = vadd.f32 %v2291_v0, %v1145_v9 }
 0x20d   : > { %v1158_v1 = vmul.f32 %v2838_v63, %v2838_v63  ;;  %v1414_v45 = vmul.f32 %v2880_v6, %v2880_v6 }
 0x20f   : > { %v1176_v3 = vsel %vm876_vm0, %v1158_v1, 0.0  ;;  %v1432_v50 = vsel %vm876_vm0, %v1414_v45, 0.0 }
 0x210   : > { %1177 = vadd.xlane.f32.xlu2 %v1176_v3 }
 0x212   : > { %v1107_v12 = vpop.f32.mrf.mxu2  ;;  %v1148_v23 = vpop.f32.mrf.mxu3 }
 0x213   : > { %v2845_v10 = vadd.f32 %v2290_v40, %v1107_v12  ;;  %v2867_v31 = vadd.f32 %v2291_v0, %v1148_v23 }
 0x215   : > { %v1159_v13 = vmul.f32 %v2845_v10, %v2845_v10  ;;  %v1415_v36 = vmul.f32 %v2867_v31, %v2867_v31 }
 0x217   : > { %v1179_v17 = vsel %vm876_vm0, %v1159_v13, 0.0  ;;  %v1435_v39 = vsel %vm876_vm0, %v1415_v36, 0.0 }
 0x218   : > { %1418 = vadd.xlane.f32.xlu2 %v1417_v16  ;;  %1180 = vadd.xlane.f32.xlu0 %v1179_v17 }
 0x21a   : > { %v1109_v33 = vpop.f32.mrf.mxu2 }
 0x21b   : > { %v2857_v24 = vadd.f32 %v2290_v40, %v1109_v33  ;;  %v1150_v40 = vpop.f32.mrf.mxu3 }
 0x21c   : > { %v2884_v52 = vadd.f32 %v2291_v0, %v1150_v40 }
 0x21d   : > { %v1160_v28 = vmul.f32 %v2857_v24, %v2857_v24 }
 0x21e   : > { %v1416_v47 = vmul.f32 %v2884_v52, %v2884_v52 }
 0x21f   : > { %v1182_v49 = vsel %vm876_vm0, %v1160_v28, 0.0 }
 0x220   : > { %1427 = vadd.xlane.f32.xlu2 %v1426_v32  ;;  %1183 = vadd.xlane.f32.xlu1 %v1182_v49  ;;  %v1438_v7 = vsel %vm876_vm0, %v1416_v47, 0.0 }
 0x221   : > { %1421 = vadd.xlane.f32.xlu0 %v1420_v4 }
 0x228   : > { %1436 = vadd.xlane.f32.xlu2 %v1435_v39  ;;  %1424 = vadd.xlane.f32.xlu1 %v1423_v18 }
 0x229   : > { %1430 = vadd.xlane.f32.xlu0 %v1429_v44 }
 0x230   : > { %1433 = vadd.xlane.f32.xlu1 %v1432_v50 }
 0x231   : > { %1439 = vadd.xlane.f32.xlu0 %v1438_v7 }
 0x25b   : > { %v1163_v53 = vpop.xlane.xlu0 %1162 }
 0x25c   : > { %2312 = vrsqrt.f32 %v1163_v53  ;;  %vm1192_vm1 = vcmp.eq.f32.partialorder %v1163_v53, inf  ;;  %v1195_v1 = vand.u32 2147483648, %v1163_v53  ;;  %vm1194_vm2 = vcmp.eq.f32.partialorder %v1163_v53, 0.0 }
 0x262   : > { %v2313_v55 = vpop.eup %2312 }
 0x263   : > { %v1186_v38 = vmul.f32 %v2313_v55, %v1163_v53  ;;  %v1166_v43 = vpop.xlane.xlu0 %1165 }
 0x264   : > { %2314 = vrsqrt.f32 %v1166_v43  ;;  %vm1204_vm3 = vcmp.eq.f32.partialorder %v1166_v43, inf  ;;  %v1207_v28 = vand.u32 2147483648, %v1166_v43  ;;  %vm1206_vm4 = vcmp.eq.f32.partialorder %v1166_v43, 0.0 }
 0x265   : > { %v1187_v54 = vmul.f32 %v2313_v55, %v1186_v38 }
 0x267   : > { %v1188_v11 = vmul.f32 0.5, %v1187_v54 }
 0x269   : > { %v1189_v57 = vsub.f32 1.5, %v1188_v11 }
 0x26a   : > { %v2315_v58 = vpop.eup %2314 }
 0x26b   : > { %v1190_v60 = vmul.f32 %v2313_v55, %v1189_v57  ;;  %v1198_v61 = vmul.f32 %v2315_v58, %v1166_v43  ;;  %v1169_v62 = vpop.xlane.xlu1 %1168 }
 0x26c   : > { %2316 = vrsqrt.f32 %v1169_v62  ;;  %vm1216_vm5 = vcmp.eq.f32.partialorder %v1169_v62, inf  ;;  %vm1218_vm6 = vcmp.eq.f32.partialorder %v1169_v62, 0.0 }
 0x26d   : > { %v1191_v34 = vmul.f32 %v1190_v60, %v1163_v53  ;;  %v1199_v0 = vmul.f32 %v2315_v58, %v1198_v61 }
 0x26f   : > { %v1193_v3 = vsel %vm1192_vm1, %v1163_v53, %v1191_v34  ;;  %v1200_v9 = vmul.f32 0.5, %v1199_v0  ;;  %v1219_v53 = vand.u32 2147483648, %v1169_v62 }
 0x270   : > { %v1196_v12 = vsel %vm1194_vm2, %v1195_v1, %v1193_v3 }
 0x271   : > { %v2893_v14 = vmax.f32 %v1196_v12, 1e-12  ;;  %v1201_v13 = vsub.f32 1.5, %v1200_v9 }
 0x272   : > { %v2317_v16 = vpop.eup %2316 }
 0x273   : > { %2318 = vrcp.f32 %v2893_v14  ;;  %v1172_v17 = vpop.xlane.xlu1 %1171  ;;  %v1202_v33 = vmul.f32 %v2315_v58, %v1201_v13  ;;  %v1210_v23 = vmul.f32 %v2317_v16, %v1169_v62  ;;  %v1300_v13 = vand.u32 2147483648, %v2893_v14 }
 0x274   : > { %2320 = vrsqrt.f32 %v1172_v17  ;;  %vm1228_vm7 = vcmp.eq.f32.partialorder %v1172_v17, inf  ;;  %v1231_v12 = vand.u32 2147483648, %v1172_v17  ;;  %vm1230_vm8 = vcmp.eq.f32.partialorder %v1172_v17, 0.0 }
 0x275   : > { %v1203_v25 = vmul.f32 %v1202_v33, %v1166_v43  ;;  %v1211_v19 = vmul.f32 %v2317_v16, %v1210_v23  ;;  %vm1294_vm10 = vweird.f32 %v2893_v14 }
 0x277   : > { %v1205_v32 = vsel %vm1204_vm3, %v1166_v43, %v1203_v25  ;;  %v1212_v49 = vmul.f32 0.5, %v1211_v19 }
 0x278   : > { %v1208_v36 = vsel %vm1206_vm4, %v1207_v28, %v1205_v32 }
 0x279   : > { %v2896_v4 = vpop.eup %2318  ;;  %v2898_v51 = vmax.f32 %v1208_v36, 1e-12  ;;  %v1213_v40 = vsub.f32 1.5, %v1212_v49 }
 0x27a   : > { %v2321_v37 = vpop.eup %2320  ;;  %v1290_v44 = vmul.f32 %v2896_v4, %v2893_v14  ;;  %vm1295_vm9 = vweird.f32 %v2896_v4 }
 0x27b   : > { %v1222_v39 = vmul.f32 %v2321_v37, %v1172_v17  ;;  %v2900_v18 = vpop.xlane.xlu2 %1174  ;;  %2322 = vrcp.f32 %v2898_v51  ;;  %v1214_v45 = vmul.f32 %v2317_v16, %v1213_v40  ;;  %vm2931_vm11 = vmor %vm1294_vm10, %vm1295_vm9  ;;  %vm1309_vm14 = vweird.f32 %v2898_v51 }
 0x27c   : > { %2324 = vrsqrt.f32 %v2900_v18  ;;  %v1291_v55 = vsub.f32 1.0, %v1290_v44  ;;  %v1313_v44 = vand.u32 2147483647, %v2898_v51  ;;  %vm1240_vm2 = vcmp.eq.f32.partialorder %v2900_v18, inf }
 0x27d   : > { %v1223_v47 = vmul.f32 %v2321_v37, %v1222_v39  ;;  %v1215_v50 = vmul.f32 %v1214_v45, %v1169_v62  ;;  %vm1242_vm3 = vcmp.eq.f32.partialorder %v2900_v18, 0.0 }
 0x27e   : > { %v1292_v1 = vmul.f32 %v2896_v4, %v1291_v55  ;;  %vm2949_vm15 = vcmp.eq.f32.partialorder %v1313_v44, 8.507059e+37 }
 0x27f   : > { %v1224_v7 = vmul.f32 0.5, %v1223_v47  ;;  %v1217_v38 = vsel %vm1216_vm5, %v1169_v62, %v1215_v50 }
 0x280   : > { %v1220_v11 = vsel %vm1218_vm6, %v1219_v53, %v1217_v38  ;;  %v1293_v23 = vadd.f32 %v2896_v4, %v1292_v1 }
 0x281   : > { %v1225_v43 = vsub.f32 1.5, %v1224_v7  ;;  %v2906_v54 = vpop.eup %2322  ;;  %v2910_v60 = vmax.f32 %v1220_v11, 1e-12 }
 0x282   : > { %v2325_v57 = vpop.eup %2324  ;;  %v1305_v58 = vmul.f32 %v2906_v54, %v2898_v51  ;;  %v1297_v47 = vsel %vm2931_vm11, %v2896_v4, %v1293_v23  ;;  %vm1310_vm12 = vweird.f32 %v2906_v54 }
 0x283   : > { %v2912_v61 = vpop.xlane.xlu2 %1177  ;;  %v1226_v34 = vmul.f32 %v2321_v37, %v1225_v43  ;;  %v1234_v0 = vmul.f32 %v2325_v57, %v2900_v18  ;;  %v1298_v37 = vand.u32 2147483647, %v2893_v14  ;;  %v1301_v14 = vor.u32 1.1754944e-38, %v1300_v13  ;;  %vm2954_vm1 = vmor %vm1309_vm14, %vm1310_vm12 }
 0x284   : > { %2326 = vrsqrt.f32 %v2912_v61  ;;  %v1306_v62 = vsub.f32 1.0, %v1305_v58  ;;  %v1315_v43 = vand.u32 2147483648, %v2898_v51  ;;  %vm1324_vm4 = vweird.f32 %v2910_v60 }
 0x285   : > { %2328 = vrcp.f32 %v2910_v60  ;;  %v1227_v3 = vmul.f32 %v1226_v34, %v1172_v17  ;;  %v1235_v9 = vmul.f32 %v2325_v57, %v1234_v0  ;;  %vm1299_vm13 = vcmp.eq.f32.partialorder %v1298_v37, 8.507059e+37 }
 0x286   : > { %v1307_v25 = vmul.f32 %v2906_v54, %v1306_v62  ;;  %v1302_v11 = vsel %vm1299_vm13, %v1301_v14, %v1297_v47  ;;  %v1243_v0 = vand.u32 2147483648, %v2900_v18  ;;  %v1316_v13 = vor.u32 1.1754944e-38, %v1315_v43 }
 0x287   : > { %v1229_v16 = vsel %vm1228_vm7, %v1172_v17, %v1227_v3  ;;  %v1236_v33 = vmul.f32 0.5, %v1235_v9  ;;  %v1330_v39 = vand.u32 2147483648, %v2910_v60  ;;  %vm1252_vm6 = vcmp.eq.f32.partialorder %v2912_v61, inf }
 0x288   : > { %v1232_v19 = vsel %vm1230_vm8, %v1231_v12, %v1229_v16  ;;  %v1308_v50 = vadd.f32 %v2906_v54, %v1307_v25  ;;  %v2970_v12 = vmul.f32 %v1302_v11, %v2810_v42  ;;  %vm1254_vm7 = vcmp.eq.f32.partialorder %v2912_v61, 0.0 }
 0x289   : > { %v2922_v32 = vmax.f32 %v1232_v19, 1e-12  ;;  %v1237_v49 = vsub.f32 1.5, %v1236_v33 }
 0x28a   : > { %v2327_v28 = vpop.eup %2326  ;;  %v1312_v1 = vsel %vm2954_vm1, %v2906_v54, %v1308_v50  ;;  %v1255_v50 = vand.u32 2147483648, %v2912_v61 }
 0x28b   : > { %v2924_v36 = vpop.eup %2328  ;;  %v1246_v17 = vmul.f32 %v2327_v28, %v2912_v61  ;;  %v2929_v40 = vpop.xlane.xlu2 %1418  ;;  %2330 = vrcp.f32 %v2922_v32  ;;  %v1238_v53 = vmul.f32 %v2325_v57, %v1237_v49  ;;  %v1317_v42 = vsel %vm2949_vm15, %v1316_v13, %v1312_v1 }
 0x28c   : > { %v1320_v45 = vmul.f32 %v2924_v36, %v2910_v60  ;;  %2332 = vrsqrt.f32 %v2929_v40  ;;  %v2945_v38 = vpop.xlane.xlu0 %1180  ;;  %vm1325_vm5 = vweird.f32 %v2924_v36  ;;  %v2996_v14 = vmul.f32 %v1317_v42, %v2815_v46 }
 0x28d   : > { %v1247_v55 = vmul.f32 %v2327_v28, %v1246_v17  ;;  %v1239_v58 = vmul.f32 %v1238_v53, %v2900_v18  ;;  %2334 = vrsqrt.f32 %v2945_v38  ;;  %vm3005_vm8 = vmor %vm1324_vm4, %vm1325_vm5  ;;  %v1343_v43 = vand.u32 2147483647, %v2922_v32 }
 0x28e   : > { %v1321_v7 = vsub.f32 1.0, %v1320_v45  ;;  %v1345_v46 = vand.u32 2147483648, %v2922_v32  ;;  %vm1339_vm11 = vweird.f32 %v2922_v32  ;;  %vm1264_vm14 = vcmp.eq.f32.partialorder %v2945_v38, inf }
 0x28f   : > { %v1248_v34 = vmul.f32 0.5, %v1247_v55  ;;  %v1241_v3 = vsel %vm1240_vm2, %v2900_v18, %v1239_v58  ;;  %v1328_v18 = vand.u32 2147483647, %v2910_v60  ;;  %vm3040_vm13 = vcmp.eq.f32.partialorder %v1343_v43, 8.507059e+37 }
 0x290   : > { %v1322_v62 = vmul.f32 %v2924_v36, %v1321_v7  ;;  %v1244_v33 = vsel %vm1242_vm3, %v1243_v0, %v1241_v3  ;;  %vm1266_vm15 = vcmp.eq.f32.partialorder %v2945_v38, 0.0  ;;  %vm1448_vm1 = vcmp.eq.f32.partialorder %v2929_v40, inf }
 0x291   : > { %v2962_v51 = vpop.eup %2330  ;;  %v1249_v9 = vsub.f32 1.5, %v1248_v34  ;;  %v2979_v54 = vmax.f32 %v1244_v33, 1e-12  ;;  %vm1329_vm10 = vcmp.eq.f32.partialorder %v1328_v18, 8.507059e+37  ;;  %v2259_v33 = vld [vmem:[%s3511_s11] sm:$0xff]  ;;  %vm1450_vm4 = vcmp.eq.f32.partialorder %v2929_v40, 0.0 }
 0x292   : > { %v1335_v16 = vmul.f32 %v2962_v51, %v2922_v32  ;;  %v2976_v25 = vpop.eup %2332  ;;  %v1323_v17 = vadd.f32 %v2924_v36, %v1322_v62  ;;  %vm1340_vm9 = vweird.f32 %v2962_v51  ;;  %v1346_v32 = vor.u32 1.1754944e-38, %v1345_v46  ;;  %1729 = vmatpush.bf16.msrb.mxu0 %v2259_v33 }
 0x293   : > { %v2974_v23 = vpop.xlane.xlu2 %1427  ;;  %v1250_v19 = vmul.f32 %v2327_v28, %v1249_v9  ;;  %v1442_v37 = vmul.f32 %v2976_v25, %v2929_v40  ;;  %v2335_v28 = vpop.eup %2334  ;;  %v1331_v9 = vor.u32 1.1754944e-38, %v1330_v39  ;;  %vm3036_vm12 = vmor %vm1339_vm11, %vm1340_vm9  ;;  %vm1354_vm2 = vweird.f32 %v2979_v54 }
 0x294   : > { %2336 = vrsqrt.f32 %v2974_v23  ;;  %v1336_v49 = vsub.f32 1.0, %v1335_v16  ;;  %v1258_v7 = vmul.f32 %v2335_v28, %v2945_v38  ;;  %v3001_v53 = vpop.xlane.xlu1 %1183  ;;  %v1327_v58 = vsel %vm3005_vm8, %v2924_v36, %v1323_v17 }
 0x295   : > { %2338 = vrcp.f32 %v2979_v54  ;;  %v1251_v45 = vmul.f32 %v1250_v19, %v2912_v61  ;;  %v1443_v47 = vmul.f32 %v2976_v25, %v1442_v37  ;;  %v1666_v36 = vsel %vm876_vm0, %v2996_v14, 0.0 }
 0x296   : > { %v1337_v44 = vmul.f32 %v2962_v51, %v1336_v49  ;;  %v1259_v60 = vmul.f32 %v2335_v28, %v1258_v7  ;;  %2340 = vrsqrt.f32 %v3001_v53  ;;  %v1332_v19 = vsel %vm1329_vm10, %v1331_v9, %v1327_v58 }
 0x297   : > { %v1253_v11 = vsel %vm1252_vm6, %v2912_v61, %v1251_v45  ;;  %v1444_v57 = vmul.f32 0.5, %v1443_v47  ;;  %v1665_v61 = vsel %vm876_vm0, %v2970_v12, 0.0  ;;  %v3047_v45 = vpop.xlane.xlu0 %1421  ;;  %v3053_v55 = vmul.f32 %v1332_v19, %v2820_v48 }
 0x298   : > { %v1256_v34 = vsel %vm1254_vm7, %v1255_v50, %v1253_v11  ;;  %v1338_v0 = vadd.f32 %v2962_v51, %v1337_v44  ;;  %v1260_v13 = vmul.f32 0.5, %v1259_v60  ;;  %v1667_v47 = vadd.f32 %v1666_v36, %v1665_v61 }
 0x299   : > { %v3017_v1 = vmax.f32 %v1256_v34, 1e-12  ;;  %v1445_v49 = vsub.f32 1.5, %v1444_v57  ;;  %v1267_v50 = vand.u32 2147483648, %v2945_v38  ;;  %v1358_v48 = vand.u32 2147483647, %v2979_v54 }
 0x29a   : > { %v2337_v4 = vpop.eup %2336  ;;  %v1342_v37 = vsel %vm3036_vm12, %v2962_v51, %v1338_v0  ;;  %v1261_v39 = vsub.f32 1.5, %v1260_v13  ;;  %v1668_v61 = vsel %vm876_vm0, %v3053_v55, 0.0  ;;  %v1360_v13 = vand.u32 2147483648, %v2979_v54 }
 0x29b   : > { %v1478_v62 = vmul.f32 %v2337_v4, %v2974_v23  ;;  %v3021_v3 = vpop.eup %2338  ;;  %2342 = vrcp.f32 %v3017_v1  ;;  %v1347_v11 = vsel %vm3040_vm13, %v1346_v32, %v1342_v37  ;;  %v1446_v58 = vmul.f32 %v2976_v25, %v1445_v49 }
 0x29c   : > { %v1350_v16 = vmul.f32 %v3021_v3, %v2979_v54  ;;  %v2341_v7 = vpop.eup %2340  ;;  %v1262_v51 = vmul.f32 %v2335_v28, %v1261_v39  ;;  %2344 = vrsqrt.f32 %v3047_v45  ;;  %vm1355_vm3 = vweird.f32 %v3021_v3  ;;  %v3094_v37 = vpop.xlane.xlu1 %1424 }
 0x29d   : > { %v1479_v44 = vmul.f32 %v2337_v4, %v1478_v62  ;;  %v1270_v34 = vmul.f32 %v2341_v7, %v3001_v53  ;;  %v3074_v9 = vmul.f32 %v1347_v11, %v2825_v56  ;;  %v1447_v33 = vmul.f32 %v1446_v58, %v2929_v40  ;;  %vm3086_vm5 = vmor %vm1354_vm2, %vm1355_vm3 }
 0x29e   : > { %v1351_v17 = vsub.f32 1.0, %v1350_v16  ;;  %v1263_v60 = vmul.f32 %v1262_v51, %v2945_v38  ;;  %v1451_v18 = vand.u32 2147483648, %v2929_v40  ;;  %vm1484_vm6 = vcmp.eq.f32.partialorder %v2974_v23, inf  ;;  %v3110_v51 = vpop.xlane.xlu2 %1436 }
 0x29f   : > { %v1480_v46 = vmul.f32 0.5, %v1479_v44  ;;  %v1271_v62 = vmul.f32 %v2341_v7, %v1270_v34  ;;  %vm1359_vm7 = vcmp.eq.f32.partialorder %v1358_v48, 8.507059e+37  ;;  %vm1486_vm8 = vcmp.eq.f32.partialorder %v2974_v23, 0.0 }
 0x2a0   : > { %v1352_v43 = vmul.f32 %v3021_v3, %v1351_v17  ;;  %v1265_v36 = vsel %vm1264_vm14, %v2945_v38, %v1263_v60  ;;  %v1361_v39 = vor.u32 1.1754944e-38, %v1360_v13  ;;  %v1373_v44 = vand.u32 2147483647, %v3017_v1  ;;  %v3137_v13 = vpop.xlane.xlu0 %1430 }
 0x2a1   : > { %v3062_v57 = vpop.eup %2342  ;;  %v1481_v0 = vsub.f32 1.5, %v1480_v46  ;;  %v1268_v19 = vsel %vm1266_vm15, %v1267_v50, %v1265_v36  ;;  %v1272_v49 = vmul.f32 0.5, %v1271_v62  ;;  %v1670_v50 = vsel %vm876_vm0, %v3074_v9, 0.0 }
 0x2a2   : > { %v1353_v28 = vadd.f32 %v3021_v3, %v1352_v43  ;;  %v1365_v25 = vmul.f32 %v3062_v57, %v3017_v1  ;;  %v3091_v32 = vmax.f32 %v1268_v19, 1e-12  ;;  %v2345_v17 = vpop.eup %2344  ;;  %vm1370_vm9 = vweird.f32 %v3062_v57 }
 0x2a3   : > { %v1482_v42 = vmul.f32 %v2337_v4, %v1481_v0  ;;  %v1669_v4 = vadd.f32 %v1668_v61, %v1667_v47  ;;  %v1273_v11 = vsub.f32 1.5, %v1272_v49  ;;  %v1454_v58 = vmul.f32 %v2345_v17, %v3047_v45 }
 0x2a4   : > { %v1366_v16 = vsub.f32 1.0, %v1365_v25  ;;  %v1357_v38 = vsel %vm3086_vm5, %v3021_v3, %v1353_v28  ;;  %2346 = vrcp.f32 %v3091_v32  ;;  %v1449_v3 = vsel %vm1448_vm1, %v2929_v40, %v1447_v33 }
 0x2a5   : > { %v1483_v43 = vmul.f32 %v1482_v42, %v2974_v23  ;;  %v1362_v46 = vsel %vm1359_vm7, %v1361_v39, %v1357_v38  ;;  %vm1369_vm10 = vweird.f32 %v3017_v1  ;;  %v1375_v34 = vand.u32 2147483648, %v3017_v1  ;;  %v3157_v38 = vpop.xlane.xlu1 %1433 }
 0x2a6   : > { %v1367_v54 = vmul.f32 %v3062_v57, %v1366_v16  ;;  %v1487_v48 = vand.u32 2147483648, %v2974_v23  ;;  %vm1276_vm11 = vcmp.eq.f32.partialorder %v3001_v53, inf  ;;  %v1671_v60 = vadd.f32 %v1670_v50, %v1669_v4  ;;  %vm3124_vm12 = vmor %vm1369_vm10, %vm1370_vm9 }
 0x2a7   : > { %v1274_v0 = vmul.f32 %v2341_v7, %v1273_v11  ;;  %v1455_v28 = vmul.f32 %v2345_v17, %v1454_v58  ;;  %2348 = vrsqrt.f32 %v3110_v51  ;;  %v3120_v25 = vmul.f32 %v1362_v46, %v2830_v59 }
 0x2a8   : > { %v1368_v47 = vadd.f32 %v3062_v57, %v1367_v54  ;;  %vm3128_vm13 = vcmp.eq.f32.partialorder %v1373_v44, 8.507059e+37  ;;  %v1452_v61 = vsel %vm1450_vm4, %v1451_v18, %v1449_v3  ;;  %v1485_v7 = vsel %vm1484_vm6, %v2974_v23, %v1483_v43 }
 0x2a9   : > { %v1275_v16 = vmul.f32 %v1274_v0, %v3001_v53  ;;  %v1456_v33 = vmul.f32 0.5, %v1455_v28  ;;  %2350 = vrsqrt.f32 %v3094_v37  ;;  %v1376_v19 = vor.u32 1.1754944e-38, %v1375_v34 }
 0x2aa   : > { %v3139_v59 = vpop.eup %2346  ;;  %v1372_v36 = vsel %vm3124_vm12, %v3062_v57, %v1368_v47  ;;  %vm1278_vm14 = vcmp.eq.f32.partialorder %v3001_v53, 0.0  ;;  %v1279_v42 = vand.u32 2147483648, %v3001_v53  ;;  %v3150_v56 = vmax.f32 %v1452_v61, 1e-12 }
 0x2ab   : > { %v1380_v40 = vmul.f32 %v3139_v59, %v3091_v32  ;;  %v1488_v18 = vsel %vm1486_vm8, %v1487_v48, %v1485_v7  ;;  %v1277_v57 = vsel %vm1276_vm11, %v3001_v53, %v1275_v16  ;;  %v1457_v49 = vsub.f32 1.5, %v1456_v33 }
 0x2ac   : > { %v1377_v54 = vsel %vm3128_vm13, %v1376_v19, %v1372_v36  ;;  %v1280_v39 = vsel %vm1278_vm14, %v1279_v42, %v1277_v57  ;;  %2352 = vrsqrt.f32 %v3137_v13  ;;  %v1672_v23 = vsel %vm876_vm0, %v3120_v25, 0.0 }
 0x2ad   : > { %v1381_v4 = vsub.f32 1.0, %v1380_v40  ;;  %v3162_v44 = vpop.eup %2348  ;;  %v3166_v50 = vmax.f32 %v1280_v39, 1e-12  ;;  %v1458_v3 = vmul.f32 %v2345_v17, %v1457_v49  ;;  %vm1460_vm15 = vcmp.eq.f32.partialorder %v3047_v45, inf }
 0x2ae   : > { %v1388_v43 = vand.u32 2147483647, %v3091_v32  ;;  %v1390_v46 = vand.u32 2147483648, %v3091_v32  ;;  %2354 = vrsqrt.f32 %v3157_v38  ;;  %v3174_v11 = vmul.f32 %v1377_v54, %v2838_v63 }
 0x2af   : > { %v1382_v53 = vmul.f32 %v3139_v59, %v1381_v4  ;;  %v2351_v47 = vpop.eup %2350  ;;  %vm1385_vm1 = vweird.f32 %v3139_v59  ;;  %v3177_v58 = vmax.f32 %v1488_v18, 1e-12  ;;  %2356 = vrcp.f32 %v3166_v50 }
 0x2b0   : > { %v1459_v34 = vmul.f32 %v1458_v3, %v3047_v45  ;;  %v1514_v48 = vmul.f32 %v3162_v44, %v3110_v51  ;;  %v1466_v0 = vmul.f32 %v2351_v47, %v3094_v37  ;;  %2358 = vrcp.f32 %v3150_v56 }
 0x2b1   : > { %v1383_v17 = vadd.f32 %v3139_v59, %v1382_v53  ;;  %vm1384_vm2 = vweird.f32 %v3091_v32  ;;  %vm1462_vm3 = vcmp.eq.f32.partialorder %v3047_v45, 0.0  ;;  %v1463_v63 = vand.u32 2147483648, %v3047_v45  ;;  %v3200_v32 = vpop.xlane.xlu0 %1439 }
 0x2b2   : > { %v2353_v28 = vpop.eup %2352  ;;  %v1673_v62 = vadd.f32 %v1672_v23, %v1671_v60  ;;  %vm3189_vm4 = vmor %vm1384_vm2, %vm1385_vm1  ;;  %vm3193_vm5 = vcmp.eq.f32.partialorder %v1388_v43, 8.507059e+37  ;;  %v1461_v7 = vsel %vm1460_vm15, %v3047_v45, %v1459_v34  ;;  %v1467_v36 = vmul.f32 %v2351_v47, %v1466_v0 }
 0x2b3   : > { %v1674_v16 = vsel %vm876_vm0, %v3174_v11, 0.0  ;;  %v1387_v60 = vsel %vm3189_vm4, %v3139_v59, %v1383_v17  ;;  %v1391_v33 = vor.u32 1.1754944e-38, %v1390_v46  ;;  %v1490_v19 = vmul.f32 %v2353_v28, %v3137_v13 }
 0x2b4   : > { %v2355_v40 = vpop.eup %2354  ;;  %2360 = vrcp.f32 %v3177_v58  ;;  %v1464_v42 = vsel %vm1462_vm3, %v1463_v63, %v1461_v7  ;;  %v1515_v18 = vmul.f32 %v3162_v44, %v1514_v48  ;;  %v1468_v45 = vmul.f32 0.5, %v1467_v36 }
 0x2b5   : > { %v2357_v57 = vpop.eup %2356  ;;  %vm1472_vm6 = vcmp.eq.f32.partialorder %v3094_v37, inf  ;;  %v1491_v49 = vmul.f32 %v2353_v28, %v1490_v19  ;;  %v1502_v54 = vmul.f32 %v2355_v40, %v3157_v38  ;;  %2362 = vrsqrt.f32 %v3200_v32 }
 0x2b6   : > { %v1675_v4 = vadd.f32 %v1674_v16, %v1673_v62  ;;  %v1392_v59 = vsel %vm3193_vm5, %v1391_v33, %v1387_v60  ;;  %v1395_v39 = vmul.f32 %v2357_v57, %v3166_v50  ;;  %vm1474_vm7 = vcmp.eq.f32.partialorder %v3094_v37, 0.0  ;;  %v3217_v23 = vpop.eup %2358 }
 0x2b7   : > { %v3219_v3 = vmax.f32 %v1464_v42, 1e-12  ;;  %v1469_v53 = vsub.f32 1.5, %v1468_v45  ;;  %v1475_v43 = vand.u32 2147483648, %v3094_v37  ;;  %v1492_v46 = vmul.f32 0.5, %v1491_v49 }
 0x2b8   : > { %v1396_v17 = vsub.f32 1.0, %v1395_v39  ;;  %v1403_v34 = vand.u32 2147483647, %v3166_v50  ;;  %v3223_v48 = vmul.f32 0.5, %v1515_v18  ;;  %v1503_v0 = vmul.f32 %v2355_v40, %v1502_v54 }
 0x2b9   : > { %v3226_v63 = vmul.f32 %v1392_v59, %v2845_v10  ;;  %v1405_v62 = vand.u32 2147483648, %v3166_v50  ;;  %v1470_v1 = vmul.f32 %v2351_v47, %v1469_v53  ;;  %v1493_v61 = vsub.f32 1.5, %v1492_v46 }
 0x2ba   : > { %v3229_v7 = vpop.eup %2360  ;;  %v1397_v36 = vmul.f32 %v2357_v57, %v1396_v17  ;;  %vm1400_vm8 = vweird.f32 %v2357_v57  ;;  %v1504_v16 = vmul.f32 0.5, %v1503_v0  ;;  %v1546_v60 = vmul.f32 %v3217_v23, %v3150_v56 }
 0x2bb   : > { %v3233_v33 = vpop.eup %2362  ;;  %vm1399_vm9 = vweird.f32 %v3166_v50  ;;  %2364 = vrcp.f32 %v3219_v3  ;;  %v1471_v10 = vmul.f32 %v1470_v1, %v3094_v37  ;;  %v1494_v19 = vmul.f32 %v2353_v28, %v1493_v61 }
 0x2bc   : > { %v1398_v42 = vadd.f32 %v2357_v57, %v1397_v36  ;;  %v1505_v47 = vsub.f32 1.5, %v1504_v16  ;;  %v1526_v18 = vmul.f32 %v3233_v33, %v3200_v32  ;;  %v1547_v45 = vsub.f32 1.0, %v1546_v60  ;;  %vm1401_vm10 = vmor %vm1399_vm9, %vm1400_vm8 }
 0x2bd   : > { %v1676_v49 = vsel %vm876_vm0, %v3226_v63, 0.0  ;;  %vm1404_vm11 = vcmp.eq.f32.partialorder %v1403_v34, 8.507059e+37  ;;  %v1406_v54 = vor.u32 1.1754944e-38, %v1405_v62  ;;  %v1473_v50 = vsel %vm1472_vm6, %v3094_v37, %v1471_v10 }
 0x2be   : > { %v1402_v59 = vsel %vm1401_vm10, %v2357_v57, %v1398_v42  ;;  %v1476_v28 = vsel %vm1474_vm7, %v1475_v43, %v1473_v50  ;;  %v1506_v39 = vmul.f32 %v2355_v40, %v1505_v47  ;;  %v1527_v53 = vmul.f32 %v3233_v33, %v1526_v18 }
 0x2bf   : > { %v1407_v46 = vsel %vm1404_vm11, %v1406_v54, %v1402_v59  ;;  %v3248_v17 = vmax.f32 %v1476_v28, 1e-12  ;;  %v1495_v0 = vmul.f32 %v1494_v19, %v3137_v13  ;;  %v1548_v1 = vmul.f32 %v3217_v23, %v1547_v45 }
 0x2c0   : > { %v3253_v34 = vmul.f32 %v1407_v46, %v2857_v24  ;;  %vm1496_vm12 = vcmp.eq.f32.partialorder %v3137_v13, inf  ;;  %v1507_v57 = vmul.f32 %v1506_v39, %v3157_v38  ;;  %vm1508_vm13 = vcmp.eq.f32.partialorder %v3157_v38, inf }
 0x2c1   : > { %v2365_v37 = vpop.eup %2364  ;;  %v1677_v40 = vadd.f32 %v1676_v49, %v1675_v4  ;;  %2366 = vrcp.f32 %v3248_v17  ;;  %vm1510_vm14 = vcmp.eq.f32.partialorder %v3157_v38, 0.0  ;;  %v1511_v43 = vand.u32 2147483648, %v3157_v38 }
 0x2c2   : > { %v1678_v62 = vsel %vm876_vm0, %v3253_v34, 0.0  ;;  %v1509_v24 = vsel %vm1508_vm13, %v3157_v38, %v1507_v57  ;;  %v1528_v61 = vmul.f32 0.5, %v1527_v53  ;;  %v1556_v36 = vand.u32 2147483648, %v3150_v56 }
 0x2c3   : > { %v1679_v16 = vadd.f32 %v1678_v62, %v1677_v40  ;;  %v1497_v60 = vsel %vm1496_vm12, %v3137_v13, %v1495_v0  ;;  %v1549_v10 = vadd.f32 %v3217_v23, %v1548_v1  ;;  %vm1551_vm15 = vweird.f32 %v3217_v23 }
 0x2c4   : > { %vm1498_vm1 = vcmp.eq.f32.partialorder %v3137_v13, 0.0  ;;  %v1499_v4 = vand.u32 2147483648, %v3137_v13  ;;  %v1512_v19 = vsel %vm1510_vm14, %v1511_v43, %v1509_v24  ;;  %v1561_v42 = vmul.f32 %v2365_v37, %v3219_v3 }
 0x2c5   : > { %v1680_v47 = vrot.slane %v1679_v16, 4  ;;  %v1517_v38 = vsub.f32 1.5, %v3223_v48  ;;  %vm1550_vm2 = vweird.f32 %v3150_v56  ;;  %v1554_v18 = vand.u32 2147483647, %v3150_v56 }
 0x2c6   : > { %v1500_v45 = vsel %vm1498_vm1, %v1499_v4, %v1497_v60  ;;  %v1529_v49 = vsub.f32 1.5, %v1528_v61  ;;  %vm3274_vm3 = vmor %vm1550_vm2, %vm1551_vm15  ;;  %v1557_v50 = vor.u32 1.1754944e-38, %v1556_v36  ;;  %v1562_v59 = vsub.f32 1.0, %v1561_v42 }
 0x2c7   : > { %v3278_v28 = vpop.eup %2366  ;;  %v1681_v13 = vadd.f32 %v1680_v47, %v1679_v16  ;;  %v3280_v39 = vmax.f32 %v1512_v19, 1e-12  ;;  %v1553_v48 = vsel %vm3274_vm3, %v3217_v23, %v1549_v10  ;;  %v1571_v53 = vand.u32 2147483648, %v3219_v3 }
 0x2c8   : > { %v1563_v56 = vmul.f32 %v2365_v37, %v1562_v59  ;;  %vm1566_vm4 = vweird.f32 %v2365_v37  ;;  %v1569_v46 = vand.u32 2147483647, %v3219_v3  ;;  %v1576_v0 = vmul.f32 %v3278_v28, %v3248_v17 }
 0x2c9   : > { %v1682_v1 = vrot.slane %v1681_v13, 2  ;;  %v1518_v57 = vmul.f32 %v3162_v44, %v1517_v38  ;;  %v3290_v40 = vmax.f32 %v1500_v45, 1e-12  ;;  %vm1555_vm5 = vcmp.eq.f32.partialorder %v1554_v18, 8.507059e+37 }
 0x2ca   : > { %v1530_v43 = vmul.f32 %v3233_v33, %v1529_v49  ;;  %v1558_v62 = vsel %vm1555_vm5, %v1557_v50, %v1553_v48  ;;  %v1564_v24 = vadd.f32 %v2365_v37, %v1563_v56  ;;  %vm1565_vm6 = vweird.f32 %v3219_v3 }
 0x2cb   : > { %v1683_v23 = vadd.f32 %v1682_v1, %v1681_v13  ;;  %vm1567_vm7 = vmor %vm1565_vm6, %vm1566_vm4  ;;  %v1572_v61 = vor.u32 1.1754944e-38, %v1571_v53  ;;  %v1577_v36 = vsub.f32 1.0, %v1576_v0  ;;  %v1591_v16 = vmul.f32 %v3229_v7, %v3177_v58 }
 0x2cc   : > { %2368 = vrcp.f32 %v3280_v39  ;;  %v1568_v60 = vsel %vm1567_vm7, %v2365_v37, %v1564_v24  ;;  %vm1570_vm8 = vcmp.eq.f32.partialorder %v1569_v46, 8.507059e+37  ;;  %v1519_v10 = vmul.f32 %v1518_v57, %v3110_v51 }
 0x2cd   : > { %v1684_v44 = vrot.slane %v1683_v23, 1  ;;  %v1573_v4 = vsel %vm1570_vm8, %v1572_v61, %v1568_v60  ;;  %v1592_v33 = vsub.f32 1.0, %v1591_v16  ;;  %2370 = vrcp.f32 %v3290_v40 }
 0x2ce   : > { %v1531_v3 = vmul.f32 %v1530_v43, %v3200_v32  ;;  %v1559_v19 = vmul.f32 %v1558_v62, %v2842_v2  ;;  %v1574_v42 = vmul.f32 %v1573_v4, %v2855_v22  ;;  %v1578_v38 = vmul.f32 %v3278_v28, %v1577_v36 }
 0x2cf   : > { %v3302_v47 = vadd.f32 %v1684_v44, %v1683_v23  ;;  %v1593_v37 = vmul.f32 %v3229_v7, %v1592_v33  ;;  %vm1520_vm9 = vcmp.eq.f32.partialorder %v3110_v51, inf  ;;  %v1523_v18 = vand.u32 2147483648, %v3110_v51 }
 0x2d0   : > { %v1521_v45 = vsel %vm1520_vm9, %v3110_v51, %v1519_v10  ;;  %vm1532_vm10 = vcmp.eq.f32.partialorder %v3200_v32, inf  ;;  %vm1534_vm11 = vcmp.eq.f32.partialorder %v3200_v32, 0.0  ;;  %v1535_v50 = vand.u32 2147483648, %v3200_v32 }
 0x2d1   : > { %v1686_v49 = vmul.f32 %v3302_v47, %v1559_v19  ;;  %v1687_v2 = vmul.f32 %v3302_v47, %v1574_v42  ;;  %v1533_v22 = vsel %vm1532_vm10, %v3200_v32, %v1531_v3  ;;  %vm1581_vm12 = vweird.f32 %v3278_v28 }
 0x2d2   : > { %v3312_v54 = vpop.eup %2368  ;;  %v1579_v13 = vadd.f32 %v3278_v28, %v1578_v38  ;;  %v1594_v48 = vadd.f32 %v3229_v7, %v1593_v37  ;;  %vm1596_vm13 = vweird.f32 %v3229_v7  ;;  %vm1580_vm14 = vweird.f32 %v3248_v17 }
 0x2d3   : > { %v1694_v59 = vpack.c.bf16 %v1687_v2, %v1686_v49  ;;  %v3321_v53 = vpop.eup %2370  ;;  %v1584_v56 = vand.u32 2147483647, %v3248_v17  ;;  %v1586_v46 = vand.u32 2147483648, %v3248_v17  ;;  %v1601_v0 = vand.u32 2147483648, %v3177_v58  ;;  %vm3328_vm15 = vmor %vm1580_vm14, %vm1581_vm12 }
 0x2d4   : > { %v1536_v32 = vsel %vm1534_vm11, %v1535_v50, %v1533_v22  ;;  %vm1595_vm1 = vweird.f32 %v3177_v58  ;;  %v1599_v57 = vand.u32 2147483647, %v3177_v58  ;;  %v1621_v43 = vmul.f32 %v3312_v54, %v3280_v39 }
 0x2d5   : > { %2212 = vmatmul.msk.bf16.vlgmr.msrb.gmra.mxu0 %vm876_vm0, %v1694_v59  ;;  %vm1522_vm2 = vcmp.eq.f32.partialorder %v3110_v51, 0.0  ;;  %vm1597_vm3 = vmor %vm1595_vm1, %vm1596_vm13  ;;  %v1583_v62 = vsel %vm3328_vm15, %v3278_v28, %v1579_v13  ;;  %v1606_v23 = vmul.f32 %v3321_v53, %v3290_v40  ;;  %v3343_v61 = vmax.f32 %v1536_v32, 1e-12  ;;  %v2260_v59 = vld [vmem:[%s3513_s13] sm:$0xff] }
 0x2d6   : > { %v1524_v17 = vsel %vm1522_vm2, %v1523_v18, %v1521_v45  ;;  %v1598_v24 = vsel %vm1597_vm3, %v3229_v7, %v1594_v48  ;;  %v1587_v36 = vor.u32 1.1754944e-38, %v1586_v46  ;;  %v1602_v58 = vor.u32 1.1754944e-38, %v1601_v0  ;;  %1794 = vmatpush.bf16.msrb.mxu1 %v2260_v59 }
 0x2d7   : > { %vm1585_vm4 = vcmp.eq.f32.partialorder %v1584_v56, 8.507059e+37  ;;  %vm1600_vm5 = vcmp.eq.f32.partialorder %v1599_v57, 8.507059e+37  ;;  %v1622_v16 = vsub.f32 1.0, %v1621_v43  ;;  %v3345_v60 = vmax.f32 %v1524_v17, 1e-12 }
 0x2d8   : > { %v1588_v51 = vsel %vm1585_vm4, %v1587_v36, %v1583_v62  ;;  %v1603_v44 = vsel %vm1600_vm5, %v1602_v58, %v1598_v24  ;;  %v1607_v10 = vsub.f32 1.0, %v1606_v23  ;;  %2372 = vrcp.f32 %v3343_v61 }
 0x2d9   : > { %v1589_v28 = vmul.f32 %v1588_v51, %v2865_v29  ;;  %v1604_v7 = vmul.f32 %v1603_v44, %v2851_v15  ;;  %v1623_v4 = vmul.f32 %v3312_v54, %v1622_v16  ;;  %2374 = vrcp.f32 %v3345_v60 }
 0x2da   : > { %v1608_v19 = vmul.f32 %v3321_v53, %v1607_v10  ;;  %vm1626_vm6 = vweird.f32 %v3312_v54  ;;  %vm1611_vm7 = vweird.f32 %v3321_v53  ;;  %v1631_v29 = vand.u32 2147483648, %v3280_v39 }
 0x2db   : > { %v1688_v33 = vmul.f32 %v3302_v47, %v1589_v28  ;;  %v1689_v3 = vmul.f32 %v3302_v47, %v1604_v7  ;;  %v1624_v42 = vadd.f32 %v3312_v54, %v1623_v4  ;;  %vm1625_vm8 = vweird.f32 %v3280_v39 }
 0x2dc   : > { %v1609_v37 = vadd.f32 %v3321_v53, %v1608_v19  ;;  %v1629_v18 = vand.u32 2147483647, %v3280_v39  ;;  %v1616_v49 = vand.u32 2147483648, %v3290_v40  ;;  %vm1627_vm9 = vmor %vm1625_vm8, %vm1626_vm6  ;;  %vm1610_vm10 = vweird.f32 %v3290_v40 }
 0x2dd   : > { %v1695_v15 = vpack.c.bf16 %v1689_v3, %v1688_v33  ;;  %v1614_v2 = vand.u32 2147483647, %v3290_v40  ;;  %v1628_v22 = vsel %vm1627_vm9, %v3312_v54, %v1624_v42  ;;  %vm1612_vm11 = vmor %vm1610_vm10, %vm1611_vm7  ;;  %v1632_v39 = vor.u32 1.1754944e-38, %v1631_v29  ;;  %v2292_v42 = vld [vmem:[%s3512_s12] ss:$0 sm:$0xff] }
 0x2de   : > { %v2373_v38 = vpop.eup %2372  ;;  %v1613_v13 = vsel %vm1612_vm11, %v3321_v53, %v1609_v37  ;;  %vm1630_vm12 = vcmp.eq.f32.partialorder %v1629_v18, 8.507059e+37  ;;  %v1617_v56 = vor.u32 1.1754944e-38, %v1616_v49  ;;  %v1661_v24 = vand.u32 2147483648, %v3343_v61 }
 0x2df   : > { %v2375_v45 = vpop.eup %2374  ;;  %v1651_v50 = vmul.f32 %v2373_v38, %v3343_v61  ;;  %v1633_v40 = vsel %vm1630_vm12, %v1632_v39, %v1628_v22  ;;  %vm1615_vm13 = vcmp.eq.f32.partialorder %v1614_v2, 8.507059e+37  ;;  %vm1656_vm14 = vweird.f32 %v2373_v38 }
 0x2e0   : > { %v1636_v48 = vmul.f32 %v2375_v45, %v3345_v60  ;;  %v1618_v46 = vsel %vm1615_vm13, %v1617_v56, %v1613_v13  ;;  %v1634_v0 = vmul.f32 %v1633_v40, %v2880_v6  ;;  %vm1641_vm15 = vweird.f32 %v2375_v45 }
 0x2e1   : > { %v1652_v54 = vsub.f32 1.0, %v1651_v50  ;;  %v1619_v1 = vmul.f32 %v1618_v46, %v2871_v30  ;;  %vm1655_vm1 = vweird.f32 %v3343_v61  ;;  %v1659_v6 = vand.u32 2147483647, %v3343_v61 }
 0x2e2   : > { %v1637_v32 = vsub.f32 1.0, %v1636_v48  ;;  %v1691_v17 = vmul.f32 %v3302_v47, %v1634_v0  ;;  %v1646_v58 = vand.u32 2147483648, %v3345_v60  ;;  %vm1657_vm2 = vmor %vm1655_vm1, %vm1656_vm14  ;;  %vm1640_vm3 = vweird.f32 %v3345_v60 }
 0x2e3   : > { %v1653_v57 = vmul.f32 %v2373_v38, %v1652_v54  ;;  %v1690_v43 = vmul.f32 %v3302_v47, %v1619_v1  ;;  %v1644_v30 = vand.u32 2147483647, %v3345_v60  ;;  %vm1642_vm4 = vmor %vm1640_vm3, %vm1641_vm15  ;;  %v1662_v51 = vor.u32 1.1754944e-38, %v1661_v24 }
 0x2e4   : > { %v1638_v53 = vmul.f32 %v2375_v45, %v1637_v32  ;;  %vm1660_vm5 = vcmp.eq.f32.partialorder %v1659_v6, 8.507059e+37  ;;  %v1647_v10 = vor.u32 1.1754944e-38, %v1646_v58  ;;  %vm1993_vm7 = vcmask 523264  }
 0x2e5   : > { %2213 = vmatmul.msk.bf16.gmra.mxu0 %vm876_vm0, %v1695_v15  ;;  %v1654_v62 = vadd.f32 %v2373_v38, %v1653_v57  ;;  %v1696_v23 = vpack.c.bf16 %v1691_v17, %v1690_v43  ;;  %vm1645_vm6 = vcmp.eq.f32.partialorder %v1644_v30, 8.507059e+37 }
 0x2e6   : > { %v1639_v36 = vadd.f32 %v2375_v45, %v1638_v53 }
 0x2e7   : > { %v1658_v16 = vsel %vm1657_vm2, %v2373_v38, %v1654_v62 }
 0x2e8   : > { %v1643_v44 = vsel %vm1642_vm4, %v2375_v45, %v1639_v36  ;;  %v1663_v28 = vsel %vm1660_vm5, %v1662_v51, %v1658_v16  ;;  %v2264_v16 = vld [vmem:[%s3517_s17 + $0x10] sm:$0xff] }
 0x2e9   : > { %v1648_v7 = vsel %vm1645_vm6, %v1647_v10, %v1643_v44  ;;  %v1664_v61 = vmul.f32 %v1663_v28, %v2884_v52 }
 0x2ea   : > { %v1649_v4 = vmul.f32 %v1648_v7, %v2867_v31 }
 0x2eb   : > { %v1693_v3 = vmul.f32 %v3302_v47, %v1664_v61 }
 0x2ec   : > { %v1692_v33 = vmul.f32 %v3302_v47, %v1649_v4 }
 0x2ee   : > { %v1697_v19 = vpack.c.bf16 %v1693_v3, %v1692_v33 }
 0x2f5   : > { %2214 = vmatmul.msk.bf16.gmra.mxu0 %vm876_vm0, %v1696_v23 }
 0x305   : > { %2215 = vmatmul.msk.bf16.gmra.mxu0 %vm876_vm0, %v1697_v19 }
 0x352   : > { %v1731_v60 = vpop.f32.mrf.mxu0 }
 0x353   : > { %v1732_v38 = vadd.f32 %v2292_v42, %v1731_v60  ;;  %v3460_v60 = vld [vmem:[%s3516_s16] ss:$0 sm:$0xff] }
 0x355   : > { %v1751_v37 = vadd.f32 %v1732_v38, %v2970_v12  ;;  %v2261_v12 = vld [vmem:[%s3515_s15] sm:$0xff] }
 0x356   : > { %1859 = vmatpush.bf16.msrb.mxu2 %v2261_v12 }
 0x35a   : > { %v1733_v29 = vpop.f32.mrf.mxu0 }
 0x35b   : > { %v1734_v15 = vadd.f32 %v2292_v42, %v1733_v29 }
 0x35d   : > { %v1752_v52 = vadd.f32 %v1734_v15, %v2996_v14 }
 0x35f   : > { %v1759_v31 = vpack.c.bf16 %v1752_v52, %v1751_v37 }
 0x361   : > { %2220 = vmatmul.msk.bf16.vlgmr.msrb.gmra.mxu1 %vm876_vm0, %v1759_v31 }
 0x362   : > { %v1736_v18 = vpop.f32.mrf.mxu0 }
 0x363   : > { %v1737_v47 = vadd.f32 %v2292_v42, %v1736_v18 }
 0x365   : > { %v1753_v2 = vadd.f32 %v1737_v47, %v3053_v55 }
 0x36a   : > { %v1738_v45 = vpop.f32.mrf.mxu0 }
 0x36b   : > { %v1739_v49 = vadd.f32 %v2292_v42, %v1738_v45 }
 0x36d   : > { %v1754_v22 = vadd.f32 %v1739_v49, %v3074_v9 }
 0x36f   : > { %v1760_v50 = vpack.c.bf16 %v1754_v22, %v1753_v2 }
 0x371   : > { %2221 = vmatmul.msk.bf16.gmra.mxu1 %vm876_vm0, %v1760_v50 }
 0x372   : > { %v1741_v59 = vpop.f32.mrf.mxu0 }
 0x373   : > { %v1742_v14 = vadd.f32 %v2292_v42, %v1741_v59 }
 0x375   : > { %v1755_v48 = vadd.f32 %v1742_v14, %v3120_v25  ;;  %v2293_v25 = vld [vmem:[%s3514_s14] ss:$0 sm:$0xff] }
 0x37a   : > { %v1743_v39 = vpop.f32.mrf.mxu0 }
 0x37b   : > { %v1744_v13 = vadd.f32 %v2292_v42, %v1743_v39 }
 0x37d   : > { %v1756_v56 = vadd.f32 %v1744_v13, %v3174_v11 }
 0x37f   : > { %v1761_v40 = vpack.c.bf16 %v1756_v56, %v1755_v48 }
 0x381   : > { %2222 = vmatmul.msk.bf16.gmra.mxu1 %vm876_vm0, %v1761_v40 }
 0x382   : > { %v1746_v55 = vpop.f32.mrf.mxu0 }
 0x383   : > { %v1747_v9 = vadd.f32 %v2292_v42, %v1746_v55 }
 0x385   : > { %v1757_v0 = vadd.f32 %v1747_v9, %v3226_v63 }
 0x38a   : > { %v1748_v54 = vpop.f32.mrf.mxu0 }
 0x38b   : > { %v1749_v46 = vadd.f32 %v2292_v42, %v1748_v54 }
 0x38d   : > { %v1758_v32 = vadd.f32 %v1749_v46, %v3253_v34 }
 0x38f   : > { %v1762_v1 = vpack.c.bf16 %v1758_v32, %v1757_v0 }
 0x391   : > { %2223 = vmatmul.msk.bf16.gmra.mxu1 %vm876_vm0, %v1762_v1 }
 0x3de   : > { %v1796_v57 = vpop.f32.mrf.mxu1 }
 0x3df   : > { %v1797_v11 = vadd.f32 %v2293_v25, %v1796_v57 }
 0x3e1   : > { %v3413_v53 = vadd.f32 %v1797_v11, %v2768_v20 }
 0x3e6   : > { %v1798_v43 = vpop.f32.mrf.mxu1 }
 0x3e7   : > { %v1799_v17 = vadd.f32 %v2293_v25, %v1798_v43 }
 0x3e9   : > { %v3416_v62 = vadd.f32 %v1799_v17, %v2771_v21  ;;  %v2265_v21 = vld [vmem:[%s3517_s17 + $0x18] sm:$0xff] }
 0x3ea   : > { %2010 = vmatpush.bf16.msrb.mxu3 %v2265_v21 }
 0x3eb   : > { %v1824_v63 = vpack.c.bf16 %v3416_v62, %v3413_v53 }
 0x3ed   : > { %2228 = vmatmul.msk.bf16.vlgmr.msrb.gmra.mxu2 %vm876_vm0, %v1824_v63 }
 0x3ee   : > { %v1801_v34 = vpop.f32.mrf.mxu1  ;;  %2011 = vmatpush.bf16.msrb.mxu3 %v2264_v16 }
 0x3ef   : > { %v1802_v24 = vadd.f32 %v2293_v25, %v1801_v34 }
 0x3f1   : > { %v3422_v6 = vadd.f32 %v1802_v24, %v2778_v26 }
 0x3f6   : > { %v1803_v23 = vpop.f32.mrf.mxu1 }
 0x3f7   : > { %v1804_v36 = vadd.f32 %v2293_v25, %v1803_v23 }
 0x3f9   : > { %v3425_v58 = vadd.f32 %v1804_v36, %v2781_v8 }
 0x3fb   : > { %v1825_v20 = vpack.c.bf16 %v3425_v58, %v3422_v6 }
 0x3fd   : > { %2229 = vmatmul.msk.bf16.gmra.mxu2 %vm876_vm0, %v1825_v20 }
 0x3fe   : > { %v1806_v30 = vpop.f32.mrf.mxu1 }
 0x3ff   : > { %v1807_v26 = vadd.f32 %v2293_v25, %v1806_v30 }
 0x401   : > { %v3437_v44 = vadd.f32 %v1807_v26, %v2788_v35 }
 0x406   : > { %v1808_v51 = vpop.f32.mrf.mxu1 }
 0x407   : > { %v1809_v8 = vadd.f32 %v2293_v25, %v1808_v51 }
 0x409   : > { %v3440_v10 = vadd.f32 %v1809_v8, %v2791_v41  ;;  %v2263_v41 = vld [vmem:[%s3517_s17 + $0x8] sm:$0xff] }
 0x40a   : > { %2012 = vmatpush.bf16.msrb.mxu3 %v2263_v41 }
 0x40b   : > { %v1826_v28 = vpack.c.bf16 %v3440_v10, %v3437_v44 }
 0x40d   : > { %2230 = vmatmul.msk.bf16.gmra.mxu2 %vm876_vm0, %v1826_v28 }
 0x40e   : > { %v1811_v7 = vpop.f32.mrf.mxu1 }
 0x40f   : > { %v1812_v61 = vadd.f32 %v2293_v25, %v1811_v7 }
 0x411   : > { %v3446_v3 = vadd.f32 %v1812_v61, %v2798_v27 }
 0x416   : > { %v1813_v4 = vpop.f32.mrf.mxu1 }
 0x417   : > { %v1814_v33 = vadd.f32 %v2293_v25, %v1813_v4 }
 0x419   : > { %v3449_v19 = vadd.f32 %v1814_v33, %v2801_v5  ;;  %v2262_v5 = vld [vmem:[%s3517_s17] sm:$0xff] }
 0x41a   : > { %2013 = vmatpush.bf16.msrb.mxu3 %v2262_v5 }
 0x41b   : > { %v1827_v35 = vpack.c.bf16 %v3449_v19, %v3446_v3 }
 0x41d   : > { %2231 = vmatmul.msk.bf16.gmra.mxu2 %vm876_vm0, %v1827_v35 }
 0x470   : > { %v1861_v27 = vpop.f32.mrf.mxu2 }
 0x471   : > { %v1862_v42 = vadd.f32 %v3460_v60, %v1861_v27 }
 0x473   : > { %v1881_v38 = vmul.f32 %v1862_v42, %v1862_v42 }
 0x475   : > { %v1889_v29 = vmul.f32 %v1881_v38, %v1862_v42 }
 0x477   : > { %v1897_v15 = vmul.f32 0.044715, %v1889_v29 }
 0x478   : > { %v1863_v37 = vpop.f32.mrf.mxu2 }
 0x479   : > { %v1905_v52 = vadd.f32 %v1897_v15, %v1862_v42  ;;  %v1864_v31 = vadd.f32 %v3460_v60, %v1863_v37 }
 0x47b   : > { %v1913_v18 = vmul.f32 0.7978846, %v1905_v52  ;;  %v1882_v47 = vmul.f32 %v1864_v31, %v1864_v31 }
 0x47d   : > { %v1890_v45 = vmul.f32 %v1882_v47, %v1864_v31  ;;  %2376 = vtanh.f32 %v1913_v18 }
 0x47f   : > { %v1898_v49 = vmul.f32 0.044715, %v1890_v45 }
 0x480   : > { %v1866_v2 = vpop.f32.mrf.mxu2 }
 0x481   : > { %v1906_v22 = vadd.f32 %v1898_v49, %v1864_v31  ;;  %v1867_v50 = vadd.f32 %v3460_v60, %v1866_v2 }
 0x483   : > { %v1914_v12 = vmul.f32 0.7978846, %v1906_v22  ;;  %v1883_v59 = vmul.f32 %v1867_v50, %v1867_v50  ;;  %v2377_v14 = vpop.eup %2376 }
 0x484   : > { %v1929_v48 = vadd.f32 1.0, %v2377_v14 }
 0x485   : > { %2378 = vtanh.f32 %v1914_v12  ;;  %v1891_v39 = vmul.f32 %v1883_v59, %v1867_v50 }
 0x486   : > { %v1937_v0 = vmul.f32 0.5, %v1929_v48 }
 0x487   : > { %v1899_v13 = vmul.f32 0.044715, %v1891_v39 }
 0x488   : > { %v1868_v56 = vpop.f32.mrf.mxu2  ;;  %v1945_v11 = vmul.f32 %v1937_v0, %v1862_v42 }
 0x489   : > { %v1907_v40 = vadd.f32 %v1899_v13, %v1867_v50  ;;  %v1869_v55 = vadd.f32 %v3460_v60, %v1868_v56 }
 0x48b   : > { %v2379_v9 = vpop.eup %2378  ;;  %v1915_v54 = vmul.f32 0.7978846, %v1907_v40  ;;  %v1884_v46 = vmul.f32 %v1869_v55, %v1869_v55 }
 0x48c   : > { %v1930_v32 = vadd.f32 1.0, %v2379_v9 }
 0x48d   : > { %v1892_v1 = vmul.f32 %v1884_v46, %v1869_v55  ;;  %2380 = vtanh.f32 %v1915_v54 }
 0x48e   : > { %v1938_v57 = vmul.f32 0.5, %v1930_v32 }
 0x48f   : > { %v1900_v25 = vmul.f32 0.044715, %v1892_v1 }
 0x490   : > { %v1946_v43 = vmul.f32 %v1938_v57, %v1864_v31  ;;  %v1871_v17 = vpop.f32.mrf.mxu2 }
 0x491   : > { %v1908_v63 = vadd.f32 %v1900_v25, %v1869_v55  ;;  %v1872_v34 = vadd.f32 %v3460_v60, %v1871_v17 }
 0x492   : > { %v1953_v24 = vpack.c.bf16 %v1946_v43, %v1945_v11 }
 0x493   : > { %v1916_v23 = vmul.f32 0.7978846, %v1908_v63  ;;  %v1885_v36 = vmul.f32 %v1872_v34, %v1872_v34  ;;  %v2381_v20 = vpop.eup %2380 }
 0x494   : > { %2248 = vmatmul.msk.bf16.vlgmr.msrb.gmra.mxu3 %vm1993_vm7, %v1953_v24  ;;  %v1931_v26 = vadd.f32 1.0, %v2381_v20 }
 0x495   : > { %2382 = vtanh.f32 %v1916_v23  ;;  %v1893_v21 = vmul.f32 %v1885_v36, %v1872_v34 }
 0x496   : > { %v1939_v33 = vmul.f32 0.5, %v1931_v26 }
 0x497   : > { %v1901_v30 = vmul.f32 0.044715, %v1893_v21 }
 0x498   : > { %v1873_v16 = vpop.f32.mrf.mxu2  ;;  %v1947_v42 = vmul.f32 %v1939_v33, %v1867_v50 }
 0x499   : > { %v1909_v51 = vadd.f32 %v1901_v30, %v1872_v34  ;;  %v1874_v8 = vadd.f32 %v3460_v60, %v1873_v16 }
 0x49b   : > { %v2383_v28 = vpop.eup %2382  ;;  %v1917_v7 = vmul.f32 0.7978846, %v1909_v51  ;;  %v1886_v61 = vmul.f32 %v1874_v8, %v1874_v8 }
 0x49c   : > { %v1932_v4 = vadd.f32 1.0, %v2383_v28 }
 0x49d   : > { %v1894_v35 = vmul.f32 %v1886_v61, %v1874_v8  ;;  %2384 = vtanh.f32 %v1917_v7 }
 0x49e   : > { %v1940_v41 = vmul.f32 0.5, %v1932_v4 }
 0x49f   : > { %v1902_v27 = vmul.f32 0.044715, %v1894_v35 }
 0x4a0   : > { %v1876_v5 = vpop.f32.mrf.mxu2  ;;  %v1948_v38 = vmul.f32 %v1940_v41, %v1869_v55 }
 0x4a1   : > { %v1910_v29 = vadd.f32 %v1902_v27, %v1874_v8  ;;  %v1877_v15 = vadd.f32 %v3460_v60, %v1876_v5 }
 0x4a2   : > { %v1954_v37 = vpack.c.bf16 %v1948_v38, %v1947_v42 }
 0x4a3   : > { %v1918_v52 = vmul.f32 0.7978846, %v1910_v29  ;;  %v1887_v31 = vmul.f32 %v1877_v15, %v1877_v15  ;;  %v2385_v18 = vpop.eup %2384 }
 0x4a4   : > { %2249 = vmatmul.msk.bf16.gmra.mxu3 %vm1993_vm7, %v1954_v37  ;;  %v1933_v2 = vadd.f32 1.0, %v2385_v18 }
 0x4a5   : > { %2386 = vtanh.f32 %v1918_v52  ;;  %v1895_v47 = vmul.f32 %v1887_v31, %v1877_v15 }
 0x4a6   : > { %v1941_v13 = vmul.f32 0.5, %v1933_v2 }
 0x4a7   : > { %v1903_v45 = vmul.f32 0.044715, %v1895_v47 }
 0x4a8   : > { %v1878_v49 = vpop.f32.mrf.mxu2  ;;  %v1949_v55 = vmul.f32 %v1941_v13, %v1872_v34  ;;  %v2295_v34 = vld [vmem:[#allocation2] ss:$0 sm:$0xff] }
 0x4a9   : > { %v1911_v22 = vadd.f32 %v1903_v45, %v1877_v15  ;;  %v1879_v12 = vadd.f32 %v3460_v60, %v1878_v49 }
 0x4ab   : > { %v2387_v59 = vpop.eup %2386  ;;  %v1919_v50 = vmul.f32 0.7978846, %v1911_v22  ;;  %v1888_v14 = vmul.f32 %v1879_v12, %v1879_v12 }
 0x4ac   : > { %v1934_v39 = vadd.f32 1.0, %v2387_v59 }
 0x4ad   : > { %v1896_v48 = vmul.f32 %v1888_v14, %v1879_v12  ;;  %2388 = vtanh.f32 %v1919_v50 }
 0x4ae   : > { %v1942_v56 = vmul.f32 0.5, %v1934_v39 }
 0x4af   : > { %v1904_v40 = vmul.f32 0.044715, %v1896_v48 }
 0x4b0   : > { %v1950_v9 = vmul.f32 %v1942_v56, %v1874_v8 }
 0x4b1   : > { %v1912_v54 = vadd.f32 %v1904_v40, %v1879_v12 }
 0x4b2   : > { %v1955_v46 = vpack.c.bf16 %v1950_v9, %v1949_v55 }
 0x4b3   : > { %v1920_v0 = vmul.f32 0.7978846, %v1912_v54  ;;  %v2389_v32 = vpop.eup %2388 }
 0x4b4   : > { %2250 = vmatmul.msk.bf16.gmra.mxu3 %vm1993_vm7, %v1955_v46  ;;  %v1935_v60 = vadd.f32 1.0, %v2389_v32 }
 0x4b5   : > { %2390 = vtanh.f32 %v1920_v0 }
 0x4b6   : > { %v1943_v25 = vmul.f32 0.5, %v1935_v60 }
 0x4b8   : > { %v1951_v43 = vmul.f32 %v1943_v25, %v1877_v15 }
 0x4bb   : > { %v2391_v1 = vpop.eup %2390 }
 0x4bc   : > { %v1936_v57 = vadd.f32 1.0, %v2391_v1 }
 0x4be   : > { %v1944_v11 = vmul.f32 0.5, %v1936_v57 }
 0x4c0   : > { %v1952_v17 = vmul.f32 %v1944_v11, %v1879_v12 }
 0x4c2   : > { %v1956_v63 = vpack.c.bf16 %v1952_v17, %v1951_v43 }
 0x4c4   : > { %2251 = vmatmul.msk.bf16.gmra.mxu3 %vm1993_vm7, %v1956_v63 }
 0x517   : > { %v2015_v24 = vpop.f32.mrf.mxu3 }
 0x518   : > { %v2016_v23 = vadd.f32 %v2295_v34, %v2015_v24 }
 0x51a   : > { %v2035_v36 = vadd.f32 %v2016_v23, %v3413_v53 }
 0x51c   : > { %2043 = vst.msk [vmem:[%s617_s27] sm:$0xff] %vm876_vm0, %v2035_v36 }
 0x51f   : > { %v2017_v20 = vpop.f32.mrf.mxu3 }
 0x520   : > { %v2018_v21 = vadd.f32 %v2295_v34, %v2017_v20 }
 0x522   : > { %v2036_v30 = vadd.f32 %v2018_v21, %v3416_v62 }
 0x524   : > { %2044 = vst.msk [vmem:[%s617_s27 + $0x8] sm:$0xff] %vm876_vm0, %v2036_v30 }
 0x527   : > { %v2020_v16 = vpop.f32.mrf.mxu3 }
 0x528   : > { %v2021_v26 = vadd.f32 %v2295_v34, %v2020_v16 }
 0x52a   : > { %v2037_v51 = vadd.f32 %v2021_v26, %v3422_v6 }
 0x52c   : > { %2045 = vst.msk [vmem:[%s617_s27 + $0x10] sm:$0xff] %vm876_vm0, %v2037_v51 }
 0x52f   : > { %v2022_v8 = vpop.f32.mrf.mxu3 }
 0x530   : > { %v2023_v28 = vadd.f32 %v2295_v34, %v2022_v8 }
 0x532   : > { %v2038_v7 = vadd.f32 %v2023_v28, %v3425_v58 }
 0x534   : > { %2046 = vst.msk [vmem:[%s617_s27 + $0x18] sm:$0xff] %vm876_vm0, %v2038_v7 }
 0x537   : > { %v2025_v53 = vpop.f32.mrf.mxu3 }
 0x538   : > { %v2026_v61 = vadd.f32 %v2295_v34, %v2025_v53 }
 0x53a   : > { %v2039_v4 = vadd.f32 %v2026_v61, %v3437_v44 }
 0x53c   : > { %2047 = vst.msk [vmem:[%s617_s27 + $0x20] sm:$0xff] %vm876_vm0, %v2039_v4 }
 0x53f   : > { %v2027_v62 = vpop.f32.mrf.mxu3 }
 0x540   : > { %v2028_v33 = vadd.f32 %v2295_v34, %v2027_v62 }
 0x542   : > { %v2040_v35 = vadd.f32 %v2028_v33, %v3440_v10 }
 0x544   : > { %2048 = vst.msk [vmem:[%s617_s27 + $0x28] sm:$0xff] %vm876_vm0, %v2040_v35 }
 0x547   : > { %v2030_v6 = vpop.f32.mrf.mxu3 }
 0x548   : > { %v2031_v41 = vadd.f32 %v2295_v34, %v2030_v6 }
 0x54a   : > { %v2041_v27 = vadd.f32 %v2031_v41, %v3446_v3 }
 0x54c   : > { %2049 = vst.msk [vmem:[%s617_s27 + $0x30] sm:$0xff] %vm876_vm0, %v2041_v27 }
 0x54f   : > { %v2032_v58 = vpop.f32.mrf.mxu3 }
 0x550   : > { %v2033_v5 = vadd.f32 %v2295_v34, %v2032_v58 }
 0x552   : > { %v2042_v42 = vadd.f32 %v2033_v5, %v3449_v19 }
 0x554   : > { %2050 = vst.msk [vmem:[%s617_s27 + $0x38] sm:$0xff] %vm876_vm0, %v2042_v42 }
 0x555 PF: > { %s30_s0 = sadd.s32 1, %s2432_s0  }
 0x556   : > { %p27_p7 = scmp.ge.s32.totalorder %s30_s0, 4  }
 0x558   :  { %29 = sbr.rel (!%p27_p7) target bundleno = 6 (0x6), region = 133 }
 0x55d   :  { %2072 = vsyncpa [#allocation3], 1 }
 0x55e   :  { %2074 = vsyncpa [#allocation3 + $0x1], 1 }

// kernel: swiftformer_classifier_forward.15
= control target key start
LH: loop header
LB: loop body
LE: loop exit
PB: predicated region body
PF: predicated region fallthrough
CT: control target
= control target key end

     0   :  { %12 = vsyncpa [#allocation3], 0  ;;  %s1131_s0 = inlined_call_operand.vmem [shape: f32[2,6,6,32], index: 0, kind: input, shape index: {}]   ;;  %s1132_s1 = inlined_call_operand.vmem [shape: f32[9,32], index: 1, kind: input, shape index: {}]   ;;  %s1133_s2 = inlined_call_operand.hbm [shape: f32[1,32], index: 2, kind: input, shape index: {}]   ;;  %s1134_s3 = inlined_call_operand.vmem [shape: bf16[32,128], index: 3, kind: input, shape index: {}]   ;;  %s1135_s4 = inlined_call_operand.hbm [shape: f32[1,128], index: 4, kind: input, shape index: {}]   ;;  %s1136_s5 = inlined_call_operand.vmem [shape: bf16[128,32], index: 5, kind: input, shape index: {}]   ;;  %s1137_s6 = inlined_call_operand.hbm [shape: f32[1,32], index: 6, kind: input, shape index: {}]   ;;  %s1138_s7 = inlined_call_operand.vmem [shape: f32[2,4,4,32], index: 7, kind: output, shape index: {}]  }
   0x1   :  { %13 = vsyncpa [#allocation5], 0  ;;  %s998_s24 = smov 0  }
   0x2 LB: > { %s232_s27 = sshll.u32 %s1135_s4, 4  ;;  %s709_s28 = sadd.s32 4294967295, %s953_s24   ;;  %s953_s24 = sphi %s998_s24, %s19_s24   ;;  %s233_s27 = int_to_ptr.hbm [resolvable:$true] %s232_s27 }
   0x3   : > { %p711_p0 = scmp.ge.s32.totalorder %s953_s24, 1  ;;  %p202_p1 = scmp.lt.s32.totalorder %s953_s24, 3 }
   0x4   : > { %p824_p2 = scmp.eq.s32.totalorder %s709_s28, 0  ;;  %s955_s30 = smov [#allocation4]  }
   0x5   : > { %p1009_p3 = pnand %p711_p0, %p202_p1  ;;  %s234_s8 = sshll.u32 %s955_s30, 4  ;;  %s235_s8 = int_to_ptr.vmem [resolvable:$true] %s234_s8 }
   0x6   : > { %s217_s11 = sshll.u32 %s1133_s2, 4  ;;  %s247_s14 = sshll.u32 %s1137_s6, 4  ;;  %s218_s11 = int_to_ptr.hbm [resolvable:$true] %s217_s11  ;;  %s248_s14 = int_to_ptr.hbm [resolvable:$true] %s247_s14 }
   0x7   : > { %p814_p4 = pneg %p1009_p3  ;;  %s956_s15 = smov [#allocation2]  }
   0x8   : > { %s219_s16 = sshll.u32 %s956_s15, 4  ;;  %s957_s17 = smov [#allocation6]   ;;  %s220_s16 = int_to_ptr.vmem [resolvable:$true] %s219_s16 }
   0x9   : > { %p815_p5 = pnand %p824_p2, %p814_p4  ;;  %s249_s18 = sshll.u32 %s957_s17, 4  ;;  %s250_s18 = int_to_ptr.vmem [resolvable:$true] %s249_s18 }
   0xa   : > { %270 = sbr.rel (%p1009_p3) target bundleno = 361 (0x169), region = 48 }
   0xb   : > { %820 = dma.hbm_to_vmem [thread:$0]  (!%p815_p5), %s233_s27, 16, %s235_s8, [#allocation5]  }
   0xc   : > { %817 = dma.hbm_to_vmem [thread:$0]  (!%p815_p5), %s218_s11, 16, %s220_s16, [#allocation3]  }
   0xd   : > { %823 = dma.hbm_to_vmem [thread:$0]  (!%p815_p5), %s248_s14, 16, %s250_s18, [#allocation5]  }
   0xf   : > { %944 = dma.done.wait (%p824_p2), [#allocation3], 16  }
  0x10   : > { %946 = vsyncadd (%p824_p2), [#allocation3], 4294967280 }
  0x11   : > { %948 = dma.done.wait (%p824_p2), [#allocation5], 32  }
  0x12   : > { %950 = vsyncadd (%p824_p2), [#allocation5], 4294967264  ;;  %p313_p6 = scmp.lt.s32.totalorder %s709_s28, 1  ;;  %v792_v0 = vld [vmem:[%s1134_s3 + $0x8] sm:$0xff]  ;;  %v791_v1 = vld [vmem:[%s1134_s3] sm:$0xff]  ;;  %vm489_vm0 = vcmask 261120  }
  0x13   : > { %v324_v2 = vld [vmem:[%s1132_s1] sm:$0xff]  ;;  %499 = vmatpush.bf16.msra.mxu0 %v792_v0  ;;  %vm618_vm1 = vcmask 257024  }
  0x14   : > { %s1141_s28 = smov (!%p313_p6, %s709_s28), 1  ;;  %v330_v7 = vperm.slane %v324_v2, 0  ;;  %v343_v8 = vperm.slane %v324_v2, 1  ;;  %v356_v26 = vperm.slane %v324_v2, 2  ;;  %v370_v29 = vperm.slane %v324_v2, 3 }
  0x15   : > { %s801_s19 = smul.u32 48, %s1141_s28  ;;  %v383_v54 = vperm.slane %v324_v2, 4  ;;  %v396_v56 = vperm.slane %v324_v2, 5  ;;  %v410_v57 = vperm.slane %v324_v2, 6  ;;  %v423_v58 = vperm.slane %v324_v2, 7  ;;  %s790_s27 = sshll.u32 %s1141_s28, 4 }
  0x16   : > { %s322_s8 = scalar_lea.vmem %s1138_s7, %s790_s27 }
  0x17   : > { %s1034_s22 = scalar_lea.vmem %s1131_s0, %s801_s19  ;;  %500 = vmatpush.bf16.msra.mxu0 %v791_v1 }
  0x18   : > { %v326_v3 = vld [vmem:[%s1034_s22] sm:$0xf]  ;;  %v327_v4 = vld [vmem:[%s1034_s22 + $0x8] sm:$0xf]  ;;  %v328_v5 = vld [vmem:[%s1034_s22 + $0x10] sm:$0xf] }
  0x19   : > { %v329_v6 = vld [vmem:[%s1034_s22 + $0x18] sm:$0xf]  ;;  %v339_v9 = vld [vmem:[%s1034_s22 + $0x1] sm:$0xf]  ;;  %v340_v10 = vld [vmem:[%s1034_s22 + $0x9] sm:$0xf]  ;;  %v331_v12 = vmul.f32 %v330_v7, %v326_v3  ;;  %v332_v13 = vmul.f32 %v330_v7, %v327_v4  ;;  %v333_v14 = vmul.f32 %v330_v7, %v328_v5 }
  0x1a   : > { %v341_v11 = vld [vmem:[%s1034_s22 + $0x11] sm:$0xf]  ;;  %v334_v15 = vmul.f32 %v330_v7, %v329_v6  ;;  %v342_v16 = vld [vmem:[%s1034_s22 + $0x19] sm:$0xf]  ;;  %v352_v17 = vld [vmem:[%s1034_s22 + $0x2] sm:$0xf]  ;;  %v344_v19 = vmul.f32 %v343_v8, %v339_v9  ;;  %v345_v20 = vmul.f32 %v343_v8, %v340_v10 }
  0x1b   : > { %v353_v18 = vld [vmem:[%s1034_s22 + $0xa] sm:$0xf]  ;;  %v346_v21 = vmul.f32 %v343_v8, %v341_v11  ;;  %v347_v22 = vmul.f32 %v343_v8, %v342_v16  ;;  %v354_v23 = vld [vmem:[%s1034_s22 + $0x12] sm:$0xf]  ;;  %v355_v24 = vld [vmem:[%s1034_s22 + $0x1a] sm:$0xf]  ;;  %v357_v35 = vmul.f32 %v356_v26, %v352_v17 }
  0x1c   : > { %v723_v25 = vld [vmem:[%s1034_s22 + $0x8] sm:$0xf]  ;;  %v724_v27 = vld [vmem:[%s1034_s22 + $0x10] sm:$0xf]  ;;  %v725_v28 = vld [vmem:[%s1034_s22 + $0x18] sm:$0xf]  ;;  %v348_v30 = vadd.f32 %v344_v19, %v331_v12  ;;  %v349_v31 = vadd.f32 %v345_v20, %v332_v13  ;;  %v358_v36 = vmul.f32 %v356_v26, %v353_v18  ;;  %v359_v37 = vmul.f32 %v356_v26, %v354_v23 }
  0x1d   : > { %v350_v32 = vadd.f32 %v346_v21, %v333_v14  ;;  %v351_v33 = vadd.f32 %v347_v22, %v334_v15  ;;  %v726_v34 = vld [vmem:[%s1034_s22 + $0x20] sm:$0xf]  ;;  %v360_v38 = vmul.f32 %v356_v26, %v355_v24  ;;  %v1062_v39 = vld [vmem:[%s1034_s22 + $0x9] sm:$0xf]  ;;  %v371_v40 = vmul.f32 %v723_v25, %v370_v29  ;;  %v1065_v44 = vld [vmem:[%s1034_s22 + $0x11] sm:$0xf] }
  0x1e   : > { %v372_v41 = vmul.f32 %v724_v27, %v370_v29  ;;  %v373_v42 = vmul.f32 %v725_v28, %v370_v29  ;;  %v374_v43 = vmul.f32 %v726_v34, %v370_v29  ;;  %v1068_v45 = vld [vmem:[%s1034_s22 + $0x19] sm:$0xf]  ;;  %v1071_v46 = vld [vmem:[%s1034_s22 + $0x21] sm:$0xf]  ;;  %v361_v47 = vadd.f32 %v357_v35, %v348_v30  ;;  %v731_v51 = vld [vmem:[%s1034_s22 + $0xa] sm:$0xf] }
  0x1f   : > { %v362_v48 = vadd.f32 %v358_v36, %v349_v31  ;;  %v363_v49 = vadd.f32 %v359_v37, %v350_v32  ;;  %v364_v50 = vadd.f32 %v360_v38, %v351_v33  ;;  %v732_v52 = vld [vmem:[%s1034_s22 + $0x12] sm:$0xf]  ;;  %v733_v53 = vld [vmem:[%s1034_s22 + $0x1a] sm:$0xf]  ;;  %v734_v55 = vld [vmem:[%s1034_s22 + $0x22] sm:$0xf]  ;;  %v384_v0 = vmul.f32 %v1062_v39, %v383_v54 }
  0x20   : > { %v375_v59 = vadd.f32 %v371_v40, %v361_v47  ;;  %v735_v63 = vld [vmem:[%s1034_s22 + $0x10] sm:$0xf]  ;;  %v385_v1 = vmul.f32 %v1065_v44, %v383_v54  ;;  %v386_v3 = vmul.f32 %v1068_v45, %v383_v54  ;;  %v387_v4 = vmul.f32 %v1071_v46, %v383_v54  ;;  %v736_v5 = vld [vmem:[%s1034_s22 + $0x18] sm:$0xf]  ;;  %v737_v6 = vld [vmem:[%s1034_s22 + $0x20] sm:$0xf] }
  0x21   : > { %v376_v60 = vadd.f32 %v372_v41, %v362_v48  ;;  %v377_v61 = vadd.f32 %v373_v42, %v363_v49  ;;  %v378_v62 = vadd.f32 %v374_v43, %v364_v50  ;;  %v738_v2 = vld [vmem:[%s1034_s22 + $0x28] sm:$0xf]  ;;  %v397_v7 = vmul.f32 %v731_v51, %v396_v56  ;;  %v739_v11 = vld [vmem:[%s1034_s22 + $0x11] sm:$0xf]  ;;  %v740_v12 = vld [vmem:[%s1034_s22 + $0x19] sm:$0xf] }
  0x22   : > { %v398_v8 = vmul.f32 %v732_v52, %v396_v56  ;;  %v399_v9 = vmul.f32 %v733_v53, %v396_v56  ;;  %v400_v10 = vmul.f32 %v734_v55, %v396_v56  ;;  %v741_v13 = vld [vmem:[%s1034_s22 + $0x21] sm:$0xf]  ;;  %v388_v14 = vadd.f32 %v384_v0, %v375_v59  ;;  %v742_v18 = vld [vmem:[%s1034_s22 + $0x29] sm:$0xf]  ;;  %v743_v23 = vld [vmem:[%s1034_s22 + $0x12] sm:$0xf] }
  0x23   : > { %v389_v15 = vadd.f32 %v385_v1, %v376_v60  ;;  %v390_v16 = vadd.f32 %v386_v3, %v377_v61  ;;  %v391_v17 = vadd.f32 %v387_v4, %v378_v62  ;;  %v411_v19 = vmul.f32 %v735_v63, %v410_v57  ;;  %v841_v24 = vld [vmem:[%s1132_s1 + $0x8] ss:$0 sm:$0xff]  ;;  %v744_v29 = vld [vmem:[%s1034_s22 + $0x1a] sm:$0xf]  ;;  %v745_v30 = vld [vmem:[%s1034_s22 + $0x22] sm:$0xf] }
  0x24   : > { %v412_v20 = vmul.f32 %v736_v5, %v410_v57  ;;  %v413_v21 = vmul.f32 %v737_v6, %v410_v57  ;;  %v414_v22 = vmul.f32 %v738_v2, %v410_v57  ;;  %v401_v25 = vadd.f32 %v397_v7, %v388_v14  ;;  %v746_v31 = vld [vmem:[%s1034_s22 + $0x2a] sm:$0xf]  ;;  %v842_v52 = vld [vmem:[#allocation2] ss:$0 sm:$0xff]  ;;  %v800_v0 = vld [vmem:[%s1136_s5 + $0x38] sm:$0xff] }
  0x25   : > { %v402_v26 = vadd.f32 %v398_v8, %v389_v15  ;;  %v403_v27 = vadd.f32 %v399_v9, %v390_v16  ;;  %v404_v28 = vadd.f32 %v400_v10, %v391_v17  ;;  %v424_v32 = vmul.f32 %v739_v11, %v423_v58  ;;  %594 = vmatpush.bf16.msra.mxu1 %v800_v0  ;;  %v799_v1 = vld [vmem:[%s1136_s5 + $0x30] sm:$0xff]  ;;  %v798_v3 = vld [vmem:[%s1136_s5 + $0x28] sm:$0xff]  ;;  %v797_v4 = vld [vmem:[%s1136_s5 + $0x20] sm:$0xff] }
  0x26   : > { %v425_v33 = vmul.f32 %v740_v12, %v423_v58  ;;  %v426_v34 = vmul.f32 %v741_v13, %v423_v58  ;;  %v427_v35 = vmul.f32 %v742_v18, %v423_v58  ;;  %v415_v36 = vadd.f32 %v411_v19, %v401_v25  ;;  %v796_v5 = vld [vmem:[%s1136_s5 + $0x18] sm:$0xff]  ;;  %v795_v6 = vld [vmem:[%s1136_s5 + $0x10] sm:$0xff]  ;;  %v794_v2 = vld [vmem:[%s1136_s5 + $0x8] sm:$0xff] }
  0x27   : > { %v416_v37 = vadd.f32 %v412_v20, %v402_v26  ;;  %v417_v38 = vadd.f32 %v413_v21, %v403_v27  ;;  %v418_v40 = vadd.f32 %v414_v22, %v404_v28  ;;  %v437_v41 = vmul.f32 %v841_v24, %v743_v23  ;;  %v843_v7 = vld [vmem:[#allocation4] ss:$0 sm:$0xff]  ;;  %v793_v8 = vld [vmem:[%s1136_s5] sm:$0xff] }
  0x28   : > { %v438_v42 = vmul.f32 %v841_v24, %v744_v29  ;;  %v439_v43 = vmul.f32 %v841_v24, %v745_v30  ;;  %v440_v47 = vmul.f32 %v841_v24, %v746_v31  ;;  %v428_v48 = vadd.f32 %v424_v32, %v415_v36  ;;  %v844_v32 = vld [vmem:[#allocation6] ss:$0 sm:$0xff] }
  0x29   : > { %v429_v49 = vadd.f32 %v425_v33, %v416_v37  ;;  %v430_v50 = vadd.f32 %v426_v34, %v417_v38  ;;  %v431_v51 = vadd.f32 %v427_v35, %v418_v40  ;;  %595 = vmatpush.bf16.msra.mxu1 %v799_v1 }
  0x2a   : > { %v441_v53 = vadd.f32 %v437_v41, %v428_v48 }
  0x2b   : > { %v442_v54 = vadd.f32 %v438_v42, %v429_v49  ;;  %v443_v55 = vadd.f32 %v439_v43, %v430_v50  ;;  %v444_v56 = vadd.f32 %v440_v47, %v431_v51 }
  0x2c   : > { %v449_v57 = vadd.f32 %v842_v52, %v441_v53 }
  0x2d   : > { %v450_v59 = vadd.f32 %v842_v52, %v442_v54  ;;  %v451_v58 = vadd.f32 %v842_v52, %v443_v55  ;;  %v452_v60 = vadd.f32 %v842_v52, %v444_v56  ;;  %596 = vmatpush.bf16.msra.mxu1 %v798_v3 }
  0x2e   : > { %457 = vst [vmem:[#allocation1] ss:$2 sm:$0xff] %v449_v57 }
  0x2f   : > { %459 = vst [vmem:[#allocation1 + $0x1] ss:$2 sm:$0xff] %v450_v59 }
  0x30   : > { %461 = vst [vmem:[#allocation1 + $0x10] ss:$2 sm:$0xff] %v451_v58 }
  0x31   : > { %463 = vst [vmem:[#allocation1 + $0x11] ss:$2 sm:$0xff] %v452_v60  ;;  %597 = vmatpush.bf16.msra.mxu1 %v797_v4 }
  0x35   : > { %598 = vmatpush.bf16.msra.mxu1 %v796_v5 }
  0x36   : > { %v464_v61 = vld.sshfl [vmem:[#allocation1] sm:$0xff pattern:$0x75316420] }
  0x38   : > { %v465_v62 = vld.sshfl [vmem:[#allocation1 + $0x10] sm:$0xff pattern:$0x75316420] }
  0x39   : > { %v468_v63 = vpack.c.bf16 %v465_v62, %v464_v61  ;;  %599 = vmatpush.bf16.msra.mxu1 %v795_v6 }
  0x3b   : > { %755 = vmatmul.msk.bf16.vlgmr.msra.gmra.mxu0 %vm489_vm0, %v468_v63 }
  0x3d   : > { %600 = vmatpush.bf16.msra.mxu1 %v794_v2 }
  0x41   : > { %601 = vmatpush.bf16.msra.mxu1 %v793_v8 }
  0xb8   : > { %v502_v9 = vpop.f32.mrf.mxu0 }
  0xb9   : > { %v503_v10 = vadd.f32 %v843_v7, %v502_v9 }
  0xbb   : > { %v507_v11 = vmul.f32 %v503_v10, %v503_v10 }
  0xbd   : > { %v509_v12 = vmul.f32 %v507_v11, %v503_v10 }
  0xbf   : > { %v511_v13 = vmul.f32 0.044715, %v509_v12 }
  0xc0   : > { %v504_v14 = vpop.f32.mrf.mxu0 }
  0xc1   : > { %v513_v15 = vadd.f32 %v511_v13, %v503_v10  ;;  %v505_v16 = vadd.f32 %v843_v7, %v504_v14 }
  0xc3   : > { %v508_v17 = vmul.f32 %v505_v16, %v505_v16  ;;  %v515_v18 = vmul.f32 0.7978846, %v513_v15 }
  0xc5   : > { %v510_v19 = vmul.f32 %v508_v17, %v505_v16  ;;  %845 = vtanh.f32 %v515_v18 }
  0xc7   : > { %v512_v20 = vmul.f32 0.044715, %v510_v19 }
  0xc9   : > { %v514_v21 = vadd.f32 %v512_v20, %v505_v16 }
  0xcb   : > { %v516_v22 = vmul.f32 0.7978846, %v514_v21  ;;  %v846_v23 = vpop.eup %845 }
  0xcc   : > { %v519_v24 = vadd.f32 1.0, %v846_v23 }
  0xcd   : > { %847 = vtanh.f32 %v516_v22 }
  0xce   : > { %v521_v27 = vmul.f32 0.5, %v519_v24 }
  0xd0   : > { %v523_v29 = vmul.f32 %v521_v27, %v503_v10 }
  0xd3   : > { %v848_v25 = vpop.eup %847 }
  0xd4   : > { %v520_v26 = vadd.f32 1.0, %v848_v25 }
  0xd6   : > { %v522_v28 = vmul.f32 0.5, %v520_v26 }
  0xd8   : > { %v524_v30 = vmul.f32 %v522_v28, %v505_v16 }
  0xda   : > { %v525_v31 = vpack.c.bf16 %v524_v30, %v523_v29 }
  0xdc   : > { %602 = vmatmul.bf16.vlgmr.msra.gmra.mxu1 %v525_v31 }
 0x159   : > { %v603_v33 = vpop.f32.mrf.mxu1 }
 0x15a   : > { %v604_v34 = vadd.f32 %v844_v32, %v603_v33 }
 0x15c   : > { %v610_v35 = vrot.slane %v604_v34, 4  ;;  %v614_v36 = vadd.f32 %v1062_v39, %v604_v34 }
 0x15e   : > { %v615_v37 = vadd.f32 %v1065_v44, %v610_v35  ;;  %619 = vst.msk [vmem:[%s322_s8] sm:$0xf] %vm618_vm1, %v614_v36 }
 0x160   : > { %620 = vst.msk [vmem:[%s322_s8 + $0x4] sm:$0xf] %vm618_vm1, %v615_v37 }
 0x161   : > { %v605_v38 = vpop.f32.mrf.mxu1 }
 0x162   : > { %v606_v40 = vadd.f32 %v844_v32, %v605_v38 }
 0x164   : > { %v611_v41 = vrot.slane %v606_v40, 4  ;;  %v616_v42 = vadd.f32 %v1068_v45, %v606_v40 }
 0x166   : > { %v617_v43 = vadd.f32 %v1071_v46, %v611_v41  ;;  %621 = vst.msk [vmem:[%s322_s8 + $0x8] sm:$0xf] %vm618_vm1, %v616_v42 }
 0x168   : > { %622 = vst.msk [vmem:[%s322_s8 + $0xc] sm:$0xf] %vm618_vm1, %v617_v43 }
 0x169 PF: > { %s19_s24 = sadd.s32 1, %s953_s24  }
 0x16a   : > { %p16_p7 = scmp.ge.s32.totalorder %s19_s24, 4  }
 0x16c   :  { %18 = sbr.rel (!%p16_p7) target bundleno = 2 (0x2), region = 96 }
 0x171   :  { %644 = vsyncpa [#allocation3], 1 }
 0x172   :  { %646 = vsyncpa [#allocation3 + $0x1], 1 }
 0x173   :  { %647 = vsyncpa [#allocation5], 1 }

// kernel: swiftformer_classifier_forward.14
= control target key start
LH: loop header
LB: loop body
LE: loop exit
PB: predicated region body
PF: predicated region fallthrough
CT: control target
= control target key end

     0   :  { %11 = vsyncpa [#allocation3], 0  ;;  %s1075_s21 = smov 0   ;;  %s1188_s0 = inlined_call_operand.vmem [shape: f32[2,5,5,16], index: 0, kind: input, shape index: {}]   ;;  %s1189_s1 = inlined_call_operand.vmem [shape: f32[2,5,5,16], index: 1, kind: input, shape index: {}]   ;;  %s1190_s2 = inlined_call_operand.vmem [shape: f32[2,5,5,16], index: 2, kind: input, shape index: {}]   ;;  %s1191_s3 = inlined_call_operand.vmem [shape: f32[2,5,5,16], index: 3, kind: input, shape index: {}]   ;;  %s1192_s4 = inlined_call_operand.vmem [shape: bf16[9,16,32], index: 4, kind: input, shape index: {}]   ;;  %s1193_s5 = inlined_call_operand.hbm [shape: f32[1,32], index: 5, kind: input, shape index: {}]   ;;  %s1194_s6 = inlined_call_operand.vmem [shape: f32[2,4,4,32], index: 6, kind: output, shape index: {}]  }
   0x1 LB: > { %s878_s22 = sadd.s32 4294967295, %s1037_s21   ;;  %p880_p0 = scmp.ge.s32.totalorder %s1037_s21, 1  ;;  %s1037_s21 = sphi %s1075_s21, %s17_s21  }
   0x2   : > { %p194_p1 = scmp.lt.s32.totalorder %s1037_s21, 3  ;;  %s209_s25 = sshll.u32 %s1193_s5, 4  ;;  %s210_s25 = int_to_ptr.hbm [resolvable:$true] %s209_s25 }
   0x3   : > { %p985_p3 = scmp.eq.s32.totalorder %s878_s22, 0  ;;  %s1039_s26 = smov [#allocation2]  }
   0x4   : > { %p195_p2 = pnand %p880_p0, %p194_p1  ;;  %s211_s27 = sshll.u32 %s1039_s26, 4  ;;  %s212_s27 = int_to_ptr.vmem [resolvable:$true] %s211_s27 }
   0x6   : > { %p981_p4 = pneg %p195_p2  ;;  %256 = sbr.rel (%p195_p2) target bundleno = 245 (0xf5), region = 44 }
   0x8   : > { %p982_p5 = pnand %p985_p3, %p981_p4 }
   0xa   : > { %984 = dma.hbm_to_vmem [thread:$0]  (!%p982_p5), %s210_s25, 16, %s212_s27, [#allocation3]  }
   0xb   : > { %1032 = dma.done.wait (%p985_p3), [#allocation3], 16  }
   0xc   : > { %1034 = vsyncadd (%p985_p3), [#allocation3], 4294967280  ;;  %p302_p6 = scmp.lt.s32.totalorder %s878_s22, 1  ;;  %v968_v0 = vld [vmem:[%s1192_s4 + $0x8] sm:$0xff]  ;;  %v969_v5 = vld [vmem:[%s1192_s4 + $0x10] sm:$0xff]  ;;  %vm379_vm0 = vcmask 130048  }
   0xd   : > { %390 = vmatpush.bf16.msra.mxu0 %v968_v0  ;;  %v967_v6 = vld [vmem:[%s1192_s4] sm:$0xff]  ;;  %459 = vmatpush.bf16.msra.mxu2 %v969_v5  ;;  %v970_v7 = vld [vmem:[%s1192_s4 + $0x18] sm:$0xff]  ;;  %v972_v20 = vld [vmem:[%s1192_s4 + $0x28] sm:$0xff]  ;;  %vm770_vm1 = vcmask 257024  }
   0xe   : > { %s1196_s22 = smov (!%p302_p6, %s878_s22), 1  ;;  %413 = vmatpush.bf16.msra.mxu1 %v967_v6  ;;  %507 = vmatpush.bf16.msra.mxu3 %v970_v7  ;;  %v971_v12 = vld [vmem:[%s1192_s4 + $0x20] sm:$0xff]  ;;  %v973_v21 = vld [vmem:[%s1192_s4 + $0x30] sm:$0xff]  ;;  %v974_v29 = vld [vmem:[%s1192_s4 + $0x38] sm:$0xff] }
   0xf   : > { %s1089_s28 = smul.u32 40, %s1196_s22  ;;  %v975_v37 = vld [vmem:[%s1192_s4 + $0x40] sm:$0xff] }
  0x11   : > { %s1095_s7 = scalar_lea.vmem %s1188_s0, %s1089_s28  ;;  %s1108_s12 = scalar_lea.vmem %s1189_s1, %s1089_s28  ;;  %555 = vmatpush.bf16.msrb.mxu0 %v971_v12  ;;  %652 = vmatpush.bf16.msrb.mxu2 %v973_v21 }
  0x12   : > { %v328_v1 = vld [vmem:[%s1095_s7] sm:$0xf]  ;;  %v329_v2 = vld [vmem:[%s1095_s7 + $0x8] sm:$0xf]  ;;  %v330_v3 = vld [vmem:[%s1095_s7 + $0x10] sm:$0xf]  ;;  %603 = vmatpush.bf16.msrb.mxu1 %v972_v20  ;;  %s1141_s30 = scalar_lea.vmem %s1190_s2, %s1089_s28  ;;  %701 = vmatpush.bf16.msrb.mxu3 %v974_v29  ;;  %s321_s13 = scalar_lea.vmem %s1191_s3, %s1089_s28 }
  0x13   : > { %v331_v4 = vld [vmem:[%s1095_s7 + $0x18] sm:$0xf]  ;;  %336 = vst [vmem:[#allocation1] ss:$2 sm:$0xff] %v328_v1  ;;  %v350_v8 = vld [vmem:[%s1108_s12] sm:$0xf] }
  0x14   : > { %338 = vst [vmem:[#allocation1 + $0x1] ss:$2 sm:$0xff] %v329_v2  ;;  %v351_v9 = vld [vmem:[%s1108_s12 + $0x8] sm:$0xf]  ;;  %v352_v10 = vld [vmem:[%s1108_s12 + $0x10] sm:$0xf] }
  0x15   : > { %340 = vst [vmem:[#allocation1 + $0x10] ss:$2 sm:$0xff] %v330_v3  ;;  %v353_v13 = vld [vmem:[%s1108_s12 + $0x18] sm:$0xf]  ;;  %v420_v16 = vld [vmem:[%s1095_s7 + $0x1] sm:$0xf] }
  0x16   : > { %342 = vst [vmem:[#allocation1 + $0x11] ss:$2 sm:$0xff] %v331_v4  ;;  %v421_v17 = vld [vmem:[%s1095_s7 + $0x9] sm:$0xf]  ;;  %v422_v18 = vld [vmem:[%s1095_s7 + $0x11] sm:$0xf] }
  0x17   : > { %v423_v22 = vld [vmem:[%s1095_s7 + $0x19] sm:$0xf]  ;;  %v468_v25 = vld [vmem:[%s1141_s30] sm:$0xf]  ;;  %v469_v26 = vld [vmem:[%s1141_s30 + $0x8] sm:$0xf] }
  0x18   : > { %v470_v28 = vld [vmem:[%s1141_s30 + $0x10] sm:$0xf]  ;;  %v471_v30 = vld [vmem:[%s1141_s30 + $0x18] sm:$0xf]  ;;  %v516_v33 = vld [vmem:[%s321_s13] sm:$0xf] }
  0x19   : > { %v517_v34 = vld [vmem:[%s321_s13 + $0x8] sm:$0xf]  ;;  %v518_v36 = vld [vmem:[%s321_s13 + $0x10] sm:$0xf]  ;;  %v519_v38 = vld [vmem:[%s321_s13 + $0x18] sm:$0xf] }
  0x1a   : > { %v564_v41 = vld [vmem:[%s1141_s30 + $0x1] sm:$0xf]  ;;  %v565_v42 = vld [vmem:[%s1141_s30 + $0x9] sm:$0xf]  ;;  %v566_v44 = vld [vmem:[%s1141_s30 + $0x11] sm:$0xf] }
  0x1b   : > { %v343_v11 = vld.sshfl [vmem:[#allocation1] sm:$0xff pattern:$0x75316420]  ;;  %v567_v45 = vld [vmem:[%s1141_s30 + $0x19] sm:$0xf]  ;;  %s966_s28 = sshll.u32 %s1196_s22, 4 }
  0x1c   : > { %358 = vst [vmem:[#allocation1] ss:$2 sm:$0xff] %v350_v8  ;;  %v931_v48 = vld [vmem:[%s1095_s7 + $0x8] sm:$0xf]  ;;  %v932_v49 = vld [vmem:[%s1095_s7 + $0x10] sm:$0xf]  ;;  %s326_s16 = scalar_lea.vmem %s1194_s6, %s966_s28 }
  0x1d   : > { %v344_v14 = vld.sshfl [vmem:[#allocation1 + $0x10] sm:$0xff pattern:$0x75316420]  ;;  %360 = vst [vmem:[#allocation1 + $0x1] ss:$2 sm:$0xff] %v351_v9 }
  0x1e   : > { %362 = vst [vmem:[#allocation1 + $0x10] ss:$2 sm:$0xff] %v352_v10  ;;  %v347_v15 = vpack.c.bf16 %v344_v14, %v343_v11  ;;  %v933_v51 = vld [vmem:[%s1095_s7 + $0x18] sm:$0xf]  ;;  %v934_v52 = vld [vmem:[%s1095_s7 + $0x20] sm:$0xf] }
  0x1f   : > { %364 = vst [vmem:[#allocation1 + $0x11] ss:$2 sm:$0xff] %v353_v13  ;;  %v942_v55 = vld [vmem:[%s1108_s12 + $0x8] sm:$0xf]  ;;  %v943_v56 = vld [vmem:[%s1108_s12 + $0x10] sm:$0xf] }
  0x20   : > { %902 = vmatmul.msk.bf16.vlgmr.msra.gmra.mxu1 %vm379_vm0, %v347_v15  ;;  %v944_v58 = vld [vmem:[%s1108_s12 + $0x18] sm:$0xf]  ;;  %v945_v59 = vld [vmem:[%s1108_s12 + $0x20] sm:$0xf]  ;;  %v953_v62 = vld [vmem:[%s1095_s7 + $0x9] sm:$0xf] }
  0x21   : > { %v954_v63 = vld [vmem:[%s1095_s7 + $0x11] sm:$0xf]  ;;  %v955_v1 = vld [vmem:[%s1095_s7 + $0x19] sm:$0xf]  ;;  %v956_v2 = vld [vmem:[%s1095_s7 + $0x21] sm:$0xf] }
  0x24   : > { %v365_v19 = vld.sshfl [vmem:[#allocation1] sm:$0xff pattern:$0x75316420] }
  0x25   : > { %428 = vst [vmem:[#allocation1] ss:$2 sm:$0xff] %v420_v16 }
  0x26   : > { %v366_v23 = vld.sshfl [vmem:[#allocation1 + $0x10] sm:$0xff pattern:$0x75316420]  ;;  %430 = vst [vmem:[#allocation1 + $0x1] ss:$2 sm:$0xff] %v421_v17 }
  0x27   : > { %v369_v24 = vpack.c.bf16 %v366_v23, %v365_v19  ;;  %432 = vst [vmem:[#allocation1 + $0x10] ss:$2 sm:$0xff] %v422_v18 }
  0x28   : > { %434 = vst [vmem:[#allocation1 + $0x11] ss:$2 sm:$0xff] %v423_v22 }
  0x29   : > { %897 = vmatmul.msk.bf16.vlgmr.msra.gmra.mxu0 %vm379_vm0, %v369_v24 }
  0x2a   : > { %749 = vmatpush.bf16.msra.mxu0 %v975_v37 }
  0x2d   : > { %v435_v27 = vld.sshfl [vmem:[#allocation1] sm:$0xff pattern:$0x75316420] }
  0x2e   : > { %476 = vst [vmem:[#allocation1] ss:$2 sm:$0xff] %v468_v25 }
  0x2f   : > { %v436_v31 = vld.sshfl [vmem:[#allocation1 + $0x10] sm:$0xff pattern:$0x75316420]  ;;  %478 = vst [vmem:[#allocation1 + $0x1] ss:$2 sm:$0xff] %v469_v26 }
  0x30   : > { %v439_v32 = vpack.c.bf16 %v436_v31, %v435_v27  ;;  %480 = vst [vmem:[#allocation1 + $0x10] ss:$2 sm:$0xff] %v470_v28 }
  0x31   : > { %482 = vst [vmem:[#allocation1 + $0x11] ss:$2 sm:$0xff] %v471_v30 }
  0x32   : > { %909 = vmatmul.msk.bf16.vlgmr.msra.gmra.mxu2 %vm379_vm0, %v439_v32  ;;  %v996_v32 = vld [vmem:[#allocation2] ss:$0 sm:$0xff] }
  0x36   : > { %v483_v35 = vld.sshfl [vmem:[#allocation1] sm:$0xff pattern:$0x75316420] }
  0x37   : > { %524 = vst [vmem:[#allocation1] ss:$2 sm:$0xff] %v516_v33 }
  0x38   : > { %v484_v39 = vld.sshfl [vmem:[#allocation1 + $0x10] sm:$0xff pattern:$0x75316420]  ;;  %526 = vst [vmem:[#allocation1 + $0x1] ss:$2 sm:$0xff] %v517_v34 }
  0x39   : > { %v487_v40 = vpack.c.bf16 %v484_v39, %v483_v35  ;;  %528 = vst [vmem:[#allocation1 + $0x10] ss:$2 sm:$0xff] %v518_v36 }
  0x3a   : > { %530 = vst [vmem:[#allocation1 + $0x11] ss:$2 sm:$0xff] %v519_v38 }
  0x3b   : > { %916 = vmatmul.msk.bf16.vlgmr.msra.gmra.mxu3 %vm379_vm0, %v487_v40 }
  0x3f   : > { %v531_v43 = vld.sshfl [vmem:[#allocation1] sm:$0xff pattern:$0x75316420] }
  0x40   : > { %572 = vst [vmem:[#allocation1] ss:$2 sm:$0xff] %v564_v41 }
  0x41   : > { %v532_v46 = vld.sshfl [vmem:[#allocation1 + $0x10] sm:$0xff pattern:$0x75316420]  ;;  %574 = vst [vmem:[#allocation1 + $0x1] ss:$2 sm:$0xff] %v565_v42 }
  0x42   : > { %v535_v47 = vpack.c.bf16 %v532_v46, %v531_v43  ;;  %576 = vst [vmem:[#allocation1 + $0x10] ss:$2 sm:$0xff] %v566_v44 }
  0x43   : > { %578 = vst [vmem:[#allocation1 + $0x11] ss:$2 sm:$0xff] %v567_v45 }
  0x44   : > { %923 = vmatmul.msk.bf16.vlgmr.msrb.gmra.mxu0 %vm379_vm0, %v535_v47 }
  0x48   : > { %v579_v50 = vld.sshfl [vmem:[#allocation1] sm:$0xff pattern:$0x75316420] }
  0x49   : > { %621 = vst [vmem:[#allocation1] ss:$2 sm:$0xff] %v931_v48 }
  0x4a   : > { %v580_v53 = vld.sshfl [vmem:[#allocation1 + $0x10] sm:$0xff pattern:$0x75316420]  ;;  %623 = vst [vmem:[#allocation1 + $0x1] ss:$2 sm:$0xff] %v932_v49 }
  0x4b   : > { %v583_v54 = vpack.c.bf16 %v580_v53, %v579_v50  ;;  %625 = vst [vmem:[#allocation1 + $0x10] ss:$2 sm:$0xff] %v933_v51 }
  0x4c   : > { %627 = vst [vmem:[#allocation1 + $0x11] ss:$2 sm:$0xff] %v934_v52 }
  0x4d   : > { %930 = vmatmul.msk.bf16.vlgmr.msrb.gmra.mxu1 %vm379_vm0, %v583_v54 }
  0x51   : > { %v628_v57 = vld.sshfl [vmem:[#allocation1] sm:$0xff pattern:$0x75316420] }
  0x52   : > { %670 = vst [vmem:[#allocation1] ss:$2 sm:$0xff] %v942_v55 }
  0x53   : > { %v629_v60 = vld.sshfl [vmem:[#allocation1 + $0x10] sm:$0xff pattern:$0x75316420]  ;;  %672 = vst [vmem:[#allocation1 + $0x1] ss:$2 sm:$0xff] %v943_v56 }
  0x54   : > { %v632_v61 = vpack.c.bf16 %v629_v60, %v628_v57  ;;  %674 = vst [vmem:[#allocation1 + $0x10] ss:$2 sm:$0xff] %v944_v58 }
  0x55   : > { %676 = vst [vmem:[#allocation1 + $0x11] ss:$2 sm:$0xff] %v945_v59 }
  0x56   : > { %941 = vmatmul.msk.bf16.vlgmr.msrb.gmra.mxu2 %vm379_vm0, %v632_v61 }
  0x5a   : > { %v677_v0 = vld.sshfl [vmem:[#allocation1] sm:$0xff pattern:$0x75316420] }
  0x5b   : > { %718 = vst [vmem:[#allocation1] ss:$2 sm:$0xff] %v953_v62 }
  0x5c   : > { %v678_v3 = vld.sshfl [vmem:[#allocation1 + $0x10] sm:$0xff pattern:$0x75316420]  ;;  %720 = vst [vmem:[#allocation1 + $0x1] ss:$2 sm:$0xff] %v954_v63 }
  0x5d   : > { %v681_v4 = vpack.c.bf16 %v678_v3, %v677_v0  ;;  %722 = vst [vmem:[#allocation1 + $0x10] ss:$2 sm:$0xff] %v955_v1 }
  0x5e   : > { %724 = vst [vmem:[#allocation1 + $0x11] ss:$2 sm:$0xff] %v956_v2 }
  0x5f   : > { %952 = vmatmul.msk.bf16.vlgmr.msrb.gmra.mxu3 %vm379_vm0, %v681_v4 }
  0x63   : > { %v725_v5 = vld.sshfl [vmem:[#allocation1] sm:$0xff pattern:$0x75316420] }
  0x65   : > { %v726_v6 = vld.sshfl [vmem:[#allocation1 + $0x10] sm:$0xff pattern:$0x75316420] }
  0x66   : > { %v729_v7 = vpack.c.bf16 %v726_v6, %v725_v5 }
  0x68   : > { %963 = vmatmul.msk.bf16.vlgmr.msra.gmra.mxu0 %vm379_vm0, %v729_v7 }
  0x9d   : > { %v415_v9 = vpop.f32.mrf.mxu1 }
  0xa5   : > { %v417_v14 = vpop.f32.mrf.mxu1 }
  0xa6   : > { %v392_v8 = vpop.f32.mrf.mxu0 }
  0xa7   : > { %v416_v12 = vadd.f32 %v415_v9, %v392_v8 }
  0xae   : > { %v394_v10 = vpop.f32.mrf.mxu0 }
  0xaf   : > { %v418_v21 = vadd.f32 %v417_v14, %v394_v10 }
  0xb5   : > { %v461_v11 = vpop.f32.mrf.mxu2 }
  0xb6   : > { %v466_v15 = vadd.f32 %v461_v11, %v416_v12 }
  0xbd   : > { %v463_v17 = vpop.f32.mrf.mxu2 }
  0xbe   : > { %v509_v13 = vpop.f32.mrf.mxu3  ;;  %v467_v25 = vadd.f32 %v463_v17, %v418_v21 }
  0xbf   : > { %v514_v18 = vadd.f32 %v509_v13, %v466_v15 }
  0xc1   : > { %v557_v16 = vpop.f32.mrf.mxu0 }
  0xc2   : > { %v562_v22 = vadd.f32 %v557_v16, %v514_v18 }
  0xc6   : > { %v511_v19 = vpop.f32.mrf.mxu3 }
  0xc7   : > { %v515_v27 = vadd.f32 %v511_v19, %v467_v25 }
  0xc9   : > { %v559_v24 = vpop.f32.mrf.mxu0 }
  0xca   : > { %v605_v20 = vpop.f32.mrf.mxu1  ;;  %v563_v33 = vadd.f32 %v559_v24, %v515_v27 }
  0xcb   : > { %v610_v26 = vadd.f32 %v605_v20, %v562_v22 }
  0xd2   : > { %v607_v31 = vpop.f32.mrf.mxu1 }
  0xd3   : > { %v611_v37 = vadd.f32 %v607_v31, %v563_v33 }
  0xd9   : > { %v654_v23 = vpop.f32.mrf.mxu2 }
  0xda   : > { %v659_v28 = vadd.f32 %v654_v23, %v610_v26 }
  0xe1   : > { %v656_v35 = vpop.f32.mrf.mxu2 }
  0xe2   : > { %v703_v29 = vpop.f32.mrf.mxu3  ;;  %v660_v39 = vadd.f32 %v656_v35, %v611_v37 }
  0xe3   : > { %v708_v30 = vadd.f32 %v703_v29, %v659_v28 }
  0xe5   : > { %v751_v34 = vpop.f32.mrf.mxu0 }
  0xe6   : > { %v756_v36 = vadd.f32 %v751_v34, %v708_v30 }
  0xe8   : > { %v762_v38 = vadd.f32 %v996_v32, %v756_v36 }
  0xea   : > { %v766_v40 = vrot.slane %v762_v38, 4  ;;  %771 = vst.msk [vmem:[%s326_s16] sm:$0xf] %vm770_vm1, %v762_v38  ;;  %v705_v41 = vpop.f32.mrf.mxu3 }
  0xeb   : > { %v709_v42 = vadd.f32 %v705_v41, %v660_v39 }
  0xec   : > { %772 = vst.msk [vmem:[%s326_s16 + $0x4] sm:$0xf] %vm770_vm1, %v766_v40 }
  0xed   : > { %v753_v43 = vpop.f32.mrf.mxu0 }
  0xee   : > { %v757_v44 = vadd.f32 %v753_v43, %v709_v42 }
  0xf0   : > { %v763_v45 = vadd.f32 %v996_v32, %v757_v44 }
  0xf2   : > { %v767_v46 = vrot.slane %v763_v45, 4  ;;  %773 = vst.msk [vmem:[%s326_s16 + $0x8] sm:$0xf] %vm770_vm1, %v763_v45 }
  0xf4   : > { %774 = vst.msk [vmem:[%s326_s16 + $0xc] sm:$0xf] %vm770_vm1, %v767_v46 }
  0xf5 PF: > { %s17_s21 = sadd.s32 1, %s1037_s21  }
  0xf6   : > { %p14_p7 = scmp.ge.s32.totalorder %s17_s21, 4  }
  0xf8   :  { %16 = sbr.rel (!%p14_p7) target bundleno = 1 (0x1), region = 125 }
  0xfd   :  { %796 = vsyncpa [#allocation3], 1 }
  0xfe   :  { %798 = vsyncpa [#allocation3 + $0x1], 1 }

// kernel: swiftformer_classifier_forward.16
= control target key start
LH: loop header
LB: loop body
LE: loop exit
PB: predicated region body
PF: predicated region fallthrough
CT: control target
= control target key end

     0   :  { %s2638_s0 = inlined_call_operand.vmem [shape: f32[2,6,6,32], index: 0, kind: input, shape index: {}]   ;;  %s2639_s1 = inlined_call_operand.vmem [shape: f32[9,32], index: 1, kind: input, shape index: {}]   ;;  %s2640_s2 = inlined_call_operand.hbm [shape: f32[1,32], index: 2, kind: input, shape index: {}]   ;;  %s2641_s3 = inlined_call_operand.vmem [shape: bf16[32,32], index: 3, kind: input, shape index: {}]   ;;  %s2642_s4 = inlined_call_operand.hbm [shape: f32[1,32], index: 4, kind: input, shape index: {}]   ;;  %s2643_s5 = inlined_call_operand.vmem [shape: bf16[32,32], index: 5, kind: input, shape index: {}]   ;;  %s2644_s6 = inlined_call_operand.hbm [shape: f32[1,32], index: 6, kind: input, shape index: {}]   ;;  %s2645_s7 = inlined_call_operand.vmem [shape: bf16[32,32], index: 7, kind: input, shape index: {}]   ;;  %s2646_s8 = inlined_call_operand.hbm [shape: f32[1,32], index: 8, kind: input, shape index: {}]   ;;  %s2647_s9 = inlined_call_operand.vmem [shape: bf16[32,32], index: 9, kind: input, shape index: {}]   ;;  %s2648_s10 = inlined_call_operand.hbm [shape: f32[1,32], index: 10, kind: input, shape index: {}]   ;;  %s2649_s11 = inlined_call_operand.vmem [shape: bf16[32,32], index: 11, kind: input, shape index: {}]   ;;  %s2650_s12 = inlined_call_operand.hbm [shape: f32[1,32], index: 12, kind: input, shape index: {}]   ;;  %s2651_s13 = inlined_call_operand.vmem [shape: bf16[32,32], index: 13, kind: input, shape index: {}]   ;;  %s2652_s14 = inlined_call_operand.hbm [shape: f32[1,32], index: 14, kind: input, shape index: {}]   ;;  %s2653_s15 = inlined_call_operand.vmem [shape: bf16[32,128], index: 15, kind: input, shape index: {}]   ;;  %s2654_s16 = inlined_call_operand.hbm [shape: f32[1,128], index: 16, kind: input, shape index: {}]   ;;  %s2655_s17 = inlined_call_operand.vmem [shape: bf16[128,32], index: 17, kind: input, shape index: {}]   ;;  %s2656_s18 = inlined_call_operand.hbm [shape: f32[1,32], index: 18, kind: input, shape index: {}]   ;;  %s2657_s19 = inlined_call_operand.vmem [shape: f32[2,4,4,32], index: 19, kind: output, shape index: {}]  }
   0x1   :  { %2661 = sst [smem:[#allocation22_spill]] %s2638_s0 }
   0x2   :  { %2662 = sst [smem:[#allocation23_spill]] %s2639_s1 }
   0x3   :  { %2663 = sst [smem:[#allocation24_spill]] %s2640_s2 }
   0x4   :  { %2664 = sst [smem:[#allocation25_spill]] %s2641_s3 }
   0x5   :  { %2665 = sst [smem:[#allocation26_spill]] %s2642_s4 }
   0x6   :  { %2666 = sst [smem:[#allocation27_spill]] %s2646_s8 }
   0x7   :  { %2667 = sst [smem:[#allocation28_spill]] %s2650_s12 }
   0x8   :  { %24 = vsyncpa [#allocation3], 0 }
   0x9   :  { %25 = vsyncpa [#allocation5], 0 }
   0xa   :  { %26 = vsyncpa [#allocation8], 0 }
   0xb   :  { %27 = vsyncpa [#allocation11], 0 }
   0xc   :  { %28 = vsyncpa [#allocation14], 0  ;;  %s2321_s0 = smov 0  }
   0xd LB: > { %2668 = sst [smem:[#allocation21_spill]] %s2210_s0  ;;  %s2330_s1 = sadd.s32 4294967295, %s2210_s0   ;;  %s2210_s0 = sphi %s2321_s0, %s34_s0  }
   0xe   : > { %s2669_s4 = sld [smem:[#allocation26_spill]]  ;;  %p1612_p0 = scmp.ge.s32.totalorder %s2210_s0, 1 }
   0xf   : > { %p469_p1 = scmp.lt.s32.totalorder %s2210_s0, 3  ;;  %p1845_p2 = scmp.eq.s32.totalorder %s2330_s1, 0 }
  0x10   : > { %s2212_s2 = smov [#allocation4]   ;;  %s2671_s8 = sld [smem:[#allocation27_spill]] }
  0x11   : > { %p2335_p3 = pnand %p1612_p0, %p469_p1  ;;  %s501_s23 = sshll.u32 %s2212_s2, 4  ;;  %s502_s23 = int_to_ptr.vmem [resolvable:$true] %s501_s23 }
  0x12   : > { %s2672_s12 = sld [smem:[#allocation28_spill]]  ;;  %s2213_s30 = smov [#allocation7]  }
  0x13   : > { %p1817_p4 = pneg %p2335_p3  ;;  %s531_s20 = sshll.u32 %s2213_s30, 4  ;;  %s532_s20 = int_to_ptr.vmem [resolvable:$true] %s531_s20 }
  0x14   : > { %s499_s21 = sshll.u32 %s2669_s4, 4  ;;  %s2214_s2 = smov [#allocation10]   ;;  %s500_s21 = int_to_ptr.hbm [resolvable:$true] %s499_s21 }
  0x15   : > { %p2349_p5 = pnand %p1845_p2, %p1817_p4  ;;  %s561_s24 = sshll.u32 %s2214_s2, 4  ;;  %s562_s24 = int_to_ptr.vmem [resolvable:$true] %s561_s24 }
  0x16   : > { %s529_s3 = sshll.u32 %s2671_s8, 4  ;;  %s589_s27 = sshll.u32 %s2654_s16, 4  ;;  %s530_s3 = int_to_ptr.hbm [resolvable:$true] %s529_s3  ;;  %s590_s27 = int_to_ptr.hbm [resolvable:$true] %s589_s27 }
  0x17   : > { %1823 = dma.hbm_to_vmem [thread:$0]  (!%p2349_p5), %s500_s21, 16, %s502_s23, [#allocation5]  }
  0x18   : > { %s559_s28 = sshll.u32 %s2672_s12, 4  ;;  %s2674_s8 = sld [smem:[#allocation24_spill]]  ;;  %s560_s28 = int_to_ptr.hbm [resolvable:$true] %s559_s28 }
  0x19   : > { %1829 = dma.hbm_to_vmem [thread:$0]  (!%p2349_p5), %s530_s3, 16, %s532_s20, [#allocation8]  }
  0x1a   : > { %1835 = dma.hbm_to_vmem [thread:$0]  (!%p2349_p5), %s560_s28, 16, %s562_s24, [#allocation11]  }
  0x1b   : > { %s2215_s0 = smov [#allocation13]   ;;  %s2216_s23 = smov [#allocation2]  }
  0x1c   : > { %s591_s21 = sshll.u32 %s2215_s0, 4  ;;  %s486_s3 = sshll.u32 %s2216_s23, 4  ;;  %s592_s21 = int_to_ptr.vmem [resolvable:$true] %s591_s21  ;;  %s487_s3 = int_to_ptr.vmem [resolvable:$true] %s486_s3 }
  0x1d   : > { %1841 = dma.hbm_to_vmem [thread:$0]  (!%p2349_p5), %s590_s27, 16, %s592_s21, [#allocation14]  }
  0x1e   : > { %s484_s12 = sshll.u32 %s2674_s8, 4  ;;  %s514_s25 = sshll.u32 %s2644_s6, 4  ;;  %s485_s12 = int_to_ptr.hbm [resolvable:$true] %s484_s12  ;;  %s515_s25 = int_to_ptr.hbm [resolvable:$true] %s514_s25 }
  0x1f   : > { %1820 = dma.hbm_to_vmem [thread:$0]  (!%p2349_p5), %s485_s12, 16, %s487_s3, [#allocation3]  }
  0x20   : > { %s544_s28 = sshll.u32 %s2648_s10, 4  ;;  %s2217_s0 = smov [#allocation6]   ;;  %s545_s28 = int_to_ptr.hbm [resolvable:$true] %s544_s28 }
  0x21   : > { %s516_s24 = sshll.u32 %s2217_s0, 4  ;;  %s2218_s26 = smov [#allocation9]   ;;  %s517_s24 = int_to_ptr.vmem [resolvable:$true] %s516_s24 }
  0x22   : > { %1826 = dma.hbm_to_vmem [thread:$0]  (!%p2349_p5), %s515_s25, 16, %s517_s24, [#allocation5]  }
  0x23   : > { %s546_s27 = sshll.u32 %s2218_s26, 4  ;;  %s574_s23 = sshll.u32 %s2652_s14, 4  ;;  %s547_s27 = int_to_ptr.vmem [resolvable:$true] %s546_s27  ;;  %s575_s23 = int_to_ptr.hbm [resolvable:$true] %s574_s23 }
  0x24   : > { %1832 = dma.hbm_to_vmem [thread:$0]  (!%p2349_p5), %s545_s28, 16, %s547_s27, [#allocation8]  }
  0x25   : > { %s604_s20 = sshll.u32 %s2656_s18, 4  ;;  %s2219_s2 = smov [#allocation12]   ;;  %s605_s20 = int_to_ptr.hbm [resolvable:$true] %s604_s20 }
  0x26   : > { %s576_s4 = sshll.u32 %s2219_s2, 4  ;;  %s2220_s25 = smov [#allocation15]   ;;  %s577_s4 = int_to_ptr.vmem [resolvable:$true] %s576_s4 }
  0x27   : > { %1838 = dma.hbm_to_vmem [thread:$0]  (!%p2349_p5), %s575_s23, 16, %s577_s4, [#allocation11]  }
  0x28   : > { %s606_s8 = sshll.u32 %s2220_s25, 4  ;;  %627 = sbr.rel (%p2335_p3) target bundleno = 1339 (0x53b), region = 96  ;;  %s607_s8 = int_to_ptr.vmem [resolvable:$true] %s606_s8 }
  0x29   : > { %1844 = dma.hbm_to_vmem [thread:$0]  (!%p2349_p5), %s605_s20, 16, %s607_s8, [#allocation14]  }
  0x2d   : > { %2189 = dma.done.wait (%p1845_p2), [#allocation3], 16  }
  0x2e   : > { %2191 = vsyncadd (%p1845_p2), [#allocation3], 4294967280 }
  0x2f   : > { %2193 = dma.done.wait (%p1845_p2), [#allocation5], 32  }
  0x30   : > { %2195 = vsyncadd (%p1845_p2), [#allocation5], 4294967264 }
  0x31   : > { %2197 = dma.done.wait (%p1845_p2), [#allocation8], 32  }
  0x32   : > { %2199 = vsyncadd (%p1845_p2), [#allocation8], 4294967264 }
  0x33   : > { %2201 = dma.done.wait (%p1845_p2), [#allocation11], 32  }
  0x34   : > { %2203 = vsyncadd (%p1845_p2), [#allocation11], 4294967264 }
  0x35   : > { %2205 = dma.done.wait (%p1845_p2), [#allocation14], 32  }
  0x36   : > { %2207 = vsyncadd (%p1845_p2), [#allocation14], 4294967264  ;;  %p724_p6 = scmp.lt.s32.totalorder %s2330_s1, 1  ;;  %s2675_s0 = sld [smem:[#allocation22_spill]]  ;;  %vm900_vm0 = vcmask 261120  }
  0x37   : > { %s2676_s30 = sld [smem:[#allocation25_spill]] }
  0x38   : > { %s2680_s1 = smov (!%p724_p6, %s2330_s1), 1  ;;  %s2677_s20 = sld [smem:[#allocation23_spill]] }
  0x39   : > { %s1780_s22 = smul.u32 48, %s2680_s1  ;;  %s1757_s23 = sshll.u32 %s2680_s1, 4 }
  0x3a   : > { %s733_s2 = scalar_lea.vmem %s2657_s19, %s1757_s23 }
  0x3c   : > { %s2419_s24 = scalar_lea.vmem %s2675_s0, %s1780_s22 }
  0x3d   : > { %v1759_v0 = vld [vmem:[%s2676_s30 + $0x8] sm:$0xff]  ;;  %v1758_v1 = vld [vmem:[%s2676_s30] sm:$0xff]  ;;  %v739_v5 = vld [vmem:[%s2419_s24 + $0x10] sm:$0xf] }
  0x3e   : > { %v735_v2 = vld [vmem:[%s2677_s20] sm:$0xff]  ;;  %v738_v4 = vld [vmem:[%s2419_s24 + $0x8] sm:$0xf]  ;;  %910 = vmatpush.bf16.msra.mxu0 %v1759_v0  ;;  %v740_v6 = vld [vmem:[%s2419_s24 + $0x18] sm:$0xf] }
  0x3f   : > { %v737_v3 = vld [vmem:[%s2419_s24] sm:$0xf]  ;;  %v741_v7 = vperm.slane %v735_v2, 0  ;;  %v754_v8 = vperm.slane %v735_v2, 1  ;;  %v751_v10 = vld [vmem:[%s2419_s24 + $0x9] sm:$0xf] }
  0x40   : > { %v750_v9 = vld [vmem:[%s2419_s24 + $0x1] sm:$0xf]  ;;  %v752_v11 = vld [vmem:[%s2419_s24 + $0x11] sm:$0xf]  ;;  %v753_v16 = vld [vmem:[%s2419_s24 + $0x19] sm:$0xf] }
  0x41   : > { %v742_v12 = vmul.f32 %v741_v7, %v737_v3  ;;  %v743_v13 = vmul.f32 %v741_v7, %v738_v4  ;;  %v744_v14 = vmul.f32 %v741_v7, %v739_v5  ;;  %v745_v15 = vmul.f32 %v741_v7, %v740_v6  ;;  %v763_v17 = vld [vmem:[%s2419_s24 + $0x2] sm:$0xf]  ;;  %v764_v18 = vld [vmem:[%s2419_s24 + $0xa] sm:$0xf]  ;;  %v765_v23 = vld [vmem:[%s2419_s24 + $0x12] sm:$0xf] }
  0x42   : > { %v755_v19 = vmul.f32 %v754_v8, %v750_v9  ;;  %v756_v20 = vmul.f32 %v754_v8, %v751_v10  ;;  %v757_v21 = vmul.f32 %v754_v8, %v752_v11  ;;  %v758_v22 = vmul.f32 %v754_v8, %v753_v16  ;;  %v766_v24 = vld [vmem:[%s2419_s24 + $0x1a] sm:$0xf]  ;;  %v1636_v25 = vld [vmem:[%s2419_s24 + $0x8] sm:$0xf]  ;;  %911 = vmatpush.bf16.msra.mxu0 %v1758_v1  ;;  %v1637_v27 = vld [vmem:[%s2419_s24 + $0x10] sm:$0xf] }
  0x43   : > { %v767_v26 = vperm.slane %v735_v2, 2  ;;  %v1638_v28 = vld [vmem:[%s2419_s24 + $0x18] sm:$0xf]  ;;  %v781_v29 = vperm.slane %v735_v2, 3  ;;  %v1639_v34 = vld [vmem:[%s2419_s24 + $0x20] sm:$0xf] }
  0x44   : > { %v759_v30 = vadd.f32 %v755_v19, %v742_v12  ;;  %v760_v31 = vadd.f32 %v756_v20, %v743_v13  ;;  %v761_v32 = vadd.f32 %v757_v21, %v744_v14  ;;  %v762_v33 = vadd.f32 %v758_v22, %v745_v15  ;;  %v2447_v39 = vld [vmem:[%s2419_s24 + $0x9] sm:$0xf]  ;;  %v2450_v44 = vld [vmem:[%s2419_s24 + $0x11] sm:$0xf]  ;;  %v2453_v45 = vld [vmem:[%s2419_s24 + $0x19] sm:$0xf] }
  0x45   : > { %v768_v35 = vmul.f32 %v767_v26, %v763_v17  ;;  %v769_v36 = vmul.f32 %v767_v26, %v764_v18  ;;  %v770_v37 = vmul.f32 %v767_v26, %v765_v23  ;;  %v771_v38 = vmul.f32 %v767_v26, %v766_v24  ;;  %v2456_v46 = vld [vmem:[%s2419_s24 + $0x21] sm:$0xf]  ;;  %v1644_v51 = vld [vmem:[%s2419_s24 + $0xa] sm:$0xf]  ;;  %v1645_v52 = vld [vmem:[%s2419_s24 + $0x12] sm:$0xf] }
  0x46   : > { %v782_v40 = vmul.f32 %v1636_v25, %v781_v29  ;;  %v783_v41 = vmul.f32 %v1637_v27, %v781_v29  ;;  %v784_v42 = vmul.f32 %v1638_v28, %v781_v29  ;;  %v785_v43 = vmul.f32 %v1639_v34, %v781_v29  ;;  %v1646_v53 = vld [vmem:[%s2419_s24 + $0x1a] sm:$0xf]  ;;  %v1647_v55 = vld [vmem:[%s2419_s24 + $0x22] sm:$0xf]  ;;  %v1648_v63 = vld [vmem:[%s2419_s24 + $0x10] sm:$0xf] }
  0x47   : > { %v772_v47 = vadd.f32 %v768_v35, %v759_v30  ;;  %v773_v48 = vadd.f32 %v769_v36, %v760_v31  ;;  %v774_v49 = vadd.f32 %v770_v37, %v761_v32  ;;  %v775_v50 = vadd.f32 %v771_v38, %v762_v33  ;;  %v1649_v0 = vld [vmem:[%s2419_s24 + $0x18] sm:$0xf]  ;;  %v1651_v6 = vld [vmem:[%s2419_s24 + $0x28] sm:$0xf]  ;;  %v1652_v7 = vld [vmem:[%s2419_s24 + $0x11] sm:$0xf] }
  0x48   : > { %v794_v54 = vperm.slane %v735_v2, 4  ;;  %v807_v56 = vperm.slane %v735_v2, 5  ;;  %v821_v57 = vperm.slane %v735_v2, 6  ;;  %v834_v58 = vperm.slane %v735_v2, 7  ;;  %v1650_v2 = vld [vmem:[%s2419_s24 + $0x20] sm:$0xf] }
  0x49   : > { %v786_v59 = vadd.f32 %v782_v40, %v772_v47  ;;  %v787_v60 = vadd.f32 %v783_v41, %v773_v48  ;;  %v788_v61 = vadd.f32 %v784_v42, %v774_v49  ;;  %v789_v62 = vadd.f32 %v785_v43, %v775_v50  ;;  %v1653_v12 = vld [vmem:[%s2419_s24 + $0x19] sm:$0xf]  ;;  %v1654_v13 = vld [vmem:[%s2419_s24 + $0x21] sm:$0xf]  ;;  %v1655_v14 = vld [vmem:[%s2419_s24 + $0x29] sm:$0xf] }
  0x4a   : > { %v795_v1 = vmul.f32 %v2447_v39, %v794_v54  ;;  %v796_v3 = vmul.f32 %v2450_v44, %v794_v54  ;;  %v797_v4 = vmul.f32 %v2453_v45, %v794_v54  ;;  %v798_v5 = vmul.f32 %v2456_v46, %v794_v54  ;;  %v1656_v19 = vld [vmem:[%s2419_s24 + $0x12] sm:$0xf]  ;;  %v1657_v20 = vld [vmem:[%s2419_s24 + $0x1a] sm:$0xf]  ;;  %v1658_v21 = vld [vmem:[%s2419_s24 + $0x22] sm:$0xf] }
  0x4b   : > { %v808_v8 = vmul.f32 %v1644_v51, %v807_v56  ;;  %v809_v9 = vmul.f32 %v1645_v52, %v807_v56  ;;  %v810_v10 = vmul.f32 %v1646_v53, %v807_v56  ;;  %v811_v11 = vmul.f32 %v1647_v55, %v807_v56  ;;  %v1659_v22 = vld [vmem:[%s2419_s24 + $0x2a] sm:$0xf]  ;;  %v1880_v27 = vld [vmem:[%s2677_s20 + $0x8] ss:$0 sm:$0xff] }
  0x4c   : > { %v799_v15 = vadd.f32 %v795_v1, %v786_v59  ;;  %v800_v16 = vadd.f32 %v796_v3, %v787_v60  ;;  %v801_v17 = vadd.f32 %v797_v4, %v788_v61  ;;  %v802_v18 = vadd.f32 %v798_v5, %v789_v62  ;;  %v1881_v52 = vld [vmem:[#allocation2] ss:$0 sm:$0xff]  ;;  %v1760_v1 = vld [vmem:[%s2643_s5] sm:$0xff]  ;;  %v1882_v3 = vld [vmem:[#allocation4] ss:$0 sm:$0xff] }
  0x4d   : > { %v822_v23 = vmul.f32 %v1648_v63, %v821_v57  ;;  %v823_v24 = vmul.f32 %v1649_v0, %v821_v57  ;;  %v824_v25 = vmul.f32 %v1650_v2, %v821_v57  ;;  %v825_v26 = vmul.f32 %v1651_v6, %v821_v57  ;;  %v1761_v0 = vld [vmem:[%s2643_s5 + $0x8] sm:$0xff] }
  0x4e   : > { %v812_v28 = vadd.f32 %v808_v8, %v799_v15  ;;  %v813_v29 = vadd.f32 %v809_v9, %v800_v16  ;;  %v814_v30 = vadd.f32 %v810_v10, %v801_v17  ;;  %v815_v31 = vadd.f32 %v811_v11, %v802_v18  ;;  %966 = vmatpush.bf16.msra.mxu1 %v1761_v0 }
  0x4f   : > { %v835_v32 = vmul.f32 %v1652_v7, %v834_v58  ;;  %v836_v33 = vmul.f32 %v1653_v12, %v834_v58  ;;  %v837_v34 = vmul.f32 %v1654_v13, %v834_v58  ;;  %v838_v35 = vmul.f32 %v1655_v14, %v834_v58 }
  0x50   : > { %v826_v36 = vadd.f32 %v822_v23, %v812_v28  ;;  %v827_v37 = vadd.f32 %v823_v24, %v813_v29  ;;  %v828_v38 = vadd.f32 %v824_v25, %v814_v30  ;;  %v829_v40 = vadd.f32 %v825_v26, %v815_v31  ;;  %v1763_v26 = vld [vmem:[%s2645_s7 + $0x8] sm:$0xff]  ;;  %v1762_v28 = vld [vmem:[%s2645_s7] sm:$0xff] }
  0x51   : > { %v848_v41 = vmul.f32 %v1880_v27, %v1656_v19  ;;  %v849_v42 = vmul.f32 %v1880_v27, %v1657_v20  ;;  %v850_v43 = vmul.f32 %v1880_v27, %v1658_v21  ;;  %v851_v47 = vmul.f32 %v1880_v27, %v1659_v22  ;;  %v1765_v27 = vld [vmem:[%s2647_s9 + $0x8] sm:$0xff]  ;;  %1029 = vmatpush.bf16.msra.mxu2 %v1763_v26  ;;  %v1764_v29 = vld [vmem:[%s2647_s9] sm:$0xff] }
  0x52   : > { %v839_v48 = vadd.f32 %v835_v32, %v826_v36  ;;  %v840_v49 = vadd.f32 %v836_v33, %v827_v37  ;;  %v841_v50 = vadd.f32 %v837_v34, %v828_v38  ;;  %v842_v51 = vadd.f32 %v838_v35, %v829_v40  ;;  %967 = vmatpush.bf16.msra.mxu1 %v1760_v1  ;;  %v1883_v30 = vld [vmem:[#allocation6] ss:$0 sm:$0xff] }
  0x53   : > { %1063 = vmatpush.bf16.msra.mxu3 %v1765_v27 }
  0x54   : > { %v852_v53 = vadd.f32 %v848_v41, %v839_v48  ;;  %v853_v54 = vadd.f32 %v849_v42, %v840_v49  ;;  %v854_v55 = vadd.f32 %v850_v43, %v841_v50  ;;  %v855_v56 = vadd.f32 %v851_v47, %v842_v51  ;;  %v1884_v43 = vld [vmem:[#allocation7] ss:$0 sm:$0xff]  ;;  %v1885_v47 = vld [vmem:[#allocation9] ss:$0 sm:$0xff] }
  0x55   : > { %1030 = vmatpush.bf16.msra.mxu2 %v1762_v28 }
  0x56   : > { %v860_v57 = vadd.f32 %v1881_v52, %v852_v53  ;;  %v861_v59 = vadd.f32 %v1881_v52, %v853_v54  ;;  %v862_v58 = vadd.f32 %v1881_v52, %v854_v55  ;;  %v863_v60 = vadd.f32 %v1881_v52, %v855_v56 }
  0x57   : > { %1064 = vmatpush.bf16.msra.mxu3 %v1764_v29 }
  0x58   : > { %868 = vst [vmem:[#allocation1] ss:$2 sm:$0xff] %v860_v57 }
  0x59   : > { %870 = vst [vmem:[#allocation1 + $0x1] ss:$2 sm:$0xff] %v861_v59 }
  0x5a   : > { %872 = vst [vmem:[#allocation1 + $0x10] ss:$2 sm:$0xff] %v862_v58 }
  0x5b   : > { %874 = vst [vmem:[#allocation1 + $0x11] ss:$2 sm:$0xff] %v863_v60 }
  0x60   : > { %v875_v61 = vld.sshfl [vmem:[#allocation1] sm:$0xff pattern:$0x75316420] }
  0x62   : > { %v876_v62 = vld.sshfl [vmem:[#allocation1 + $0x10] sm:$0xff pattern:$0x75316420] }
  0x63   : > { %v879_v63 = vpack.c.bf16 %v876_v62, %v875_v61 }
  0x65   : > { %1668 = vmatmul.msk.bf16.vlgmr.msra.gmra.mxu0 %vm900_vm0, %v879_v63 }
  0xe2   : > { %v913_v4 = vpop.f32.mrf.mxu0 }
  0xe3   : > { %v914_v5 = vadd.f32 %v1882_v3, %v913_v4 }
  0xe5   : > { %v918_v2 = vmul.f32 %v914_v5, %v914_v5 }
  0xe7   : > { %v920_v6 = vmul.f32 %v918_v2, %v914_v5 }
  0xe9   : > { %v922_v7 = vmul.f32 0.044715, %v920_v6 }
  0xea   : > { %v915_v8 = vpop.f32.mrf.mxu0 }
  0xeb   : > { %v924_v9 = vadd.f32 %v922_v7, %v914_v5  ;;  %v916_v10 = vadd.f32 %v1882_v3, %v915_v8 }
  0xed   : > { %v926_v11 = vmul.f32 0.7978846, %v924_v9  ;;  %v919_v12 = vmul.f32 %v916_v10, %v916_v10  ;;  %v1767_v9 = vld [vmem:[%s2649_s11 + $0x8] sm:$0xff] }
  0xee   : > { %1240 = vmatpush.bf16.msrb.mxu0 %v1767_v9 }
  0xef   : > { %v921_v13 = vmul.f32 %v919_v12, %v916_v10  ;;  %1890 = vtanh.f32 %v926_v11  ;;  %v1766_v12 = vld [vmem:[%s2649_s11] sm:$0xff] }
  0xf1   : > { %v923_v14 = vmul.f32 0.044715, %v921_v13 }
  0xf2   : > { %1241 = vmatpush.bf16.msrb.mxu0 %v1766_v12 }
  0xf3   : > { %v925_v15 = vadd.f32 %v923_v14, %v916_v10 }
  0xf5   : > { %v927_v16 = vmul.f32 0.7978846, %v925_v15  ;;  %v1891_v17 = vpop.eup %1890 }
  0xf6   : > { %v930_v18 = vadd.f32 1.0, %v1891_v17 }
  0xf7   : > { %1892 = vtanh.f32 %v927_v16 }
  0xf8   : > { %v932_v21 = vmul.f32 0.5, %v930_v18 }
  0xfa   : > { %v934_v23 = vmul.f32 %v932_v21, %v914_v5 }
  0xfd   : > { %v1893_v19 = vpop.eup %1892 }
  0xfe   : > { %v931_v20 = vadd.f32 1.0, %v1893_v19 }
 0x100   : > { %v933_v22 = vmul.f32 0.5, %v931_v20 }
 0x102   : > { %v935_v24 = vmul.f32 %v933_v22, %v916_v10 }
 0x104   : > { %v936_v25 = vpack.c.bf16 %v935_v24, %v934_v23 }
 0x106   : > { %1677 = vmatmul.msk.bf16.vlgmr.msra.gmra.mxu1 %vm900_vm0, %v936_v25 }
 0x183   : > { %v969_v31 = vpop.f32.mrf.mxu1 }
 0x184   : > { %v970_v32 = vadd.f32 %v1883_v30, %v969_v31 }
 0x186   : > { %v976_v33 = vrot.slane %v970_v32, 4  ;;  %v2502_v34 = vadd.f32 %v2447_v39, %v970_v32 }
 0x188   : > { %v2505_v35 = vadd.f32 %v2450_v44, %v976_v33  ;;  %988 = vst [vmem:[#allocation1] ss:$2 sm:$0xff] %v2502_v34 }
 0x18a   : > { %990 = vst [vmem:[#allocation1 + $0x1] ss:$2 sm:$0xff] %v2505_v35 }
 0x18b   : > { %v971_v36 = vpop.f32.mrf.mxu1 }
 0x18c   : > { %v972_v37 = vadd.f32 %v1883_v30, %v971_v36 }
 0x18e   : > { %v977_v38 = vrot.slane %v972_v37, 4  ;;  %v2510_v40 = vadd.f32 %v2453_v45, %v972_v37 }
 0x190   : > { %v2513_v41 = vadd.f32 %v2456_v46, %v977_v38  ;;  %992 = vst [vmem:[#allocation1 + $0x10] ss:$2 sm:$0xff] %v2510_v40 }
 0x191   : > { %v995_v39 = vld.sshfl [vmem:[#allocation1] sm:$0xff pattern:$0x75316420] }
 0x192   : > { %994 = vst [vmem:[#allocation1 + $0x11] ss:$2 sm:$0xff] %v2513_v41 }
 0x199   : > { %v996_v44 = vld.sshfl [vmem:[#allocation1 + $0x10] sm:$0xff pattern:$0x75316420] }
 0x19a   : > { %v999_v42 = vpack.c.bf16 %v996_v44, %v995_v39 }
 0x19c   : > { %1686 = vmatmul.msk.bf16.vlgmr.msra.gmra.mxu2 %vm900_vm0, %v999_v42  ;;  %1695 = vmatmul.msk.bf16.vlgmr.msra.gmra.mxu3 %vm900_vm0, %v999_v42 }
 0x21f   : > { %v1032_v48 = vpop.f32.mrf.mxu2  ;;  %v1066_v49 = vpop.f32.mrf.mxu3 }
 0x220   : > { %v2519_v45 = vadd.f32 %v1884_v43, %v1032_v48  ;;  %v2521_v50 = vadd.f32 %v1885_v47, %v1066_v49 }
 0x222   : > { %v1135_v46 = vmul.f32 %v2521_v50, %v2521_v50  ;;  %v1071_v51 = vmul.f32 %v2519_v45, %v2519_v45 }
 0x224   : > { %v1137_v52 = vsel %vm900_vm0, %v1135_v46, 0.0  ;;  %v1073_v53 = vsel %vm900_vm0, %v1071_v51, 0.0 }
 0x225   : > { %1138 = vadd.xlane.f32.xlu1 %v1137_v52  ;;  %1074 = vadd.xlane.f32.xlu0 %v1073_v53 }
 0x227   : > { %v1034_v54 = vpop.f32.mrf.mxu2  ;;  %v1068_v55 = vpop.f32.mrf.mxu3 }
 0x228   : > { %v2529_v56 = vadd.f32 %v1884_v43, %v1034_v54  ;;  %v2531_v57 = vadd.f32 %v1885_v47, %v1068_v55 }
 0x22a   : > { %v1136_v59 = vmul.f32 %v2531_v57, %v2531_v57  ;;  %v1072_v58 = vmul.f32 %v2529_v56, %v2529_v56 }
 0x22c   : > { %v1140_v60 = vsel %vm900_vm0, %v1136_v59, 0.0  ;;  %v1076_v61 = vsel %vm900_vm0, %v1072_v58, 0.0 }
 0x22d   : > { %1141 = vadd.xlane.f32.xlu1 %v1140_v60  ;;  %1077 = vadd.xlane.f32.xlu0 %v1076_v61 }
 0x298   : > { %v1139_v62 = vpop.xlane.xlu1 %1138  ;;  %v1075_v63 = vpop.xlane.xlu0 %1074 }
 0x299   : > { %1894 = vrsqrt.f32 %v1139_v62  ;;  %vm1086_vm1 = vcmp.eq.f32.partialorder %v1075_v63, inf  ;;  %v1089_v24 = vand.u32 2147483648, %v1075_v63  ;;  %vm1150_vm2 = vcmp.eq.f32.partialorder %v1139_v62, inf }
 0x29a   : > { %1896 = vrsqrt.f32 %v1075_v63  ;;  %vm1088_vm3 = vcmp.eq.f32.partialorder %v1075_v63, 0.0  ;;  %v1153_v31 = vand.u32 2147483648, %v1139_v62  ;;  %vm1152_vm4 = vcmp.eq.f32.partialorder %v1139_v62, 0.0 }
 0x29f   : > { %v1895_v0 = vpop.eup %1894 }
 0x2a0   : > { %v1897_v1 = vpop.eup %1896  ;;  %v1144_v3 = vmul.f32 %v1895_v0, %v1139_v62  ;;  %v1142_v4 = vpop.xlane.xlu1 %1141 }
 0x2a1   : > { %v1078_v5 = vpop.xlane.xlu0 %1077  ;;  %v1080_v2 = vmul.f32 %v1897_v1, %v1075_v63  ;;  %1898 = vrsqrt.f32 %v1142_v4  ;;  %vm1162_vm5 = vcmp.eq.f32.partialorder %v1142_v4, inf  ;;  %vm1164_vm6 = vcmp.eq.f32.partialorder %v1142_v4, 0.0 }
 0x2a2   : > { %v1145_v6 = vmul.f32 %v1895_v0, %v1144_v3  ;;  %1900 = vrsqrt.f32 %v1078_v5  ;;  %v1165_v44 = vand.u32 2147483648, %v1142_v4  ;;  %vm1098_vm7 = vcmp.eq.f32.partialorder %v1078_v5, inf }
 0x2a3   : > { %v1081_v7 = vmul.f32 %v1897_v1, %v1080_v2  ;;  %v1101_v48 = vand.u32 2147483648, %v1078_v5  ;;  %vm1100_vm8 = vcmp.eq.f32.partialorder %v1078_v5, 0.0 }
 0x2a4   : > { %v1146_v8 = vmul.f32 0.5, %v1145_v6 }
 0x2a5   : > { %v1082_v10 = vmul.f32 0.5, %v1081_v7 }
 0x2a6   : > { %v1147_v11 = vsub.f32 1.5, %v1146_v8 }
 0x2a7   : > { %v1899_v13 = vpop.eup %1898  ;;  %v1083_v14 = vsub.f32 1.5, %v1082_v10 }
 0x2a8   : > { %v1901_v15 = vpop.eup %1900  ;;  %v1148_v16 = vmul.f32 %v1895_v0, %v1147_v11  ;;  %v1156_v17 = vmul.f32 %v1899_v13, %v1142_v4  ;;  %v1769_v0 = vld [vmem:[%s2651_s13 + $0x8] sm:$0xff] }
 0x2a9   : > { %v1084_v18 = vmul.f32 %v1897_v1, %v1083_v14  ;;  %v1092_v19 = vmul.f32 %v1901_v15, %v1078_v5  ;;  %1280 = vmatpush.bf16.msrb.mxu1 %v1769_v0  ;;  %v1887_v0 = vld [vmem:[#allocation12] ss:$0 sm:$0xff] }
 0x2aa   : > { %v1149_v20 = vmul.f32 %v1148_v16, %v1139_v62  ;;  %v1157_v21 = vmul.f32 %v1899_v13, %v1156_v17 }
 0x2ab   : > { %v1085_v22 = vmul.f32 %v1084_v18, %v1075_v63  ;;  %v1093_v23 = vmul.f32 %v1901_v15, %v1092_v19 }
 0x2ac   : > { %v1158_v25 = vmul.f32 0.5, %v1157_v21  ;;  %v1151_v28 = vsel %vm1150_vm2, %v1139_v62, %v1149_v20 }
 0x2ad   : > { %v1087_v26 = vsel %vm1086_vm1, %v1075_v63, %v1085_v22  ;;  %v1094_v27 = vmul.f32 0.5, %v1093_v23  ;;  %v1154_v37 = vsel %vm1152_vm4, %v1153_v31, %v1151_v28 }
 0x2ae   : > { %v1090_v29 = vsel %vm1088_vm3, %v1089_v24, %v1087_v26  ;;  %v1159_v30 = vsub.f32 1.5, %v1158_v25  ;;  %v2545_v43 = vmax.f32 %v1154_v37, 1e-12 }
 0x2af   : > { %v1103_v32 = vmax.f32 %v1090_v29, 1e-12  ;;  %v1095_v33 = vsub.f32 1.5, %v1094_v27 }
 0x2b0   : > { %v1160_v36 = vmul.f32 %v1899_v13, %v1159_v30  ;;  %vm1174_vm4 = vweird.f32 %v2545_v43  ;;  %v1180_v28 = vand.u32 2147483648, %v2545_v43  ;;  %v1178_v29 = vand.u32 2147483647, %v2545_v43 }
 0x2b1   : > { %1902 = vrcp.f32 %v1103_v32  ;;  %v1096_v38 = vmul.f32 %v1901_v15, %v1095_v33  ;;  %v1116_v63 = vand.u32 2147483648, %v1103_v32  ;;  %vm1110_vm10 = vweird.f32 %v1103_v32 }
 0x2b2   : > { %v1161_v39 = vmul.f32 %v1160_v36, %v1142_v4  ;;  %1904 = vrcp.f32 %v2545_v43  ;;  %v1181_v37 = vor.u32 1.1754944e-38, %v1180_v28 }
 0x2b3   : > { %v1097_v42 = vmul.f32 %v1096_v38, %v1078_v5  ;;  %v1117_v6 = vor.u32 1.1754944e-38, %v1116_v63  ;;  %v1770_v63 = vld [vmem:[%s2653_s15] sm:$0xff] }
 0x2b4   : > { %v1163_v47 = vsel %vm1162_vm5, %v1142_v4, %v1161_v39  ;;  %v1114_v4 = vand.u32 2147483647, %v1103_v32 }
 0x2b5   : > { %v1166_v49 = vsel %vm1164_vm6, %v1165_v44, %v1163_v47  ;;  %v1099_v46 = vsel %vm1098_vm7, %v1078_v5, %v1097_v42 }
 0x2b6   : > { %v2547_v51 = vmax.f32 %v1166_v49, 1e-12  ;;  %v1102_v52 = vsel %vm1100_vm8, %v1101_v48, %v1099_v46  ;;  %vm1115_vm12 = vcmp.eq.f32.partialorder %v1114_v4, 8.507059e+37  ;;  %vm1179_vm8 = vcmp.eq.f32.partialorder %v1178_v29, 8.507059e+37 }
 0x2b7   : > { %v1903_v53 = vpop.eup %1902  ;;  %v1104_v54 = vmax.f32 %v1102_v52, 1e-12 }
 0x2b8   : > { %v1106_v55 = vmul.f32 %v1903_v53, %v1103_v32  ;;  %v2551_v60 = vpop.eup %1904  ;;  %vm1111_vm9 = vweird.f32 %v1903_v53  ;;  %vm1189_vm6 = vweird.f32 %v2547_v51  ;;  %v1193_v30 = vand.u32 2147483647, %v2547_v51 }
 0x2b9   : > { %1906 = vrcp.f32 %v1104_v54  ;;  %vm1112_vm11 = vmor %vm1110_vm10, %vm1111_vm9  ;;  %v1131_v7 = vand.u32 2147483648, %v1104_v54  ;;  %v1170_v8 = vmul.f32 %v2551_v60, %v2545_v43  ;;  %v1129_v11 = vand.u32 2147483647, %v1104_v54 }
 0x2ba   : > { %v1107_v59 = vsub.f32 1.0, %v1106_v55  ;;  %1908 = vrcp.f32 %v2547_v51  ;;  %vm1125_vm14 = vweird.f32 %v1104_v54  ;;  %vm1175_vm2 = vweird.f32 %v2551_v60  ;;  %v1886_v55 = vld [vmem:[#allocation10] ss:$0 sm:$0xff] }
 0x2bb   : > { %v1132_v14 = vor.u32 1.1754944e-38, %v1131_v7  ;;  %v1171_v15 = vsub.f32 1.0, %v1170_v8  ;;  %vm1130_vm1 = vcmp.eq.f32.partialorder %v1129_v11, 8.507059e+37  ;;  %vm1176_vm5 = vmor %vm1174_vm4, %vm1175_vm2  ;;  %vm1194_vm9 = vcmp.eq.f32.partialorder %v1193_v30, 8.507059e+37 }
 0x2bc   : > { %v1108_v58 = vmul.f32 %v1903_v53, %v1107_v59 }
 0x2bd   : > { %v1172_v21 = vmul.f32 %v2551_v60, %v1171_v15  ;;  %v1774_v15 = vld [vmem:[%s2655_s17 + $0x10] sm:$0xff] }
 0x2be   : > { %v1109_v61 = vadd.f32 %v1903_v53, %v1108_v58 }
 0x2bf   : > { %v1907_v62 = vpop.eup %1906  ;;  %v1173_v26 = vadd.f32 %v2551_v60, %v1172_v21 }
 0x2c0   : > { %v1909_v1 = vpop.eup %1908  ;;  %v1121_v3 = vmul.f32 %v1907_v62, %v1104_v54  ;;  %v1113_v2 = vsel %vm1112_vm11, %v1903_v53, %v1109_v61  ;;  %vm1126_vm13 = vweird.f32 %v1907_v62  ;;  %v1768_v53 = vld [vmem:[%s2651_s13] sm:$0xff] }
 0x2c1   : > { %v1185_v9 = vmul.f32 %v1909_v1, %v2547_v51  ;;  %v1118_v12 = vsel %vm1115_vm12, %v1117_v6, %v1113_v2  ;;  %vm1127_vm15 = vmor %vm1125_vm14, %vm1126_vm13  ;;  %vm1190_vm3 = vweird.f32 %v1909_v1  ;;  %v1177_v32 = vsel %vm1176_vm5, %v2551_v60, %v1173_v26  ;;  %1281 = vmatpush.bf16.msrb.mxu1 %v1768_v53 }
 0x2c2   : > { %v1122_v5 = vsub.f32 1.0, %v1121_v3  ;;  %v1119_v17 = vmul.f32 %v1118_v12, %v2519_v45  ;;  %vm1191_vm7 = vmor %vm1189_vm6, %vm1190_vm3  ;;  %v1182_v44 = vsel %vm1179_vm8, %v1181_v37, %v1177_v32  ;;  %v1779_v12 = vld [vmem:[%s2655_s17 + $0x38] sm:$0xff] }
 0x2c3   : > { %v1186_v16 = vsub.f32 1.0, %v1185_v9  ;;  %v1183_v43 = vmul.f32 %v1182_v44, %v2521_v50  ;;  %1438 = vmatpush.bf16.msrb.mxu3 %v1779_v12 }
 0x2c4   : > { %v1123_v10 = vmul.f32 %v1907_v62, %v1122_v5  ;;  %v1199_v23 = vsel %vm900_vm0, %v1119_v17, 0.0 }
 0x2c5   : > { %v1187_v22 = vmul.f32 %v1909_v1, %v1186_v16  ;;  %v1773_v16 = vld [vmem:[%s2655_s17 + $0x8] sm:$0xff] }
 0x2c6   : > { %v1124_v13 = vadd.f32 %v1907_v62, %v1123_v10 }
 0x2c7   : > { %v1188_v27 = vadd.f32 %v1909_v1, %v1187_v22 }
 0x2c8   : > { %v1128_v18 = vsel %vm1127_vm15, %v1907_v62, %v1124_v13  ;;  %v1776_v13 = vld [vmem:[%s2655_s17 + $0x20] sm:$0xff] }
 0x2c9   : > { %v1133_v19 = vsel %vm1130_vm1, %v1132_v14, %v1128_v18  ;;  %v1192_v33 = vsel %vm1191_vm7, %v1909_v1, %v1188_v27  ;;  %v1775_v14 = vld [vmem:[%s2655_s17 + $0x18] sm:$0xff]  ;;  %v1772_v18 = vld [vmem:[%s2655_s17] sm:$0xff] }
 0x2ca   : > { %v1134_v20 = vmul.f32 %v1133_v19, %v2529_v56  ;;  %v1195_v56 = vand.u32 2147483648, %v2547_v51 }
 0x2cc   : > { %v1200_v24 = vsel %vm900_vm0, %v1134_v20, 0.0  ;;  %v1196_v38 = vor.u32 1.1754944e-38, %v1195_v56 }
 0x2cd   : > { %v1201_v25 = vadd.f32 %v1200_v24, %v1199_v23 }
 0x2ce   : > { %v1197_v42 = vsel %vm1194_vm9, %v1196_v38, %v1192_v33 }
 0x2cf   : > { %v1202_v45 = vrot.slane %v1201_v25, 4  ;;  %v1198_v48 = vmul.f32 %v1197_v42, %v2531_v57  ;;  %v1771_v57 = vld [vmem:[%s2653_s15 + $0x8] sm:$0xff] }
 0x2d0   : > { %1343 = vmatpush.bf16.msrb.mxu2 %v1771_v57 }
 0x2d1   : > { %v1203_v31 = vadd.f32 %v1202_v45, %v1201_v25 }
 0x2d3   : > { %v1204_v36 = vrot.slane %v1203_v31, 2 }
 0x2d4   : > { %1344 = vmatpush.bf16.msrb.mxu2 %v1770_v63 }
 0x2d5   : > { %v1205_v39 = vadd.f32 %v1204_v36, %v1203_v31 }
 0x2d7   : > { %v1206_v47 = vrot.slane %v1205_v39, 1 }
 0x2d9   : > { %v1207_v49 = vadd.f32 %v1206_v47, %v1205_v39  ;;  %v1889_v47 = vld [vmem:[#allocation15] ss:$0 sm:$0xff] }
 0x2db   : > { %v1208_v46 = vmul.f32 %v1207_v49, %v1183_v43  ;;  %v1209_v51 = vmul.f32 %v1207_v49, %v1198_v48 }
 0x2dd   : > { %v1210_v52 = vpack.c.bf16 %v1209_v51, %v1208_v46 }
 0x2df   : > { %1704 = vmatmul.msk.bf16.vlgmr.msrb.gmra.mxu0 %vm900_vm0, %v1210_v52 }
 0x35c   : > { %v1243_v54 = vpop.f32.mrf.mxu0 }
 0x35d   : > { %v1244_v59 = vadd.f32 %v1886_v55, %v1243_v54 }
 0x35f   : > { %v1248_v61 = vadd.f32 %v1244_v59, %v1119_v17  ;;  %v1888_v17 = vld [vmem:[#allocation13] ss:$0 sm:$0xff] }
 0x364   : > { %v1245_v58 = vpop.f32.mrf.mxu0 }
 0x365   : > { %v1246_v60 = vadd.f32 %v1886_v55, %v1245_v58 }
 0x367   : > { %v1249_v50 = vadd.f32 %v1246_v60, %v1134_v20 }
 0x369   : > { %v1250_v62 = vpack.c.bf16 %v1249_v50, %v1248_v61 }
 0x36b   : > { %1713 = vmatmul.msk.bf16.vlgmr.msrb.gmra.mxu1 %vm900_vm0, %v1250_v62 }
 0x3e8   : > { %v1283_v1 = vpop.f32.mrf.mxu1 }
 0x3e9   : > { %v1284_v3 = vadd.f32 %v1887_v0, %v1283_v1 }
 0x3eb   : > { %v1290_v4 = vrot.slane %v1284_v3, 4  ;;  %v2587_v5 = vadd.f32 %v1284_v3, %v2502_v34 }
 0x3ed   : > { %v2590_v2 = vadd.f32 %v1290_v4, %v2505_v35  ;;  %1302 = vst [vmem:[#allocation1] ss:$2 sm:$0xff] %v2587_v5 }
 0x3ef   : > { %1304 = vst [vmem:[#allocation1 + $0x1] ss:$2 sm:$0xff] %v2590_v2 }
 0x3f0   : > { %v1285_v6 = vpop.f32.mrf.mxu1 }
 0x3f1   : > { %v1286_v7 = vadd.f32 %v1887_v0, %v1285_v6 }
 0x3f3   : > { %v1291_v8 = vrot.slane %v1286_v7, 4  ;;  %v2595_v9 = vadd.f32 %v1286_v7, %v2510_v40  ;;  %v1778_v40 = vld [vmem:[%s2655_s17 + $0x30] sm:$0xff] }
 0x3f4   : > { %1439 = vmatpush.bf16.msrb.mxu3 %v1778_v40 }
 0x3f5   : > { %v2598_v10 = vadd.f32 %v1291_v8, %v2513_v41  ;;  %1306 = vst [vmem:[#allocation1 + $0x10] ss:$2 sm:$0xff] %v2595_v9  ;;  %v1777_v41 = vld [vmem:[%s2655_s17 + $0x28] sm:$0xff] }
 0x3f6   : > { %v1309_v34 = vld.sshfl [vmem:[#allocation1] sm:$0xff pattern:$0x75316420] }
 0x3f7   : > { %1308 = vst [vmem:[#allocation1 + $0x11] ss:$2 sm:$0xff] %v2598_v10 }
 0x3f8   : > { %1440 = vmatpush.bf16.msrb.mxu3 %v1777_v41 }
 0x3fc   : > { %1441 = vmatpush.bf16.msrb.mxu3 %v1776_v13 }
 0x3fe   : > { %v1310_v35 = vld.sshfl [vmem:[#allocation1 + $0x10] sm:$0xff pattern:$0x75316420] }
 0x3ff   : > { %v1313_v11 = vpack.c.bf16 %v1310_v35, %v1309_v34 }
 0x400   : > { %1442 = vmatpush.bf16.msrb.mxu3 %v1775_v14 }
 0x401   : > { %1722 = vmatmul.msk.bf16.vlgmr.msrb.gmra.mxu2 %vm900_vm0, %v1313_v11  ;;  %vm1462_vm0 = vcmask 257024  }
 0x404   : > { %1443 = vmatpush.bf16.msrb.mxu3 %v1774_v15 }
 0x408   : > { %1444 = vmatpush.bf16.msrb.mxu3 %v1773_v16 }
 0x40c   : > { %1445 = vmatpush.bf16.msrb.mxu3 %v1772_v18 }
 0x484   : > { %v1346_v19 = vpop.f32.mrf.mxu2 }
 0x485   : > { %v1347_v20 = vadd.f32 %v1888_v17, %v1346_v19 }
 0x487   : > { %v1351_v21 = vmul.f32 %v1347_v20, %v1347_v20 }
 0x489   : > { %v1353_v22 = vmul.f32 %v1351_v21, %v1347_v20 }
 0x48b   : > { %v1355_v23 = vmul.f32 0.044715, %v1353_v22 }
 0x48c   : > { %v1348_v24 = vpop.f32.mrf.mxu2 }
 0x48d   : > { %v1357_v25 = vadd.f32 %v1355_v23, %v1347_v20  ;;  %v1349_v26 = vadd.f32 %v1888_v17, %v1348_v24 }
 0x48f   : > { %v1359_v27 = vmul.f32 0.7978846, %v1357_v25  ;;  %v1352_v45 = vmul.f32 %v1349_v26, %v1349_v26 }
 0x491   : > { %v1354_v28 = vmul.f32 %v1352_v45, %v1349_v26  ;;  %1910 = vtanh.f32 %v1359_v27 }
 0x493   : > { %v1356_v56 = vmul.f32 0.044715, %v1354_v28 }
 0x495   : > { %v1358_v29 = vadd.f32 %v1356_v56, %v1349_v26 }
 0x497   : > { %v1360_v30 = vmul.f32 0.7978846, %v1358_v29  ;;  %v1911_v31 = vpop.eup %1910 }
 0x498   : > { %v1363_v32 = vadd.f32 1.0, %v1911_v31 }
 0x499   : > { %1912 = vtanh.f32 %v1360_v30 }
 0x49a   : > { %v1365_v37 = vmul.f32 0.5, %v1363_v32 }
 0x49c   : > { %v1367_v39 = vmul.f32 %v1365_v37, %v1347_v20 }
 0x49f   : > { %v1913_v33 = vpop.eup %1912 }
 0x4a0   : > { %v1364_v36 = vadd.f32 1.0, %v1913_v33 }
 0x4a2   : > { %v1366_v38 = vmul.f32 0.5, %v1364_v36 }
 0x4a4   : > { %v1368_v44 = vmul.f32 %v1366_v38, %v1349_v26 }
 0x4a6   : > { %v1369_v42 = vpack.c.bf16 %v1368_v44, %v1367_v39 }
 0x4a8   : > { %1446 = vmatmul.bf16.vlgmr.msrb.gmra.mxu3 %v1369_v42 }
 0x52b   : > { %v1447_v43 = vpop.f32.mrf.mxu3 }
 0x52c   : > { %v1448_v48 = vadd.f32 %v1889_v47, %v1447_v43 }
 0x52e   : > { %v1454_v49 = vrot.slane %v1448_v48, 4  ;;  %v1458_v46 = vadd.f32 %v1448_v48, %v2587_v5 }
 0x530   : > { %v1459_v51 = vadd.f32 %v1454_v49, %v2590_v2  ;;  %1463 = vst.msk [vmem:[%s733_s2] sm:$0xf] %vm1462_vm0, %v1458_v46 }
 0x532   : > { %1464 = vst.msk [vmem:[%s733_s2 + $0x4] sm:$0xf] %vm1462_vm0, %v1459_v51 }
 0x533   : > { %v1449_v52 = vpop.f32.mrf.mxu3 }
 0x534   : > { %v1450_v53 = vadd.f32 %v1889_v47, %v1449_v52 }
 0x536   : > { %v1455_v54 = vrot.slane %v1450_v53, 4  ;;  %v1460_v55 = vadd.f32 %v1450_v53, %v2595_v9 }
 0x538   : > { %v1461_v59 = vadd.f32 %v1455_v54, %v2598_v10  ;;  %1465 = vst.msk [vmem:[%s733_s2 + $0x8] sm:$0xf] %vm1462_vm0, %v1460_v55 }
 0x53a   : > { %1466 = vst.msk [vmem:[%s733_s2 + $0xc] sm:$0xf] %vm1462_vm0, %v1461_v59 }
 0x53b PF: > { %s2678_s1 = sld [smem:[#allocation21_spill]] }
 0x541   : > { %s34_s0 = sadd.s32 1, %s2678_s1  }
 0x542   : > { %p31_p7 = scmp.ge.s32.totalorder %s34_s0, 4  }
 0x544   :  { %33 = sbr.rel (!%p31_p7) target bundleno = 13 (0xd), region = 174 }
 0x549   :  { %1488 = vsyncpa [#allocation3], 1 }
 0x54a   :  { %1490 = vsyncpa [#allocation3 + $0x1], 1 }
 0x54b   :  { %1491 = vsyncpa [#allocation5], 1 }
 0x54c   :  { %1492 = vsyncpa [#allocation8], 1 }
 0x54d   :  { %1493 = vsyncpa [#allocation11], 1 }
 0x54e   :  { %1494 = vsyncpa [#allocation14], 1 }

// kernel: swiftformer_classifier_forward.17
= control target key start
LH: loop header
LB: loop body
LE: loop exit
PB: predicated region body
PF: predicated region fallthrough
CT: control target
= control target key end

     0   :  { %10 = vsyncpa [#allocation3], 0  ;;  %s457_s0 = inlined_call_operand.vmem [shape: f32[2,16,32], index: 0, kind: input, shape index: {}]   ;;  %s458_s1 = inlined_call_operand.hbm [shape: f32[1,32], index: 1, kind: input, shape index: {}]   ;;  %s459_s2 = inlined_call_operand.hbm [shape: f32[1,32], index: 2, kind: input, shape index: {}]   ;;  %s460_s3 = inlined_call_operand.vmem [shape: f32[32,256], index: 3, kind: input, shape index: {}]   ;;  %s461_s4 = inlined_call_operand.vmem [shape: f32[1,256], index: 4, kind: input, shape index: {}]   ;;  %s462_s5 = inlined_call_operand.hbm [shape: f32[2,256], index: 5, kind: output, shape index: {}]  }
   0x1   :  { %11 = vsyncpa [#allocation6], 0 }
   0x2   :  { %12 = vsyncpa [#allocation4], 0  ;;  %s20_s20 = sshll.u32 %s458_s1, 4  ;;  %s362_s21 = smov [#allocation2]   ;;  %s21_s20 = int_to_ptr.hbm [resolvable:$true] %s20_s20 }
   0x3   :  { %s22_s22 = sshll.u32 %s362_s21, 4  ;;  %s31_s25 = sshll.u32 %s459_s2, 4  ;;  %s23_s22 = int_to_ptr.vmem [resolvable:$true] %s22_s22  ;;  %s32_s25 = int_to_ptr.hbm [resolvable:$true] %s31_s25 }
   0x4   :  { %25 = dma.hbm_to_vmem [thread:$0]  %s21_s20, 16, %s23_s22, [#allocation3]  }
   0x5   :  { %s363_s26 = smov [#allocation5]  }
   0x6   :  { %s33_s27 = sshll.u32 %s363_s26, 4  ;;  %s34_s27 = int_to_ptr.vmem [resolvable:$true] %s33_s27 }
   0x7   :  { %36 = dma.hbm_to_vmem [thread:$0]  %s32_s25, 16, %s34_s27, [#allocation6]  }
   0x8   :  { %356 = dma.done.wait [#allocation3], 16  }
   0x9   :  { %357 = vsyncadd [#allocation3], 4294967280 }
   0xa   :  { %358 = dma.done.wait [#allocation6], 16  }
   0xb   :  { %359 = vsyncadd [#allocation6], 4294967280  ;;  %v364_v0 = vmov 16.0   ;;  %v49_v2 = vld [vmem:[%s457_s0] sm:$0xff]  ;;  %v50_v3 = vld [vmem:[%s457_s0 + $0x8] sm:$0xff]  ;;  %vm65_vm0 = vcmask 261120  }
   0xc   :  { %268 = vrcp.f32 %v364_v0  ;;  %v51_v4 = vld [vmem:[%s457_s0 + $0x10] sm:$0xff]  ;;  %v52_v5 = vld [vmem:[%s457_s0 + $0x18] sm:$0xff]  ;;  %v53_v6 = vmax.f32 %v49_v2, 1e-06  ;;  %v54_v7 = vmax.f32 %v50_v3, 1e-06 }
   0xd   :  { %v55_v8 = vmax.f32 %v51_v4, 1e-06  ;;  %v56_v9 = vmax.f32 %v52_v5, 1e-06  ;;  %v365_v17 = vmov 3.0   ;;  %vm112_vm3 = vcmask 1041409  }
   0xe   :  { %v57_v10 = vmul.f32 %v53_v6, %v53_v6  ;;  %v58_v11 = vmul.f32 %v54_v7, %v54_v7  ;;  %270 = vrcp.f32 %v365_v17  ;;  %vm115_vm4 = vcmask 254976   ;;  %v177_v17 = vld [vmem:[%s460_s3 + $0x20] sm:$0xff]  ;;  %s367_s25 = smov [#allocation7]   ;;  %s247_s28 = sshll.u32 %s462_s5, 4  ;;  %s248_s28 = int_to_ptr.hbm [resolvable:$true] %s247_s28 }
   0xf   :  { %v59_v13 = vmul.f32 %v55_v8, %v55_v8  ;;  %v60_v14 = vmul.f32 %v56_v9, %v56_v9  ;;  %v366_v62 = vmov 32.0   ;;  %s245_s26 = sshll.u32 %s367_s25, 4  ;;  %vm236_vm9 = vcmask 1041408   ;;  %s246_s26 = int_to_ptr.vmem [resolvable:$true] %s245_s26 }
  0x10   :  { %v61_v15 = vmul.f32 %v57_v10, %v53_v6  ;;  %v62_v16 = vmul.f32 %v58_v11, %v54_v7 }
  0x11   :  { %v63_v18 = vmul.f32 %v59_v13, %v55_v8  ;;  %v64_v19 = vmul.f32 %v60_v14, %v56_v9 }
  0x12   :  { %v269_v1 = vpop.eup %268  ;;  %v66_v20 = vsel %vm65_vm0, %v61_v15, 0.0  ;;  %v67_v21 = vsel %vm65_vm0, %v62_v16, 0.0  ;;  %v179_v15 = vld [vmem:[%s460_s3 + $0x30] sm:$0xff]  ;;  %v180_v16 = vld [vmem:[%s460_s3 + $0x38] sm:$0xff] }
  0x13   :  { %v85_v12 = vmul.f32 16.0, %v269_v1  ;;  %v68_v23 = vadd.f32 %v67_v21, %v66_v20  ;;  %v75_v24 = vsel %vm65_vm0, %v63_v18, 0.0  ;;  %v76_v25 = vsel %vm65_vm0, %v64_v19, 0.0  ;;  %205 = vmatpush.msra.mxu0 %v179_v15  ;;  %225 = vmatpush.msra.mxu1 %v180_v16  ;;  %v178_v18 = vld [vmem:[%s460_s3 + $0x28] sm:$0xff]  ;;  %v175_v19 = vld [vmem:[%s460_s3 + $0x10] sm:$0xff]  ;;  %v176_v20 = vld [vmem:[%s460_s3 + $0x18] sm:$0xff] }
  0x14   :  { %v77_v26 = vadd.f32 %v76_v25, %v75_v24  ;;  %v271_v28 = vpop.eup %270  ;;  %vm89_vm1 = vweird.f32 %v269_v1  ;;  %v173_v21 = vld [vmem:[%s460_s3] sm:$0xff] }
  0x15   :  { %v86_v22 = vsub.f32 1.0, %v85_v12  ;;  %v69_v27 = vrot.slane %v68_v23, 4  ;;  %v98_v34 = vmul.f32 3.0, %v271_v28  ;;  %vm102_vm2 = vweird.f32 %v271_v28  ;;  %206 = vmatpush.msra.mxu0 %v177_v17  ;;  %226 = vmatpush.msra.mxu1 %v178_v18 }
  0x16   :  { %v78_v29 = vrot.slane %v77_v26, 4 }
  0x17   :  { %v87_v30 = vmul.f32 %v269_v1, %v86_v22  ;;  %v70_v31 = vadd.f32 %v69_v27, %v68_v23  ;;  %v99_v40 = vsub.f32 1.0, %v98_v34  ;;  %v174_v22 = vld [vmem:[%s460_s3 + $0x8] sm:$0xff]  ;;  %207 = vmatpush.msra.mxu0 %v175_v19  ;;  %227 = vmatpush.msra.mxu1 %v176_v20 }
  0x18   :  { %v79_v32 = vadd.f32 %v78_v29, %v77_v26 }
  0x19   :  { %v71_v33 = vrot.slane %v70_v31, 2  ;;  %v88_v36 = vadd.f32 %v269_v1, %v87_v30  ;;  %v100_v46 = vmul.f32 %v271_v28, %v99_v40  ;;  %208 = vmatpush.msra.mxu0 %v173_v21  ;;  %228 = vmatpush.msra.mxu1 %v174_v22 }
  0x1a   :  { %v80_v35 = vrot.slane %v79_v32, 2 }
  0x1b   :  { %v72_v37 = vadd.f32 %v71_v33, %v70_v31  ;;  %v90_v42 = vsel %vm89_vm1, %v269_v1, %v88_v36  ;;  %v101_v48 = vadd.f32 %v271_v28, %v100_v46 }
  0x1c   :  { %v81_v38 = vadd.f32 %v80_v35, %v79_v32  ;;  %v266_v35 = vld [vmem:[#allocation2] ss:$0 sm:$0xff] }
  0x1d   :  { %v73_v39 = vrot.slane %v72_v37, 1  ;;  %v103_v50 = vsel %vm102_vm2, %v271_v28, %v101_v48 }
  0x1e   :  { %v82_v41 = vrot.slane %v81_v38, 1 }
  0x1f   :  { %v74_v43 = vadd.f32 %v73_v39, %v72_v37  ;;  %v267_v39 = vld [vmem:[#allocation5] ss:$0 sm:$0xff] }
  0x20   :  { %v83_v44 = vadd.f32 %v82_v41, %v81_v38 }
  0x21   :  { %v91_v45 = vmul.f32 %v90_v42, %v74_v43 }
  0x22   :  { %v92_v47 = vmul.f32 %v90_v42, %v83_v44  ;;  %v181_v44 = vld [vmem:[%s461_s4] sm:$0x3] }
  0x23   :  { %272 = vlog2.f32 %v91_v45  ;;  %v184_v45 = vperm.slane %v181_v44, 1  ;;  %v183_v46 = vperm.slane %v181_v44, 0 }
  0x24   :  { %274 = vlog2.f32 %v92_v47 }
  0x29   :  { %v273_v49 = vpop.eup %272 }
  0x2a   :  { %v275_v51 = vpop.eup %274  ;;  %v94_v52 = vmul.f32 0.6931472, %v273_v49 }
  0x2b   :  { %v96_v53 = vmul.f32 0.6931472, %v275_v51 }
  0x2c   :  { %v104_v54 = vmul.f32 %v103_v50, %v94_v52 }
  0x2d   :  { %v105_v55 = vmul.f32 %v103_v50, %v96_v53 }
  0x2e   :  { %v106_v56 = vmul.f32 1.442695, %v104_v54 }
  0x2f   :  { %v108_v57 = vmul.f32 1.442695, %v105_v55 }
  0x30   :  { %276 = vpow2.f32 %v106_v56 }
  0x31   :  { %278 = vpow2.f32 %v108_v57 }
  0x32   :  { %280 = vrcp.f32 %v366_v62 }
  0x36   :  { %v277_v58 = vpop.eup %276 }
  0x37   :  { %v279_v59 = vpop.eup %278 }
  0x38   :  { %v113_v60 = vsel %vm112_vm3, %v279_v59, %v277_v58  ;;  %v281_v63 = vpop.eup %280 }
  0x39   :  { %v116_v61 = vsel %vm115_vm4, %v113_v60, 0.0  ;;  %v120_v0 = vmul.f32 32.0, %v281_v63  ;;  %vm124_vm5 = vweird.f32 %v281_v63 }
  0x3a   :  { %117 = vadd.xlane.f32.xlu0 %v116_v61 }
  0x3b   :  { %v121_v1 = vsub.f32 1.0, %v120_v0 }
  0x3d   :  { %v122_v2 = vmul.f32 %v281_v63, %v121_v1 }
  0x3f   :  { %v123_v3 = vadd.f32 %v281_v63, %v122_v2 }
  0x41   :  { %v125_v4 = vsel %vm124_vm5, %v281_v63, %v123_v3 }
  0xad   :  { %v118_v5 = vpop.xlane.xlu0 %117 }
  0xae   :  { %v126_v6 = vmul.f32 %v125_v4, %v118_v5 }
  0xb0   :  { %v128_v7 = vrot.slane %v126_v6, 1  ;;  %v131_v8 = vsub.f32 %v277_v58, %v126_v6 }
  0xb2   :  { %v132_v9 = vsub.f32 %v279_v59, %v128_v7  ;;  %v133_v11 = vmul.f32 %v131_v8, %v131_v8 }
  0xb4   :  { %v134_v10 = vmul.f32 %v132_v9, %v132_v9 }
  0xb6   :  { %v137_v12 = vrot.slane %v134_v10, 7 }
  0xb8   :  { %v138_v13 = vsel %vm112_vm3, %v137_v12, %v133_v11 }
  0xb9   :  { %v140_v14 = vsel %vm115_vm4, %v138_v13, 0.0 }
  0xba   :  { %141 = vadd.xlane.f32.xlu0 %v140_v14 }
 0x12d   :  { %v142_v23 = vpop.xlane.xlu0 %141 }
 0x12e   :  { %v143_v24 = vmul.f32 %v142_v23, %v125_v4 }
 0x130   :  { %v144_v25 = vadd.f32 1e-05, %v143_v24 }
 0x132   :  { %282 = vrsqrt.f32 %v144_v25  ;;  %vm151_vm7 = vweird.f32 %v144_v25 }
 0x138   :  { %v283_v26 = vpop.eup %282 }
 0x139   :  { %v146_v27 = vmul.f32 %v283_v26, %v144_v25  ;;  %vm152_vm6 = vweird.f32 %v283_v26 }
 0x13a   :  { %vm153_vm8 = vmor %vm151_vm7, %vm152_vm6 }
 0x13b   :  { %v147_v28 = vmul.f32 %v283_v26, %v146_v27 }
 0x13d   :  { %v148_v29 = vmul.f32 0.5, %v147_v28 }
 0x13f   :  { %v149_v30 = vsub.f32 1.5, %v148_v29 }
 0x141   :  { %v150_v31 = vmul.f32 %v283_v26, %v149_v30 }
 0x143   :  { %v154_v32 = vsel %vm153_vm8, %v283_v26, %v150_v31 }
 0x144   :  { %v156_v33 = vrot.slane %v154_v32, 1  ;;  %v159_v34 = vmul.f32 %v154_v32, %v131_v8 }
 0x146   :  { %v160_v36 = vmul.f32 %v156_v33, %v132_v9  ;;  %v165_v37 = vmul.f32 %v266_v35, %v159_v34 }
 0x148   :  { %v166_v38 = vmul.f32 %v266_v35, %v160_v36  ;;  %v171_v41 = vadd.f32 %v267_v39, %v165_v37 }
 0x14a   :  { %v172_v40 = vadd.f32 %v267_v39, %v166_v38 }
 0x14c   :  { %v189_v42 = vrot.slane %v172_v40, 7 }
 0x14e   :  { %v190_v43 = vsel %vm112_vm3, %v189_v42, %v171_v41 }
 0x14f   :  { %258 = vmatmul.msk.f32.vlgmr.msra.gmra.mxu0 %vm65_vm0, %v190_v43  ;;  %259 = vmatmul.msk.f32.vlgmr.msra.gmra.mxu1 %vm65_vm0, %v190_v43 }
 0x1cc   :  { %v210_v47 = vpop.f32.mrf.mxu0  ;;  %v230_v48 = vpop.f32.mrf.mxu1 }
 0x1cd   :  { %v231_v49 = vadd.f32 %v230_v48, %v184_v45  ;;  %v211_v50 = vadd.f32 %v210_v47, %v183_v46 }
 0x1cf   :  { %v235_v51 = vrot.slane %v231_v49, 6 }
 0x1d1   :  { %v237_v52 = vsel %vm236_vm9, %v211_v50, %v235_v51 }
 0x1d2   :  { %239 = vst [vmem:[#allocation7] sm:$0xf] %v237_v52 }
 0x1d3   :  { %250 = dma.vmem_to_hbm [thread:$0]  %s246_s26, 64, %s248_s28, [#allocation4]  }
 0x1d4   :  { %360 = dma.done.wait [#allocation4], 64  }
 0x1d5   :  { %361 = vsyncadd [#allocation4], 4294967232 }
 0x1d6   :  { %255 = vsyncpa [#allocation3], 1 }
 0x1d7   :  { %256 = vsyncpa [#allocation6], 1 }
 0x1d8   :  { %257 = vsyncpa [#allocation4], 1 }

</bundles_post_ra>
